<compile_context>
chip_gen: v6e
topology: v6e:2x2x1
jax: 0.10.0
libtpu: 0.0.40
codegen_flags: <defaults>
</compile_context>

<pallas_src>
import jax
import jax.numpy as jnp
from jax.experimental import pallas as pl
from jax.experimental.pallas import tpu as pltpu

C_MID = 64            # stem output channels (representative of the EfficientNet stem width)
C_FEAT = 2560         # EfficientNet-B7 embedding dim == resnet18.classifier[1].in_features
NUM_CLASSES = 10
C_OUT_PAD = 128       # lane-dense classifier output width (zero-padded, sliced in wrapper)
K_RAW = 3 * 3 * 3     # 3x3 conv, 3 input channels -> 27
K_PAD = 32            # contraction dim padded to a sublane-aligned size
BLOCK_N = 8           # images per grid step (amortizes per-step overhead)


def _silu(y):
    # y * sigmoid(y).  exp and approx-reciprocal both go to the EUP slot, keeping VALU free.
    return y * pl.reciprocal(1.0 + jnp.exp(-y), approx=True)


# -------------------- fused forward kernel: stem GEMM -> head GEMM -> pool -> classifier --------------------
def fused_forward_kernel(p_ref, sw_ref, sb_ref, hw_ref, hb_ref, fw_ref, fb_ref,
                         logits_ref, feat_ref):
    bn, c_feat = feat_ref.shape
    bn_hw, _ = p_ref.shape
    hw = bn_hw // bn

    # Stage 1: stem 3x3/s2 conv as im2col GEMM (bf16 MXU, f32 accum) + bias + SiLU.
    y = jnp.dot(p_ref[...], sw_ref[...], preferred_element_type=jnp.float32)
    y = _silu(y + sb_ref[...])                                     # (bn*hw, C_MID) f32

    # Stage 2: 1x1 head conv to 2560 + bias + SiLU (stays in VMEM, never touches HBM).
    z = jnp.dot(y.astype(jnp.bfloat16), hw_ref[...], preferred_element_type=jnp.float32)
    z = _silu(z + hb_ref[...])                                     # (bn*hw, C_FEAT) f32

    # Stage 3: adaptive average pool per image -> embedding (feature.view(N, -1)).
    feat = jnp.mean(z.reshape(bn, hw, c_feat), axis=1)             # (bn, C_FEAT) f32
    feat_ref[...] = feat

    # Stage 4: classifier = Dropout(eval -> identity) + Linear(2560, 10) into a 128-wide
    # lane-dense (zero-padded) output.
    logits_ref[...] = (
        jnp.dot(feat.astype(jnp.bfloat16), fw_ref[...], preferred_element_type=jnp.float32)
        + fb_ref[...]
    )


def _im2col(x_nhwc, k=3, stride=2, pad=1):
    """Extract conv patches; returns (N, Ho, Wo, k*k*Cin) with (kh, kw, cin) flattening order."""
    x = jnp.pad(x_nhwc, ((0, 0), (pad, pad), (pad, pad), (0, 0)))
    N, H, W, C = x.shape
    Ho = (H - k) // stride + 1
    Wo = (W - k) // stride + 1
    cols = []
    for i in range(k):
        for j in range(k):
            cols.append(x[:, i:i + stride * Ho:stride, j:j + stride * Wo:stride, :])
    patches = jnp.stack(cols, axis=3)                              # (N, Ho, Wo, k*k, C)
    return patches.reshape(N, Ho, Wo, k * k * C), Ho, Wo


def _prepare_params(params):
    """Pad to lane/sublane-aligned shapes and cast GEMM operands to bf16 (f32 biases)."""
    stem_w = jnp.pad(params["stem_w"], ((0, K_PAD - params["stem_w"].shape[0]), (0, 0)))
    fc_w = jnp.pad(params["fc_w"], ((0, 0), (0, C_OUT_PAD - params["fc_w"].shape[1])))
    fc_b = jnp.pad(params["fc_b"], ((0, C_OUT_PAD - params["fc_b"].shape[0]),))
    return (
        stem_w.astype(jnp.bfloat16),
        params["stem_b"].reshape(1, C_MID).astype(jnp.float32),
        params["head_w"].astype(jnp.bfloat16),
        params["head_b"].reshape(1, C_FEAT).astype(jnp.float32),
        fc_w.astype(jnp.bfloat16),
        fc_b.reshape(1, C_OUT_PAD).astype(jnp.float32),
    )


def cifar10_net_forward(x_nchw, params):
    """Returns (output, embedding) exactly like CIFAR10_Net.forward."""
    N = x_nchw.shape[0]
    x = jnp.transpose(x_nchw, (0, 2, 3, 1)).astype(jnp.float32)    # NCHW -> NHWC

    # im2col for the stem conv (3x3, stride 2, pad 1), contraction dim padded 27 -> 32.
    patches, Ho, Wo = _im2col(x, k=3, stride=2, pad=1)
    HW = Ho * Wo
    K = patches.shape[-1]
    patches = jnp.pad(patches.reshape(N, HW, K), ((0, 0), (0, 0), (0, K_PAD - K)))

    # Batch tiling: Bn images per grid step; pad batch so the grid divides evenly.
    Bn = min(BLOCK_N, N)
    Np = ((N + Bn - 1) // Bn) * Bn
    if Np != N:
        patches = jnp.pad(patches, ((0, Np - N), (0, 0), (0, 0)))
    patches2d = patches.reshape(Np * HW, K_PAD).astype(jnp.bfloat16)

    stem_w, stem_b, head_w, head_b, fc_w, fc_b = _prepare_params(params)

    M = Np * HW
    cost = pl.CostEstimate(
        flops=2 * M * K_PAD * C_MID + 2 * M * C_MID * C_FEAT + 2 * Np * C_FEAT * C_OUT_PAD,
        transcendentals=M * (C_MID + C_FEAT),
        bytes_accessed=(M * K_PAD * 2
                        + (K_PAD * C_MID + C_MID * C_FEAT + C_FEAT * C_OUT_PAD) * 2
                        + (C_MID + C_FEAT + C_OUT_PAD) * 4
                        + Np * (C_FEAT + C_OUT_PAD) * 4),
    )

    logits_pad, feat = pl.pallas_call(
        fused_forward_kernel,
        out_shape=(
            jax.ShapeDtypeStruct((Np, C_OUT_PAD), jnp.float32),
            jax.ShapeDtypeStruct((Np, C_FEAT), jnp.float32),
        ),
        grid=(Np // Bn,),
        in_specs=[
            pl.BlockSpec((Bn * HW, K_PAD), lambda i: (i, 0)),      # patches: tiled over batch
            pl.BlockSpec((K_PAD, C_MID), lambda i: (0, 0)),        # stem_w (resident)
            pl.BlockSpec((1, C_MID), lambda i: (0, 0)),            # stem_b
            pl.BlockSpec((C_MID, C_FEAT), lambda i: (0, 0)),       # head_w (resident)
            pl.BlockSpec((1, C_FEAT), lambda i: (0, 0)),           # head_b
            pl.BlockSpec((C_FEAT, C_OUT_PAD), lambda i: (0, 0)),   # fc_w (resident)
            pl.BlockSpec((1, C_OUT_PAD), lambda i: (0, 0)),        # fc_b
        ],
        out_specs=(
            pl.BlockSpec((Bn, C_OUT_PAD), lambda i: (i, 0)),       # padded logits (lane-dense)
            pl.BlockSpec((Bn, C_FEAT), lambda i: (i, 0)),          # embedding
        ),
        compiler_params=pltpu.CompilerParams(
            dimension_semantics=("parallel",),                     # shards over v7x's 2 TCs
            vmem_limit_bytes=32 * 1024 * 1024,                     # safe on v5e/v6e/v7x
        ),
        cost_estimate=cost,
    )(patches2d, stem_w, stem_b, head_w, head_b, fc_w, fc_b)

    logits = logits_pad[:N, :NUM_CLASSES]
    feat = feat[:N]
    return logits, feat


def init_params(key):
    ks = jax.random.split(key, 6)
    s = 0.05
    return {
        "stem_w": s * jax.random.normal(ks[0], (K_RAW, C_MID), jnp.float32),   # (kh*kw*Cin, C_MID)
        "stem_b": s * jax.random.normal(ks[1], (C_MID,), jnp.float32),
        "head_w": s * jax.random.normal(ks[2], (C_MID, C_FEAT), jnp.float32),
        "head_b": s * jax.random.normal(ks[3], (C_FEAT,), jnp.float32),
        "fc_w":   s * jax.random.normal(ks[4], (C_FEAT, NUM_CLASSES), jnp.float32),
        "fc_b":   s * jax.random.normal(ks[5], (NUM_CLASSES,), jnp.float32),
    }


if __name__ == "__main__":
    key = jax.random.PRNGKey(0)
    pkey, xkey = jax.random.split(key)
    params = init_params(pkey)

    # Small CIFAR-like input, NCHW like PyTorch: batch=2, channels=3, 16x16 spatial.
    x = jax.random.normal(xkey, (2, 3, 16, 16), jnp.float32)

    logits, feat = jax.jit(cifar10_net_forward)(x, params)
    jax.block_until_ready((logits, feat))

    assert logits.shape == (2, NUM_CLASSES), logits.shape
    assert feat.shape == (2, C_FEAT), feat.shape
    assert bool(jnp.all(jnp.isfinite(logits))) and bool(jnp.all(jnp.isfinite(feat)))
    print("KERNEL_OK")
</pallas_src>

<mosaic_0001>
module attributes {stable_mosaic.version = 11 : i64} {
  func.func @fused_forward_kernel(%arg0: i32, %arg1: memref<128x32xbf16, #tpu.memory_space<vmem>>, %arg2: memref<32x64xbf16, #tpu.memory_space<vmem>>, %arg3: memref<1x64xf32, #tpu.memory_space<vmem>>, %arg4: memref<64x2560xbf16, #tpu.memory_space<vmem>>, %arg5: memref<1x2560xf32, #tpu.memory_space<vmem>>, %arg6: memref<2560x128xbf16, #tpu.memory_space<vmem>>, %arg7: memref<1x128xf32, #tpu.memory_space<vmem>>, %arg8: memref<2x128xf32, #tpu.memory_space<vmem>>, %arg9: memref<2x2560xf32, #tpu.memory_space<vmem>>) attributes {dimension_semantics = [#tpu.dimension_semantics<parallel>], iteration_bounds = array<i64: 1>, scalar_prefetch = 0 : i64, scratch_operands = 0 : i64, tpu.core_type = #tpu.core_type<tc>, window_params = [{transform_indices = @transform_0, window_bounds = array<i64: 128, 32>}, {pipeline_mode = #tpu.pipeline_mode<synchronous>, transform_indices = @transform_1, window_bounds = array<i64: 32, 64>}, {pipeline_mode = #tpu.pipeline_mode<synchronous>, transform_indices = @transform_2, window_bounds = array<i64: 1, 64>}, {pipeline_mode = #tpu.pipeline_mode<synchronous>, transform_indices = @transform_3, window_bounds = array<i64: 64, 2560>}, {pipeline_mode = #tpu.pipeline_mode<synchronous>, transform_indices = @transform_4, window_bounds = array<i64: 1, 2560>}, {pipeline_mode = #tpu.pipeline_mode<synchronous>, transform_indices = @transform_5, window_bounds = array<i64: 2560, 128>}, {pipeline_mode = #tpu.pipeline_mode<synchronous>, transform_indices = @transform_6, window_bounds = array<i64: 1, 128>}, {transform_indices = @transform_7, window_bounds = array<i64: 2, 128>}, {transform_indices = @transform_8, window_bounds = array<i64: 2, 2560>}]} {
    %c0 = arith.constant 0 : index
    %c0_0 = arith.constant 0 : index
    %0 = vector.load %arg1[%c0, %c0_0] : memref<128x32xbf16, #tpu.memory_space<vmem>>, vector<128x32xbf16>
    %c0_1 = arith.constant 0 : index
    %c0_2 = arith.constant 0 : index
    %1 = vector.load %arg2[%c0_1, %c0_2] : memref<32x64xbf16, #tpu.memory_space<vmem>>, vector<32x64xbf16>
    %cst = arith.constant dense<0.000000e+00> : vector<128x64xf32>
    %2 = tpu.matmul %0, %1, %cst {dimension_numbers = #tpu.dot_dimension_numbers<[1], [0], [0], [1], [0, 0, 1, 1], [], []>} : vector<128x32xbf16>, vector<32x64xbf16>, vector<128x64xf32> -> vector<128x64xf32>
    %c0_3 = arith.constant 0 : index
    %c0_4 = arith.constant 0 : index
    %3 = vector.load %arg3[%c0_3, %c0_4] : memref<1x64xf32, #tpu.memory_space<vmem>>, vector<1x64xf32>
    %4 = vector.broadcast %3 : vector<1x64xf32> to vector<128x64xf32>
    %5 = arith.addf %2, %4 : vector<128x64xf32>
    %cst_5 = arith.constant 0.000000e+00 : f32
    %6 = vector.broadcast %cst_5 : f32 to vector<128x64xf32>
    %7 = arith.subf %6, %5 : vector<128x64xf32>
    %8 = math.exp %7 : vector<128x64xf32>
    %cst_6 = arith.constant 1.000000e+00 : f32
    %9 = vector.broadcast %cst_6 : f32 to vector<128x64xf32>
    %10 = arith.addf %9, %8 : vector<128x64xf32>
    %11 = tpu.reciprocal %10 {approx = true} : vector<128x64xf32> -> vector<128x64xf32>
    %12 = arith.mulf %5, %11 : vector<128x64xf32>
    %13 = arith.truncf %12 : vector<128x64xf32> to vector<128x64xbf16>
    %c0_7 = arith.constant 0 : index
    %c0_8 = arith.constant 0 : index
    %14 = vector.load %arg4[%c0_7, %c0_8] : memref<64x2560xbf16, #tpu.memory_space<vmem>>, vector<64x2560xbf16>
    %cst_9 = arith.constant dense<0.000000e+00> : vector<128x2560xf32>
    %15 = tpu.matmul %13, %14, %cst_9 {dimension_numbers = #tpu.dot_dimension_numbers<[1], [0], [0], [1], [0, 0, 1, 1], [], []>} : vector<128x64xbf16>, vector<64x2560xbf16>, vector<128x2560xf32> -> vector<128x2560xf32>
    %c0_10 = arith.constant 0 : index
    %c0_11 = arith.constant 0 : index
    %16 = vector.load %arg5[%c0_10, %c0_11] : memref<1x2560xf32, #tpu.memory_space<vmem>>, vector<1x2560xf32>
    %17 = vector.broadcast %16 : vector<1x2560xf32> to vector<128x2560xf32>
    %18 = arith.addf %15, %17 : vector<128x2560xf32>
    %cst_12 = arith.constant 0.000000e+00 : f32
    %19 = vector.broadcast %cst_12 : f32 to vector<128x2560xf32>
    %20 = arith.subf %19, %18 : vector<128x2560xf32>
    %21 = math.exp %20 : vector<128x2560xf32>
    %cst_13 = arith.constant 1.000000e+00 : f32
    %22 = vector.broadcast %cst_13 : f32 to vector<128x2560xf32>
    %23 = arith.addf %22, %21 : vector<128x2560xf32>
    %24 = tpu.reciprocal %23 {approx = true} : vector<128x2560xf32> -> vector<128x2560xf32>
    %25 = arith.mulf %18, %24 : vector<128x2560xf32>
    %26 = vector.shape_cast %25 : vector<128x2560xf32> to vector<2x64x2560xf32>
    %cst_14 = arith.constant dense<0.000000e+00> : vector<2x2560xf32>
    %27 = vector.multi_reduction <add>, %26, %cst_14 [1] : vector<2x64x2560xf32> to vector<2x2560xf32>
    %cst_15 = arith.constant 6.400000e+01 : f32
    %28 = vector.broadcast %cst_15 : f32 to vector<2x2560xf32>
    %29 = arith.divf %27, %28 : vector<2x2560xf32>
    %c0_16 = arith.constant 0 : index
    %c0_17 = arith.constant 0 : index
    %30 = vector.load %arg9[%c0_16, %c0_17] : memref<2x2560xf32, #tpu.memory_space<vmem>>, vector<2x2560xf32>
    tpu.vector_store %arg9[%c0_16, %c0_17], %29 {strides = array<i32>} : memref<2x2560xf32, #tpu.memory_space<vmem>>, vector<2x2560xf32>,
    %31 = arith.truncf %29 : vector<2x2560xf32> to vector<2x2560xbf16>
    %c0_18 = arith.constant 0 : index
    %c0_19 = arith.constant 0 : index
    %32 = vector.load %arg6[%c0_18, %c0_19] : memref<2560x128xbf16, #tpu.memory_space<vmem>>, vector<2560x128xbf16>
    %cst_20 = arith.constant dense<0.000000e+00> : vector<2x128xf32>
    %33 = tpu.matmul %31, %32, %cst_20 {dimension_numbers = #tpu.dot_dimension_numbers<[1], [0], [0], [1], [0, 0, 1, 1], [], []>} : vector<2x2560xbf16>, vector<2560x128xbf16>, vector<2x128xf32> -> vector<2x128xf32>
    %c0_21 = arith.constant 0 : index
    %c0_22 = arith.constant 0 : index
    %34 = vector.load %arg7[%c0_21, %c0_22] : memref<1x128xf32, #tpu.memory_space<vmem>>, vector<1x128xf32>
    %35 = vector.broadcast %34 : vector<1x128xf32> to vector<2x128xf32>
    %36 = arith.addf %33, %35 : vector<2x128xf32>
    %c0_23 = arith.constant 0 : index
    %c0_24 = arith.constant 0 : index
    %37 = vector.load %arg8[%c0_23, %c0_24] : memref<2x128xf32, #tpu.memory_space<vmem>>, vector<2x128xf32>
    tpu.vector_store %arg8[%c0_23, %c0_24], %36 {strides = array<i32>} : memref<2x128xf32, #tpu.memory_space<vmem>>, vector<2x128xf32>,
    return
  }
  func.func @transform_0(%arg0: i32) -> (i32, i32) {
    %c0_i32 = arith.constant 0 : i32
    %c0_i32_0 = arith.constant 0 : i32
    return %arg0, %c0_i32 : i32, i32
  }
  func.func @transform_1(%arg0: i32) -> (i32, i32) {
    %c0_i32 = arith.constant 0 : i32
    %c0_i32_0 = arith.constant 0 : i32
    %c0_i32_1 = arith.constant 0 : i32
    return %c0_i32, %c0_i32_0 : i32, i32
  }
  func.func @transform_2(%arg0: i32) -> (i32, i32) {
    %c0_i32 = arith.constant 0 : i32
    %c0_i32_0 = arith.constant 0 : i32
    %c0_i32_1 = arith.constant 0 : i32
    return %c0_i32, %c0_i32_0 : i32, i32
  }
  func.func @transform_3(%arg0: i32) -> (i32, i32) {
    %c0_i32 = arith.constant 0 : i32
    %c0_i32_0 = arith.constant 0 : i32
    %c0_i32_1 = arith.constant 0 : i32
    return %c0_i32, %c0_i32_0 : i32, i32
  }
  func.func @transform_4(%arg0: i32) -> (i32, i32) {
    %c0_i32 = arith.constant 0 : i32
    %c0_i32_0 = arith.constant 0 : i32
    %c0_i32_1 = arith.constant 0 : i32
    return %c0_i32, %c0_i32_0 : i32, i32
  }
  func.func @transform_5(%arg0: i32) -> (i32, i32) {
    %c0_i32 = arith.constant 0 : i32
    %c0_i32_0 = arith.constant 0 : i32
    %c0_i32_1 = arith.constant 0 : i32
    return %c0_i32, %c0_i32_0 : i32, i32
  }
  func.func @transform_6(%arg0: i32) -> (i32, i32) {
    %c0_i32 = arith.constant 0 : i32
    %c0_i32_0 = arith.constant 0 : i32
    %c0_i32_1 = arith.constant 0 : i32
    return %c0_i32, %c0_i32_0 : i32, i32
  }
  func.func @transform_7(%arg0: i32) -> (i32, i32) {
    %c0_i32 = arith.constant 0 : i32
    %c0_i32_0 = arith.constant 0 : i32
    return %arg0, %c0_i32 : i32, i32
  }
  func.func @transform_8(%arg0: i32) -> (i32, i32) {
    %c0_i32 = arith.constant 0 : i32
    %c0_i32_0 = arith.constant 0 : i32
    return %arg0, %c0_i32 : i32, i32
  }
}

</mosaic_0001>

<bundles_post_ra>
// kernel: cifar10_net_forward.1
= control target key start
LH: loop header
LB: loop body
LE: loop exit
PB: predicated region body
PF: predicated region fallthrough
CT: control target
= control target key end

     0   :  { %14 = vsyncpa [#allocation3], 0  ;;  %vm110_vm0 = vcmask 261120   ;;  %v13567_v26 = vmov 0   ;;  %s13558_s0 = inlined_call_operand.vmem [shape: bf16[128,32], index: 0, kind: input, shape index: {}]   ;;  %s13559_s1 = inlined_call_operand.vmem [shape: bf16[32,64], index: 1, kind: input, shape index: {}]   ;;  %s13560_s2 = inlined_call_operand.vmem [shape: f32[1,64], index: 2, kind: input, shape index: {}]   ;;  %s13561_s3 = inlined_call_operand.vmem [shape: bf16[64,2560], index: 3, kind: input, shape index: {}]   ;;  %s13562_s4 = inlined_call_operand.vmem [shape: f32[1,2560], index: 4, kind: input, shape index: {}]   ;;  %s13563_s5 = inlined_call_operand.vmem [shape: bf16[2560,128], index: 5, kind: input, shape index: {}]   ;;  %s13564_s6 = inlined_call_operand.vmem [shape: f32[1,128], index: 6, kind: input, shape index: {}]   ;;  %s13565_s7 = inlined_call_operand.hbm [shape: f32[2,128], index: 7, kind: output, shape index: {0}]   ;;  %s13566_s8 = inlined_call_operand.hbm [shape: f32[2,2560], index: 8, kind: output, shape index: {1}]  }
   0x1   :  { %v7313_v0 = vld [vmem:[%s13559_s1 + $0x8] sm:$0xff]   ;;  %v7314_v1 = vld [vmem:[%s13559_s1] sm:$0xff]   ;;  %v7319_v6 = vld [vmem:[%s13558_s0 + $0x10] sm:$0xff]  }
   0x2   :  { %7285 = vmatprep.subr.bf16.mxu0 %v7313_v0  ;;  %7305 = vmatprep.subr.bf16.mxu1 %v7313_v0  ;;  %v7315_v2 = vld [vmem:[%s13558_s0] sm:$0xff]   ;;  %v7317_v4 = vld [vmem:[%s13558_s0 + $0x8] sm:$0xff]   ;;  %v7320_v7 = vld [vmem:[%s13558_s0 + $0x30] sm:$0xff]  }
   0x3   :  { %7286 = vmatpush3.bf16.msra.mxu0 %v7313_v0  ;;  %7307 = vmatpush3.bf16.msra.mxu1 %v7313_v0  ;;  %v7316_v3 = vld [vmem:[%s13558_s0 + $0x20] sm:$0xff]   ;;  %v7318_v5 = vld [vmem:[%s13558_s0 + $0x28] sm:$0xff]   ;;  %v7321_v8 = vld [vmem:[%s13558_s0 + $0x18] sm:$0xff]  }
   0x4   :  { %7287 = vmatprep.subr.bf16.mxu0 %v7314_v1  ;;  %7306 = vmatprep.subr.bf16.mxu1 %v7314_v1  ;;  %v7322_v9 = vld [vmem:[%s13558_s0 + $0x38] sm:$0xff]   ;;  %v7325_v10 = vld [vmem:[%s13561_s3 + $0x1e4] ss:$80 sps:$4 sm:$0xff]   ;;  %v7323_v12 = vld [vmem:[%s13561_s3 + $0x1e0] ss:$80 sps:$4 sm:$0xff]  }
   0x5   :  { %7289 = vmatprep.mubr.msk.bf16.mxu0 %vm110_vm0, %v7315_v2  ;;  %7297 = vmatprep.mubr.msk.bf16.mxu1 %vm110_vm0, %v7316_v3  ;;  %v7328_v11 = vld [vmem:[%s13561_s3 + $0x1ec] ss:$80 sps:$4 sm:$0xff]   ;;  %v7326_v13 = vld [vmem:[%s13561_s3 + $0x1e8] ss:$80 sps:$4 sm:$0xff]   ;;  %v7331_v14 = vld [vmem:[%s13561_s3 + $0x144] ss:$80 sps:$4 sm:$0xff]  }
   0x6   :  { %v7334_v15 = vld [vmem:[%s13561_s3 + $0x14c] ss:$80 sps:$4 sm:$0xff]   ;;  %v7329_v16 = vld [vmem:[%s13561_s3 + $0x140] ss:$80 sps:$4 sm:$0xff]   ;;  %v7332_v17 = vld [vmem:[%s13561_s3 + $0x148] ss:$80 sps:$4 sm:$0xff]  }
   0x7   :  { %7288 = vmatpush3.bf16.msra.mxu0 %v7314_v1  ;;  %7308 = vmatpush3.bf16.msra.mxu1 %v7314_v1  ;;  %v7337_v18 = vld [vmem:[%s13561_s3 + $0xa4] ss:$80 sps:$4 sm:$0xff]   ;;  %v7340_v19 = vld [vmem:[%s13561_s3 + $0xac] ss:$80 sps:$4 sm:$0xff]   ;;  %v7335_v20 = vld [vmem:[%s13561_s3 + $0xa0] ss:$80 sps:$4 sm:$0xff]  }
   0x8   :  { %955 = vmatprep.subr.bf16.mxu1 %v7325_v10  ;;  %1068 = vmatprep.subr.bf16.mxu0 %v7328_v11  ;;  %v7338_v21 = vld [vmem:[%s13561_s3 + $0xa8] ss:$80 sps:$4 sm:$0xff]   ;;  %v7343_v22 = vld [vmem:[%s13561_s3 + $0x4] ss:$80 sps:$4 sm:$0xff]   ;;  %v7346_v23 = vld [vmem:[%s13561_s3 + $0xc] ss:$80 sps:$4 sm:$0xff]  }
   0x9   :  { %v7341_v24 = vld [vmem:[%s13561_s3] ss:$80 sps:$4 sm:$0xff]   ;;  %v7344_v25 = vld [vmem:[%s13561_s3 + $0x8] ss:$80 sps:$4 sm:$0xff]   ;;  %v7349_v27 = vld [vmem:[%s13561_s3 + $0x1f4] ss:$80 sps:$4 sm:$0xff]  }
   0xa   :  { %7290 = vmatmul.mubr.msk.bf16.vlgmr.msra.gmra.mxu0 %vm110_vm0, %v7317_v4  ;;  %7298 = vmatmul.mubr.msk.bf16.vlgmr.msra.gmra.mxu1 %vm110_vm0, %v7318_v5  ;;  %v7352_v28 = vld [vmem:[%s13561_s3 + $0x1fc] ss:$80 sps:$4 sm:$0xff]  }
   0xb   :  { %7293 = vmatprep.mubr.msk.bf16.mxu0 %vm110_vm0, %v7319_v6  ;;  %7301 = vmatprep.mubr.msk.bf16.mxu1 %vm110_vm0, %v7320_v7 }
   0xc   :  { %956 = vmatpush1.bf16.msra.mxu1 %v7323_v12  ;;  %1069 = vmatpush1.bf16.msra.mxu0 %v7326_v13 }
   0xd   :  { %957 = vmatprep.subr.bf16.mxu1 %v7331_v14  ;;  %1070 = vmatprep.subr.bf16.mxu0 %v7334_v15 }
  0x10   :  { %958 = vmatpush1.bf16.msra.mxu1 %v7329_v16  ;;  %1071 = vmatpush1.bf16.msra.mxu0 %v7332_v17 }
  0x11   :  { %959 = vmatprep.subr.bf16.mxu1 %v7337_v18  ;;  %1072 = vmatprep.subr.bf16.mxu0 %v7340_v19 }
  0x12   :  { %7294 = vmatmul.mubr.msk.bf16.gmra.mxu0 %vm110_vm0, %v7321_v8  ;;  %7302 = vmatmul.mubr.msk.bf16.gmra.mxu1 %vm110_vm0, %v7322_v9 }
  0x13   :  { %979 = vmatprep.mubr.bf16.mxu1 %v13567_v26  ;;  %1092 = vmatprep.mubr.bf16.mxu0 %v13567_v26 }
  0x14   :  { %960 = vmatpush1.bf16.msra.mxu1 %v7335_v20  ;;  %1073 = vmatpush1.bf16.msra.mxu0 %v7338_v21 }
  0x15   :  { %961 = vmatprep.subr.bf16.mxu1 %v7343_v22  ;;  %1074 = vmatprep.subr.bf16.mxu0 %v7346_v23 }
  0x18   :  { %962 = vmatpush1.bf16.msra.mxu1 %v7341_v24  ;;  %1075 = vmatpush1.bf16.msra.mxu0 %v7344_v25 }
  0x19   :  { %1181 = vmatprep.subr.bf16.mxu1 %v7349_v27  ;;  %1294 = vmatprep.subr.bf16.mxu0 %v7352_v28 }
  0x1a   :  { %15 = vsyncpa [#allocation5], 0  ;;  %v9139_v30 = vld [vmem:[%s13560_s2] ss:$0 sm:$0xff]  ;;  %vm922_vm1 = vcmask 523264   ;;  %vm4773_vm2 = vcmask 1041409  }
  0x1b   :  { %vm4775_vm3 = vcmask 1043459   ;;  %vm4777_vm4 = vcmask 1045509   ;;  %vm4779_vm5 = vcmask 1047559  }
  0xca   :  { %v7291_v29 = vpop.f32.mrf.mxu0  ;;  %v7299_v46 = vpop.f32.mrf.mxu1 }
  0xcb   :  { %v9145_v33 = vadd.f32 %v7291_v29, %v9139_v30  ;;  %v9185_v20 = vadd.f32 %v7299_v46, %v9139_v30  ;;  %v7350_v46 = vld [vmem:[%s13561_s3 + $0x1f8] ss:$80 sps:$4 sm:$0xff]  }
  0xcc   :  { %v169_v31 = vpop.f32.mrf.mxu0  ;;  %v201_v52 = vpop.f32.mrf.mxu1 }
  0xcd   :  { %v9142_v32 = vadd.f32 %v9139_v30, %v169_v31  ;;  %v234_v40 = vsub.f32 0.0, %v9145_v33  ;;  %v9177_v7 = vadd.f32 %v9139_v30, %v201_v52  ;;  %v242_v27 = vsub.f32 0.0, %v9185_v20 }
  0xce   :  { %v7292_v34 = vpop.f32.mrf.mxu0  ;;  %v7300_v57 = vpop.f32.mrf.mxu1 }
  0xcf   :  { %v232_v35 = vsub.f32 0.0, %v9142_v32  ;;  %v9149_v36 = vadd.f32 %v7292_v34, %v9139_v30  ;;  %v252_v48 = vmul.f32 1.442695, %v234_v40  ;;  %v240_v15 = vsub.f32 0.0, %v9177_v7 }
  0xd0   :  { %v172_v37 = vpop.f32.mrf.mxu0  ;;  %v204_v63 = vpop.f32.mrf.mxu1  ;;  %v9182_v16 = vadd.f32 %v7300_v57, %v9139_v30  ;;  %v268_v40 = vmul.f32 1.442695, %v242_v27 }
  0xd1   :  { %v248_v38 = vmul.f32 1.442695, %v232_v35  ;;  %v9152_v39 = vadd.f32 %v9139_v30, %v172_v37  ;;  %v235_v41 = vsub.f32 0.0, %v9149_v36  ;;  %v9174_v4 = vadd.f32 %v9139_v30, %v204_v63 }
  0xd2   :  { %v7295_v42 = vpop.f32.mrf.mxu0  ;;  %v7303_v6 = vpop.f32.mrf.mxu1  ;;  %v264_v21 = vmul.f32 1.442695, %v240_v15  ;;  %v243_v23 = vsub.f32 0.0, %v9182_v16 }
  0xd3   :  { %7603 = vpow2.f32 %v248_v38  ;;  %v233_v43 = vsub.f32 0.0, %v9152_v39  ;;  %v254_v44 = vmul.f32 1.442695, %v235_v41  ;;  %v9169_v59 = vadd.f32 %v7295_v42, %v9139_v30 }
  0xd4   :  { %v185_v45 = vpop.f32.mrf.mxu0  ;;  %v241_v12 = vsub.f32 0.0, %v9174_v4  ;;  %v217_v13 = vpop.f32.mrf.mxu1  ;;  %v270_v35 = vmul.f32 1.442695, %v243_v23  ;;  %v7373_v23 = vld [vmem:[%s13561_s3 + $0x204] ss:$80 sps:$4 sm:$0xff]  }
  0xd5   :  { %v250_v47 = vmul.f32 1.442695, %v233_v43  ;;  %v9158_v49 = vadd.f32 %v9139_v30, %v185_v45  ;;  %7605 = vpow2.f32 %v254_v44  ;;  %v238_v1 = vsub.f32 0.0, %v9169_v59  ;;  %v7347_v45 = vld [vmem:[%s13561_s3 + $0x1f0] ss:$80 sps:$4 sm:$0xff]  }
  0xd6   :  { %v7296_v50 = vpop.f32.mrf.mxu0  ;;  %v266_v17 = vmul.f32 1.442695, %v241_v12  ;;  %v7304_v19 = vpop.f32.mrf.mxu1  ;;  %v9190_v31 = vadd.f32 %v9139_v30, %v217_v13  ;;  %v7370_v12 = vld [vmem:[%s13561_s3 + $0x1c] ss:$80 sps:$4 sm:$0xff]  }
  0xd7   :  { %7607 = vpow2.f32 %v250_v47  ;;  %v236_v54 = vsub.f32 0.0, %v9158_v49  ;;  %v9165_v55 = vadd.f32 %v7296_v50, %v9139_v30  ;;  %v260_v9 = vmul.f32 1.442695, %v238_v1  ;;  %v7355_v50 = vld [vmem:[%s13561_s3 + $0x154] ss:$80 sps:$4 sm:$0xff]  }
  0xd8   :  { %v188_v51 = vpop.f32.mrf.mxu0  ;;  %7609 = vpow2.f32 %v252_v48  ;;  %v220_v25 = vpop.f32.mrf.mxu1  ;;  %v244_v44 = vsub.f32 0.0, %v9190_v31  ;;  %v7364_v1 = vld [vmem:[%s13561_s3 + $0xbc] ss:$80 sps:$4 sm:$0xff]  }
  0xd9   :  { %v9161_v53 = vadd.f32 %v9139_v30, %v188_v51  ;;  %v256_v60 = vmul.f32 1.442695, %v236_v54  ;;  %v239_v61 = vsub.f32 0.0, %v9165_v55  ;;  %v9193_v37 = vadd.f32 %v9139_v30, %v220_v25  ;;  %v7358_v51 = vld [vmem:[%s13561_s3 + $0x15c] ss:$80 sps:$4 sm:$0xff]  }
  0xda   :  { %v272_v57 = vmul.f32 1.442695, %v244_v44 }
  0xdb   :  { %v237_v56 = vsub.f32 0.0, %v9161_v53  ;;  %v262_v2 = vmul.f32 1.442695, %v239_v61 }
  0xdd   :  { %v258_v58 = vmul.f32 1.442695, %v237_v56  ;;  %v9218_v56 = vadd.f32 %v7303_v6, %v9139_v30 }
  0xdf   :  { %7611 = vpow2.f32 %v258_v58  ;;  %v7353_v58 = vld [vmem:[%s13561_s3 + $0x150] ss:$80 sps:$4 sm:$0xff]  }
  0xe0   :  { %v7604_v62 = vpop.eup %7603  ;;  %7613 = vpow2.f32 %v256_v60  ;;  %v7356_v60 = vld [vmem:[%s13561_s3 + $0x158] ss:$80 sps:$4 sm:$0xff]  }
  0xe1   :  { %v280_v0 = vadd.f32 1.0, %v7604_v62  ;;  %v9228_v62 = vadd.f32 %v7304_v19, %v9139_v30  ;;  %v7365_v19 = vld [vmem:[%s13561_s3 + $0x10] ss:$80 sps:$4 sm:$0xff]  }
  0xe2   :  { %v7606_v3 = vpop.eup %7605 }
  0xe3   :  { %7615 = vrcp.f32 %v280_v0  ;;  %v283_v11 = vadd.f32 1.0, %v7606_v3  ;;  %v7361_v0 = vld [vmem:[%s13561_s3 + $0xb4] ss:$80 sps:$4 sm:$0xff]   ;;  %v246_v3 = vsub.f32 0.0, %v9218_v56 }
  0xe4   :  { %v7608_v5 = vpop.eup %7607  ;;  %7617 = vpow2.f32 %v262_v2 }
  0xe5   :  { %v281_v8 = vadd.f32 1.0, %v7608_v5  ;;  %v7610_v10 = vpop.eup %7609  ;;  %v276_v15 = vmul.f32 1.442695, %v246_v3  ;;  %v7380_v3 = vld [vmem:[%s13561_s3 + $0x168] ss:$80 sps:$4 sm:$0xff]  }
  0xe6   :  { %v282_v14 = vadd.f32 1.0, %v7610_v10 }
  0xe7   :  { %7619 = vrcp.f32 %v281_v8  ;;  %v247_v8 = vsub.f32 0.0, %v9228_v62 }
  0xe8   :  { %7621 = vpow2.f32 %v260_v9  ;;  %v7359_v9 = vld [vmem:[%s13561_s3 + $0xb0] ss:$80 sps:$4 sm:$0xff]  }
  0xe9   :  { %7623 = vrcp.f32 %v283_v11  ;;  %v7367_v11 = vld [vmem:[%s13561_s3 + $0x14] ss:$80 sps:$4 sm:$0xff]  }
  0xea   :  { %7625 = vrcp.f32 %v282_v14 }
  0xeb   :  { %7627 = vpow2.f32 %v266_v17  ;;  %v278_v17 = vmul.f32 1.442695, %v247_v8  ;;  %v7388_v8 = vld [vmem:[%s13561_s3 + $0xcc] ss:$80 sps:$4 sm:$0xff]  }
  0xec   :  { %v7612_v18 = vpop.eup %7611  ;;  %7629 = vpow2.f32 %v264_v21  ;;  %v7368_v21 = vld [vmem:[%s13561_s3 + $0x18] ss:$80 sps:$4 sm:$0xff]  }
  0xed   :  { %v7614_v22 = vpop.eup %7613  ;;  %v285_v24 = vadd.f32 1.0, %v7612_v18 }
  0xee   :  { %v284_v28 = vadd.f32 1.0, %v7614_v22 }
  0xef   :  { %7631 = vrcp.f32 %v285_v24 }
  0xf0   :  { %v7616_v29 = vpop.eup %7615  ;;  %7633 = vrcp.f32 %v284_v28 }
  0xf1   :  { %v7618_v34 = vpop.eup %7617  ;;  %v312_v41 = vmul.f32 %v7616_v29, %v9142_v32  ;;  %7635 = vpow2.f32 %v270_v35  ;;  %v245_v32 = vsub.f32 0.0, %v9193_v37 }
  0xf2   :  { %v287_v48 = vadd.f32 1.0, %v7618_v34  ;;  %7637 = vpow2.f32 %v268_v40 }
  0xf3   :  { %v274_v63 = vmul.f32 1.442695, %v245_v32 }
  0xf4   :  { %v7620_v38 = vpop.eup %7619  ;;  %7639 = vrcp.f32 %v287_v48 }
  0xf5   :  { %v313_v42 = vmul.f32 %v7620_v38, %v9152_v39  ;;  %v7622_v43 = vpop.eup %7621 }
  0xf6   :  { %v7624_v39 = vpop.eup %7623  ;;  %v286_v52 = vadd.f32 1.0, %v7622_v43 }
  0xf7   :  { %v9204_v47 = vpack.c.bf16 %v313_v42, %v312_v41  ;;  %v7626_v54 = vpop.eup %7625  ;;  %v315_v61 = vmul.f32 %v7624_v39, %v9149_v36 }
  0xf8   :  { %v7628_v2 = vpop.eup %7627  ;;  %v314_v36 = vmul.f32 %v7626_v54, %v9145_v33  ;;  %7641 = vrcp.f32 %v286_v52  ;;  %v7362_v33 = vld [vmem:[%s13561_s3 + $0xb8] ss:$80 sps:$4 sm:$0xff]  }
  0xf9   :  { %6814 = vmatmul.mubr.msk.bf16.vlgmr.msra.gmra.mxu1 %vm922_vm1, %v9204_v47  ;;  %6822 = vmatmul.mubr.msk.bf16.vlgmr.msra.gmra.mxu0 %vm922_vm1, %v9204_v47  ;;  %v7630_v30 = vpop.eup %7629  ;;  %7643 = vpow2.f32 %v272_v57  ;;  %v289_v6 = vadd.f32 1.0, %v7628_v2 }
  0xfa   :  { %1182 = vmatpush1.bf16.msra.mxu1 %v7347_v45  ;;  %1295 = vmatpush1.bf16.msra.mxu0 %v7350_v46  ;;  %v9240_v5 = vpack.c.bf16 %v315_v61, %v314_v36  ;;  %7645 = vpow2.f32 %v274_v63  ;;  %v288_v13 = vadd.f32 1.0, %v7630_v30  ;;  %v7382_v36 = vld [vmem:[%s13561_s3 + $0x16c] ss:$80 sps:$4 sm:$0xff]   ;;  %v7377_v30 = vld [vmem:[%s13561_s3 + $0x160] ss:$80 sps:$4 sm:$0xff]  }
  0xfb   :  { %989 = vmatprep.mubr.bf16.mxu1 %v13567_v26  ;;  %1102 = vmatprep.mubr.bf16.mxu0 %v13567_v26  ;;  %7647 = vrcp.f32 %v289_v6  ;;  %v7385_v6 = vld [vmem:[%s13561_s3 + $0xc4] ss:$80 sps:$4 sm:$0xff]  }
  0xfc   :  { %1183 = vmatprep.subr.bf16.mxu1 %v7355_v50  ;;  %1296 = vmatprep.subr.bf16.mxu0 %v7358_v51  ;;  %13723 = vst [vmem:[#allocation8_spill] sm:$0xff] %v9240_v5  ;;  %v7632_v10 = vpop.eup %7631  ;;  %7649 = vrcp.f32 %v288_v13  ;;  %v7392_v13 = vld [vmem:[%s13561_s3 + $0x28] ss:$80 sps:$4 sm:$0xff]  }
  0xfd   :  { %v7634_v14 = vpop.eup %7633  ;;  %v317_v18 = vmul.f32 %v7632_v10, %v9161_v53  ;;  %v7376_v53 = vld [vmem:[%s13561_s3 + $0x20c] ss:$80 sps:$4 sm:$0xff]   ;;  %7651 = vpow2.f32 %v276_v15  ;;  %v7391_v10 = vld [vmem:[%s13561_s3 + $0x24] ss:$80 sps:$4 sm:$0xff]  }
  0xfe   :  { %1184 = vmatpush1.bf16.msra.mxu1 %v7353_v58  ;;  %1297 = vmatpush1.bf16.msra.mxu0 %v7356_v60  ;;  %v7636_v22 = vpop.eup %7635  ;;  %v316_v24 = vmul.f32 %v7634_v14, %v9158_v49  ;;  %7653 = vpow2.f32 %v278_v17  ;;  %v7397_v14 = vld [vmem:[%s13561_s3 + $0x214] ss:$80 sps:$4 sm:$0xff]   ;;  %v7400_v15 = vld [vmem:[%s13561_s3 + $0x21c] ss:$80 sps:$4 sm:$0xff]   ;;  %v7395_v17 = vld [vmem:[%s13561_s3 + $0x210] ss:$80 sps:$4 sm:$0xff]  }
  0xff   :  { %1185 = vmatprep.subr.bf16.mxu1 %v7361_v0  ;;  %1298 = vmatprep.subr.bf16.mxu0 %v7364_v1  ;;  %v7638_v25 = vpop.eup %7637  ;;  %v291_v27 = vadd.f32 1.0, %v7636_v22  ;;  %v7401_v22 = vld [vmem:[%s13561_s3 + $0x170] ss:$80 sps:$4 sm:$0xff]  }
 0x100   :  { %v9275_v28 = vpack.c.bf16 %v317_v18, %v316_v24  ;;  %v290_v34 = vadd.f32 1.0, %v7638_v25  ;;  %v7398_v18 = vld [vmem:[%s13561_s3 + $0x218] ss:$80 sps:$4 sm:$0xff]   ;;  %v7412_v24 = vld [vmem:[%s13561_s3 + $0xdc] ss:$80 sps:$4 sm:$0xff]  }
 0x101   :  { %6815 = vmatmul.mubr.msk.bf16.gmra.mxu1 %vm922_vm1, %v9240_v5  ;;  %6823 = vmatmul.mubr.msk.bf16.gmra.mxu0 %vm922_vm1, %v9240_v5  ;;  %v7640_v29 = vpop.eup %7639  ;;  %7655 = vrcp.f32 %v291_v27  ;;  %v7407_v25 = vld [vmem:[%s13561_s3 + $0xd0] ss:$80 sps:$4 sm:$0xff]   ;;  %v7410_v27 = vld [vmem:[%s13561_s3 + $0xd8] ss:$80 sps:$4 sm:$0xff]  }
 0x102   :  { %999 = vmatprep.mubr.bf16.mxu1 %v13567_v26  ;;  %1112 = vmatprep.mubr.bf16.mxu0 %v13567_v26  ;;  %13724 = vst [vmem:[#allocation9_spill] sm:$0xff] %v9275_v28  ;;  %v319_v38 = vmul.f32 %v7640_v29, %v9165_v55  ;;  %7657 = vrcp.f32 %v290_v34  ;;  %v7415_v29 = vld [vmem:[%s13561_s3 + $0x34] ss:$80 sps:$4 sm:$0xff]   ;;  %v7418_v34 = vld [vmem:[%s13561_s3 + $0x3c] ss:$80 sps:$4 sm:$0xff]  }
 0x103   :  { %1186 = vmatpush1.bf16.msra.mxu1 %v7359_v9  ;;  %1299 = vmatpush1.bf16.msra.mxu0 %v7362_v33  ;;  %v7383_v9 = vld [vmem:[%s13561_s3 + $0xc0] ss:$80 sps:$4 sm:$0xff]   ;;  %v7386_v33 = vld [vmem:[%s13561_s3 + $0xc8] ss:$80 sps:$4 sm:$0xff]  }
 0x104   :  { %1187 = vmatprep.subr.bf16.mxu1 %v7367_v11  ;;  %1300 = vmatprep.subr.bf16.mxu0 %v7370_v12  ;;  %v7394_v11 = vld [vmem:[%s13561_s3 + $0x2c] ss:$80 sps:$4 sm:$0xff]   ;;  %v7389_v12 = vld [vmem:[%s13561_s3 + $0x20] ss:$80 sps:$4 sm:$0xff]  }
 0x105   :  { %v7642_v35 = vpop.eup %7641 }
 0x106   :  { %v7644_v49 = vpop.eup %7643  ;;  %v318_v41 = vmul.f32 %v7642_v35, %v9169_v59  ;;  %v7413_v35 = vld [vmem:[%s13561_s3 + $0x30] ss:$80 sps:$4 sm:$0xff]  }
 0x107   :  { %1188 = vmatpush1.bf16.msra.mxu1 %v7365_v19  ;;  %1301 = vmatpush1.bf16.msra.mxu0 %v7368_v21  ;;  %v7646_v40 = vpop.eup %7645  ;;  %v292_v42 = vadd.f32 1.0, %v7644_v49  ;;  %v7403_v19 = vld [vmem:[%s13561_s3 + $0x174] ss:$80 sps:$4 sm:$0xff]   ;;  %v7406_v21 = vld [vmem:[%s13561_s3 + $0x17c] ss:$80 sps:$4 sm:$0xff]  }
 0x108   :  { %1407 = vmatprep.subr.bf16.mxu1 %v7373_v23  ;;  %1520 = vmatprep.subr.bf16.mxu0 %v7376_v53  ;;  %v9285_v43 = vpack.c.bf16 %v319_v38, %v318_v41  ;;  %v293_v44 = vadd.f32 1.0, %v7646_v40  ;;  %v7648_v45 = vpop.eup %7647  ;;  %v7404_v23 = vld [vmem:[%s13561_s3 + $0x178] ss:$80 sps:$4 sm:$0xff]   ;;  %v7409_v53 = vld [vmem:[%s13561_s3 + $0xd4] ss:$80 sps:$4 sm:$0xff]   ;;  %v422_v41 = vlaneseq }
 0x109   :  { %6816 = vmatmul.mubr.msk.bf16.gmra.mxu1 %vm922_vm1, %v9275_v28  ;;  %6824 = vmatmul.mubr.msk.bf16.gmra.mxu0 %vm922_vm1, %v9275_v28  ;;  %v7650_v46 = vpop.eup %7649  ;;  %7659 = vrcp.f32 %v292_v42  ;;  %v321_v59 = vmul.f32 %v7648_v45, %v9174_v4  ;;  %v7416_v49 = vld [vmem:[%s13561_s3 + $0x38] ss:$80 sps:$4 sm:$0xff]   ;;  %v7421_v38 = vld [vmem:[%s13561_s3 + $0x224] ss:$80 sps:$4 sm:$0xff]   ;;  %v7424_v40 = vld [vmem:[%s13561_s3 + $0x22c] ss:$80 sps:$4 sm:$0xff]  }
 0x10a   :  { %1009 = vmatprep.mubr.bf16.mxu1 %v13567_v26  ;;  %1122 = vmatprep.mubr.bf16.mxu0 %v13567_v26  ;;  %13725 = vst [vmem:[#allocation10_spill] sm:$0xff] %v9285_v43  ;;  %v7652_v55 = vpop.eup %7651  ;;  %7661 = vrcp.f32 %v293_v44  ;;  %v320_v32 = vmul.f32 %v7650_v46, %v9177_v7  ;;  %v9519_v42 = vshrl.u32 %v422_v41, 7  ;;  %v416_v46 = vld [vmem:[%s13562_s4] sm:$0xff]  ;;  %v7440_v41 = vld [vmem:[%s13561_s3 + $0x48] ss:$80 sps:$4 sm:$0xff]  }
 0x10b   :  { %v7654_v48 = vpop.eup %7653  ;;  %v294_v39 = vadd.f32 1.0, %v7652_v55 }
 0x10c   :  { %v9295_v50 = vpack.c.bf16 %v321_v59, %v320_v32  ;;  %v295_v51 = vadd.f32 1.0, %v7654_v48  ;;  %13730 = vst [vmem:[#allocation15_spill] sm:$0xff] %v9519_v42  ;;  %v9528_v44 = vsub.s32 0, %v9519_v42  ;;  %v9531_v45 = vsub.s32 2, %v9519_v42  ;;  %v7419_v48 = vld [vmem:[%s13561_s3 + $0x220] ss:$80 sps:$4 sm:$0xff]  }
 0x10d   :  { %7663 = vrcp.f32 %v294_v39  ;;  %v9537_v55 = vsub.s32 1, %v9519_v42  ;;  %v9540_v59 = vsub.s32 3, %v9519_v42 }
 0x10e   :  { %13726 = vst [vmem:[#allocation11_spill] sm:$0xff] %v9295_v50  ;;  %v7656_v52 = vpop.eup %7655  ;;  %7665 = vrcp.f32 %v295_v51  ;;  %13731 = vst [vmem:[#allocation16_spill] sm:$0xff] %v9528_v44  ;;  %v9546_v32 = vrot.slane %v416_v46, %v9528_v44  ;;  %v9549_v39 = vrot.slane %v416_v46, %v9531_v45  ;;  %v7422_v51 = vld [vmem:[%s13561_s3 + $0x228] ss:$80 sps:$4 sm:$0xff]  }
 0x10f   :  { %v7658_v54 = vpop.eup %7657  ;;  %v323_v4 = vmul.f32 %v7656_v52, %v9182_v16  ;;  %13732 = vst [vmem:[#allocation17_spill] sm:$0xff] %v9531_v45  ;;  %13733 = vst [vmem:[#allocation18_spill] sm:$0xff] %v9537_v55  ;;  %v9555_v52 = vrot.slane %v416_v46, %v9537_v55 }
 0x110   :  { %v322_v7 = vmul.f32 %v7658_v54, %v9185_v20  ;;  %13734 = vst [vmem:[#allocation19_spill] sm:$0xff] %v9540_v59  ;;  %v9558_v54 = vrot.slane %v416_v46, %v9540_v59 }
 0x111   :  { %6817 = vmatmul.mubr.msk.bf16.gmra.mxu1 %vm922_vm1, %v9285_v43  ;;  %6825 = vmatmul.mubr.msk.bf16.gmra.mxu0 %vm922_vm1, %v9285_v43 }
 0x112   :  { %1019 = vmatprep.mubr.bf16.mxu1 %v13567_v26  ;;  %1132 = vmatprep.mubr.bf16.mxu0 %v13567_v26  ;;  %v9305_v58 = vpack.c.bf16 %v323_v4, %v322_v7  ;;  %v7427_v4 = vld [vmem:[%s13561_s3 + $0x184] ss:$80 sps:$4 sm:$0xff]   ;;  %v7430_v7 = vld [vmem:[%s13561_s3 + $0x18c] ss:$80 sps:$4 sm:$0xff]  }
 0x114   :  { %13727 = vst [vmem:[#allocation12_spill] sm:$0xff] %v9305_v58 }
 0x116   :  { %v7660_v57 = vpop.eup %7659 }
 0x117   :  { %v7662_v60 = vpop.eup %7661  ;;  %v324_v61 = vmul.f32 %v7660_v57, %v9190_v31 }
 0x118   :  { %v325_v16 = vmul.f32 %v7662_v60, %v9193_v37  ;;  %v7371_v37 = vld [vmem:[%s13561_s3 + $0x200] ss:$80 sps:$4 sm:$0xff]  }
 0x119   :  { %6818 = vmatmul.mubr.msk.bf16.gmra.mxu1 %vm922_vm1, %v9295_v50  ;;  %6826 = vmatmul.mubr.msk.bf16.gmra.mxu0 %vm922_vm1, %v9295_v50 }
 0x11a   :  { %1029 = vmatprep.mubr.bf16.mxu1 %v13567_v26  ;;  %1142 = vmatprep.mubr.bf16.mxu0 %v13567_v26  ;;  %v7664_v63 = vpop.eup %7663  ;;  %v9315_v20 = vpack.c.bf16 %v325_v16, %v324_v61 }
 0x11b   :  { %v7666_v0 = vpop.eup %7665  ;;  %v326_v1 = vmul.f32 %v7664_v63, %v9218_v56  ;;  %v7374_v56 = vld [vmem:[%s13561_s3 + $0x208] ss:$80 sps:$4 sm:$0xff]   ;;  %v7425_v63 = vld [vmem:[%s13561_s3 + $0x180] ss:$80 sps:$4 sm:$0xff]  }
 0x11c   :  { %13728 = vst [vmem:[#allocation13_spill] sm:$0xff] %v9315_v20  ;;  %v327_v31 = vmul.f32 %v7666_v0, %v9228_v62  ;;  %v7379_v62 = vld [vmem:[%s13561_s3 + $0x164] ss:$80 sps:$4 sm:$0xff]   ;;  %v7428_v0 = vld [vmem:[%s13561_s3 + $0x188] ss:$80 sps:$4 sm:$0xff]  }
 0x11e   :  { %v9325_v2 = vpack.c.bf16 %v327_v31, %v326_v1 }
 0x120   :  { %13729 = vst [vmem:[#allocation14_spill] sm:$0xff] %v9325_v2 }
 0x121   :  { %6819 = vmatmul.mubr.msk.bf16.gmra.mxu1 %vm922_vm1, %v9305_v58  ;;  %6827 = vmatmul.mubr.msk.bf16.gmra.mxu0 %vm922_vm1, %v9305_v58 }
 0x122   :  { %1039 = vmatprep.mubr.bf16.mxu1 %v13567_v26  ;;  %1152 = vmatprep.mubr.bf16.mxu0 %v13567_v26 }
 0x129   :  { %6820 = vmatmul.mubr.msk.bf16.gmra.mxu1 %vm922_vm1, %v9315_v20  ;;  %6828 = vmatmul.mubr.msk.bf16.gmra.mxu0 %vm922_vm1, %v9315_v20 }
 0x12a   :  { %1049 = vmatprep.mubr.bf16.mxu1 %v13567_v26  ;;  %1162 = vmatprep.mubr.bf16.mxu0 %v13567_v26 }
 0x131   :  { %6821 = vmatmul.mubr.msk.bf16.gmra.mxu1 %vm922_vm1, %v9325_v2  ;;  %6829 = vmatmul.mubr.msk.bf16.gmra.mxu0 %vm922_vm1, %v9325_v2 }
 0x132   :  { %1205 = vmatprep.mubr.bf16.mxu1 %v13567_v26  ;;  %1318 = vmatprep.mubr.bf16.mxu0 %v13567_v26 }
 0x139   :  { %6830 = vmatmul.mubr.msk.bf16.vlgmr.msra.gmra.mxu1 %vm922_vm1, %v9204_v47  ;;  %6838 = vmatmul.mubr.msk.bf16.vlgmr.msra.gmra.mxu0 %vm922_vm1, %v9204_v47 }
 0x13a   :  { %1408 = vmatpush1.bf16.msra.mxu1 %v7371_v37  ;;  %1521 = vmatpush1.bf16.msra.mxu0 %v7374_v56  ;;  %v7433_v37 = vld [vmem:[%s13561_s3 + $0xe4] ss:$80 sps:$4 sm:$0xff]   ;;  %v7436_v56 = vld [vmem:[%s13561_s3 + $0xec] ss:$80 sps:$4 sm:$0xff]  }
 0x13b   :  { %1215 = vmatprep.mubr.bf16.mxu1 %v13567_v26  ;;  %1328 = vmatprep.mubr.bf16.mxu0 %v13567_v26 }
 0x13c   :  { %1409 = vmatprep.subr.bf16.mxu1 %v7379_v62  ;;  %1522 = vmatprep.subr.bf16.mxu0 %v7382_v36 }
 0x13e   :  { %1410 = vmatpush1.bf16.msra.mxu1 %v7377_v30  ;;  %1523 = vmatpush1.bf16.msra.mxu0 %v7380_v3 }
 0x13f   :  { %1411 = vmatprep.subr.bf16.mxu1 %v7385_v6  ;;  %1524 = vmatprep.subr.bf16.mxu0 %v7388_v8 }
 0x141   :  { %6831 = vmatmul.mubr.msk.bf16.gmra.mxu1 %vm922_vm1, %v9240_v5  ;;  %6839 = vmatmul.mubr.msk.bf16.gmra.mxu0 %vm922_vm1, %v9240_v5 }
 0x142   :  { %1225 = vmatprep.mubr.bf16.mxu1 %v13567_v26  ;;  %1338 = vmatprep.mubr.bf16.mxu0 %v13567_v26 }
 0x143   :  { %1412 = vmatpush1.bf16.msra.mxu1 %v7383_v9  ;;  %1525 = vmatpush1.bf16.msra.mxu0 %v7386_v33 }
 0x144   :  { %1413 = vmatprep.subr.bf16.mxu1 %v7391_v10  ;;  %1526 = vmatprep.subr.bf16.mxu0 %v7394_v11 }
 0x147   :  { %1414 = vmatpush1.bf16.msra.mxu1 %v7389_v12  ;;  %1527 = vmatpush1.bf16.msra.mxu0 %v7392_v13 }
 0x148   :  { %1633 = vmatprep.subr.bf16.mxu1 %v7397_v14  ;;  %1746 = vmatprep.subr.bf16.mxu0 %v7400_v15 }
 0x149   :  { %6832 = vmatmul.mubr.msk.bf16.gmra.mxu1 %vm922_vm1, %v9275_v28  ;;  %6840 = vmatmul.mubr.msk.bf16.gmra.mxu0 %vm922_vm1, %v9275_v28 }
 0x14a   :  { %1235 = vmatprep.mubr.bf16.mxu1 %v13567_v26  ;;  %1348 = vmatprep.mubr.bf16.mxu0 %v13567_v26 }
 0x151   :  { %6833 = vmatmul.mubr.msk.bf16.gmra.mxu1 %vm922_vm1, %v9285_v43  ;;  %6841 = vmatmul.mubr.msk.bf16.gmra.mxu0 %vm922_vm1, %v9285_v43 }
 0x152   :  { %1245 = vmatprep.mubr.bf16.mxu1 %v13567_v26  ;;  %1358 = vmatprep.mubr.bf16.mxu0 %v13567_v26 }
 0x159   :  { %6834 = vmatmul.mubr.msk.bf16.gmra.mxu1 %vm922_vm1, %v9295_v50  ;;  %6842 = vmatmul.mubr.msk.bf16.gmra.mxu0 %vm922_vm1, %v9295_v50 }
 0x15a   :  { %1255 = vmatprep.mubr.bf16.mxu1 %v13567_v26  ;;  %1368 = vmatprep.mubr.bf16.mxu0 %v13567_v26 }
 0x161   :  { %6835 = vmatmul.mubr.msk.bf16.gmra.mxu1 %vm922_vm1, %v9305_v58  ;;  %6843 = vmatmul.mubr.msk.bf16.gmra.mxu0 %vm922_vm1, %v9305_v58 }
 0x162   :  { %1265 = vmatprep.mubr.bf16.mxu1 %v13567_v26  ;;  %1378 = vmatprep.mubr.bf16.mxu0 %v13567_v26 }
 0x169   :  { %6836 = vmatmul.mubr.msk.bf16.gmra.mxu1 %vm922_vm1, %v9315_v20  ;;  %6844 = vmatmul.mubr.msk.bf16.gmra.mxu0 %vm922_vm1, %v9315_v20 }
 0x16a   :  { %1275 = vmatprep.mubr.bf16.mxu1 %v13567_v26  ;;  %1388 = vmatprep.mubr.bf16.mxu0 %v13567_v26 }
 0x171   :  { %6837 = vmatmul.mubr.msk.bf16.gmra.mxu1 %vm922_vm1, %v9325_v2  ;;  %6845 = vmatmul.mubr.msk.bf16.gmra.mxu0 %vm922_vm1, %v9325_v2 }
 0x172   :  { %1431 = vmatprep.mubr.bf16.mxu1 %v13567_v26  ;;  %1544 = vmatprep.mubr.bf16.mxu0 %v13567_v26 }
 0x179   :  { %6846 = vmatmul.mubr.msk.bf16.vlgmr.msra.gmra.mxu1 %vm922_vm1, %v9204_v47  ;;  %6854 = vmatmul.mubr.msk.bf16.vlgmr.msra.gmra.mxu0 %vm922_vm1, %v9204_v47 }
 0x17a   :  { %1634 = vmatpush1.bf16.msra.mxu1 %v7395_v17  ;;  %1747 = vmatpush1.bf16.msra.mxu0 %v7398_v18  ;;  %v7431_v17 = vld [vmem:[%s13561_s3 + $0xe0] ss:$80 sps:$4 sm:$0xff]   ;;  %v7434_v18 = vld [vmem:[%s13561_s3 + $0xe8] ss:$80 sps:$4 sm:$0xff]  }
 0x17b   :  { %1441 = vmatprep.mubr.bf16.mxu1 %v13567_v26  ;;  %1554 = vmatprep.mubr.bf16.mxu0 %v13567_v26 }
 0x17c   :  { %1635 = vmatprep.subr.bf16.mxu1 %v7403_v19  ;;  %1748 = vmatprep.subr.bf16.mxu0 %v7406_v21  ;;  %v7439_v19 = vld [vmem:[%s13561_s3 + $0x44] ss:$80 sps:$4 sm:$0xff]  }
 0x17e   :  { %1636 = vmatpush1.bf16.msra.mxu1 %v7401_v22  ;;  %1749 = vmatpush1.bf16.msra.mxu0 %v7404_v23 }
 0x17f   :  { %1637 = vmatprep.subr.bf16.mxu1 %v7409_v53  ;;  %1750 = vmatprep.subr.bf16.mxu0 %v7412_v24  ;;  %v7442_v53 = vld [vmem:[%s13561_s3 + $0x4c] ss:$80 sps:$4 sm:$0xff]  }
 0x181   :  { %6847 = vmatmul.mubr.msk.bf16.gmra.mxu1 %vm922_vm1, %v9240_v5  ;;  %6855 = vmatmul.mubr.msk.bf16.gmra.mxu0 %vm922_vm1, %v9240_v5 }
 0x182   :  { %1451 = vmatprep.mubr.bf16.mxu1 %v13567_v26  ;;  %1564 = vmatprep.mubr.bf16.mxu0 %v13567_v26 }
 0x183   :  { %1638 = vmatpush1.bf16.msra.mxu1 %v7407_v25  ;;  %1751 = vmatpush1.bf16.msra.mxu0 %v7410_v27 }
 0x184   :  { %1639 = vmatprep.subr.bf16.mxu1 %v7415_v29  ;;  %1752 = vmatprep.subr.bf16.mxu0 %v7418_v34 }
 0x187   :  { %1640 = vmatpush1.bf16.msra.mxu1 %v7413_v35  ;;  %1753 = vmatpush1.bf16.msra.mxu0 %v7416_v49 }
 0x188   :  { %1859 = vmatprep.subr.bf16.mxu1 %v7421_v38  ;;  %1972 = vmatprep.subr.bf16.mxu0 %v7424_v40  ;;  %v7437_v40 = vld [vmem:[%s13561_s3 + $0x40] ss:$80 sps:$4 sm:$0xff]  }
 0x189   :  { %6848 = vmatmul.mubr.msk.bf16.gmra.mxu1 %vm922_vm1, %v9275_v28  ;;  %6856 = vmatmul.mubr.msk.bf16.gmra.mxu0 %vm922_vm1, %v9275_v28 }
 0x18a   :  { %1461 = vmatprep.mubr.bf16.mxu1 %v13567_v26  ;;  %1574 = vmatprep.mubr.bf16.mxu0 %v13567_v26 }
 0x191   :  { %6849 = vmatmul.mubr.msk.bf16.gmra.mxu1 %vm922_vm1, %v9285_v43  ;;  %6857 = vmatmul.mubr.msk.bf16.gmra.mxu0 %vm922_vm1, %v9285_v43 }
 0x192   :  { %1471 = vmatprep.mubr.bf16.mxu1 %v13567_v26  ;;  %1584 = vmatprep.mubr.bf16.mxu0 %v13567_v26 }
 0x199   :  { %6850 = vmatmul.mubr.msk.bf16.gmra.mxu1 %vm922_vm1, %v9295_v50  ;;  %6858 = vmatmul.mubr.msk.bf16.gmra.mxu0 %vm922_vm1, %v9295_v50 }
 0x19a   :  { %1481 = vmatprep.mubr.bf16.mxu1 %v13567_v26  ;;  %1594 = vmatprep.mubr.bf16.mxu0 %v13567_v26 }
 0x1a1   :  { %6851 = vmatmul.mubr.msk.bf16.gmra.mxu1 %vm922_vm1, %v9305_v58  ;;  %6859 = vmatmul.mubr.msk.bf16.gmra.mxu0 %vm922_vm1, %v9305_v58 }
 0x1a2   :  { %1491 = vmatprep.mubr.bf16.mxu1 %v13567_v26  ;;  %1604 = vmatprep.mubr.bf16.mxu0 %v13567_v26 }
 0x1a9   :  { %6852 = vmatmul.mubr.msk.bf16.gmra.mxu1 %vm922_vm1, %v9315_v20  ;;  %6860 = vmatmul.mubr.msk.bf16.gmra.mxu0 %vm922_vm1, %v9315_v20 }
 0x1aa   :  { %1501 = vmatprep.mubr.bf16.mxu1 %v13567_v26  ;;  %1614 = vmatprep.mubr.bf16.mxu0 %v13567_v26 }
 0x1b1   :  { %6853 = vmatmul.mubr.msk.bf16.gmra.mxu1 %vm922_vm1, %v9325_v2  ;;  %6861 = vmatmul.mubr.msk.bf16.gmra.mxu0 %vm922_vm1, %v9325_v2 }
 0x1b2   :  { %1657 = vmatprep.mubr.bf16.mxu1 %v13567_v26  ;;  %1770 = vmatprep.mubr.bf16.mxu0 %v13567_v26 }
 0x1b9   :  { %v981_v57 = vpop.f32.mrf.mxu1  ;;  %v1094_v60 = vpop.f32.mrf.mxu0  ;;  %6862 = vmatmul.mubr.msk.bf16.vlgmr.msra.gmra.mxu1 %vm922_vm1, %v9204_v47  ;;  %6870 = vmatmul.mubr.msk.bf16.vlgmr.msra.gmra.mxu0 %vm922_vm1, %v9204_v47 }
 0x1ba   :  { %v9571_v61 = vadd.f32 %v981_v57, %v9546_v32  ;;  %v9574_v16 = vadd.f32 %v1094_v60, %v9549_v39  ;;  %1860 = vmatpush1.bf16.msra.mxu1 %v7419_v48  ;;  %1973 = vmatpush1.bf16.msra.mxu0 %v7422_v51 }
 0x1bb   :  { %v983_v1 = vpop.f32.mrf.mxu1  ;;  %v1096_v31 = vpop.f32.mrf.mxu0  ;;  %1667 = vmatprep.mubr.bf16.mxu1 %v13567_v26  ;;  %1780 = vmatprep.mubr.bf16.mxu0 %v13567_v26 }
 0x1bc   :  { %v2077_v62 = vsub.f32 0.0, %v9571_v61  ;;  %v2079_v36 = vsub.f32 0.0, %v9574_v16  ;;  %v9593_v30 = vadd.f32 %v983_v1, %v9555_v52  ;;  %v9596_v3 = vadd.f32 %v1096_v31, %v9558_v54  ;;  %1861 = vmatprep.subr.bf16.mxu1 %v7427_v4  ;;  %1974 = vmatprep.subr.bf16.mxu0 %v7430_v7 }
 0x1bd   :  { %v985_v6 = vpop.f32.mrf.mxu1  ;;  %v1098_v8 = vpop.f32.mrf.mxu0 }
 0x1be   :  { %v2397_v9 = vmul.f32 1.442695, %v2077_v62  ;;  %v2401_v33 = vmul.f32 1.442695, %v2079_v36  ;;  %v2078_v10 = vsub.f32 0.0, %v9593_v30  ;;  %v2080_v11 = vsub.f32 0.0, %v9596_v3  ;;  %1862 = vmatpush1.bf16.msra.mxu1 %v7425_v63  ;;  %1975 = vmatpush1.bf16.msra.mxu0 %v7428_v0 }
 0x1bf   :  { %v9601_v12 = vadd.f32 %v985_v6, %v9546_v32  ;;  %v9604_v13 = vadd.f32 %v1098_v8, %v9549_v39  ;;  %v987_v14 = vpop.f32.mrf.mxu1  ;;  %v1100_v15 = vpop.f32.mrf.mxu0  ;;  %1863 = vmatprep.subr.bf16.mxu1 %v7433_v37  ;;  %1976 = vmatprep.subr.bf16.mxu0 %v7436_v56 }
 0x1c0   :  { %7667 = vpow2.f32 %v2397_v9  ;;  %v2399_v21 = vmul.f32 1.442695, %v2078_v10  ;;  %v2403_v22 = vmul.f32 1.442695, %v2080_v11  ;;  %v9616_v23 = vadd.f32 %v987_v14, %v9555_v52 }
 0x1c1   :  { %7669 = vpow2.f32 %v2401_v33  ;;  %v2097_v24 = vsub.f32 0.0, %v9601_v12  ;;  %v2099_v25 = vsub.f32 0.0, %v9604_v13  ;;  %v9624_v27 = vadd.f32 %v1100_v15, %v9558_v54  ;;  %v991_v29 = vpop.f32.mrf.mxu1  ;;  %v1104_v34 = vpop.f32.mrf.mxu0  ;;  %6863 = vmatmul.mubr.msk.bf16.gmra.mxu1 %vm922_vm1, %v9240_v5  ;;  %6871 = vmatmul.mubr.msk.bf16.gmra.mxu0 %vm922_vm1, %v9240_v5 }
 0x1c2   :  { %7671 = vpow2.f32 %v2399_v21  ;;  %v2098_v35 = vsub.f32 0.0, %v9616_v23  ;;  %v9632_v49 = vadd.f32 %v991_v29, %v9546_v32  ;;  %v9635_v38 = vadd.f32 %v1104_v34, %v9549_v39  ;;  %1677 = vmatprep.mubr.bf16.mxu1 %v13567_v26  ;;  %1790 = vmatprep.mubr.bf16.mxu0 %v13567_v26 }
 0x1c3   :  { %7673 = vpow2.f32 %v2403_v22  ;;  %v2437_v46 = vmul.f32 1.442695, %v2097_v24  ;;  %v2441_v48 = vmul.f32 1.442695, %v2099_v25  ;;  %v2100_v51 = vsub.f32 0.0, %v9624_v27  ;;  %v993_v4 = vpop.f32.mrf.mxu1  ;;  %v1106_v7 = vpop.f32.mrf.mxu0  ;;  %1864 = vmatpush1.bf16.msra.mxu1 %v7431_v17  ;;  %1977 = vmatpush1.bf16.msra.mxu0 %v7434_v18 }
 0x1c4   :  { %v2439_v57 = vmul.f32 1.442695, %v2098_v35  ;;  %v2117_v60 = vsub.f32 0.0, %v9632_v49  ;;  %v2119_v63 = vsub.f32 0.0, %v9635_v38  ;;  %v9649_v0 = vadd.f32 %v993_v4, %v9555_v52  ;;  %1865 = vmatprep.subr.bf16.mxu1 %v7439_v19  ;;  %1978 = vmatprep.subr.bf16.mxu0 %v7442_v53 }
 0x1c5   :  { %7675 = vpow2.f32 %v2437_v46  ;;  %v2443_v1 = vmul.f32 1.442695, %v2100_v51  ;;  %v9652_v31 = vadd.f32 %v1106_v7, %v9558_v54  ;;  %v995_v37 = vpop.f32.mrf.mxu1  ;;  %v1108_v56 = vpop.f32.mrf.mxu0 }
 0x1c6   :  { %7677 = vpow2.f32 %v2441_v48  ;;  %v2477_v62 = vmul.f32 1.442695, %v2117_v60  ;;  %v2481_v36 = vmul.f32 1.442695, %v2119_v63  ;;  %v2118_v6 = vsub.f32 0.0, %v9649_v0 }
 0x1c7   :  { %7679 = vpow2.f32 %v2439_v57  ;;  %v2120_v8 = vsub.f32 0.0, %v9652_v31  ;;  %v9657_v9 = vadd.f32 %v995_v37, %v9546_v32  ;;  %v9660_v33 = vadd.f32 %v1108_v56, %v9549_v39  ;;  %v997_v10 = vpop.f32.mrf.mxu1  ;;  %v1110_v11 = vpop.f32.mrf.mxu0  ;;  %1866 = vmatpush1.bf16.msra.mxu1 %v7437_v40  ;;  %1979 = vmatpush1.bf16.msra.mxu0 %v7440_v41 }
 0x1c8   :  { %7681 = vpow2.f32 %v2443_v1  ;;  %v2479_v14 = vmul.f32 1.442695, %v2118_v6  ;;  %v9663_v15 = vadd.f32 %v997_v10, %v9555_v52  ;;  %v9666_v17 = vadd.f32 %v1110_v11, %v9558_v54 }
 0x1c9   :  { %7683 = vpow2.f32 %v2477_v62  ;;  %v2483_v18 = vmul.f32 1.442695, %v2120_v8  ;;  %v2137_v19 = vsub.f32 0.0, %v9657_v9  ;;  %v2139_v21 = vsub.f32 0.0, %v9660_v33  ;;  %v1001_v22 = vpop.f32.mrf.mxu1  ;;  %v1114_v53 = vpop.f32.mrf.mxu0  ;;  %6864 = vmatmul.mubr.msk.bf16.gmra.mxu1 %vm922_vm1, %v9275_v28  ;;  %6872 = vmatmul.mubr.msk.bf16.gmra.mxu0 %vm922_vm1, %v9275_v28 }
 0x1ca   :  { %7685 = vpow2.f32 %v2481_v36  ;;  %v2138_v24 = vsub.f32 0.0, %v9663_v15  ;;  %1687 = vmatprep.mubr.bf16.mxu1 %v13567_v26  ;;  %1800 = vmatprep.mubr.bf16.mxu0 %v13567_v26  ;;  %v2140_v34 = vsub.f32 0.0, %v9666_v17  ;;  %v9679_v46 = vadd.f32 %v1001_v22, %v9546_v32 }
 0x1cb   :  { %7687 = vpow2.f32 %v2479_v14  ;;  %v2517_v25 = vmul.f32 1.442695, %v2137_v19  ;;  %v2521_v29 = vmul.f32 1.442695, %v2139_v21  ;;  %v1003_v35 = vpop.f32.mrf.mxu1  ;;  %v1116_v40 = vpop.f32.mrf.mxu0  ;;  %v9682_v48 = vadd.f32 %v1114_v53, %v9549_v39 }
 0x1cc   :  { %7689 = vpow2.f32 %v2483_v18  ;;  %v2519_v41 = vmul.f32 1.442695, %v2138_v24  ;;  %13735 = vst [vmem:[#allocation20_spill] sm:$0xff] %v9679_v46  ;;  %v2523_v37 = vmul.f32 1.442695, %v2140_v34  ;;  %v2157_v8 = vsub.f32 0.0, %v9679_v46 }
 0x1cd   :  { %13736 = vst [vmem:[#allocation21_spill] sm:$0xff] %v9682_v48  ;;  %v7668_v51 = vpop.eup %7667  ;;  %7691 = vpow2.f32 %v2517_v25  ;;  %v1005_v4 = vpop.f32.mrf.mxu1  ;;  %v2159_v10 = vsub.f32 0.0, %v9682_v48  ;;  %v9687_v14 = vadd.f32 %v1003_v35, %v9555_v52  ;;  %v9690_v18 = vadd.f32 %v1116_v40, %v9558_v54 }
 0x1ce   :  { %v1118_v7 = vpop.f32.mrf.mxu0  ;;  %v7670_v57 = vpop.eup %7669  ;;  %v3037_v60 = vadd.f32 1.0, %v7668_v51  ;;  %7693 = vpow2.f32 %v2521_v29  ;;  %v9697_v53 = vadd.f32 %v1005_v4, %v9546_v32 }
 0x1cf   :  { %v7672_v63 = vpop.eup %7671  ;;  %v3039_v1 = vadd.f32 1.0, %v7670_v57  ;;  %7695 = vpow2.f32 %v2519_v41  ;;  %v1007_v56 = vpop.f32.mrf.mxu1  ;;  %13737 = vst [vmem:[#allocation22_spill] sm:$0xff] %v9687_v14  ;;  %13738 = vst [vmem:[#allocation23_spill] sm:$0xff] %v9690_v18  ;;  %v9701_v41 = vmul.f32 1.442695, %v2157_v8 }
 0x1d0   :  { %v1120_v62 = vpop.f32.mrf.mxu0  ;;  %v7674_v36 = vpop.eup %7673  ;;  %7697 = vrcp.f32 %v3037_v60  ;;  %v3038_v6 = vadd.f32 1.0, %v7672_v63  ;;  %13739 = vst [vmem:[#allocation24_spill] sm:$0xff] %v9697_v53  ;;  %v9703_v51 = vmul.f32 1.442695, %v2159_v10  ;;  %v2158_v60 = vsub.f32 0.0, %v9687_v14 }
 0x1d1   :  { %7699 = vrcp.f32 %v3039_v1  ;;  %v3040_v11 = vadd.f32 1.0, %v7674_v36  ;;  %v1011_v19 = vpop.f32.mrf.mxu1  ;;  %6865 = vmatmul.mubr.msk.bf16.gmra.mxu1 %vm922_vm1, %v9285_v43  ;;  %6873 = vmatmul.mubr.msk.bf16.gmra.mxu0 %vm922_vm1, %v9285_v43  ;;  %v2160_v63 = vsub.f32 0.0, %v9690_v18 }
 0x1d2   :  { %v1124_v21 = vpop.f32.mrf.mxu0  ;;  %v7676_v22 = vpop.eup %7675  ;;  %7701 = vrcp.f32 %v3038_v6  ;;  %1697 = vmatprep.mubr.bf16.mxu1 %v13567_v26  ;;  %1810 = vmatprep.mubr.bf16.mxu0 %v13567_v26  ;;  %v9724_v59 = vadd.f32 %v1011_v19, %v9546_v32  ;;  %v2559_v18 = vmul.f32 1.442695, %v2158_v60 }
 0x1d3   :  { %v7678_v24 = vpop.eup %7677  ;;  %7703 = vrcp.f32 %v3040_v11  ;;  %v3057_v25 = vadd.f32 1.0, %v7676_v22  ;;  %v1013_v29 = vpop.f32.mrf.mxu1  ;;  %v2177_v22 = vsub.f32 0.0, %v9697_v53 }
 0x1d4   :  { %v1126_v34 = vpop.f32.mrf.mxu0  ;;  %v7680_v35 = vpop.eup %7679  ;;  %v3059_v40 = vadd.f32 1.0, %v7678_v24  ;;  %7705 = vpow2.f32 %v2523_v37  ;;  %v9711_v37 = vadd.f32 %v1118_v7, %v9549_v39  ;;  %v9714_v24 = vadd.f32 %v1007_v56, %v9555_v52  ;;  %13743 = vst [vmem:[#allocation28_spill] sm:$0xff] %v9724_v59 }
 0x1d5   :  { %v7682_v57 = vpop.eup %7681  ;;  %7707 = vrcp.f32 %v3057_v25  ;;  %v3058_v4 = vadd.f32 1.0, %v7680_v35  ;;  %v1015_v1 = vpop.f32.mrf.mxu1  ;;  %v9717_v25 = vadd.f32 %v1120_v62, %v9558_v54  ;;  %v9727_v7 = vadd.f32 %v1124_v21, %v9549_v39 }
 0x1d6   :  { %v9707_v36 = vpop.f32.mrf.mxu0  ;;  %v7684_v6 = vpop.eup %7683  ;;  %7709 = vrcp.f32 %v3059_v40  ;;  %v3060_v11 = vadd.f32 1.0, %v7682_v57  ;;  %13740 = vst [vmem:[#allocation25_spill] sm:$0xff] %v9711_v37  ;;  %13741 = vst [vmem:[#allocation26_spill] sm:$0xff] %v9714_v24  ;;  %v9733_v62 = vadd.f32 %v1126_v34, %v9558_v54  ;;  %v13748_v34 = vmov 0  }
 0x1d7   :  { %v7686_v8 = vpop.eup %7685  ;;  %7711 = vrcp.f32 %v3058_v4  ;;  %v3077_v10 = vadd.f32 1.0, %v7684_v6  ;;  %13742 = vst [vmem:[#allocation27_spill] sm:$0xff] %v9717_v25  ;;  %v9719_v35 = vpop.f32.mrf.mxu1  ;;  %13744 = vst [vmem:[#allocation29_spill] sm:$0xff] %v9727_v7  ;;  %v9730_v6 = vadd.f32 %v1013_v29, %v9555_v52  ;;  %v9745_v29 = vadd.f32 %v1015_v1, %v9546_v32 }
 0x1d8   :  { %v9721_v26 = vpop.f32.mrf.mxu0  ;;  %v7688_v40 = vpop.eup %7687  ;;  %7713 = vrcp.f32 %v3060_v11  ;;  %v3079_v57 = vadd.f32 1.0, %v7686_v8  ;;  %13746 = vst [vmem:[#allocation31_spill] sm:$0xff] %v9733_v62  ;;  %v2179_v11 = vsub.f32 0.0, %v9711_v37  ;;  %v2180_v44 = vsub.f32 0.0, %v9717_v25 }
 0x1d9   :  { %v7690_v4 = vpop.eup %7689  ;;  %7715 = vrcp.f32 %v3077_v10  ;;  %v3078_v56 = vadd.f32 1.0, %v7688_v40  ;;  %13745 = vst [vmem:[#allocation30_spill] sm:$0xff] %v9730_v6  ;;  %v9735_v55 = vpop.f32.mrf.mxu1  ;;  %6866 = vmatmul.mubr.msk.bf16.gmra.mxu1 %vm922_vm1, %v9295_v50  ;;  %6874 = vmatmul.mubr.msk.bf16.gmra.mxu0 %vm922_vm1, %v9295_v50  ;;  %13747 = vst [vmem:[#allocation32_spill] sm:$0xff] %v9745_v29  ;;  %v2178_v40 = vsub.f32 0.0, %v9714_v24  ;;  %v2197_v1 = vsub.f32 0.0, %v9724_v59 }
 0x1da   :  { %v9737_v45 = vpop.f32.mrf.mxu0  ;;  %v7692_v19 = vpop.eup %7691  ;;  %7717 = vrcp.f32 %v3079_v57  ;;  %v3080_v21 = vadd.f32 1.0, %v7690_v4  ;;  %1707 = vmatprep.mubr.bf16.mxu1 %v13748_v34  ;;  %1820 = vmatprep.mubr.bf16.mxu0 %v13748_v34  ;;  %v2199_v28 = vsub.f32 0.0, %v9727_v7  ;;  %v2597_v7 = vmul.f32 1.442695, %v2177_v22 }
 0x1db   :  { %v7694_v8 = vpop.eup %7693  ;;  %7719 = vrcp.f32 %v3078_v56  ;;  %v3097_v10 = vadd.f32 1.0, %v7692_v19  ;;  %v9751_v50 = vpop.f32.mrf.mxu1  ;;  %v2198_v56 = vsub.f32 0.0, %v9730_v6  ;;  %v2200_v19 = vsub.f32 0.0, %v9733_v62 }
 0x1dc   :  { %v9753_v57 = vpop.f32.mrf.mxu0  ;;  %v7696_v4 = vpop.eup %7695  ;;  %7721 = vrcp.f32 %v3080_v21  ;;  %v3099_v43 = vadd.f32 1.0, %v7694_v8  ;;  %v2563_v21 = vmul.f32 1.442695, %v2160_v63  ;;  %v2217_v8 = vsub.f32 0.0, %v9745_v29 }
 0x1dd   :  { %v7698_v37 = vpop.eup %7697  ;;  %7723 = vrcp.f32 %v3097_v10  ;;  %v3098_v53 = vadd.f32 1.0, %v7696_v4  ;;  %v9759_v24 = vpop.f32.mrf.mxu1  ;;  %v2601_v14 = vmul.f32 1.442695, %v2179_v11  ;;  %v2599_v10 = vmul.f32 1.442695, %v2178_v40 }
 0x1de   :  { %v9761_v25 = vpop.f32.mrf.mxu0  ;;  %v7700_v5 = vpop.eup %7699  ;;  %7725 = vrcp.f32 %v3099_v43  ;;  %v2603_v48 = vmul.f32 1.442695, %v2180_v44  ;;  %v2637_v46 = vmul.f32 1.442695, %v2197_v1  ;;  %v9771_v43 = vadd.f32 %v9707_v36, %v9549_v39 }
 0x1df   :  { %v7702_v59 = vpop.eup %7701  ;;  %7727 = vrcp.f32 %v3098_v53  ;;  %v9764_v4 = vpop.f32.mrf.mxu1  ;;  %v2641_v53 = vmul.f32 1.442695, %v2199_v28  ;;  %v9774_v63 = vmul.f32 1.442695, %v2198_v56  ;;  %v9776_v22 = vmul.f32 1.442695, %v2200_v19 }
 0x1e0   :  { %v9766_v6 = vpop.f32.mrf.mxu0  ;;  %v7704_v62 = vpop.eup %7703  ;;  %7729 = vpow2.f32 %v9701_v41  ;;  %13749 = vst [vmem:[#allocation33_spill] sm:$0xff] %v9771_v43  ;;  %v3677_v41 = vmul.f32 %v7698_v37, %v9571_v61  ;;  %v9787_v28 = vmul.f32 1.442695, %v2217_v8  ;;  %v3679_v1 = vmul.f32 %v7700_v5, %v9574_v16 }
 0x1e1   :  { %v7706_v60 = vpop.eup %7705  ;;  %7731 = vpow2.f32 %v9703_v51  ;;  %v9778_v11 = vpop.f32.mrf.mxu1  ;;  %6867 = vmatmul.mubr.msk.bf16.gmra.mxu1 %vm922_vm1, %v9305_v58  ;;  %6875 = vmatmul.mubr.msk.bf16.gmra.mxu0 %vm922_vm1, %v9305_v58  ;;  %v9795_v19 = vadd.f32 %v9719_v35, %v9555_v52  ;;  %v2219_v8 = vsub.f32 0.0, %v9771_v43  ;;  %v9805_v5 = vadd.f32 %v9721_v26, %v9558_v54 }
 0x1e2   :  { %v9780_v40 = vpop.f32.mrf.mxu0  ;;  %v7708_v44 = vpop.eup %7707  ;;  %v3100_v36 = vadd.f32 1.0, %v7706_v60  ;;  %7733 = vpow2.f32 %v2559_v18  ;;  %1717 = vmatprep.mubr.bf16.mxu1 %v13748_v34  ;;  %1830 = vmatprep.mubr.bf16.mxu0 %v13748_v34 }
 0x1e3   :  { %v7710_v51 = vpop.eup %7709  ;;  %v3697_v56 = vmul.f32 %v7708_v44, %v9601_v12  ;;  %7735 = vpow2.f32 %v2563_v21  ;;  %v9797_v58 = vpop.f32.mrf.mxu1  ;;  %v3678_v12 = vmul.f32 %v7702_v59, %v9593_v30  ;;  %v2218_v59 = vsub.f32 0.0, %v9795_v19 }
 0x1e4   :  { %v9799_v61 = vpop.f32.mrf.mxu0  ;;  %v7712_v18 = vpop.eup %7711  ;;  %v3699_v37 = vmul.f32 %v7710_v51, %v9604_v13  ;;  %7737 = vrcp.f32 %v3100_v36  ;;  %v3680_v13 = vmul.f32 %v7704_v62, %v9596_v3  ;;  %v9824_v3 = vadd.f32 %v9735_v55, %v9546_v32 }
 0x1e5   :  { %13750 = vst [vmem:[#allocation34_spill] sm:$0xff] %v9799_v61  ;;  %v7714_v16 = vpop.eup %7713  ;;  %v3997_v21 = vadd.f32 %v3697_v56, %v3677_v41  ;;  %v3698_v35 = vmul.f32 %v7712_v18, %v9616_v23  ;;  %7739 = vpow2.f32 %v2597_v7  ;;  %v9809_v60 = vpop.f32.mrf.mxu1  ;;  %v2681_v62 = vmul.f32 1.442695, %v2219_v8 }
 0x1e6   :  { %v9811_v44 = vpop.f32.mrf.mxu0  ;;  %v7716_v29 = vpop.eup %7715  ;;  %v4023_v36 = vadd.f32 %v3699_v37, %v3679_v1  ;;  %v3700_v51 = vmul.f32 %v7714_v16, %v9624_v27  ;;  %7741 = vpow2.f32 %v2601_v14  ;;  %v2220_v1 = vsub.f32 0.0, %v9805_v5 }
 0x1e7   :  { %v7718_v26 = vpop.eup %7717  ;;  %v4010_v43 = vadd.f32 %v3698_v35, %v3678_v12  ;;  %v3717_v61 = vmul.f32 %v7716_v29, %v9632_v49  ;;  %7743 = vpow2.f32 %v2599_v10  ;;  %v9817_v30 = vpop.f32.mrf.mxu1  ;;  %v2679_v18 = vmul.f32 1.442695, %v2218_v59 }
 0x1e8   :  { %v9819_v23 = vpop.f32.mrf.mxu0  ;;  %v7720_v7 = vpop.eup %7719  ;;  %v4036_v41 = vadd.f32 %v3700_v51, %v3680_v13  ;;  %v3719_v56 = vmul.f32 %v7718_v26, %v9635_v38  ;;  %7745 = vpow2.f32 %v2603_v48  ;;  %v2237_v12 = vsub.f32 0.0, %v9824_v3 }
 0x1e9   :  { %v7722_v27 = vpop.eup %7721  ;;  %v3998_v14 = vadd.f32 %v3997_v21, %v3717_v61  ;;  %v3718_v49 = vmul.f32 %v7720_v7, %v9649_v0  ;;  %7747 = vpow2.f32 %v2637_v46  ;;  %v9827_v29 = vpop.f32.mrf.mxu1  ;;  %6868 = vmatmul.mubr.msk.bf16.gmra.mxu1 %vm922_vm1, %v9315_v20  ;;  %6876 = vmatmul.mubr.msk.bf16.gmra.mxu0 %vm922_vm1, %v9315_v20  ;;  %v9864_v51 = vadd.f32 %v9751_v50, %v9555_v52 }
 0x1ea   :  { %v9829_v10 = vpop.f32.mrf.mxu0  ;;  %v7724_v38 = vpop.eup %7723  ;;  %v4024_v48 = vadd.f32 %v4023_v36, %v3719_v56  ;;  %v3720_v55 = vmul.f32 %v7722_v27, %v9652_v31  ;;  %7749 = vpow2.f32 %v2641_v53  ;;  %1727 = vmatprep.mubr.bf16.mxu1 %v13748_v34  ;;  %1840 = vmatprep.mubr.bf16.mxu0 %v13748_v34  ;;  %v2683_v27 = vmul.f32 1.442695, %v2220_v1 }
 0x1eb   :  { %v7726_v0 = vpop.eup %7725  ;;  %v4011_v46 = vadd.f32 %v4010_v43, %v3718_v49  ;;  %v3737_v61 = vmul.f32 %v7724_v38, %v9657_v9  ;;  %7751 = vpow2.f32 %v9774_v63  ;;  %v9841_v37 = vpop.f32.mrf.mxu1  ;;  %v9854_v43 = vadd.f32 %v9737_v45, %v9549_v39 }
 0x1ec   :  { %v9843_v8 = vpop.f32.mrf.mxu0  ;;  %v7728_v16 = vpop.eup %7727  ;;  %v4037_v31 = vadd.f32 %v4036_v41, %v3720_v55  ;;  %v3739_v53 = vmul.f32 %v7726_v0, %v9660_v33  ;;  %7753 = vpow2.f32 %v9776_v22  ;;  %v9870_v45 = vadd.f32 %v9753_v57, %v9558_v54  ;;  %v7445_v57 = vld [vmem:[%s13563_s5 + $0x38] sm:$0xff]  }
 0x1ed   :  { %v7730_v21 = vpop.eup %7729  ;;  %v9848_v35 = vadd.f32 %v3998_v14, %v3737_v61  ;;  %v3738_v9 = vmul.f32 %v7728_v16, %v9663_v15  ;;  %7755 = vpow2.f32 %v9787_v28  ;;  %v9856_v63 = vpop.f32.mrf.mxu1  ;;  %v9878_v49 = vadd.f32 %v9759_v24, %v9546_v32 }
 0x1ee   :  { %v9858_v13 = vpop.f32.mrf.mxu0  ;;  %v7732_v33 = vpop.eup %7731  ;;  %v9860_v36 = vadd.f32 %v4024_v48, %v3739_v53  ;;  %v3117_v22 = vadd.f32 1.0, %v7730_v21  ;;  %7757 = vpow2.f32 %v2681_v62  ;;  %v9890_v1 = vmul.f32 1.442695, %v2237_v12 }
 0x1ef   :  { %v7734_v15 = vpop.eup %7733  ;;  %v9866_v26 = vadd.f32 %v4011_v46, %v3738_v9  ;;  %v3119_v28 = vadd.f32 1.0, %v7732_v33  ;;  %7759 = vpow2.f32 %v2679_v18  ;;  %v9872_v59 = vpop.f32.mrf.mxu1  ;;  %v2239_v24 = vsub.f32 0.0, %v9854_v43 }
 0x1f0   :  { %v9874_v7 = vpop.f32.mrf.mxu0  ;;  %v7736_v41 = vpop.eup %7735  ;;  %7761 = vrcp.f32 %v3117_v22  ;;  %v3118_v56 = vadd.f32 1.0, %v7734_v15  ;;  %v2238_v61 = vsub.f32 0.0, %v9864_v51  ;;  %v2240_v18 = vsub.f32 0.0, %v9870_v45 }
 0x1f1   :  { %v7738_v14 = vpop.eup %7737  ;;  %7763 = vrcp.f32 %v3119_v28  ;;  %v3120_v50 = vadd.f32 1.0, %v7736_v41  ;;  %v9880_v62 = vpop.f32.mrf.mxu1  ;;  %6869 = vmatmul.mubr.msk.bf16.gmra.mxu1 %vm922_vm1, %v9325_v2  ;;  %6877 = vmatmul.mubr.msk.bf16.gmra.mxu0 %vm922_vm1, %v9325_v2  ;;  %v9905_v9 = vadd.f32 %v9761_v25, %v9549_v39  ;;  %v2257_v15 = vsub.f32 0.0, %v9878_v49 }
 0x1f2   :  { %v9882_v38 = vpop.f32.mrf.mxu0  ;;  %v7740_v48 = vpop.eup %7739  ;;  %v3740_v55 = vmul.f32 %v7738_v14, %v9666_v17  ;;  %7765 = vrcp.f32 %v3118_v56  ;;  %1883 = vmatprep.mubr.bf16.mxu1 %v13748_v34  ;;  %1996 = vmatprep.mubr.bf16.mxu0 %v13748_v34  ;;  %v9910_v28 = vadd.f32 %v9764_v4, %v9555_v52  ;;  %v9918_v25 = vadd.f32 %v9766_v6, %v9558_v54 }
 0x1f3   :  { %v7742_v0 = vpop.eup %7741  ;;  %7767 = vrcp.f32 %v3120_v50  ;;  %v3137_v46 = vadd.f32 1.0, %v7740_v48  ;;  %v9897_v16 = vpop.f32.mrf.mxu1  ;;  %v9922_v14 = vadd.f32 %v9778_v11, %v9546_v32  ;;  %v9924_v4 = vmul.f32 1.442695, %v2239_v24  ;;  %v7443_v11 = vld [vmem:[%s13563_s5 + $0x78] sm:$0xff]  }
 0x1f4   :  { %v9899_v53 = vpop.f32.mrf.mxu0  ;;  %v7744_v17 = vpop.eup %7743  ;;  %v9901_v12 = vadd.f32 %v4037_v31, %v3740_v55  ;;  %v3139_v21 = vadd.f32 1.0, %v7742_v0  ;;  %7769 = vpow2.f32 %v2683_v27  ;;  %v9926_v55 = vmul.f32 1.442695, %v2238_v61  ;;  %v7444_v24 = vld [vmem:[%s13563_s5 + $0xf8] sm:$0xff]   ;;  %7065 = vmatprep.subr.bf16.mxu1 %v7443_v11 }
 0x1f5   :  { %13751 = vst [vmem:[#allocation35_spill] sm:$0xff] %v9899_v53  ;;  %v7746_v33 = vpop.eup %7745  ;;  %7771 = vrcp.f32 %v3137_v46  ;;  %v3138_v22 = vadd.f32 1.0, %v7744_v17  ;;  %v9912_v41 = vpop.f32.mrf.mxu1  ;;  %13754 = vst [vmem:[#allocation38_spill] sm:$0xff] %v9922_v14  ;;  %v9932_v6 = vmul.f32 1.442695, %v2240_v18  ;;  %v2260_v2 = vsub.f32 0.0, %v9918_v25  ;;  %7087 = vmatprep.subr.bf16.mxu0 %v7444_v24 }
 0x1f6   :  { %13752 = vst [vmem:[#allocation36_spill] sm:$0xff] %v9912_v41  ;;  %v9914_v56 = vpop.f32.mrf.mxu0  ;;  %v7748_v31 = vpop.eup %7747  ;;  %7773 = vrcp.f32 %v3139_v21  ;;  %v3140_v27 = vadd.f32 1.0, %v7746_v33  ;;  %v2259_v33 = vsub.f32 0.0, %v9905_v9  ;;  %v9984_v11 = vadd.f32 %v9809_v60, %v9546_v32 }
 0x1f7   :  { %13753 = vst [vmem:[#allocation37_spill] sm:$0xff] %v9914_v56  ;;  %v7750_v50 = vpop.eup %7749  ;;  %7775 = vrcp.f32 %v3138_v22  ;;  %v3157_v48 = vadd.f32 1.0, %v7748_v31  ;;  %v9928_v0 = vpop.f32.mrf.mxu1  ;;  %v9941_v31 = vmul.f32 1.442695, %v2257_v15  ;;  %v7446_v15 = vld [vmem:[%s13563_s5 + $0xb8] sm:$0xff]  }
 0x1f8   :  { %13755 = vst [vmem:[#allocation39_spill] sm:$0xff] %v9928_v0  ;;  %v9930_v46 = vpop.f32.mrf.mxu0  ;;  %v7752_v17 = vpop.eup %7751  ;;  %7777 = vrcp.f32 %v3140_v27  ;;  %v3159_v21 = vadd.f32 1.0, %v7750_v50  ;;  %v2258_v27 = vsub.f32 0.0, %v9910_v28  ;;  %v9968_v0 = vadd.f32 %v9797_v58, %v9555_v52  ;;  %13764 = vst [vmem:[#allocation46_spill] sm:$0xff] %v9984_v11 }
 0x1f9   :  { %13756 = vst [vmem:[#allocation40_spill] sm:$0xff] %v9930_v46  ;;  %v7754_v61 = vpop.eup %7753  ;;  %7779 = vrcp.f32 %v3157_v48  ;;  %v3158_v22 = vadd.f32 1.0, %v7752_v17  ;;  %v9944_v50 = vpop.f32.mrf.mxu1  ;;  %6878 = vmatmul.mubr.msk.bf16.vlgmr.msra.gmra.mxu1 %vm922_vm1, %v9204_v47  ;;  %6886 = vmatmul.mubr.msk.bf16.vlgmr.msra.gmra.mxu0 %vm922_vm1, %v9204_v47  ;;  %v9964_v46 = vadd.f32 %v9780_v40, %v9549_v39  ;;  %v9974_v20 = vmul.f32 1.442695, %v2259_v33 }
 0x1fa   :  { %13757 = vst [vmem:[#allocation41_spill] sm:$0xff] %v9944_v50  ;;  %v9946_v18 = vpop.f32.mrf.mxu0  ;;  %v7756_v48 = vpop.eup %7755  ;;  %7781 = vrcp.f32 %v3159_v21  ;;  %v3160_v17 = vadd.f32 1.0, %v7754_v61  ;;  %1893 = vmatprep.mubr.bf16.mxu1 %v13748_v34  ;;  %2006 = vmatprep.mubr.bf16.mxu0 %v13748_v34  ;;  %13759 = vst [vmem:[#allocation43_spill] sm:$0xff] %v9968_v0  ;;  %v9980_v53 = vmul.f32 1.442695, %v2258_v27  ;;  %v2278_v60 = vsub.f32 0.0, %v9968_v0 }
 0x1fb   :  { %13758 = vst [vmem:[#allocation42_spill] sm:$0xff] %v9946_v18  ;;  %v2277_v18 = vsub.f32 0.0, %v9922_v14  ;;  %v7758_v47 = vpop.eup %7757  ;;  %7783 = vrcp.f32 %v3158_v22  ;;  %v3177_v50 = vadd.f32 1.0, %v7756_v48  ;;  %v9970_v21 = vpop.f32.mrf.mxu1  ;;  %v13762_v22 = vld [vmem:[#allocation34_spill] sm:$0xff]  ;;  %7066 = vmatpush3.bf16.msra.mxu1 %v7445_v57  ;;  %7088 = vmatpush3.bf16.msra.mxu0 %v7446_v15  ;;  %v2279_v15 = vsub.f32 0.0, %v9964_v46  ;;  %v13777_v0 = vld [vmem:[#allocation27_spill] sm:$0xff] }
 0x1fc   :  { %13760 = vst [vmem:[#allocation44_spill] sm:$0xff] %v9970_v21  ;;  %v9972_v61 = vpop.f32.mrf.mxu0  ;;  %v7760_v56 = vpop.eup %7759  ;;  %7785 = vrcp.f32 %v3160_v17  ;;  %v3179_v41 = vadd.f32 1.0, %v7758_v47  ;;  %v9978_v48 = vadd.f32 %v13762_v22, %v9558_v54  ;;  %v13767_v47 = vld [vmem:[#allocation20_spill] sm:$0xff]  ;;  %v9991_v22 = vmul.f32 1.442695, %v2260_v2 }
 0x1fd   :  { %13761 = vst [vmem:[#allocation45_spill] sm:$0xff] %v9972_v61  ;;  %v7762_v40 = vpop.eup %7761  ;;  %7787 = vrcp.f32 %v3177_v50  ;;  %v3178_v58 = vadd.f32 1.0, %v7760_v56  ;;  %v9986_v24 = vpop.f32.mrf.mxu1  ;;  %v9993_v57 = vmul.f32 1.442695, %v2277_v18  ;;  %v13768_v56 = vld [vmem:[#allocation21_spill] sm:$0xff] }
 0x1fe   :  { %13763 = vst [vmem:[#allocation34_spill] sm:$0xff] %v9978_v48  ;;  %13765 = vst [vmem:[#allocation47_spill] sm:$0xff] %v9986_v24  ;;  %v9988_v17 = vpop.f32.mrf.mxu0  ;;  %v7764_v33 = vpop.eup %7763  ;;  %v3757_v61 = vmul.f32 %v7762_v40, %v13767_v47  ;;  %7789 = vrcp.f32 %v3179_v41  ;;  %v2280_v2 = vsub.f32 0.0, %v9978_v48  ;;  %v7447_v41 = vld [vmem:[%s13563_s5 + $0x70] sm:$0xff]  }
 0x1ff   :  { %13766 = vst [vmem:[#allocation48_spill] sm:$0xff] %v9988_v17  ;;  %v7766_v50 = vpop.eup %7765  ;;  %v3759_v27 = vmul.f32 %v7764_v33, %v13768_v56  ;;  %7791 = vrcp.f32 %v3178_v58  ;;  %v13769_v17 = vld [vmem:[#allocation22_spill] sm:$0xff]  ;;  %v7448_v18 = vld [vmem:[%s13563_s5 + $0xf0] sm:$0xff]   ;;  %v13770_v33 = vld [vmem:[#allocation23_spill] sm:$0xff]  ;;  %7067 = vmatprep.subr.bf16.mxu1 %v7447_v41 }
 0x200   :  { %v7768_v21 = vpop.eup %7767  ;;  %v4000_v24 = vadd.f32 %v9848_v35, %v3757_v61  ;;  %v3758_v14 = vmul.f32 %v7766_v50, %v13769_v17  ;;  %7793 = vpow2.f32 %v9890_v1  ;;  %v2297_v35 = vsub.f32 0.0, %v9984_v11  ;;  %v10012_v1 = vpop.f32.mrf.mxu1  ;;  %v13773_v17 = vld [vmem:[#allocation8_spill] sm:$0xff]  ;;  %7089 = vmatprep.subr.bf16.mxu0 %v7448_v18 }
 0x201   :  { %v7770_v40 = vpop.eup %7769  ;;  %v4026_v58 = vadd.f32 %v9860_v36, %v3759_v27  ;;  %v3760_v47 = vmul.f32 %v7768_v21, %v13770_v33  ;;  %7795 = vpow2.f32 %v9924_v4  ;;  %13771 = vst [vmem:[#allocation20_spill] sm:$0xff] %v10012_v1  ;;  %v10014_v61 = vpop.f32.mrf.mxu0  ;;  %6879 = vmatmul.mubr.msk.bf16.gmra.mxu1 %vm922_vm1, %v13773_v17  ;;  %6887 = vmatmul.mubr.msk.bf16.gmra.mxu0 %vm922_vm1, %v13773_v17  ;;  %v7449_v36 = vld [vmem:[%s13563_s5 + $0x30] sm:$0xff]   ;;  %v2799_v11 = vmul.f32 1.442695, %v2278_v60 }
 0x202   :  { %13772 = vst [vmem:[#allocation21_spill] sm:$0xff] %v10014_v61  ;;  %v7450_v4 = vld [vmem:[%s13563_s5 + $0xb0] sm:$0xff]   ;;  %v7772_v21 = vpop.eup %7771  ;;  %v4013_v50 = vadd.f32 %v9866_v26, %v3758_v14  ;;  %v3180_v56 = vadd.f32 1.0, %v7770_v40  ;;  %7797 = vpow2.f32 %v9926_v55  ;;  %v10030_v27 = vadd.f32 %v9811_v44, %v9549_v39  ;;  %1903 = vmatprep.mubr.bf16.mxu1 %v13748_v34  ;;  %2016 = vmatprep.mubr.bf16.mxu0 %v13748_v34 }
 0x203   :  { %v7774_v33 = vpop.eup %7773  ;;  %v4039_v17 = vadd.f32 %v9901_v12, %v3760_v47  ;;  %v13774_v61 = vld [vmem:[#allocation24_spill] sm:$0xff]  ;;  %7799 = vpow2.f32 %v9932_v6  ;;  %v10039_v26 = vadd.f32 %v9817_v30, %v9555_v52  ;;  %v13775_v44 = vld [vmem:[#allocation25_spill] sm:$0xff]  ;;  %v2801_v40 = vmul.f32 1.442695, %v2279_v15  ;;  %7068 = vmatpush3.bf16.msra.mxu1 %v7449_v36  ;;  %7090 = vmatpush3.bf16.msra.mxu0 %v7450_v4  ;;  %v13776_v47 = vld [vmem:[#allocation26_spill] sm:$0xff]  ;;  %v10046_v30 = vpop.f32.mrf.mxu0 }
 0x204   :  { %v3777_v1 = vmul.f32 %v7772_v21, %v13774_v61  ;;  %v7776_v14 = vpop.eup %7775  ;;  %v3779_v55 = vmul.f32 %v7774_v33, %v13775_v44  ;;  %7801 = vrcp.f32 %v3180_v56  ;;  %v2803_v6 = vmul.f32 1.442695, %v2280_v2  ;;  %v10044_v21 = vpop.f32.mrf.mxu1  ;;  %v13779_v56 = vld [vmem:[#allocation29_spill] sm:$0xff] }
 0x205   :  { %v7778_v48 = vpop.eup %7777  ;;  %v3778_v61 = vmul.f32 %v7776_v14, %v13776_v47  ;;  %7803 = vpow2.f32 %v9941_v31  ;;  %v2299_v15 = vsub.f32 0.0, %v10030_v27  ;;  %v2298_v31 = vsub.f32 0.0, %v10039_v26  ;;  %v13782_v47 = vld [vmem:[#allocation31_spill] sm:$0xff] }
 0x206   :  { %v4001_v12 = vadd.f32 %v4000_v24, %v3777_v1  ;;  %v7780_v41 = vpop.eup %7779  ;;  %v4027_v18 = vadd.f32 %v4026_v58, %v3779_v55  ;;  %v3780_v33 = vmul.f32 %v7778_v48, %v13777_v0  ;;  %7805 = vpow2.f32 %v9974_v20  ;;  %v13778_v24 = vld [vmem:[#allocation28_spill] sm:$0xff]  ;;  %v13780_v58 = vld [vmem:[#allocation30_spill] sm:$0xff]  ;;  %v10064_v55 = vpop.f32.mrf.mxu0 }
 0x207   :  { %v7782_v60 = vpop.eup %7781  ;;  %v4014_v36 = vadd.f32 %v4013_v50, %v3778_v61  ;;  %v3797_v1 = vmul.f32 %v7780_v41, %v13778_v24  ;;  %7807 = vpow2.f32 %v9980_v53  ;;  %v10058_v0 = vadd.f32 %v9819_v23, %v9558_v54  ;;  %v10062_v53 = vpop.f32.mrf.mxu1  ;;  %v13783_v41 = vld [vmem:[#allocation32_spill] sm:$0xff] }
 0x208   :  { %v7784_v2 = vpop.eup %7783  ;;  %v4040_v4 = vadd.f32 %v4039_v17, %v3780_v33  ;;  %v3799_v14 = vmul.f32 %v7782_v60, %v13779_v56  ;;  %7809 = vpow2.f32 %v9991_v22  ;;  %v2837_v44 = vmul.f32 1.442695, %v2297_v35  ;;  %v13781_v17 = vld [vmem:[#allocation9_spill] sm:$0xff] }
 0x209   :  { %v7786_v20 = vpop.eup %7785  ;;  %v4002_v48 = vadd.f32 %v4001_v12, %v3797_v1  ;;  %v3798_v50 = vmul.f32 %v7784_v2, %v13780_v58  ;;  %7811 = vpow2.f32 %v9993_v57  ;;  %6880 = vmatmul.mubr.msk.bf16.gmra.mxu1 %vm922_vm1, %v13781_v17  ;;  %6888 = vmatmul.mubr.msk.bf16.gmra.mxu0 %vm922_vm1, %v13781_v17  ;;  %v2841_v12 = vmul.f32 1.442695, %v2299_v15  ;;  %v13784_v2 = vld [vmem:[#allocation33_spill] sm:$0xff]  ;;  %v10082_v58 = vpop.f32.mrf.mxu0 }
 0x20a   :  { %v7788_v22 = vpop.eup %7787  ;;  %v4028_v23 = vadd.f32 %v4027_v18, %v3799_v14  ;;  %v3800_v61 = vmul.f32 %v7786_v20, %v13782_v47  ;;  %7813 = vpow2.f32 %v2801_v40  ;;  %1913 = vmatprep.mubr.bf16.mxu1 %v13748_v34  ;;  %2026 = vmatprep.mubr.bf16.mxu0 %v13748_v34  ;;  %v2839_v60 = vmul.f32 1.442695, %v2298_v31  ;;  %13785 = vst [vmem:[#allocation22_spill] sm:$0xff] %v10082_v58 }
 0x20b   :  { %v7790_v57 = vpop.eup %7789  ;;  %v4015_v35 = vadd.f32 %v4014_v36, %v3798_v50  ;;  %v3817_v33 = vmul.f32 %v7788_v22, %v13783_v41  ;;  %7815 = vpow2.f32 %v2799_v11  ;;  %v2300_v18 = vsub.f32 0.0, %v10058_v0  ;;  %v10080_v36 = vpop.f32.mrf.mxu1  ;;  %v7451_v11 = vld [vmem:[%s13563_s5 + $0x68] sm:$0xff]  }
 0x20c   :  { %v7792_v24 = vpop.eup %7791  ;;  %v4041_v1 = vadd.f32 %v4040_v4, %v3800_v61  ;;  %v3819_v56 = vmul.f32 %v7790_v57, %v13784_v2  ;;  %7817 = vpow2.f32 %v2803_v6  ;;  %v13610_v20 = vsub.s32 6, %v9519_v42  ;;  %v7452_v6 = vld [vmem:[%s13563_s5 + $0xe8] sm:$0xff]   ;;  %7069 = vmatprep.subr.bf16.mxu1 %v7451_v11  ;;  %v8947_v57 = vld [vmem:[%s13562_s4] sm:$0xff] }
 0x20d   :  { %v7794_v14 = vpop.eup %7793  ;;  %v10076_v40 = vadd.f32 %v4002_v48, %v3817_v33  ;;  %v3818_v15 = vmul.f32 %v7792_v24, %v9795_v19  ;;  %7819 = vpow2.f32 %v2837_v44  ;;  %v13609_v19 = vsub.s32 5, %v9519_v42  ;;  %v7453_v50 = vld [vmem:[%s13563_s5 + $0x28] sm:$0xff]   ;;  %7091 = vmatprep.subr.bf16.mxu0 %v7452_v6 }
 0x20e   :  { %v7796_v31 = vpop.eup %7795  ;;  %v10090_v4 = vadd.f32 %v4028_v23, %v3819_v56  ;;  %v3197_v48 = vadd.f32 1.0, %v7794_v14  ;;  %7821 = vpow2.f32 %v2841_v12  ;;  %v7454_v44 = vld [vmem:[%s13563_s5 + $0xa8] sm:$0xff]   ;;  %v2843_v12 = vmul.f32 1.442695, %v2300_v18  ;;  %7070 = vmatpush3.bf16.msra.mxu1 %v7453_v50  ;;  %v10116_v56 = vpop.f32.mrf.mxu1  ;;  %v13789_v14 = vld [vmem:[#allocation10_spill] sm:$0xff] }
 0x20f   :  { %v7798_v17 = vpop.eup %7797  ;;  %v10099_v22 = vadd.f32 %v4015_v35, %v3818_v15  ;;  %v3199_v47 = vadd.f32 1.0, %v7796_v31  ;;  %7823 = vpow2.f32 %v2839_v60  ;;  %v13786_v41 = vsub.s32 4, %v9519_v42  ;;  %7092 = vmatpush3.bf16.msra.mxu0 %v7454_v44  ;;  %13787 = vst [vmem:[#allocation23_spill] sm:$0xff] %v10116_v56  ;;  %v10118_v18 = vpop.f32.mrf.mxu0 }
 0x210   :  { %v7800_v23 = vpop.eup %7799  ;;  %7825 = vrcp.f32 %v3197_v48  ;;  %v3198_v61 = vadd.f32 1.0, %v7798_v17  ;;  %v10110_v60 = vadd.f32 %v9827_v29, %v9546_v32  ;;  %v10114_v2 = vrot.slane %v8947_v57, %v13610_v20  ;;  %13788 = vst [vmem:[#allocation8_spill] sm:$0xff] %v10118_v18 }
 0x211   :  { %v10106_v33 = vrot.slane %v8947_v57, %v13786_v41  ;;  %v7802_v35 = vpop.eup %7801  ;;  %7827 = vrcp.f32 %v3199_v47  ;;  %v3200_v24 = vadd.f32 1.0, %v7800_v23  ;;  %6881 = vmatmul.mubr.msk.bf16.gmra.mxu1 %vm922_vm1, %v13789_v14  ;;  %6889 = vmatmul.mubr.msk.bf16.gmra.mxu0 %vm922_vm1, %v13789_v14  ;;  %v10127_v29 = vrot.slane %v8947_v57, %v13609_v19  ;;  %v7458_v14 = vld [vmem:[%s13563_s5 + $0xa0] sm:$0xff]  }
 0x212   :  { %v7804_v15 = vpop.eup %7803  ;;  %v3820_v11 = vmul.f32 %v7802_v35, %v9805_v5  ;;  %7829 = vrcp.f32 %v3198_v61  ;;  %v13611_v6 = vsub.s32 7, %v9519_v42  ;;  %1923 = vmatprep.mubr.bf16.mxu1 %v13748_v34  ;;  %2036 = vmatprep.mubr.bf16.mxu0 %v13748_v34  ;;  %v10134_v50 = vadd.f32 %v9829_v10, %v9549_v39  ;;  %v7455_v61 = vld [vmem:[%s13563_s5 + $0x60] sm:$0xff]   ;;  %v10157_v35 = vpop.f32.mrf.mxu1 }
 0x213   :  { %v7806_v31 = vpop.eup %7805  ;;  %7831 = vrcp.f32 %v3200_v24  ;;  %v3217_v48 = vadd.f32 1.0, %v7804_v15  ;;  %v10138_v5 = vadd.f32 %v9841_v37, %v9555_v52  ;;  %v10144_v23 = vadd.f32 %v9843_v8, %v9558_v54  ;;  %v7456_v10 = vld [vmem:[%s13563_s5 + $0xe0] sm:$0xff]   ;;  %13791 = vst [vmem:[#allocation25_spill] sm:$0xff] %v10157_v35  ;;  %v10159_v8 = vpop.f32.mrf.mxu0  ;;  %7071 = vmatprep.subr.bf16.mxu1 %v7455_v61  ;;  %v7459_v61 = vld [vmem:[%s13563_s5 + $0x58] sm:$0xff]  }
 0x214   :  { %v7808_v44 = vpop.eup %7807  ;;  %v10140_v17 = vadd.f32 %v4041_v1, %v3820_v11  ;;  %v3219_v47 = vadd.f32 1.0, %v7806_v31  ;;  %7833 = vpow2.f32 %v2843_v12  ;;  %v2317_v1 = vsub.f32 0.0, %v10110_v60  ;;  %13792 = vst [vmem:[#allocation26_spill] sm:$0xff] %v10159_v8  ;;  %v7457_v24 = vld [vmem:[%s13563_s5 + $0x20] sm:$0xff]   ;;  %7093 = vmatprep.subr.bf16.mxu0 %v7456_v10  ;;  %v7460_v10 = vld [vmem:[%s13563_s5 + $0xd8] sm:$0xff]  }
 0x215   :  { %v7810_v41 = vpop.eup %7809  ;;  %7835 = vrcp.f32 %v3217_v48  ;;  %v3218_v37 = vadd.f32 1.0, %v7808_v44  ;;  %v10155_v12 = vadd.f32 %v9856_v63, %v9546_v32  ;;  %v4004_v11 = vrot.slane %v10076_v40, 4  ;;  %7072 = vmatpush3.bf16.msra.mxu1 %v7457_v24  ;;  %7094 = vmatpush3.bf16.msra.mxu0 %v7458_v14 }
 0x216   :  { %13790 = vst [vmem:[#allocation24_spill] sm:$0xff] %v10140_v17  ;;  %v7812_v15 = vpop.eup %7811  ;;  %7837 = vrcp.f32 %v3219_v47  ;;  %v3220_v31 = vadd.f32 1.0, %v7810_v41  ;;  %v10170_v63 = vrot.slane %v8947_v57, %v13611_v6  ;;  %v2319_v19 = vsub.f32 0.0, %v10134_v50  ;;  %v7461_v6 = vld [vmem:[%s13563_s5 + $0x18] sm:$0xff]   ;;  %7073 = vmatprep.subr.bf16.mxu1 %v7459_v61  ;;  %7095 = vmatprep.subr.bf16.mxu0 %v7460_v10 }
 0x217   :  { %v7814_v48 = vpop.eup %7813  ;;  %7839 = vrcp.f32 %v3218_v37  ;;  %v3237_v44 = vadd.f32 1.0, %v7812_v15  ;;  %v10175_v20 = vadd.f32 %v9858_v13, %v9549_v39  ;;  %v2318_v41 = vsub.f32 0.0, %v10138_v5  ;;  %v10186_v15 = vpop.f32.mrf.mxu1 }
 0x218   :  { %v7816_v8 = vpop.eup %7815  ;;  %7841 = vrcp.f32 %v3220_v31  ;;  %v3239_v47 = vadd.f32 1.0, %v7814_v48  ;;  %v2320_v57 = vsub.f32 0.0, %v10144_v23  ;;  %v2877_v24 = vmul.f32 1.442695, %v2317_v1  ;;  %13793 = vst [vmem:[#allocation27_spill] sm:$0xff] %v10186_v15  ;;  %v10188_v31 = vpop.f32.mrf.mxu0  ;;  %v13795_v48 = vld [vmem:[#allocation11_spill] sm:$0xff] }
 0x219   :  { %v7818_v37 = vpop.eup %7817  ;;  %7843 = vrcp.f32 %v3237_v44  ;;  %v3238_v13 = vadd.f32 1.0, %v7816_v8  ;;  %v2337_v14 = vsub.f32 0.0, %v10155_v12  ;;  %13794 = vst [vmem:[#allocation28_spill] sm:$0xff] %v10188_v31  ;;  %6882 = vmatmul.mubr.msk.bf16.gmra.mxu1 %vm922_vm1, %v13795_v48  ;;  %6890 = vmatmul.mubr.msk.bf16.gmra.mxu0 %vm922_vm1, %v13795_v48  ;;  %v7462_v1 = vld [vmem:[%s13563_s5 + $0x98] sm:$0xff]   ;;  %v10201_v44 = vadd.f32 %v4004_v11, %v10076_v40 }
 0x21a   :  { %v7820_v8 = vpop.eup %7819  ;;  %v4030_v42 = vrot.slane %v10090_v4, 4  ;;  %7845 = vrcp.f32 %v3239_v47  ;;  %v3240_v31 = vadd.f32 1.0, %v7818_v37  ;;  %1933 = vmatprep.mubr.bf16.mxu1 %v13748_v34  ;;  %2046 = vmatprep.mubr.bf16.mxu0 %v13748_v34  ;;  %v2881_v35 = vmul.f32 1.442695, %v2319_v19  ;;  %v10211_v19 = vpop.f32.mrf.mxu1 }
 0x21b   :  { %v7822_v48 = vpop.eup %7821  ;;  %7847 = vrcp.f32 %v3238_v13  ;;  %v3257_v15 = vadd.f32 1.0, %v7820_v8  ;;  %v2339_v18 = vsub.f32 0.0, %v10175_v20  ;;  %v2879_v11 = vmul.f32 1.442695, %v2318_v41  ;;  %7074 = vmatpush3.bf16.msra.mxu1 %v7461_v6  ;;  %7096 = vmatpush3.bf16.msra.mxu0 %v7462_v1  ;;  %v10213_v8 = vpop.f32.mrf.mxu0 }
 0x21c   :  { %v7824_v56 = vpop.eup %7823  ;;  %7849 = vrcp.f32 %v3240_v31  ;;  %v3259_v40 = vadd.f32 1.0, %v7822_v48  ;;  %v2883_v17 = vmul.f32 1.442695, %v2320_v57  ;;  %v2917_v58 = vmul.f32 1.442695, %v2337_v14 }
 0x21d   :  { %v7826_v47 = vpop.eup %7825  ;;  %7851 = vrcp.f32 %v3257_v15  ;;  %v3258_v37 = vadd.f32 1.0, %v7824_v56  ;;  %v10209_v13 = vadd.f32 %v9872_v59, %v9555_v52  ;;  %v10217_v41 = vadd.f32 %v4030_v42, %v10090_v4 }
 0x21e   :  { %v7828_v61 = vpop.eup %7827  ;;  %7853 = vrcp.f32 %v3259_v40  ;;  %v3837_v56 = vmul.f32 %v7826_v47, %v9824_v3  ;;  %v2921_v14 = vmul.f32 1.442695, %v2339_v18  ;;  %v10226_v42 = vadd.f32 %v9874_v7, %v9558_v54  ;;  %v10233_v18 = vpop.f32.mrf.mxu1 }
 0x21f   :  { %v7830_v57 = vpop.eup %7829  ;;  %7855 = vrcp.f32 %v3258_v37  ;;  %v2338_v59 = vsub.f32 0.0, %v10209_v13  ;;  %v3839_v31 = vmul.f32 %v7828_v61, %v9854_v43  ;;  %v10231_v3 = vadd.f32 %v9880_v62, %v9546_v32  ;;  %v10235_v47 = vpop.f32.mrf.mxu0  ;;  %v13797_v43 = vld [vmem:[#allocation12_spill] sm:$0xff] }
 0x220   :  { %v7832_v15 = vpop.eup %7831  ;;  %v3838_v1 = vmul.f32 %v7830_v57, %v9864_v51  ;;  %7857 = vpow2.f32 %v2877_v24  ;;  %13796 = vst [vmem:[#allocation29_spill] sm:$0xff] %v10235_v47  ;;  %v10252_v61 = vadd.f32 %v9897_v16, %v9555_v52 }
 0x221   :  { %v7834_v4 = vpop.eup %7833  ;;  %v3840_v48 = vmul.f32 %v7832_v15, %v9870_v45  ;;  %7859 = vpow2.f32 %v2881_v35  ;;  %v2919_v40 = vmul.f32 1.442695, %v2338_v59  ;;  %6883 = vmatmul.mubr.msk.bf16.gmra.mxu1 %vm922_vm1, %v13797_v43  ;;  %6891 = vmatmul.mubr.msk.bf16.gmra.mxu0 %vm922_vm1, %v13797_v43  ;;  %v2340_v45 = vsub.f32 0.0, %v10226_v42 }
 0x222   :  { %v7836_v51 = vpop.eup %7835  ;;  %v3260_v7 = vadd.f32 1.0, %v7834_v4  ;;  %7861 = vpow2.f32 %v2879_v11  ;;  %v10244_v35 = vadd.f32 %v9882_v38, %v9549_v39  ;;  %1943 = vmatprep.mubr.bf16.mxu1 %v13748_v34  ;;  %2056 = vmatprep.mubr.bf16.mxu0 %v13748_v34  ;;  %v2357_v37 = vsub.f32 0.0, %v10231_v3 }
 0x223   :  { %v7838_v62 = vpop.eup %7837  ;;  %v3857_v24 = vmul.f32 %v7836_v51, %v9878_v49  ;;  %7863 = vpow2.f32 %v2883_v17  ;;  %v2923_v38 = vmul.f32 1.442695, %v2340_v45  ;;  %v10257_v17 = vpop.f32.mrf.mxu1 }
 0x224   :  { %v7840_v11 = vpop.eup %7839  ;;  %v3859_v57 = vmul.f32 %v7838_v62, %v9905_v9  ;;  %7865 = vrcp.f32 %v3260_v7  ;;  %v2359_v59 = vsub.f32 0.0, %v10244_v35  ;;  %v2957_v49 = vmul.f32 1.442695, %v2357_v37  ;;  %13798 = vst [vmem:[#allocation30_spill] sm:$0xff] %v10257_v17  ;;  %v10259_v51 = vpop.f32.mrf.mxu0  ;;  %v13800_v62 = vld [vmem:[#allocation38_spill] sm:$0xff]  ;;  %v13801_v37 = vld [vmem:[#allocation35_spill] sm:$0xff] }
 0x225   :  { %v7842_v15 = vpop.eup %7841  ;;  %v4257_v4 = vadd.f32 %v3857_v24, %v3837_v56  ;;  %v3858_v43 = vmul.f32 %v7840_v11, %v9910_v28  ;;  %7867 = vpow2.f32 %v2917_v58  ;;  %13799 = vst [vmem:[#allocation9_spill] sm:$0xff] %v10259_v51  ;;  %v2358_v56 = vsub.f32 0.0, %v10252_v61 }
 0x226   :  { %v7844_v10 = vpop.eup %7843  ;;  %v4283_v16 = vadd.f32 %v3859_v57, %v3839_v31  ;;  %v3860_v6 = vmul.f32 %v7842_v15, %v9918_v25  ;;  %7869 = vpow2.f32 %v2921_v14  ;;  %v2961_v9 = vmul.f32 1.442695, %v2359_v59  ;;  %v13802_v14 = vld [vmem:[#allocation43_spill] sm:$0xff]  ;;  %v10270_v59 = vpop.f32.mrf.mxu1 }
 0x227   :  { %v7846_v7 = vpop.eup %7845  ;;  %v4270_v45 = vadd.f32 %v3858_v43, %v3838_v1  ;;  %v3877_v47 = vmul.f32 %v7844_v10, %v13800_v62  ;;  %7871 = vpow2.f32 %v2919_v40  ;;  %v10267_v11 = vadd.f32 %v13801_v37, %v9558_v54  ;;  %13803 = vst [vmem:[#allocation31_spill] sm:$0xff] %v10270_v59  ;;  %v10272_v10 = vpop.f32.mrf.mxu0  ;;  %v13805_v40 = vld [vmem:[#allocation13_spill] sm:$0xff]  ;;  %v13807_v43 = vld [vmem:[#allocation46_spill] sm:$0xff] }
 0x228   :  { %v7848_v28 = vpop.eup %7847  ;;  %v4296_v58 = vadd.f32 %v3860_v6, %v3840_v48  ;;  %v3879_v24 = vmul.f32 %v7846_v7, %v9964_v46  ;;  %7873 = vpow2.f32 %v2923_v38  ;;  %v2959_v1 = vmul.f32 1.442695, %v2358_v56  ;;  %13804 = vst [vmem:[#allocation32_spill] sm:$0xff] %v10272_v10  ;;  %v13806_v48 = vld [vmem:[#allocation34_spill] sm:$0xff]  ;;  %v13808_v7 = vld [vmem:[#allocation36_spill] sm:$0xff] }
 0x229   :  { %v7850_v31 = vpop.eup %7849  ;;  %v4258_v25 = vadd.f32 %v4257_v4, %v3877_v47  ;;  %v3878_v57 = vmul.f32 %v7848_v28, %v13802_v14  ;;  %7875 = vpow2.f32 %v2957_v49  ;;  %6884 = vmatmul.mubr.msk.bf16.gmra.mxu1 %vm922_vm1, %v13805_v40  ;;  %6892 = vmatmul.mubr.msk.bf16.gmra.mxu0 %vm922_vm1, %v13805_v40  ;;  %v2360_v47 = vsub.f32 0.0, %v10267_v11  ;;  %v13810_v14 = vld [vmem:[#allocation39_spill] sm:$0xff]  ;;  %v7465_v40 = vld [vmem:[%s13563_s5 + $0x10] sm:$0xff]  }
 0x22a   :  { %v7852_v46 = vpop.eup %7851  ;;  %v4284_v6 = vadd.f32 %v4283_v16, %v3879_v24  ;;  %v3880_v38 = vmul.f32 %v7850_v31, %v13806_v48  ;;  %7877 = vpow2.f32 %v2961_v9  ;;  %1953 = vmatprep.mubr.bf16.mxu1 %v13748_v34  ;;  %2066 = vmatprep.mubr.bf16.mxu0 %v13748_v34  ;;  %v10285_v62 = vadd.f32 %v13808_v7, %v9546_v32  ;;  %v13809_v24 = vld [vmem:[#allocation37_spill] sm:$0xff] }
 0x22b   :  { %v7854_v15 = vpop.eup %7853  ;;  %v4271_v4 = vadd.f32 %v4270_v45, %v3878_v57  ;;  %v3897_v49 = vmul.f32 %v7852_v46, %v13807_v43  ;;  %7879 = vpow2.f32 %v2959_v1  ;;  %v2963_v9 = vmul.f32 1.442695, %v2360_v47  ;;  %v7463_v34 = vld [vmem:[%s13563_s5 + $0x50] sm:$0xff]   ;;  %v10308_v1 = vpop.f32.mrf.mxu0 }
 0x22c   :  { %v7856_v56 = vpop.eup %7855  ;;  %v4297_v16 = vadd.f32 %v4296_v58, %v3880_v38  ;;  %v3899_v28 = vmul.f32 %v7854_v15, %v10030_v27  ;;  %v10290_v37 = vadd.f32 %v13809_v24, %v9549_v39  ;;  %v7464_v45 = vld [vmem:[%s13563_s5 + $0xd0] sm:$0xff]   ;;  %v2377_v27 = vsub.f32 0.0, %v10285_v62  ;;  %v10306_v39 = vpop.f32.mrf.mxu1  ;;  %13812 = vst [vmem:[#allocation10_spill] sm:$0xff] %v10308_v1  ;;  %7075 = vmatprep.subr.bf16.mxu1 %v7463_v34  ;;  %v13820_v15 = vld [vmem:[#allocation42_spill] sm:$0xff] }
 0x22d   :  { %v7858_v31 = vpop.eup %7857  ;;  %v10298_v32 = vadd.f32 %v4258_v25, %v3897_v49  ;;  %v3898_v58 = vmul.f32 %v7856_v56, %v10039_v26  ;;  %v10304_v57 = vadd.f32 %v13810_v14, %v9555_v52  ;;  %13811 = vst [vmem:[#allocation33_spill] sm:$0xff] %v10306_v39  ;;  %v7466_v25 = vld [vmem:[%s13563_s5 + $0x90] sm:$0xff]   ;;  %v13813_v26 = vrot.slane %v10099_v22, 4  ;;  %7097 = vmatprep.subr.bf16.mxu0 %v7464_v45 }
 0x22e   :  { %v7860_v46 = vpop.eup %7859  ;;  %v10321_v52 = vadd.f32 %v4284_v6, %v3899_v28  ;;  %v3277_v38 = vadd.f32 1.0, %v7858_v31  ;;  %7881 = vpow2.f32 %v2963_v9  ;;  %v2379_v7 = vsub.f32 0.0, %v10290_v37  ;;  %7076 = vmatpush3.bf16.msra.mxu1 %v7465_v40  ;;  %7098 = vmatpush3.bf16.msra.mxu0 %v7466_v25  ;;  %v13814_v6 = vld [vmem:[#allocation40_spill] sm:$0xff]  ;;  %v10342_v14 = vpop.f32.mrf.mxu1  ;;  %v13818_v40 = vld [vmem:[#allocation14_spill] sm:$0xff] }
 0x22f   :  { %v10319_v48 = vadd.f32 %v13813_v26, %v10099_v22  ;;  %v7862_v47 = vpop.eup %7861  ;;  %v10324_v43 = vadd.f32 %v4271_v4, %v3898_v58  ;;  %v3279_v49 = vadd.f32 1.0, %v7860_v46  ;;  %v2997_v24 = vmul.f32 1.442695, %v2377_v27  ;;  %v7467_v9 = vld [vmem:[%s13563_s5 + $0x48] sm:$0xff]   ;;  %v13815_v58 = vld [vmem:[#allocation41_spill] sm:$0xff]  ;;  %13816 = vst [vmem:[#allocation11_spill] sm:$0xff] %v10342_v14 }
 0x230   :  { %v7864_v56 = vpop.eup %7863  ;;  %7883 = vrcp.f32 %v3277_v38  ;;  %v3278_v22 = vadd.f32 1.0, %v7862_v47  ;;  %v10329_v28 = vadd.f32 %v13814_v6, %v9558_v54  ;;  %v7468_v4 = vld [vmem:[%s13563_s5 + $0xc8] sm:$0xff]   ;;  %v2378_v31 = vsub.f32 0.0, %v10304_v57  ;;  %v10344_v54 = vpop.f32.mrf.mxu0  ;;  %7077 = vmatprep.subr.bf16.mxu1 %v7467_v9 }
 0x231   :  { %v7866_v34 = vpop.eup %7865  ;;  %7885 = vrcp.f32 %v3279_v49  ;;  %v3280_v45 = vadd.f32 1.0, %v7864_v56  ;;  %v10340_v27 = vadd.f32 %v13815_v58, %v10106_v33  ;;  %13817 = vst [vmem:[#allocation12_spill] sm:$0xff] %v10344_v54  ;;  %6885 = vmatmul.mubr.msk.bf16.gmra.mxu1 %vm922_vm1, %v13818_v40  ;;  %6893 = vmatmul.mubr.msk.bf16.gmra.mxu0 %vm922_vm1, %v13818_v40  ;;  %v7469_v25 = vld [vmem:[%s13563_s5 + $0x8] sm:$0xff]   ;;  %v13819_v38 = vrot.slane %v10201_v44, 2 }
 0x232   :  { %v7470_v46 = vld [vmem:[%s13563_s5 + $0x88] sm:$0xff]   ;;  %v7868_v26 = vpop.eup %7867  ;;  %v3900_v49 = vmul.f32 %v7866_v34, %v10058_v0  ;;  %7887 = vrcp.f32 %v3278_v22  ;;  %v2380_v56 = vsub.f32 0.0, %v10329_v28  ;;  %7099 = vmatprep.subr.bf16.mxu0 %v7468_v4  ;;  %v3001_v40 = vmul.f32 1.442695, %v2379_v7  ;;  %7078 = vmatpush3.bf16.msra.mxu1 %v7469_v25 }
 0x233   :  { %v10359_v47 = vadd.f32 %v13819_v38, %v10201_v44  ;;  %v7870_v6 = vpop.eup %7869  ;;  %7889 = vrcp.f32 %v3280_v45  ;;  %v3297_v58 = vadd.f32 1.0, %v7868_v26  ;;  %v10365_v54 = vadd.f32 %v13820_v15, %v10114_v2  ;;  %7100 = vmatpush3.bf16.msra.mxu0 %v7470_v46  ;;  %v13821_v0 = vld [vmem:[#allocation44_spill] sm:$0xff]  ;;  %v13822_v46 = vld [vmem:[#allocation45_spill] sm:$0xff] }
 0x234   :  { %v7872_v14 = vpop.eup %7871  ;;  %v10367_v44 = vadd.f32 %v4297_v16, %v3900_v49  ;;  %v3299_v38 = vadd.f32 1.0, %v7870_v6  ;;  %7891 = vpow2.f32 %v2997_v24  ;;  %v10371_v22 = vadd.f32 %v13821_v0, %v10127_v29  ;;  %v7471_v24 = vld [vmem:[%s13563_s5 + $0x40] sm:$0xff]  }
 0x235   :  { %v7874_v9 = vpop.eup %7873  ;;  %7893 = vrcp.f32 %v3297_v58  ;;  %v3298_v4 = vadd.f32 1.0, %v7872_v14  ;;  %v2999_v34 = vmul.f32 1.442695, %v2378_v31  ;;  %v2081_v7 = vsub.f32 0.0, %v10340_v27  ;;  %v13823_v31 = vld [vmem:[#allocation47_spill] sm:$0xff]  ;;  %7079 = vmatprep.subr.bf16.mxu1 %v7471_v24 }
 0x236   :  { %v7876_v45 = vpop.eup %7875  ;;  %7895 = vrcp.f32 %v3299_v38  ;;  %v3300_v15 = vadd.f32 1.0, %v7874_v9  ;;  %v3003_v25 = vmul.f32 1.442695, %v2380_v56  ;;  %v10376_v16 = vadd.f32 %v13822_v46, %v10170_v63 }
 0x237   :  { %v7878_v26 = vpop.eup %7877  ;;  %7897 = vrcp.f32 %v3298_v4  ;;  %v3317_v49 = vadd.f32 1.0, %v7876_v45  ;;  %v2083_v14 = vsub.f32 0.0, %v10365_v54  ;;  %v10384_v6 = vadd.f32 %v13823_v31, %v10106_v33  ;;  %v13824_v4 = vld [vmem:[#allocation48_spill] sm:$0xff] }
 0x238   :  { %v7880_v58 = vpop.eup %7879  ;;  %7899 = vrcp.f32 %v3300_v15  ;;  %v3319_v56 = vadd.f32 1.0, %v7878_v26  ;;  %v2082_v38 = vsub.f32 0.0, %v10371_v22  ;;  %v2084_v0 = vsub.f32 0.0, %v10376_v16  ;;  %v13825_v31 = vld [vmem:[#allocation20_spill] sm:$0xff]  ;;  %v13826_v15 = vld [vmem:[#allocation21_spill] sm:$0xff] }
 0x239   :  { %7901 = vrcp.f32 %v3317_v49  ;;  %v3318_v9 = vadd.f32 1.0, %v7880_v58  ;;  %v2101_v46 = vsub.f32 0.0, %v10384_v6  ;;  %v10391_v45 = vadd.f32 %v13824_v4, %v10114_v2 }
 0x23a   :  { %7903 = vrcp.f32 %v3319_v56  ;;  %v2405_v1 = vmul.f32 1.442695, %v2081_v7  ;;  %v10395_v39 = vadd.f32 %v13825_v31, %v10127_v29  ;;  %v10399_v26 = vadd.f32 %v13826_v15, %v10170_v63 }
 0x23b   :  { %v7882_v10 = vpop.eup %7881  ;;  %7905 = vrcp.f32 %v3318_v9  ;;  %v2409_v24 = vmul.f32 1.442695, %v2083_v14  ;;  %v2103_v49 = vsub.f32 0.0, %v10391_v45  ;;  %v10404_v58 = vadd.f32 %v10044_v21, %v10106_v33 }
 0x23c   :  { %v3320_v4 = vadd.f32 1.0, %v7882_v10  ;;  %7907 = vpow2.f32 %v3001_v40  ;;  %v2407_v7 = vmul.f32 1.442695, %v2082_v38  ;;  %v2102_v56 = vsub.f32 0.0, %v10395_v39 }
 0x23d   :  { %v7884_v31 = vpop.eup %7883  ;;  %7909 = vpow2.f32 %v2999_v34  ;;  %v2411_v59 = vmul.f32 1.442695, %v2084_v0  ;;  %v2445_v51 = vmul.f32 1.442695, %v2101_v46  ;;  %v10409_v15 = vadd.f32 %v10046_v30, %v10114_v2 }
 0x23e   :  { %v7886_v14 = vpop.eup %7885  ;;  %v3917_v9 = vmul.f32 %v7884_v31, %v10110_v60  ;;  %7911 = vrcp.f32 %v3320_v4  ;;  %v2449_v17 = vmul.f32 1.442695, %v2103_v49  ;;  %v2104_v21 = vsub.f32 0.0, %v10399_v26 }
 0x23f   :  { %v7888_v10 = vpop.eup %7887  ;;  %v3919_v40 = vmul.f32 %v7886_v14, %v10134_v50  ;;  %7913 = vpow2.f32 %v3003_v25  ;;  %v2447_v38 = vmul.f32 1.442695, %v2102_v56  ;;  %v2121_v34 = vsub.f32 0.0, %v10404_v58 }
 0x240   :  { %v7890_v0 = vpop.eup %7889  ;;  %v4260_v46 = vadd.f32 %v10298_v32, %v3917_v9  ;;  %v3918_v30 = vmul.f32 %v7888_v10, %v10138_v5  ;;  %7915 = vpow2.f32 %v2405_v1  ;;  %v10419_v60 = vadd.f32 %v10062_v53, %v10127_v29 }
 0x241   :  { %v7892_v49 = vpop.eup %7891  ;;  %v4286_v4 = vadd.f32 %v10321_v52, %v3919_v40  ;;  %v3920_v31 = vmul.f32 %v7890_v0, %v10144_v23  ;;  %7917 = vpow2.f32 %v2409_v24  ;;  %v2123_v50 = vsub.f32 0.0, %v10409_v15 }
 0x242   :  { %v7894_v25 = vpop.eup %7893  ;;  %v4273_v56 = vadd.f32 %v10324_v43, %v3918_v30  ;;  %v3337_v14 = vadd.f32 1.0, %v7892_v49  ;;  %7919 = vpow2.f32 %v2407_v7  ;;  %v2122_v5 = vsub.f32 0.0, %v10419_v60 }
 0x243   :  { %v7896_v32 = vpop.eup %7895  ;;  %v4299_v1 = vadd.f32 %v10367_v44, %v3920_v31  ;;  %v3937_v53 = vmul.f32 %v7894_v25, %v10155_v12  ;;  %7921 = vpow2.f32 %v2411_v59  ;;  %v10430_v52 = vadd.f32 %v10064_v55, %v10170_v63 }
 0x244   :  { %v7898_v23 = vpop.eup %7897  ;;  %v3939_v24 = vmul.f32 %v7896_v32, %v10175_v20  ;;  %7923 = vrcp.f32 %v3337_v14  ;;  %v2451_v9 = vmul.f32 1.442695, %v2104_v21  ;;  %v2485_v43 = vmul.f32 1.442695, %v2121_v34 }
 0x245   :  { %v7900_v10 = vpop.eup %7899  ;;  %v4261_v7 = vadd.f32 %v4260_v46, %v3937_v53  ;;  %v3938_v40 = vmul.f32 %v7898_v23, %v10209_v13  ;;  %7925 = vpow2.f32 %v2445_v51  ;;  %v2489_v0 = vmul.f32 1.442695, %v2123_v50 }
 0x246   :  { %v7902_v44 = vpop.eup %7901  ;;  %v4287_v30 = vadd.f32 %v4286_v4, %v3939_v24  ;;  %v3940_v12 = vmul.f32 %v7900_v10, %v10226_v42  ;;  %7927 = vpow2.f32 %v2449_v17  ;;  %v2124_v55 = vsub.f32 0.0, %v10430_v52 }
 0x247   :  { %v7904_v59 = vpop.eup %7903  ;;  %v4274_v49 = vadd.f32 %v4273_v56, %v3938_v40  ;;  %v3957_v20 = vmul.f32 %v7902_v44, %v10231_v3  ;;  %7929 = vpow2.f32 %v2447_v38  ;;  %v2487_v21 = vmul.f32 1.442695, %v2122_v5 }
 0x248   :  { %v7906_v34 = vpop.eup %7905  ;;  %v4300_v31 = vadd.f32 %v4299_v1, %v3940_v12  ;;  %v3959_v46 = vmul.f32 %v7904_v59, %v10244_v35  ;;  %7931 = vpow2.f32 %v2451_v9  ;;  %v10440_v13 = vadd.f32 %v10080_v36, %v10106_v33  ;;  %v13827_v36 = vld [vmem:[#allocation22_spill] sm:$0xff]  ;;  %v13831_v59 = vld [vmem:[#allocation8_spill] sm:$0xff] }
 0x249   :  { %v7908_v51 = vpop.eup %7907  ;;  %v4019_v42 = vrot.slane %v10319_v48, 2  ;;  %v4262_v17 = vadd.f32 %v4261_v7, %v3957_v20  ;;  %v3958_v4 = vmul.f32 %v7906_v34, %v10252_v61  ;;  %7933 = vpow2.f32 %v2485_v43  ;;  %v13829_v43 = vld [vmem:[#allocation24_spill] sm:$0xff] }
 0x24a   :  { %v7910_v50 = vpop.eup %7909  ;;  %v10444_v3 = vadd.f32 %v4287_v30, %v3959_v46  ;;  %v3339_v38 = vadd.f32 1.0, %v7908_v51  ;;  %7935 = vpow2.f32 %v2489_v0  ;;  %v2491_v25 = vmul.f32 1.442695, %v2124_v55 }
 0x24b   :  { %v7912_v56 = vpop.eup %7911  ;;  %v10446_v35 = vadd.f32 %v4274_v49, %v3958_v4  ;;  %v3338_v14 = vadd.f32 1.0, %v7910_v50  ;;  %7937 = vpow2.f32 %v2487_v21  ;;  %v10450_v5 = vadd.f32 %v13827_v36, %v10114_v2 }
 0x24c   :  { %v7914_v32 = vpop.eup %7913  ;;  %v13828_v61 = vrot.slane %v10217_v41, 2  ;;  %v3960_v53 = vmul.f32 %v7912_v56, %v10267_v11  ;;  %7939 = vrcp.f32 %v3339_v38  ;;  %v2141_v23 = vsub.f32 0.0, %v10440_v13 }
 0x24d   :  { %v7916_v24 = vpop.eup %7915  ;;  %v4008_v9 = vrot.slane %v10359_v47, 1  ;;  %v4043_v10 = vrot.slane %v13829_v43, 4  ;;  %7941 = vrcp.f32 %v3338_v14  ;;  %v3340_v7 = vadd.f32 1.0, %v7914_v32 }
 0x24e   :  { %v10455_v1 = vadd.f32 %v13828_v61, %v10217_v41  ;;  %v7918_v40 = vpop.eup %7917  ;;  %v10461_v0 = vadd.f32 %v4300_v31, %v3960_v53  ;;  %v3041_v44 = vadd.f32 1.0, %v7916_v24  ;;  %7943 = vpow2.f32 %v2491_v25  ;;  %v13830_v41 = vld [vmem:[#allocation23_spill] sm:$0xff]  ;;  %v13832_v31 = vld [vmem:[#allocation25_spill] sm:$0xff] }
 0x24f   :  { %v10465_v30 = vadd.f32 %v13830_v41, %v10127_v29  ;;  %v7920_v11 = vpop.eup %7919  ;;  %7945 = vrcp.f32 %v3340_v7  ;;  %v3043_v12 = vadd.f32 1.0, %v7918_v40  ;;  %v2143_v55 = vsub.f32 0.0, %v10450_v5 }
 0x250   :  { %v10470_v49 = vadd.f32 %v13831_v59, %v10170_v63  ;;  %v7922_v20 = vpop.eup %7921  ;;  %7947 = vrcp.f32 %v3041_v44  ;;  %v3042_v21 = vadd.f32 1.0, %v7920_v11  ;;  %v2525_v34 = vmul.f32 1.442695, %v2141_v23  ;;  %v13835_v44 = vld [vmem:[#allocation27_spill] sm:$0xff] }
 0x251   :  { %v10474_v46 = vadd.f32 %v13832_v31, %v10106_v33  ;;  %v7924_v51 = vpop.eup %7923  ;;  %v4034_v4 = vrot.slane %v10455_v1, 1  ;;  %v10478_v50 = vadd.f32 %v4019_v42, %v10319_v48  ;;  %7949 = vrcp.f32 %v3043_v12 }
 0x252   :  { %v3044_v38 = vadd.f32 1.0, %v7922_v20  ;;  %v7926_v25 = vpop.eup %7925  ;;  %v10481_v56 = vadd.f32 %v4043_v10, %v13829_v43  ;;  %v3977_v14 = vmul.f32 %v7924_v51, %v10285_v62  ;;  %7951 = vrcp.f32 %v3042_v21  ;;  %v13834_v62 = vld [vmem:[#allocation26_spill] sm:$0xff] }
 0x253   :  { %13833 = vst [vmem:[#allocation38_spill] sm:$0xff] %v10478_v50  ;;  %v2142_v36 = vsub.f32 0.0, %v10465_v30  ;;  %v7928_v32 = vpop.eup %7927  ;;  %v3061_v61 = vadd.f32 1.0, %v7926_v25  ;;  %v2529_v53 = vmul.f32 1.442695, %v2143_v55  ;;  %v2144_v23 = vsub.f32 0.0, %v10470_v49 }
 0x254   :  { %7953 = vrcp.f32 %v3044_v38  ;;  %v7930_v24 = vpop.eup %7929  ;;  %v4263_v48 = vadd.f32 %v4262_v17, %v3977_v14  ;;  %v3063_v42 = vadd.f32 1.0, %v7928_v32  ;;  %v2161_v7 = vsub.f32 0.0, %v10474_v46 }
 0x255   :  { %7955 = vpow2.f32 %v2525_v34  ;;  %v7932_v40 = vpop.eup %7931  ;;  %v3062_v43 = vadd.f32 1.0, %v7930_v24  ;;  %v10489_v10 = vadd.f32 %v13834_v62, %v10114_v2  ;;  %v10493_v41 = vadd.f32 %v13835_v44, %v10127_v29  ;;  %v13836_v34 = vld [vmem:[#allocation28_spill] sm:$0xff] }
 0x256   :  { %7957 = vrcp.f32 %v3061_v61  ;;  %v7934_v11 = vpop.eup %7933  ;;  %v4264_v12 = vrot.slane %v4263_v48, 4  ;;  %v3064_v55 = vadd.f32 1.0, %v7932_v40  ;;  %v2527_v17 = vmul.f32 1.442695, %v2142_v36 }
 0x257   :  { %7959 = vrcp.f32 %v3063_v42  ;;  %v7936_v59 = vpop.eup %7935  ;;  %v3081_v20 = vadd.f32 1.0, %v7934_v11  ;;  %v2531_v21 = vmul.f32 1.442695, %v2144_v23  ;;  %v10497_v31 = vadd.f32 %v13836_v34, %v10170_v63 }
 0x258   :  { %7961 = vrcp.f32 %v3062_v43  ;;  %v7938_v51 = vpop.eup %7937  ;;  %v4265_v38 = vadd.f32 %v4264_v12, %v4263_v48  ;;  %v3083_v25 = vadd.f32 1.0, %v7936_v59  ;;  %v2565_v14 = vmul.f32 1.442695, %v2161_v7 }
 0x259   :  { %7963 = vrcp.f32 %v3064_v55  ;;  %v7940_v32 = vpop.eup %7939  ;;  %v3082_v61 = vadd.f32 1.0, %v7938_v51  ;;  %v2163_v24 = vsub.f32 0.0, %v10489_v10  ;;  %v2162_v36 = vsub.f32 0.0, %v10493_v41 }
 0x25a   :  { %7965 = vrcp.f32 %v3081_v20  ;;  %v7942_v42 = vpop.eup %7941  ;;  %v3979_v40 = vmul.f32 %v7940_v32, %v10290_v37  ;;  %v10504_v23 = vadd.f32 %v10211_v19, %v10106_v33  ;;  %v10508_v48 = vadd.f32 %v10213_v8, %v10114_v2 }
 0x25b   :  { %7967 = vrcp.f32 %v3083_v25  ;;  %v7944_v7 = vpop.eup %7943  ;;  %v3978_v43 = vmul.f32 %v7942_v42, %v10304_v57  ;;  %v2164_v62 = vsub.f32 0.0, %v10497_v31  ;;  %v10514_v44 = vadd.f32 %v10233_v18, %v10127_v29 }
 0x25c   :  { %7969 = vrcp.f32 %v3082_v61  ;;  %v7946_v37 = vpop.eup %7945  ;;  %v4266_v11 = vrot.slane %v4265_v38, 2  ;;  %v10517_v12 = vadd.f32 %v10444_v3, %v3979_v40  ;;  %v3084_v19 = vadd.f32 1.0, %v7944_v7 }
 0x25d   :  { %7971 = vpow2.f32 %v2529_v53  ;;  %v7948_v55 = vpop.eup %7947  ;;  %v10520_v8 = vadd.f32 %v10446_v35, %v3978_v43  ;;  %v3980_v57 = vmul.f32 %v7946_v37, %v10329_v28  ;;  %v2569_v59 = vmul.f32 1.442695, %v2163_v24 }
 0x25e   :  { %7973 = vpow2.f32 %v2527_v17  ;;  %v7950_v20 = vpop.eup %7949  ;;  %v2567_v34 = vmul.f32 1.442695, %v2162_v36  ;;  %v2181_v18 = vsub.f32 0.0, %v10504_v23  ;;  %v2183_v51 = vsub.f32 0.0, %v10508_v48 }
 0x25f   :  { %7975 = vrcp.f32 %v3084_v19  ;;  %v7952_v25 = vpop.eup %7951  ;;  %v10526_v3 = vadd.f32 %v10461_v0, %v3980_v57  ;;  %v2571_v53 = vmul.f32 1.442695, %v2164_v62  ;;  %v2182_v35 = vsub.f32 0.0, %v10514_v44 }
 0x260   :  { %7977 = vpow2.f32 %v2531_v21  ;;  %v4009_v28 = vadd.f32 %v4008_v9, %v10359_v47  ;;  %v4267_v17 = vadd.f32 %v4266_v11, %v4265_v38  ;;  %v10535_v24 = vadd.f32 %v4034_v4, %v10455_v1 }
 0x261   :  { %v7954_v32 = vpop.eup %7953  ;;  %7979 = vpow2.f32 %v2565_v14  ;;  %v2605_v40 = vmul.f32 1.442695, %v2181_v18  ;;  %v2609_v7 = vmul.f32 1.442695, %v2183_v51  ;;  %v3681_v47 = vmul.f32 %v7948_v55, %v10340_v27 }
 0x262   :  { %v7956_v61 = vpop.eup %7955  ;;  %7981 = vpow2.f32 %v2569_v59  ;;  %v2607_v38 = vmul.f32 1.442695, %v2182_v35  ;;  %v4268_v1 = vrot.slane %v4267_v17, 1  ;;  %v3683_v4 = vmul.f32 %v7950_v20, %v10365_v54 }
 0x263   :  { %v7958_v36 = vpop.eup %7957  ;;  %v3101_v42 = vadd.f32 1.0, %v7956_v61  ;;  %7983 = vpow2.f32 %v2567_v34  ;;  %v4290_v11 = vrot.slane %v10517_v12, 4  ;;  %v3682_v19 = vmul.f32 %v7952_v25, %v10371_v22 }
 0x264   :  { %v7960_v43 = vpop.eup %7959  ;;  %v3701_v9 = vmul.f32 %v7958_v36, %v10384_v6  ;;  %7985 = vpow2.f32 %v2571_v53  ;;  %v4277_v6 = vrot.slane %v10520_v8, 4  ;;  %v3684_v55 = vmul.f32 %v7954_v32, %v10376_v16  ;;  %v13837_v53 = vld [vmem:[#allocation29_spill] sm:$0xff] }
 0x265   :  { %v7962_v14 = vpop.eup %7961  ;;  %v3703_v62 = vmul.f32 %v7960_v43, %v10391_v45  ;;  %7987 = vrcp.f32 %v3101_v42  ;;  %v10549_v20 = vmul.f32 0.015625, %v4009_v28  ;;  %v10554_v22 = vadd.f32 %v13837_v53, %v10170_v63 }
 0x266   :  { %v7964_v37 = vpop.eup %7963  ;;  %v4049_v57 = vadd.f32 %v3701_v9, %v3681_v47  ;;  %v3702_v59 = vmul.f32 %v7962_v14, %v10395_v39  ;;  %v10556_v39 = vadd.f32 %v4268_v1, %v4267_v17  ;;  %7989 = vpow2.f32 %v2605_v40 }
 0x267   :  { %v7966_v27 = vpop.eup %7965  ;;  %v4075_v34 = vadd.f32 %v3703_v62, %v3683_v4  ;;  %v3704_v18 = vmul.f32 %v7964_v37, %v10399_v26  ;;  %v4291_v26 = vadd.f32 %v4290_v11, %v10517_v12  ;;  %7991 = vpow2.f32 %v2609_v7 }
 0x268   :  { %v7968_v54 = vpop.eup %7967  ;;  %v4062_v45 = vadd.f32 %v3702_v59, %v3682_v19  ;;  %v3721_v51 = vmul.f32 %v7966_v27, %v10404_v58  ;;  %v10562_v58 = vadd.f32 %v4277_v6, %v10520_v8  ;;  %7993 = vpow2.f32 %v2607_v38  ;;  %v13839_v38 = vld [vmem:[#allocation9_spill] sm:$0xff] }
 0x269   :  { %v7970_v25 = vpop.eup %7969  ;;  %v4088_v35 = vadd.f32 %v3704_v18, %v3684_v55  ;;  %v3723_v61 = vmul.f32 %v7968_v54, %v10409_v15  ;;  %v7472_v15 = vld [vmem:[%s13563_s5 + $0xc0] sm:$0xff]   ;;  %v2184_v47 = vsub.f32 0.0, %v10554_v22  ;;  %v4303_v9 = vrot.slane %v10526_v3, 4 }
 0x26a   :  { %v7972_v16 = vpop.eup %7971  ;;  %v4050_v32 = vadd.f32 %v4049_v57, %v3721_v51  ;;  %v3722_v28 = vmul.f32 %v7970_v25, %v10419_v60  ;;  %v13838_v60 = vld [vmem:[#allocation30_spill] sm:$0xff]  ;;  %v10580_v1 = vadd.f32 %v13839_v38, %v10114_v2  ;;  %7101 = vmatprep.subr.bf16.mxu0 %v7472_v15  ;;  %v4292_v62 = vrot.slane %v4291_v26, 2  ;;  %v13840_v18 = vld [vmem:[#allocation31_spill] sm:$0xff]  ;;  %v1360_v38 = vpop.f32.mrf.mxu0 }
 0x26b   :  { %v7974_v36 = vpop.eup %7973  ;;  %v10564_v42 = vadd.f32 %v4075_v34, %v3723_v61  ;;  %v3103_v43 = vadd.f32 1.0, %v7972_v16  ;;  %v10574_v7 = vadd.f32 %v13838_v60, %v10106_v33  ;;  %v2611_v27 = vmul.f32 1.442695, %v2184_v47  ;;  %v7474_v51 = vld [vmem:[%s13563_s5 + $0x80] sm:$0xff]   ;;  %v13841_v61 = vld [vmem:[#allocation32_spill] sm:$0xff] }
 0x26c   :  { %v7976_v17 = vpop.eup %7975  ;;  %v10569_v40 = vadd.f32 %v4062_v45, %v3722_v28  ;;  %v3102_v12 = vadd.f32 1.0, %v7974_v36  ;;  %v2203_v6 = vsub.f32 0.0, %v10580_v1  ;;  %v10588_v54 = vadd.f32 %v13840_v18, %v10127_v29  ;;  %v7473_v45 = vld [vmem:[%s13563_s5] sm:$0xff]   ;;  %v1247_v28 = vpop.f32.mrf.mxu1  ;;  %7102 = vmatpush3.bf16.msra.mxu0 %v7474_v51  ;;  %v13845_v51 = vld [vmem:[#allocation12_spill] sm:$0xff] }
 0x26d   :  { %v7978_v8 = vpop.eup %7977  ;;  %v3724_v14 = vmul.f32 %v7976_v17, %v10430_v52  ;;  %7995 = vrcp.f32 %v3103_v43  ;;  %v2201_v11 = vsub.f32 0.0, %v10574_v7  ;;  %v10598_v16 = vadd.f32 %v13841_v61, %v10170_v63  ;;  %v13842_v17 = vld [vmem:[#allocation33_spill] sm:$0xff]  ;;  %7080 = vmatpush3.bf16.msra.mxu1 %v7473_v45 }
 0x26e   :  { %v7980_v4 = vpop.eup %7979  ;;  %7997 = vrcp.f32 %v3102_v12  ;;  %v3104_v37 = vadd.f32 1.0, %v7978_v8  ;;  %v2202_v15 = vsub.f32 0.0, %v10588_v54  ;;  %v10603_v12 = vadd.f32 %v13842_v17, %v10106_v33  ;;  %v13843_v8 = vld [vmem:[#allocation10_spill] sm:$0xff] }
 0x26f   :  { %v7982_v19 = vpop.eup %7981  ;;  %v10583_v57 = vadd.f32 %v4088_v35, %v3724_v14  ;;  %v3121_v59 = vadd.f32 1.0, %v7980_v4  ;;  %v2645_v34 = vmul.f32 1.442695, %v2201_v11  ;;  %v2649_v35 = vmul.f32 1.442695, %v2203_v6  ;;  %v13844_v11 = vld [vmem:[#allocation11_spill] sm:$0xff] }
 0x270   :  { %v7984_v52 = vpop.eup %7983  ;;  %7999 = vrcp.f32 %v3104_v37  ;;  %v3123_v55 = vadd.f32 1.0, %v7982_v19  ;;  %v2204_v60 = vsub.f32 0.0, %v10598_v16  ;;  %v10609_v14 = vadd.f32 %v13843_v8, %v10114_v2 }
 0x271   :  { %v7986_v53 = vpop.eup %7985  ;;  %8001 = vrcp.f32 %v3121_v59  ;;  %v3122_v25 = vadd.f32 1.0, %v7984_v52  ;;  %v2647_v4 = vmul.f32 1.442695, %v2202_v15  ;;  %v2221_v37 = vsub.f32 0.0, %v10603_v12  ;;  %v1249_v52 = vpop.f32.mrf.mxu1 }
 0x272   :  { %v7988_v36 = vpop.eup %7987  ;;  %8003 = vrcp.f32 %v3123_v55  ;;  %v3124_v43 = vadd.f32 1.0, %v7986_v53  ;;  %v10614_v19 = vadd.f32 %v13844_v11, %v10127_v29  ;;  %v10616_v59 = vadd.f32 %v4292_v62, %v4291_v26 }
 0x273   :  { %v3741_v47 = vmul.f32 %v7988_v36, %v10440_v13  ;;  %8005 = vrcp.f32 %v3122_v25  ;;  %v10619_v13 = vadd.f32 %v4303_v9, %v10526_v3  ;;  %v7990_v55 = vpop.eup %7989  ;;  %v2651_v18 = vmul.f32 1.442695, %v2204_v60 }
 0x274   :  { %8007 = vrcp.f32 %v3124_v43  ;;  %v2223_v45 = vsub.f32 0.0, %v10609_v14  ;;  %v10626_v53 = vadd.f32 %v13845_v51, %v10170_v63  ;;  %v7992_v25 = vpop.eup %7991  ;;  %v3141_v61 = vadd.f32 1.0, %v7990_v55 }
 0x275   :  { %v10621_v6 = vadd.f32 %v4050_v32, %v3741_v47  ;;  %8009 = vpow2.f32 %v2611_v27  ;;  %v2222_v26 = vsub.f32 0.0, %v10614_v19  ;;  %v10630_v3 = vadd.f32 %v1247_v28, %v10106_v33  ;;  %v1362_v32 = vpop.f32.mrf.mxu0  ;;  %v7994_v9 = vpop.eup %7993 }
 0x276   :  { %8011 = vpow2.f32 %v2645_v34  ;;  %v3143_v62 = vadd.f32 1.0, %v7992_v25  ;;  %v2685_v27 = vmul.f32 1.442695, %v2221_v37  ;;  %v2224_v34 = vsub.f32 0.0, %v10626_v53 }
 0x277   :  { %8013 = vpow2.f32 %v2649_v35  ;;  %v3142_v36 = vadd.f32 1.0, %v7994_v9  ;;  %v2241_v43 = vsub.f32 0.0, %v10630_v3  ;;  %v10635_v15 = vadd.f32 %v1360_v38, %v10114_v2  ;;  %v1251_v35 = vpop.f32.mrf.mxu1  ;;  %v1364_v55 = vpop.f32.mrf.mxu0 }
 0x278   :  { %8015 = vpow2.f32 %v2647_v4  ;;  %v2689_v47 = vmul.f32 1.442695, %v2223_v45  ;;  %v10638_v28 = vadd.f32 %v1249_v52, %v10127_v29  ;;  %v10641_v60 = vadd.f32 %v1362_v32, %v10170_v63 }
 0x279   :  { %8017 = vrcp.f32 %v3141_v61  ;;  %v2687_v4 = vmul.f32 1.442695, %v2222_v26  ;;  %v2691_v37 = vmul.f32 1.442695, %v2224_v34  ;;  %v2243_v11 = vsub.f32 0.0, %v10635_v15  ;;  %v1253_v26 = vpop.f32.mrf.mxu1 }
 0x27a   :  { %v7996_v17 = vpop.eup %7995  ;;  %8019 = vrcp.f32 %v3143_v62  ;;  %v2242_v51 = vsub.f32 0.0, %v10638_v28  ;;  %v2244_v45 = vsub.f32 0.0, %v10641_v60  ;;  %v2725_v61 = vmul.f32 1.442695, %v2241_v43  ;;  %v1366_v43 = vpop.f32.mrf.mxu0 }
 0x27b   :  { %v7998_v8 = vpop.eup %7997  ;;  %8021 = vrcp.f32 %v3142_v36  ;;  %v3743_v38 = vmul.f32 %v7996_v17, %v10450_v5  ;;  %v10649_v32 = vadd.f32 %v1251_v35, %v10106_v33  ;;  %v10652_v62 = vmul.f32 0.015625, %v10535_v24 }
 0x27c   :  { %8023 = vpow2.f32 %v2651_v18  ;;  %v3742_v52 = vmul.f32 %v7998_v8, %v10465_v30  ;;  %v10655_v5 = vmul.f32 0.015625, %v10556_v39  ;;  %v2729_v18 = vmul.f32 1.442695, %v2243_v11  ;;  %v1257_v30 = vpop.f32.mrf.mxu1 }
 0x27d   :  { %v8000_v25 = vpop.eup %7999  ;;  %8025 = vpow2.f32 %v2685_v27  ;;  %v2727_v27 = vmul.f32 1.442695, %v2242_v51  ;;  %v2731_v17 = vmul.f32 1.442695, %v2244_v45  ;;  %v2261_v8 = vsub.f32 0.0, %v10649_v32 }
 0x27e   :  { %v8002_v9 = vpop.eup %8001  ;;  %8027 = vpow2.f32 %v2689_v47  ;;  %v10661_v24 = vadd.f32 %v1364_v55, %v10114_v2  ;;  %v4294_v47 = vrot.slane %v10616_v59, 1  ;;  %v4077_v11 = vadd.f32 %v10564_v42, %v3743_v38  ;;  %v1370_v42 = vpop.f32.mrf.mxu0 }
 0x27f   :  { %v8004_v34 = vpop.eup %8003  ;;  %8029 = vpow2.f32 %v2687_v4  ;;  %v4064_v0 = vadd.f32 %v10569_v40, %v3742_v52  ;;  %v3744_v51 = vmul.f32 %v8000_v25, %v10470_v49  ;;  %v10671_v50 = vadd.f32 %v1253_v26, %v10127_v29 }
 0x280   :  { %v8006_v35 = vpop.eup %8005  ;;  %8031 = vpow2.f32 %v2691_v37  ;;  %v3761_v37 = vmul.f32 %v8002_v9, %v10474_v46  ;;  %v2263_v45 = vsub.f32 0.0, %v10661_v24  ;;  %v3763_v55 = vmul.f32 %v8004_v34, %v10489_v10 }
 0x281   :  { %v8008_v39 = vpop.eup %8007  ;;  %8033 = vpow2.f32 %v2725_v61  ;;  %v3762_v38 = vmul.f32 %v8006_v35, %v10493_v41  ;;  %v2765_v49 = vmul.f32 1.442695, %v2261_v8  ;;  %v2262_v26 = vsub.f32 0.0, %v10671_v50 }
 0x282   :  { %v8010_v4 = vpop.eup %8009  ;;  %8035 = vpow2.f32 %v2729_v18  ;;  %v3764_v46 = vmul.f32 %v8008_v39, %v10497_v31  ;;  %v2769_v9 = vmul.f32 1.442695, %v2263_v45  ;;  %v1259_v18 = vpop.f32.mrf.mxu1  ;;  %v4090_v41 = vadd.f32 %v10583_v57, %v3744_v51 }
 0x283   :  { %v8012_v36 = vpop.eup %8011  ;;  %v3144_v21 = vadd.f32 1.0, %v8010_v4  ;;  %8037 = vpow2.f32 %v2727_v27  ;;  %v10677_v27 = vadd.f32 %v1366_v43, %v10170_v63  ;;  %v10684_v31 = vadd.f32 %v1370_v42, %v10114_v2 }
 0x284   :  { %v8014_v40 = vpop.eup %8013  ;;  %v3161_v52 = vadd.f32 1.0, %v8012_v36  ;;  %8039 = vpow2.f32 %v2731_v17  ;;  %v10681_v36 = vadd.f32 %v1257_v30, %v10106_v33  ;;  %v10687_v17 = vadd.f32 %v4294_v47, %v10616_v59  ;;  %v1261_v30 = vpop.f32.mrf.mxu1 }
 0x285   :  { %v8016_v25 = vpop.eup %8015  ;;  %8041 = vrcp.f32 %v3144_v21  ;;  %v3163_v61 = vadd.f32 1.0, %v8014_v40  ;;  %v1372_v21 = vpop.f32.mrf.mxu0  ;;  %v4052_v8 = vadd.f32 %v10621_v6, %v3761_v37  ;;  %v4078_v39 = vadd.f32 %v4077_v11, %v3763_v55 }
 0x286   :  { %v8018_v10 = vpop.eup %8017  ;;  %8043 = vrcp.f32 %v3161_v52  ;;  %v3162_v34 = vadd.f32 1.0, %v8016_v25  ;;  %v4065_v45 = vadd.f32 %v4064_v0, %v3762_v38  ;;  %v10690_v40 = vadd.f32 %v4090_v41, %v3764_v46 }
 0x287   :  { %v8020_v4 = vpop.eup %8019  ;;  %8045 = vrcp.f32 %v3163_v61  ;;  %v3781_v57 = vmul.f32 %v8018_v10, %v10504_v23  ;;  %v2767_v52 = vmul.f32 1.442695, %v2262_v26  ;;  %v2264_v25 = vsub.f32 0.0, %v10677_v27  ;;  %v1374_v37 = vpop.f32.mrf.mxu0 }
 0x288   :  { %v8022_v35 = vpop.eup %8021  ;;  %8047 = vrcp.f32 %v3162_v34  ;;  %v3783_v47 = vmul.f32 %v8020_v4, %v10508_v48  ;;  %v2281_v11 = vsub.f32 0.0, %v10681_v36  ;;  %v2283_v0 = vsub.f32 0.0, %v10684_v31  ;;  %v1263_v10 = vpop.f32.mrf.mxu1 }
 0x289   :  { %v8024_v43 = vpop.eup %8023  ;;  %8049 = vpow2.f32 %v2765_v49  ;;  %v10698_v38 = vadd.f32 %v1259_v18, %v10127_v29  ;;  %v10701_v49 = vadd.f32 %v1372_v21, %v10170_v63  ;;  %v10703_v61 = vadd.f32 %v4052_v8, %v3781_v57  ;;  %v1376_v8 = vpop.f32.mrf.mxu0 }
 0x28a   :  { %v8026_v51 = vpop.eup %8025  ;;  %v3164_v42 = vadd.f32 1.0, %v8024_v43  ;;  %8051 = vpow2.f32 %v2769_v9  ;;  %v10706_v9 = vadd.f32 %v1261_v30, %v10106_v33  ;;  %v3782_v26 = vmul.f32 %v8022_v35, %v10514_v44  ;;  %v7475_v44 = vld [vmem:[%s13563_s5 + $0x178] sm:$0xff]  }
 0x28b   :  { %v8028_v59 = vpop.eup %8027  ;;  %v3181_v6 = vadd.f32 1.0, %v8026_v51  ;;  %13846 = vst [vmem:[#allocation35_spill] sm:$0xff] %v10701_v49  ;;  %v2771_v41 = vmul.f32 1.442695, %v2264_v25  ;;  %v4079_v43 = vadd.f32 %v4078_v39, %v3783_v47  ;;  %v10710_v51 = vadd.f32 %v1374_v37, %v10114_v2  ;;  %v7476_v37 = vld [vmem:[%s13563_s5 + $0x1f8] sm:$0xff]   ;;  %7109 = vmatprep.subr.bf16.mxu1 %v7475_v44 }
 0x28c   :  { %v8030_v55 = vpop.eup %8029  ;;  %8053 = vrcp.f32 %v3164_v42  ;;  %v3183_v23 = vadd.f32 1.0, %v8028_v59  ;;  %v2282_v30 = vsub.f32 0.0, %v10698_v38  ;;  %v2284_v59 = vsub.f32 0.0, %v10701_v49  ;;  %7131 = vmatprep.subr.bf16.mxu0 %v7476_v37 }
 0x28d   :  { %v8032_v46 = vpop.eup %8031  ;;  %8055 = vrcp.f32 %v3181_v6  ;;  %v3182_v48 = vadd.f32 1.0, %v8030_v55  ;;  %v2805_v39 = vmul.f32 1.442695, %v2281_v11  ;;  %v2301_v47 = vsub.f32 0.0, %v10706_v9  ;;  %v1267_v6 = vpop.f32.mrf.mxu1 }
 0x28e   :  { %v8034_v34 = vpop.eup %8033  ;;  %8057 = vrcp.f32 %v3183_v23  ;;  %v3184_v4 = vadd.f32 1.0, %v8032_v46  ;;  %v10722_v46 = vadd.f32 %v1263_v10, %v10127_v29  ;;  %v2809_v11 = vmul.f32 1.442695, %v2283_v0  ;;  %v1380_v10 = vpop.f32.mrf.mxu0 }
 0x28f   :  { %v8036_v18 = vpop.eup %8035  ;;  %8059 = vrcp.f32 %v3182_v48  ;;  %v3201_v21 = vadd.f32 1.0, %v8034_v34  ;;  %v10725_v48 = vadd.f32 %v1376_v8, %v10170_v63  ;;  %v2811_v49 = vmul.f32 1.442695, %v2284_v59 }
 0x290   :  { %v8038_v57 = vpop.eup %8037  ;;  %8061 = vrcp.f32 %v3184_v4  ;;  %v3203_v42 = vadd.f32 1.0, %v8036_v18  ;;  %13847 = vst [vmem:[#allocation43_spill] sm:$0xff] %v10722_v46  ;;  %v2303_v4 = vsub.f32 0.0, %v10710_v51  ;;  %v10738_v37 = vadd.f32 %v1380_v10, %v10114_v2 }
 0x291   :  { %v8040_v35 = vpop.eup %8039  ;;  %v3202_v25 = vadd.f32 1.0, %v8038_v57  ;;  %8063 = vpow2.f32 %v2767_v52  ;;  %13848 = vst [vmem:[#allocation13_spill] sm:$0xff] %v10725_v48  ;;  %v4066_v52 = vadd.f32 %v4065_v45, %v3782_v26  ;;  %v2807_v57 = vmul.f32 1.442695, %v2282_v30 }
 0x292   :  { %v8042_v55 = vpop.eup %8041  ;;  %8065 = vrcp.f32 %v3201_v21  ;;  %v3204_v23 = vadd.f32 1.0, %v8040_v35  ;;  %v10729_v21 = vadd.f32 %v1267_v6, %v10106_v33  ;;  %v2302_v45 = vsub.f32 0.0, %v10722_v46  ;;  %13849 = vst [vmem:[#allocation34_spill] sm:$0xff] %v10738_v37 }
 0x293   :  { %v8044_v34 = vpop.eup %8043  ;;  %8067 = vrcp.f32 %v3203_v42  ;;  %v3784_v8 = vmul.f32 %v8042_v55, %v10554_v22  ;;  %v2845_v42 = vmul.f32 1.442695, %v2301_v47  ;;  %v2304_v30 = vsub.f32 0.0, %v10725_v48 }
 0x294   :  { %v8046_v18 = vpop.eup %8045  ;;  %8069 = vrcp.f32 %v3202_v25  ;;  %v3801_v44 = vmul.f32 %v8044_v34, %v10574_v7  ;;  %v2849_v7 = vmul.f32 1.442695, %v2303_v4  ;;  %v2321_v55 = vsub.f32 0.0, %v10729_v21  ;;  %v1269_v34 = vpop.f32.mrf.mxu1 }
 0x295   :  { %v8048_v35 = vpop.eup %8047  ;;  %8071 = vrcp.f32 %v3204_v23  ;;  %v3803_v26 = vmul.f32 %v8046_v18, %v10580_v1  ;;  %v4092_v1 = vadd.f32 %v10690_v40, %v3784_v8  ;;  %v2847_v47 = vmul.f32 1.442695, %v2302_v45 }
 0x296   :  { %v8050_v0 = vpop.eup %8049  ;;  %8073 = vpow2.f32 %v2771_v41  ;;  %v3802_v25 = vmul.f32 %v8048_v35, %v10588_v54  ;;  %v4054_v41 = vadd.f32 %v10703_v61, %v3801_v44  ;;  %v2851_v10 = vmul.f32 1.442695, %v2304_v30  ;;  %v1382_v35 = vpop.f32.mrf.mxu0 }
 0x297   :  { %v8052_v59 = vpop.eup %8051  ;;  %v3221_v6 = vadd.f32 1.0, %v8050_v0  ;;  %8075 = vpow2.f32 %v2805_v39  ;;  %v4080_v54 = vadd.f32 %v4079_v43, %v3803_v26  ;;  %v10748_v8 = vadd.f32 %v1269_v34, %v10127_v29 }
 0x298   :  { %v3223_v22 = vadd.f32 1.0, %v8052_v59  ;;  %8077 = vpow2.f32 %v2809_v11  ;;  %v4067_v11 = vadd.f32 %v4066_v52, %v3802_v25  ;;  %v2323_v59 = vsub.f32 0.0, %v10738_v37 }
 0x299   :  { %v8054_v23 = vpop.eup %8053  ;;  %8079 = vpow2.f32 %v2807_v57  ;;  %v2885_v57 = vmul.f32 1.442695, %v2321_v55  ;;  %13850 = vst [vmem:[#allocation46_spill] sm:$0xff] %v10748_v8  ;;  %v10752_v52 = vadd.f32 %v1382_v35, %v10170_v63 }
 0x29a   :  { %v8056_v18 = vpop.eup %8055  ;;  %v3804_v39 = vmul.f32 %v8054_v23, %v10598_v16  ;;  %8081 = vrcp.f32 %v3221_v6  ;;  %v2889_v55 = vmul.f32 1.442695, %v2323_v59  ;;  %v4839_v59 = vpack.c.bf16 %v10655_v5, %v10655_v5 }
 0x29b   :  { %v8058_v0 = vpop.eup %8057  ;;  %v3821_v4 = vmul.f32 %v8056_v18, %v10603_v12  ;;  %8083 = vrcp.f32 %v3223_v22  ;;  %13851 = vst [vmem:[#allocation36_spill] sm:$0xff] %v10752_v52 }
 0x29c   :  { %v8060_v40 = vpop.eup %8059  ;;  %v3823_v61 = vmul.f32 %v8058_v0, %v10609_v14  ;;  %8085 = vpow2.f32 %v2811_v49  ;;  %v4093_v45 = vadd.f32 %v4092_v1, %v3804_v39  ;;  %v1271_v14 = vpop.f32.mrf.mxu1  ;;  %v10759_v1 = vmul.f32 0.015625, %v10687_v17 }
 0x29d   :  { %v8062_v43 = vpop.eup %8061  ;;  %v4055_v16 = vadd.f32 %v4054_v41, %v3821_v4  ;;  %v3822_v44 = vmul.f32 %v8060_v40, %v10614_v19  ;;  %8087 = vpow2.f32 %v2845_v42  ;;  %v10755_v49 = vpop.f32.mrf.mxu0  ;;  %v2322_v41 = vsub.f32 0.0, %v10748_v8 }
 0x29e   :  { %v8064_v12 = vpop.eup %8063  ;;  %v4081_v26 = vadd.f32 %v4080_v54, %v3823_v61  ;;  %v3824_v30 = vmul.f32 %v8062_v43, %v10626_v53  ;;  %8089 = vpow2.f32 %v2849_v7  ;;  %v4819_v39 = vpack.c.bf16 %v10549_v20, %v10549_v20  ;;  %v10773_v17 = vpop.f32.mrf.mxu1 }
 0x29f   :  { %v8066_v25 = vpop.eup %8065  ;;  %v4056_v6 = vrot.slane %v4055_v16, 4  ;;  %v4068_v22 = vadd.f32 %v4067_v11, %v3822_v44  ;;  %8091 = vpow2.f32 %v2847_v47  ;;  %v3222_v18 = vadd.f32 1.0, %v8064_v12  ;;  %v10775_v11 = vpop.f32.mrf.mxu0 }
 0x2a0   :  { %v8068_v23 = vpop.eup %8067  ;;  %v4082_v19 = vrot.slane %v4081_v26, 4  ;;  %v4094_v42 = vadd.f32 %v4093_v45, %v3824_v30  ;;  %8093 = vpow2.f32 %v2851_v10  ;;  %v4821_v47 = vpack.c.bf16 %v10652_v62, %v10652_v62 }
 0x2a1   :  { %v8070_v34 = vpop.eup %8069  ;;  %v4057_v53 = vadd.f32 %v4056_v6, %v4055_v16  ;;  %v4069_v7 = vrot.slane %v4068_v22, 4  ;;  %v13852_v10 = vrot.slane %v10481_v56, 2  ;;  %v2324_v0 = vsub.f32 0.0, %v10752_v52 }
 0x2a2   :  { %v10761_v54 = vpop.eup %8071  ;;  %v13853_v40 = vrot.slane %v10562_v58, 2  ;;  %v4083_v43 = vadd.f32 %v4082_v19, %v4081_v26  ;;  %8095 = vpow2.f32 %v2885_v57  ;;  %v4095_v12 = vrot.slane %v4094_v42, 4 }
 0x2a3   :  { %v10770_v35 = vadd.f32 %v13852_v10, %v10481_v56  ;;  %v8074_v4 = vpop.eup %8073  ;;  %v13854_v56 = vrot.slane %v10619_v13, 2  ;;  %8097 = vpow2.f32 %v2889_v55  ;;  %v2887_v45 = vmul.f32 1.442695, %v2322_v41 }
 0x2a4   :  { %v10782_v61 = vadd.f32 %v13853_v40, %v10562_v58  ;;  %v8076_v16 = vpop.eup %8075  ;;  %v4841_v6 = vpack.c.bf16 %v10759_v1, %v10759_v1  ;;  %v4058_v10 = vrot.slane %v4057_v53, 2  ;;  %v4070_v52 = vadd.f32 %v4069_v7, %v4068_v22 }
 0x2a5   :  { %v10787_v44 = vadd.f32 %v13854_v56, %v10619_v13  ;;  %v8078_v30 = vpop.eup %8077  ;;  %8099 = vrcp.f32 %v3222_v18  ;;  %v10791_v40 = vunpack.c.l.b16 %v4819_v39  ;;  %v10793_v57 = vunpack.c.l.b16 %v4821_v47  ;;  %v1277_v13 = vpop.f32.mrf.mxu1 }
 0x2a6   :  { %v8080_v58 = vpop.eup %8079  ;;  %v2891_v19 = vmul.f32 1.442695, %v2324_v0  ;;  %v1390_v56 = vpop.f32.mrf.mxu0  ;;  %v10796_v55 = vunpack.c.l.b16 %v4839_v59  ;;  %v4084_v48 = vrot.slane %v4083_v43, 2  ;;  %v3224_v46 = vadd.f32 1.0, %v8074_v4 }
 0x2a7   :  { %13855 = vst [vmem:[#allocation37_spill] sm:$0xff] %v10791_v40  ;;  %13856 = vst [vmem:[#allocation39_spill] sm:$0xff] %v10793_v57  ;;  %v8082_v8 = vpop.eup %8081  ;;  %v4096_v7 = vadd.f32 %v4095_v12, %v4094_v42  ;;  %v3241_v18 = vadd.f32 1.0, %v8076_v16  ;;  %8101 = vpow2.f32 %v2887_v45  ;;  %v10800_v47 = vunpack.c.l.b16 %v4841_v6  ;;  %v10807_v40 = vpop.f32.mrf.mxu1 }
 0x2a8   :  { %13857 = vst [vmem:[#allocation40_spill] sm:$0xff] %v10796_v55  ;;  %v8084_v37 = vpop.eup %8083  ;;  %v4059_v26 = vadd.f32 %v4058_v10, %v4057_v53  ;;  %v4071_v0 = vrot.slane %v4070_v52, 2  ;;  %v10803_v57 = vadd.f32 %v1271_v14, %v10106_v33  ;;  %v3841_v55 = vmul.f32 %v8066_v25, %v10630_v3  ;;  %v10809_v42 = vpop.f32.mrf.mxu0 }
 0x2a9   :  { %v8086_v39 = vpop.eup %8085  ;;  %v3843_v41 = vmul.f32 %v8068_v23, %v10635_v15  ;;  %v3243_v4 = vadd.f32 1.0, %v8078_v30  ;;  %8103 = vpow2.f32 %v2891_v19  ;;  %v4085_v12 = vadd.f32 %v4084_v48, %v4083_v43  ;;  %v1281_v43 = vpop.f32.mrf.mxu1 }
 0x2aa   :  { %v8088_v59 = vpop.eup %8087  ;;  %v10812_v45 = vmul.f32 %v8070_v34, %v10638_v28  ;;  %8105 = vrcp.f32 %v3224_v46  ;;  %v3242_v53 = vadd.f32 1.0, %v8080_v58  ;;  %v4097_v6 = vrot.slane %v4096_v7, 2  ;;  %v1394_v58 = vpop.f32.mrf.mxu0 }
 0x2ab   :  { %v8090_v16 = vpop.eup %8089  ;;  %8107 = vrcp.f32 %v3241_v18  ;;  %v3244_v10 = vadd.f32 1.0, %v8086_v39  ;;  %v10816_v3 = vadd.f32 %v10755_v49, %v10114_v2  ;;  %v4060_v25 = vrot.slane %v4059_v26, 1 }
 0x2ac   :  { %v8092_v14 = vpop.eup %8091  ;;  %v10818_v23 = vadd.f32 %v4071_v0, %v4070_v52  ;;  %v3261_v30 = vadd.f32 1.0, %v8088_v59  ;;  %v2341_v48 = vsub.f32 0.0, %v10803_v57  ;;  %v10823_v28 = vmul.f32 %v10761_v54, %v10641_v60 }
 0x2ad   :  { %v8094_v15 = vpop.eup %8093  ;;  %8109 = vrcp.f32 %v3243_v4  ;;  %v3263_v46 = vadd.f32 1.0, %v8090_v16  ;;  %v2343_v34 = vsub.f32 0.0, %v10816_v3  ;;  %v4086_v19 = vrot.slane %v4085_v12, 1 }
 0x2ae   :  { %13858 = vst [vmem:[#allocation41_spill] sm:$0xff] %v10818_v23  ;;  %13859 = vst [vmem:[#allocation14_spill] sm:$0xff] %v10823_v28  ;;  %v3861_v49 = vmul.f32 %v8082_v8, %v10649_v32  ;;  %8111 = vrcp.f32 %v3242_v53  ;;  %v3262_v18 = vadd.f32 1.0, %v8092_v14  ;;  %v10827_v39 = vadd.f32 %v4097_v6, %v4096_v7  ;;  %v10837_v7 = vpop.f32.mrf.mxu1 }
 0x2af   :  { %v8096_v52 = vpop.eup %8095  ;;  %v3863_v0 = vmul.f32 %v8084_v37, %v10661_v24  ;;  %8113 = vrcp.f32 %v3244_v10  ;;  %v3264_v59 = vadd.f32 1.0, %v8094_v15  ;;  %v4061_v54 = vadd.f32 %v4060_v25, %v4059_v26  ;;  %v10839_v24 = vpop.f32.mrf.mxu0 }
 0x2b0   :  { %13860 = vst [vmem:[#allocation42_spill] sm:$0xff] %v10827_v39  ;;  %v8098_v60 = vpop.eup %8097  ;;  %8115 = vrcp.f32 %v3261_v30  ;;  %v2925_v16 = vmul.f32 1.442695, %v2341_v48  ;;  %v2929_v28 = vmul.f32 1.442695, %v2343_v34  ;;  %v10832_v32 = vadd.f32 %v1277_v13, %v10106_v33  ;;  %v10857_v48 = vpop.f32.mrf.mxu1 }
 0x2b1   :  { %8117 = vrcp.f32 %v3263_v46  ;;  %v10835_v8 = vadd.f32 %v1390_v56, %v10114_v2  ;;  %v4087_v37 = vadd.f32 %v4086_v19, %v4085_v12  ;;  %v10841_v53 = vadd.f32 %v3861_v49, %v3841_v55  ;;  %v10859_v46 = vpop.f32.mrf.mxu0 }
 0x2b2   :  { %v8100_v22 = vpop.eup %8099  ;;  %8119 = vrcp.f32 %v3262_v18  ;;  %v3281_v26 = vadd.f32 1.0, %v8096_v52  ;;  %v3283_v14 = vadd.f32 1.0, %v8098_v60  ;;  %v2361_v6 = vsub.f32 0.0, %v10832_v32 }
 0x2b3   :  { %8121 = vrcp.f32 %v3264_v59  ;;  %v2363_v10 = vsub.f32 0.0, %v10835_v8  ;;  %v3862_v56 = vmul.f32 %v8100_v22, %v10671_v50  ;;  %v10849_v25 = vadd.f32 %v10773_v17, %v10127_v29 }
 0x2b4   :  { %v8102_v13 = vpop.eup %8101  ;;  %8123 = vpow2.f32 %v2925_v16  ;;  %v10851_v55 = vadd.f32 %v3863_v0, %v3843_v41  ;;  %v10855_v12 = vadd.f32 %v10775_v11, %v10170_v63  ;;  %v2965_v30 = vmul.f32 1.442695, %v2361_v6 }
 0x2b5   :  { %8125 = vpow2.f32 %v2929_v28  ;;  %v10861_v19 = vmul.f32 0.015625, %v4061_v54  ;;  %v2969_v50 = vmul.f32 1.442695, %v2363_v10  ;;  %v10865_v17 = vadd.f32 %v10807_v40, %v10127_v29  ;;  %v10882_v54 = vpop.f32.mrf.mxu1 }
 0x2b6   :  { %v8104_v34 = vpop.eup %8103  ;;  %8127 = vrcp.f32 %v3281_v26  ;;  %v10867_v22 = vmul.f32 0.015625, %v4087_v37  ;;  %v3282_v11 = vadd.f32 1.0, %v8102_v13  ;;  %v10870_v28 = vadd.f32 %v1281_v43, %v10106_v33  ;;  %v10884_v33 = vpop.f32.mrf.mxu0 }
 0x2b7   :  { %13861 = vst [vmem:[#allocation44_spill] sm:$0xff] %v10861_v19  ;;  %v8106_v41 = vpop.eup %8105  ;;  %8129 = vrcp.f32 %v3283_v14  ;;  %v2342_v18 = vsub.f32 0.0, %v10849_v25  ;;  %v10875_v52 = vadd.f32 %v10809_v42, %v10170_v63  ;;  %v10878_v0 = vadd.f32 %v1394_v58, %v10114_v2  ;;  %v13863_v42 = vld [vmem:[#allocation38_spill] sm:$0xff]  ;;  %v10906_v39 = vpop.f32.mrf.mxu1 }
 0x2b8   :  { %13862 = vst [vmem:[#allocation45_spill] sm:$0xff] %v10867_v22  ;;  %v8108_v49 = vpop.eup %8107  ;;  %8131 = vpow2.f32 %v2965_v30  ;;  %v3284_v40 = vadd.f32 1.0, %v8104_v34  ;;  %v2344_v59 = vsub.f32 0.0, %v10855_v12  ;;  %v2381_v60 = vsub.f32 0.0, %v10870_v28 }
 0x2b9   :  { %8133 = vpow2.f32 %v2969_v50  ;;  %v2362_v16 = vsub.f32 0.0, %v10865_v17  ;;  %v2383_v37 = vsub.f32 0.0, %v10878_v0  ;;  %v13864_v26 = vrot.slane %v13863_v42, 1 }
 0x2ba   :  { %v8110_v43 = vpop.eup %8109  ;;  %v13865_v58 = vrot.slane %v10782_v61, 1  ;;  %v4823_v10 = vpack.c.bf16 %v10861_v19, %v10861_v19  ;;  %v4825_v13 = vpack.c.bf16 %v10867_v22, %v10867_v22  ;;  %8135 = vrcp.f32 %v3282_v11  ;;  %v10908_v11 = vpop.f32.mrf.mxu0 }
 0x2bb   :  { %v4022_v2 = vadd.f32 %v13864_v26, %v13863_v42  ;;  %v8112_v6 = vpop.eup %8111  ;;  %v3005_v30 = vmul.f32 1.442695, %v2381_v60  ;;  %v3881_v50 = vmul.f32 %v8108_v49, %v10681_v36  ;;  %v2927_v15 = vmul.f32 1.442695, %v2342_v18 }
 0x2bc   :  { %v4282_v14 = vadd.f32 %v13865_v58, %v10782_v61  ;;  %v10898_v34 = vpop.eup %8113  ;;  %v2364_v42 = vsub.f32 0.0, %v10875_v52  ;;  %v3009_v26 = vmul.f32 1.442695, %v2383_v37  ;;  %v10903_v61 = vadd.f32 %v3862_v56, %v10812_v45 }
 0x2bd   :  { %v8116_v4 = vpop.eup %8115  ;;  %v3883_v58 = vmul.f32 %v8110_v43, %v10684_v31  ;;  %8137 = vrcp.f32 %v3284_v40  ;;  %v2931_v19 = vmul.f32 1.442695, %v2344_v59  ;;  %v2967_v22 = vmul.f32 1.442695, %v2362_v16 }
 0x2be   :  { %v8118_v60 = vpop.eup %8117  ;;  %8139 = vpow2.f32 %v3005_v30  ;;  %v4519_v36 = vmul.f32 0.015625, %v4022_v2  ;;  %v4539_v49 = vmul.f32 0.015625, %v4282_v14  ;;  %v10912_v37 = vunpack.c.l.b16 %v4823_v10  ;;  %v10926_v10 = vpop.f32.mrf.mxu1 }
 0x2bf   :  { %v10910_v18 = vpop.eup %8119  ;;  %v10914_v23 = vunpack.c.l.b16 %v4825_v13  ;;  %v10917_v45 = vmul.f32 %v8106_v41, %v10677_v27  ;;  %8141 = vpow2.f32 %v3009_v26  ;;  %v4310_v56 = vadd.f32 %v10841_v53, %v3881_v50  ;;  %v10928_v27 = vpop.f32.mrf.mxu0 }
 0x2c0   :  { %13866 = vst [vmem:[#allocation47_spill] sm:$0xff] %v10912_v37  ;;  %v10919_v31 = vpop.eup %8121  ;;  %8143 = vpow2.f32 %v2927_v15  ;;  %v2971_v40 = vmul.f32 1.442695, %v2364_v42  ;;  %v4336_v43 = vadd.f32 %v10851_v55, %v3883_v58  ;;  %v10924_v16 = vmul.f32 %v8112_v6, %v10698_v38 }
 0x2c1   :  { %13867 = vst [vmem:[#allocation48_spill] sm:$0xff] %v10914_v23  ;;  %v8124_v59 = vpop.eup %8123  ;;  %8145 = vpow2.f32 %v2931_v19  ;;  %v8994_v2 = vmov 1983009808   ;;  %v4820_v30 = vpack.c.bf16 %v4519_v36, %v4519_v36  ;;  %v4840_v53 = vpack.c.bf16 %v4539_v49, %v4539_v49 }
 0x2c2   :  { %v4601_v14 = vunpack.c.l.s4 %v8994_v2  ;;  %v8126_v41 = vpop.eup %8125  ;;  %v3301_v13 = vadd.f32 1.0, %v8124_v59  ;;  %8147 = vpow2.f32 %v2967_v22  ;;  %v4598_v42 = vcombine.low %v10549_v20, %v4519_v36  ;;  %v13869_v59 = vld [vmem:[#allocation15_spill] sm:$0xff] }
 0x2c3   :  { %v8128_v15 = vpop.eup %8127  ;;  %v3303_v50 = vadd.f32 1.0, %v8126_v41  ;;  %v13868_v38 = vrot.slane %v10770_v35, 1  ;;  %v3901_v26 = vmul.f32 %v8116_v4, %v10706_v9  ;;  %8149 = vpow2.f32 %v2971_v40 }
 0x2c4   :  { %v4602_v55 = vunpack.c.0.s8 %v4601_v14  ;;  %v8130_v6 = vpop.eup %8129  ;;  %v5227_v58 = vunpack.c.l.b16 %v4820_v30  ;;  %v5247_v2 = vunpack.c.l.b16 %v4840_v53  ;;  %v4683_v37 = vcombine.low %v10655_v5, %v4539_v49  ;;  %v10942_v14 = vpop.f32.mrf.mxu1 }
 0x2c5   :  { %v4048_v19 = vadd.f32 %v13868_v38, %v10770_v35  ;;  %v8132_v23 = vpop.eup %8131  ;;  %v13871_v20 = vrot.slane %v10787_v44, 1  ;;  %v10944_v35 = vpop.f32.mrf.mxu0  ;;  %8151 = vrcp.f32 %v3301_v13  ;;  %v3903_v30 = vmul.f32 %v8118_v60, %v10710_v51 }
 0x2c6   :  { %v10936_v22 = vsub.s32 %v4602_v55, %v13869_v59  ;;  %v8134_v41 = vpop.eup %8133  ;;  %v3321_v9 = vadd.f32 1.0, %v8132_v23  ;;  %v5267_v4 = vsel %vm4773_vm2, %v5247_v2, %v5227_v58  ;;  %8153 = vrcp.f32 %v3303_v50  ;;  %v10962_v60 = vpop.f32.mrf.mxu1 }
 0x2c7   :  { %v4308_v36 = vadd.f32 %v13871_v20, %v10787_v44  ;;  %v4521_v40 = vmul.f32 0.015625, %v4048_v19  ;;  %v3323_v53 = vadd.f32 1.0, %v8134_v41  ;;  %v10951_v49 = vpop.eup %8135  ;;  %v5287_v44 = vpack.c.b16 %v5267_v4, %v5267_v4  ;;  %v10964_v50 = vpop.f32.mrf.mxu0 }
 0x2c8   :  { %13870 = vst [vmem:[#allocation20_spill] sm:$0xff] %v10936_v22  ;;  %v10949_v5 = vrot.slane %v4598_v42, %v10936_v22  ;;  %8155 = vrcp.f32 %v3321_v9  ;;  %v10956_v23 = vadd.f32 %v10837_v7, %v10127_v29  ;;  %v10960_v51 = vadd.f32 %v10839_v24, %v10170_v63 }
 0x2c9   :  { %v4541_v55 = vmul.f32 0.015625, %v4308_v36  ;;  %v4599_v38 = vcombine.low %v10652_v62, %v4521_v40  ;;  %8157 = vrcp.f32 %v3323_v53  ;;  %v4822_v13 = vpack.c.bf16 %v4521_v40, %v4521_v40  ;;  %6318 = vmatprep.mubr.bf16.mxu1 %v5287_v44  ;;  %v417_v36 = vld [vmem:[%s13562_s4 + $0x8] sm:$0xff]  ;;  %v10986_v40 = vpop.f32.mrf.mxu1  ;;  %v13878_v44 = vld [vmem:[#allocation34_spill] sm:$0xff] }
 0x2ca   :  { %13872 = vst [vmem:[#allocation21_spill] sm:$0xff] %v10949_v5  ;;  %13873 = vst [vmem:[#allocation22_spill] sm:$0xff] %v10956_v23  ;;  %v10966_v42 = vpop.eup %8137  ;;  %v10969_v19 = vrot.slane %v4683_v37, %v10936_v22  ;;  %v4311_v2 = vadd.f32 %v4310_v56, %v3901_v26  ;;  %v4337_v63 = vadd.f32 %v4336_v43, %v3903_v30  ;;  %v2382_v20 = vsub.f32 0.0, %v10956_v23  ;;  %v10988_v30 = vpop.f32.mrf.mxu0  ;;  %v13886_v23 = vld [vmem:[#allocation19_spill] sm:$0xff] }
 0x2cb   :  { %13874 = vst [vmem:[#allocation24_spill] sm:$0xff] %v10960_v51  ;;  %v10972_v62 = vrot.slane %v4599_v38, %v10936_v22  ;;  %v4684_v29 = vcombine.low %v10759_v1, %v4541_v55  ;;  %v4842_v7 = vpack.c.bf16 %v4541_v55, %v4541_v55  ;;  %v8140_v58 = vpop.eup %8139  ;;  %v3921_v24 = vmul.f32 %v8128_v15, %v10729_v21 }
 0x2cc   :  { %13875 = vst [vmem:[#allocation23_spill] sm:$0xff] %v10969_v19  ;;  %v8142_v37 = vpop.eup %8141  ;;  %v3341_v41 = vadd.f32 1.0, %v8140_v58  ;;  %v2384_v1 = vsub.f32 0.0, %v10960_v51  ;;  %v5229_v26 = vunpack.c.l.b16 %v4822_v13  ;;  %v3007_v15 = vmul.f32 1.442695, %v2382_v20  ;;  %v7480_v19 = vld [vmem:[%s13563_s5 + $0x1f0] sm:$0xff]  }
 0x2cd   :  { %13876 = vst [vmem:[#allocation8_spill] sm:$0xff] %v10972_v62  ;;  %v10983_v4 = vrot.slane %v4684_v29, %v10936_v22  ;;  %v8144_v56 = vpop.eup %8143  ;;  %v3343_v43 = vadd.f32 1.0, %v8142_v37  ;;  %v5249_v21 = vunpack.c.l.b16 %v4842_v7  ;;  %v3923_v55 = vmul.f32 %v8130_v6, %v13878_v44  ;;  %v13879_v29 = vld [vmem:[#allocation16_spill] sm:$0xff]  ;;  %v13880_v7 = vld [vmem:[#allocation17_spill] sm:$0xff] }
 0x2ce   :  { %v8146_v53 = vpop.eup %8145  ;;  %8159 = vrcp.f32 %v3341_v41  ;;  %v10994_v58 = vrot.slane %v417_v36, %v13879_v29  ;;  %v10998_v20 = vrot.slane %v417_v36, %v13880_v7  ;;  %v13881_v37 = vld [vmem:[#allocation37_spill] sm:$0xff]  ;;  %v13882_v62 = vld [vmem:[#allocation40_spill] sm:$0xff]  ;;  %v3011_v6 = vmul.f32 1.442695, %v2384_v1  ;;  %v11017_v1 = vpop.f32.mrf.mxu1 }
 0x2cf   :  { %13877 = vst [vmem:[#allocation25_spill] sm:$0xff] %v10983_v4  ;;  %v8148_v9 = vpop.eup %8147  ;;  %8161 = vrcp.f32 %v3343_v43  ;;  %v5269_v13 = vsel %vm4773_vm2, %v5249_v21, %v5229_v26  ;;  %v5266_v5 = vsel %vm4773_vm2, %v13882_v62, %v13881_v37  ;;  %v7477_v43 = vld [vmem:[%s13563_s5 + $0x138] sm:$0xff]   ;;  %v3302_v26 = vadd.f32 1.0, %v8144_v56  ;;  %v13883_v4 = vld [vmem:[#allocation39_spill] sm:$0xff]  ;;  %v7479_v56 = vld [vmem:[%s13563_s5 + $0x170] sm:$0xff]  }
 0x2d0   :  { %v5289_v59 = vpack.c.b16 %v5269_v13, %v5269_v13  ;;  %8163 = vpow2.f32 %v3007_v15  ;;  %v11005_v41 = vadd.f32 %v10857_v48, %v10994_v58  ;;  %v8150_v44 = vpop.eup %8149  ;;  %v11012_v21 = vadd.f32 %v10859_v46, %v10998_v20  ;;  %v11019_v15 = vpop.f32.mrf.mxu0  ;;  %v7478_v48 = vld [vmem:[%s13563_s5 + $0x1b8] sm:$0xff]   ;;  %v13884_v13 = vld [vmem:[#allocation35_spill] sm:$0xff] }
 0x2d1   :  { %v5286_v38 = vpack.c.b16 %v5266_v5, %v5266_v5  ;;  %v5268_v62 = vsel %vm4773_vm2, %v10800_v47, %v13883_v4  ;;  %v11029_v46 = vmul.f32 %v10898_v34, %v13884_v13  ;;  %v13885_v4 = vld [vmem:[#allocation18_spill] sm:$0xff]  ;;  %v4312_v29 = vadd.f32 %v4311_v2, %v3921_v24  ;;  %v7481_v2 = vld [vmem:[%s13563_s5 + $0x130] sm:$0xff]  }
 0x2d2   :  { %6358 = vmatprep.mubr.bf16.mxu0 %v5289_v59  ;;  %v2085_v5 = vsub.f32 0.0, %v11005_v41  ;;  %v5288_v47 = vpack.c.b16 %v5268_v62, %v5268_v62  ;;  %v11033_v37 = vrot.slane %v417_v36, %v13885_v4  ;;  %v8152_v7 = vpop.eup %8151  ;;  %v4338_v22 = vadd.f32 %v4337_v63, %v3923_v55 }
 0x2d3   :  { %v2087_v51 = vsub.f32 0.0, %v11012_v21  ;;  %6319 = vmatmul.mubr.bf16.vlgmr.msra.gmra.mxu1 %v5286_v38  ;;  %v11040_v34 = vrot.slane %v417_v36, %v13886_v23  ;;  %v8154_v59 = vpop.eup %8153  ;;  %8165 = vpow2.f32 %v3011_v6  ;;  %v11048_v4 = vadd.f32 %v10906_v39, %v10994_v58  ;;  %v11057_v38 = vpop.f32.mrf.mxu1  ;;  %v7482_v39 = vld [vmem:[%s13563_s5 + $0x1b0] sm:$0xff]   ;;  %v7483_v6 = vld [vmem:[%s13563_s5 + $0x168] sm:$0xff]  }
 0x2d4   :  { %v2413_v13 = vmul.f32 1.442695, %v2085_v5  ;;  %6359 = vmatmul.mubr.bf16.vlgmr.msra.gmra.mxu0 %v5288_v47  ;;  %v11044_v62 = vadd.f32 %v10882_v54, %v11033_v37  ;;  %7110 = vmatpush3.bf16.msra.mxu1 %v7477_v43  ;;  %8167 = vrcp.f32 %v3302_v26  ;;  %v3304_v24 = vadd.f32 1.0, %v8146_v53  ;;  %v11059_v54 = vpop.f32.mrf.mxu0 }
 0x2d5   :  { %v8156_v63 = vpop.eup %8155  ;;  %v2417_v36 = vmul.f32 1.442695, %v2087_v51  ;;  %v11055_v55 = vadd.f32 %v10884_v33, %v11040_v34  ;;  %7132 = vmatpush3.bf16.msra.mxu0 %v7478_v48  ;;  %7111 = vmatprep.subr.bf16.mxu1 %v7479_v56  ;;  %v3941_v51 = vmul.f32 %v8152_v7, %v10803_v57  ;;  %v3322_v43 = vadd.f32 1.0, %v8148_v9  ;;  %v7484_v48 = vld [vmem:[%s13563_s5 + $0x1e8] sm:$0xff]  }
 0x2d6   :  { %v8158_v53 = vpop.eup %8157  ;;  %v3324_v33 = vadd.f32 1.0, %v8150_v44  ;;  %v2086_v26 = vsub.f32 0.0, %v11044_v62  ;;  %7133 = vmatprep.subr.bf16.mxu0 %v7480_v19  ;;  %v3943_v56 = vmul.f32 %v8154_v59, %v10816_v3  ;;  %v3961_v5 = vmul.f32 %v8156_v63, %v10832_v32  ;;  %v7485_v19 = vld [vmem:[%s13563_s5 + $0x128] sm:$0xff]   ;;  %v11092_v59 = vpop.f32.mrf.mxu1  ;;  %v7488_v63 = vld [vmem:[%s13563_s5 + $0x1e0] sm:$0xff]  }
 0x2d7   :  { %8169 = vpow2.f32 %v2413_v13  ;;  %v2088_v47 = vsub.f32 0.0, %v11055_v55  ;;  %v2105_v57 = vsub.f32 0.0, %v11048_v4  ;;  %v11078_v9 = vadd.f32 %v10908_v11, %v10998_v20  ;;  %v11094_v11 = vpop.f32.mrf.mxu0  ;;  %v7486_v13 = vld [vmem:[%s13563_s5 + $0x1a8] sm:$0xff]  }
 0x2d8   :  { %8171 = vpow2.f32 %v2417_v36  ;;  %v2415_v23 = vmul.f32 1.442695, %v2086_v26  ;;  %7112 = vmatpush3.bf16.msra.mxu1 %v7481_v2  ;;  %v3963_v3 = vmul.f32 %v8158_v53, %v10835_v8  ;;  %v11086_v32 = vadd.f32 %v10926_v10, %v11033_v37  ;;  %v7487_v8 = vld [vmem:[%s13563_s5 + $0x160] sm:$0xff]  }
 0x2d9   :  { %v2419_v7 = vmul.f32 1.442695, %v2088_v47  ;;  %v11090_v44 = vadd.f32 %v10928_v27, %v11040_v34  ;;  %7134 = vmatpush3.bf16.msra.mxu0 %v7482_v39  ;;  %7113 = vmatprep.subr.bf16.mxu1 %v7483_v6  ;;  %v4313_v10 = vadd.f32 %v4312_v29, %v3941_v51  ;;  %v2453_v2 = vmul.f32 1.442695, %v2105_v57  ;;  %v7489_v51 = vld [vmem:[%s13563_s5 + $0x120] sm:$0xff]  }
 0x2da   :  { %8173 = vpow2.f32 %v2415_v23  ;;  %v2107_v27 = vsub.f32 0.0, %v11078_v9  ;;  %7135 = vmatprep.subr.bf16.mxu0 %v7484_v48  ;;  %v4339_v39 = vadd.f32 %v4338_v22, %v3943_v56  ;;  %v2106_v6 = vsub.f32 0.0, %v11086_v32 }
 0x2db   :  { %13887 = vst [vmem:[#allocation26_spill] sm:$0xff] %v11090_v44  ;;  %v8160_v36 = vpop.eup %8159  ;;  %8175 = vpow2.f32 %v2419_v7  ;;  %v2108_v53 = vsub.f32 0.0, %v11090_v44  ;;  %v4314_v47 = vadd.f32 %v4313_v10, %v3961_v5  ;;  %v11113_v7 = vpop.f32.mrf.mxu1 }
 0x2dc   :  { %v8162_v26 = vpop.eup %8161  ;;  %8177 = vrcp.f32 %v3304_v24  ;;  %v3981_v23 = vmul.f32 %v8160_v36, %v10870_v28  ;;  %v2457_v29 = vmul.f32 1.442695, %v2107_v27  ;;  %7114 = vmatpush3.bf16.msra.mxu1 %v7485_v19  ;;  %v4340_v57 = vadd.f32 %v4339_v39, %v3963_v3  ;;  %v11115_v44 = vpop.f32.mrf.mxu0  ;;  %v7490_v28 = vld [vmem:[%s13563_s5 + $0x1a0] sm:$0xff]   ;;  %v7491_v24 = vld [vmem:[%s13563_s5 + $0x158] sm:$0xff]  }
 0x2dd   :  { %v8164_v48 = vpop.eup %8163  ;;  %8179 = vrcp.f32 %v3322_v43  ;;  %v3983_v22 = vmul.f32 %v8162_v26, %v10878_v0  ;;  %v2455_v56 = vmul.f32 1.442695, %v2106_v6  ;;  %7136 = vmatpush3.bf16.msra.mxu0 %v7486_v13  ;;  %7115 = vmatprep.subr.bf16.mxu1 %v7487_v8  ;;  %v11125_v0 = vadd.f32 %v10942_v14, %v10994_v58  ;;  %v7492_v43 = vld [vmem:[%s13563_s5 + $0x1d8] sm:$0xff]   ;;  %v11147_v39 = vpop.f32.mrf.mxu1 }
 0x2de   :  { %v4315_v5 = vadd.f32 %v4314_v47, %v3981_v23  ;;  %v3342_v19 = vadd.f32 1.0, %v8164_v48  ;;  %8181 = vpow2.f32 %v2453_v2  ;;  %7137 = vmatprep.subr.bf16.mxu0 %v7488_v63  ;;  %v2459_v13 = vmul.f32 1.442695, %v2108_v53  ;;  %v7493_v27 = vld [vmem:[%s13563_s5 + $0x118] sm:$0xff]   ;;  %v11149_v6 = vpop.f32.mrf.mxu0  ;;  %v7495_v53 = vld [vmem:[%s13563_s5 + $0x150] sm:$0xff]  }
 0x2df   :  { %13888 = vst [vmem:[#allocation27_spill] sm:$0xff] %v11125_v0  ;;  %8183 = vrcp.f32 %v3324_v33  ;;  %v4341_v3 = vadd.f32 %v4340_v57, %v3983_v22  ;;  %v11132_v8 = vadd.f32 %v10944_v35, %v10998_v20  ;;  %v2125_v2 = vsub.f32 0.0, %v11125_v0  ;;  %v13892_v47 = vld [vmem:[#allocation14_spill] sm:$0xff] }
 0x2e0   :  { %v4316_v10 = vrot.slane %v4315_v5, 4  ;;  %8185 = vpow2.f32 %v2457_v29  ;;  %v11137_v14 = vadd.f32 %v10962_v60, %v11033_v37  ;;  %7116 = vmatpush3.bf16.msra.mxu1 %v7489_v51  ;;  %v8166_v33 = vpop.eup %8165  ;;  %v11145_v35 = vadd.f32 %v10964_v50, %v11040_v34  ;;  %v7494_v60 = vld [vmem:[%s13563_s5 + $0x198] sm:$0xff]   ;;  %v7496_v51 = vld [vmem:[%s13563_s5 + $0x1d0] sm:$0xff]  }
 0x2e1   :  { %13889 = vst [vmem:[#allocation28_spill] sm:$0xff] %v11132_v8  ;;  %v4342_v63 = vrot.slane %v4341_v3, 4  ;;  %8187 = vpow2.f32 %v2455_v56  ;;  %v2127_v36 = vsub.f32 0.0, %v11132_v8  ;;  %7138 = vmatpush3.bf16.msra.mxu0 %v7490_v28  ;;  %7117 = vmatprep.subr.bf16.mxu1 %v7491_v24  ;;  %v11157_v26 = vpop.eup %8167  ;;  %v4348_v50 = vadd.f32 %v10917_v45, %v13892_v47  ;;  %v11178_v47 = vpop.f32.mrf.mxu1  ;;  %v13899_v8 = vld [vmem:[#allocation36_spill] sm:$0xff] }
 0x2e2   :  { %13890 = vst [vmem:[#allocation29_spill] sm:$0xff] %v11137_v14  ;;  %13891 = vst [vmem:[#allocation30_spill] sm:$0xff] %v11145_v35  ;;  %8189 = vrcp.f32 %v3342_v19  ;;  %v2493_v23 = vmul.f32 1.442695, %v2125_v2  ;;  %v2126_v29 = vsub.f32 0.0, %v11137_v14  ;;  %7139 = vmatprep.subr.bf16.mxu0 %v7492_v43  ;;  %v4317_v48 = vadd.f32 %v4316_v10, %v4315_v5  ;;  %v7497_v43 = vld [vmem:[%s13563_s5 + $0x110] sm:$0xff]  }
 0x2e3   :  { %v2497_v57 = vmul.f32 1.442695, %v2127_v36  ;;  %v2128_v22 = vsub.f32 0.0, %v11145_v35  ;;  %v11168_v56 = vadd.f32 %v10986_v40, %v10994_v58  ;;  %v4323_v45 = vadd.f32 %v10903_v61, %v10924_v16  ;;  %v13894_v2 = vld [vmem:[#allocation43_spill] sm:$0xff]  ;;  %v11180_v35 = vpop.f32.mrf.mxu0  ;;  %v7498_v61 = vld [vmem:[%s13563_s5 + $0x190] sm:$0xff]  }
 0x2e4   :  { %v8170_v28 = vpop.eup %8169  ;;  %v4343_v24 = vadd.f32 %v4342_v63, %v4341_v3  ;;  %v3344_v19 = vadd.f32 1.0, %v8166_v33  ;;  %8191 = vpow2.f32 %v2459_v13  ;;  %7118 = vmatpush3.bf16.msra.mxu1 %v7493_v27  ;;  %v4349_v10 = vadd.f32 %v4348_v50, %v11029_v46  ;;  %v7499_v16 = vld [vmem:[%s13563_s5 + $0x148] sm:$0xff]  }
 0x2e5   :  { %13893 = vst [vmem:[#allocation9_spill] sm:$0xff] %v11168_v56  ;;  %v8172_v5 = vpop.eup %8171  ;;  %v3902_v36 = vmul.f32 %v10910_v18, %v13894_v2  ;;  %8193 = vpow2.f32 %v2493_v23  ;;  %v2495_v40 = vmul.f32 1.442695, %v2126_v29  ;;  %7140 = vmatpush3.bf16.msra.mxu0 %v7494_v60  ;;  %7119 = vmatprep.subr.bf16.mxu1 %v7495_v53  ;;  %v2499_v46 = vmul.f32 1.442695, %v2128_v22  ;;  %v7500_v13 = vld [vmem:[%s13563_s5 + $0x1c8] sm:$0xff]   ;;  %v11214_v14 = vpop.f32.mrf.mxu0 }
 0x2e6   :  { %8195 = vpow2.f32 %v2497_v57  ;;  %v2145_v18 = vsub.f32 0.0, %v11168_v56  ;;  %v11191_v3 = vadd.f32 %v10988_v30, %v10998_v20  ;;  %7141 = vmatprep.subr.bf16.mxu0 %v7496_v51  ;;  %v4318_v33 = vrot.slane %v4317_v48, 2  ;;  %v13897_v23 = vld [vmem:[#allocation13_spill] sm:$0xff]  ;;  %v7501_v57 = vld [vmem:[%s13563_s5 + $0x108] sm:$0xff]   ;;  %v11212_v56 = vpop.f32.mrf.mxu1 }
 0x2e7   :  { %v8174_v27 = vpop.eup %8173  ;;  %v3045_v63 = vadd.f32 1.0, %v8170_v28  ;;  %v11198_v60 = vadd.f32 %v11017_v1, %v11033_v37  ;;  %v11202_v53 = vadd.f32 %v11019_v15, %v11040_v34  ;;  %v3904_v30 = vmul.f32 %v10919_v31, %v13897_v23  ;;  %v13898_v28 = vld [vmem:[#allocation46_spill] sm:$0xff]  ;;  %v7502_v31 = vld [vmem:[%s13563_s5 + $0x188] sm:$0xff]  }
 0x2e8   :  { %13895 = vst [vmem:[#allocation31_spill] sm:$0xff] %v11191_v3  ;;  %v8176_v50 = vpop.eup %8175  ;;  %v4344_v29 = vrot.slane %v4343_v24, 2  ;;  %8197 = vrcp.f32 %v3344_v19  ;;  %v3047_v51 = vadd.f32 1.0, %v8172_v5  ;;  %7120 = vmatpush3.bf16.msra.mxu1 %v7497_v43  ;;  %v3922_v1 = vmul.f32 %v10951_v49, %v13898_v28  ;;  %v7503_v19 = vld [vmem:[%s13563_s5 + $0x140] sm:$0xff]  }
 0x2e9   :  { %13896 = vst [vmem:[#allocation32_spill] sm:$0xff] %v11198_v60  ;;  %v8178_v22 = vpop.eup %8177  ;;  %8199 = vpow2.f32 %v2495_v40  ;;  %v2533_v2 = vmul.f32 1.442695, %v2145_v18  ;;  %v2147_v15 = vsub.f32 0.0, %v11191_v3  ;;  %7142 = vmatpush3.bf16.msra.mxu0 %v7498_v61  ;;  %7121 = vmatprep.subr.bf16.mxu1 %v7499_v16  ;;  %v4324_v49 = vadd.f32 %v4323_v45, %v3902_v36  ;;  %v7504_v61 = vld [vmem:[%s13563_s5 + $0x1c0] sm:$0xff]  }
 0x2ea   :  { %v8180_v43 = vpop.eup %8179  ;;  %v3046_v5 = vadd.f32 1.0, %v8174_v27  ;;  %8201 = vpow2.f32 %v2499_v46  ;;  %v2146_v40 = vsub.f32 0.0, %v11198_v60  ;;  %7143 = vmatprep.subr.bf16.mxu0 %v7500_v13  ;;  %v4319_v18 = vadd.f32 %v4318_v33, %v4317_v48  ;;  %v7505_v46 = vld [vmem:[%s13563_s5 + $0x100] sm:$0xff]   ;;  %v11232_v33 = vpop.f32.mrf.mxu1 }
 0x2eb   :  { %v8182_v16 = vpop.eup %8181  ;;  %8203 = vrcp.f32 %v3045_v63  ;;  %v3048_v23 = vadd.f32 1.0, %v8176_v50  ;;  %v2148_v28 = vsub.f32 0.0, %v11202_v53  ;;  %v3924_v0 = vmul.f32 %v10966_v42, %v13899_v8  ;;  %v11234_v63 = vpop.f32.mrf.mxu0  ;;  %v7506_v42 = vld [vmem:[%s13563_s5 + $0x180] sm:$0xff]  }
 0x2ec   :  { %v8184_v3 = vpop.eup %8183  ;;  %v4345_v45 = vadd.f32 %v4344_v29, %v4343_v24  ;;  %8205 = vrcp.f32 %v3047_v51  ;;  %v2537_v36 = vmul.f32 1.442695, %v2147_v15  ;;  %7122 = vmatpush3.bf16.msra.mxu1 %v7501_v57  ;;  %v4350_v27 = vadd.f32 %v4349_v10, %v3904_v30 }
 0x2ed   :  { %v8186_v13 = vpop.eup %8185  ;;  %v4325_v60 = vadd.f32 %v4324_v49, %v3922_v1  ;;  %8207 = vpow2.f32 %v2533_v2  ;;  %v2535_v48 = vmul.f32 1.442695, %v2146_v40  ;;  %7144 = vmatpush3.bf16.msra.mxu0 %v7502_v31  ;;  %7123 = vmatprep.subr.bf16.mxu1 %v7503_v19  ;;  %v3942_v24 = vmul.f32 %v11157_v26, %v10849_v25  ;;  %v11251_v19 = vpop.f32.mrf.mxu1 }
 0x2ee   :  { %v8188_v8 = vpop.eup %8187  ;;  %8209 = vrcp.f32 %v3046_v5  ;;  %v3065_v50 = vadd.f32 1.0, %v8182_v16  ;;  %v11243_v10 = vadd.f32 %v11057_v38, %v10994_v58  ;;  %7145 = vmatprep.subr.bf16.mxu0 %v7504_v61  ;;  %v4320_v29 = vrot.slane %v4319_v18, 1  ;;  %v11253_v49 = vpop.f32.mrf.mxu0 }
 0x2ef   :  { %v8190_v30 = vpop.eup %8189  ;;  %8211 = vrcp.f32 %v3048_v23  ;;  %v2539_v51 = vmul.f32 1.442695, %v2148_v28  ;;  %v11247_v57 = vadd.f32 %v11059_v54, %v10998_v20  ;;  %v4351_v1 = vadd.f32 %v4350_v27, %v3924_v0 }
 0x2f0   :  { %v4346_v2 = vrot.slane %v4345_v45, 1  ;;  %v3067_v15 = vadd.f32 1.0, %v8186_v13  ;;  %8213 = vpow2.f32 %v2537_v36  ;;  %7124 = vmatpush3.bf16.msra.mxu1 %v7505_v46  ;;  %v3944_v26 = vmul.f32 %v8178_v22, %v10855_v12 }
 0x2f1   :  { %v8192_v25 = vpop.eup %8191  ;;  %v3066_v31 = vadd.f32 1.0, %v8188_v8  ;;  %8215 = vpow2.f32 %v2535_v48  ;;  %v2165_v38 = vsub.f32 0.0, %v11243_v10  ;;  %7146 = vmatpush3.bf16.msra.mxu0 %v7506_v42  ;;  %v4326_v54 = vadd.f32 %v4325_v60, %v3942_v24  ;;  %v11262_v60 = vpop.f32.mrf.mxu1  ;;  %v13900_v8 = vld [vmem:[#allocation22_spill] sm:$0xff] }
 0x2f2   :  { %v8194_v5 = vpop.eup %8193  ;;  %v3962_v0 = vmul.f32 %v8180_v43, %v10865_v17  ;;  %8217 = vrcp.f32 %v3065_v50  ;;  %v2167_v40 = vsub.f32 0.0, %v11247_v57  ;;  %v3964_v16 = vmul.f32 %v8184_v3, %v10875_v52  ;;  %v11264_v43 = vpop.f32.mrf.mxu0 }
 0x2f3   :  { %v8196_v61 = vpop.eup %8195  ;;  %v4321_v12 = vadd.f32 %v4320_v29, %v4319_v18  ;;  %8219 = vpow2.f32 %v2539_v51  ;;  %v2573_v22 = vmul.f32 1.442695, %v2165_v38  ;;  %v4347_v23 = vadd.f32 %v4346_v2, %v4345_v45 }
 0x2f4   :  { %8221 = vrcp.f32 %v3067_v15  ;;  %v3068_v28 = vadd.f32 1.0, %v8192_v25  ;;  %v2577_v36 = vmul.f32 1.442695, %v2167_v40  ;;  %v4352_v13 = vadd.f32 %v4351_v1, %v3944_v26  ;;  %v13903_v15 = vld [vmem:[#allocation24_spill] sm:$0xff] }
 0x2f5   :  { %v8198_v46 = vpop.eup %8197  ;;  %8223 = vrcp.f32 %v3066_v31  ;;  %v3085_v27 = vadd.f32 1.0, %v8194_v5  ;;  %v11260_v17 = vadd.f32 %v11092_v59, %v11033_v37  ;;  %v4327_v3 = vadd.f32 %v4326_v54, %v3962_v0  ;;  %v11278_v31 = vpop.f32.mrf.mxu1 }
 0x2f6   :  { %v8200_v52 = vpop.eup %8199  ;;  %v3087_v18 = vadd.f32 1.0, %v8196_v61  ;;  %8225 = vpow2.f32 %v2573_v22  ;;  %v11268_v45 = vadd.f32 %v11094_v11, %v11040_v34  ;;  %v4353_v42 = vadd.f32 %v4352_v13, %v3964_v16 }
 0x2f7   :  { %v8202_v48 = vpop.eup %8201  ;;  %v3982_v24 = vmul.f32 %v8190_v30, %v13900_v8  ;;  %8227 = vpow2.f32 %v2577_v36  ;;  %v2166_v59 = vsub.f32 0.0, %v11260_v17  ;;  %v11272_v29 = vmul.f32 0.015625, %v4321_v12  ;;  %v11280_v30 = vpop.f32.mrf.mxu0 }
 0x2f8   :  { %v8204_v50 = vpop.eup %8203  ;;  %v11274_v51 = vmul.f32 0.015625, %v4347_v23  ;;  %8229 = vrcp.f32 %v3068_v28  ;;  %v2168_v1 = vsub.f32 0.0, %v11268_v45  ;;  %v3984_v25 = vmul.f32 %v8198_v46, %v13903_v15 }
 0x2f9   :  { %13901 = vst [vmem:[#allocation33_spill] sm:$0xff] %v11272_v29  ;;  %v8206_v2 = vpop.eup %8205  ;;  %8231 = vrcp.f32 %v3085_v27  ;;  %v3086_v11 = vadd.f32 1.0, %v8200_v52  ;;  %v2575_v26 = vmul.f32 1.442695, %v2166_v59  ;;  %v3088_v5 = vadd.f32 1.0, %v8202_v48  ;;  %v11304_v27 = vpop.f32.mrf.mxu1 }
 0x2fa   :  { %13902 = vst [vmem:[#allocation10_spill] sm:$0xff] %v11274_v51  ;;  %v8208_v38 = vpop.eup %8207  ;;  %8233 = vrcp.f32 %v3087_v18  ;;  %v2579_v54 = vmul.f32 1.442695, %v2168_v1  ;;  %v11284_v0 = vadd.f32 %v11113_v7, %v10994_v58  ;;  %v11286_v61 = vadd.f32 %v4327_v3, %v3982_v24  ;;  %v11306_v52 = vpop.f32.mrf.mxu0  ;;  %v13911_v24 = vld [vmem:[#allocation27_spill] sm:$0xff] }
 0x2fb   :  { %v8210_v40 = vpop.eup %8209  ;;  %v3105_v16 = vadd.f32 1.0, %v8208_v38  ;;  %8235 = vpow2.f32 %v2575_v26  ;;  %v11290_v12 = vadd.f32 %v11115_v44, %v10998_v20  ;;  %v11297_v46 = vadd.f32 %v4353_v42, %v3984_v25 }
 0x2fc   :  { %v8212_v22 = vpop.eup %8211  ;;  %8237 = vpow2.f32 %v2579_v54  ;;  %v2185_v7 = vsub.f32 0.0, %v11284_v0  ;;  %v11302_v44 = vadd.f32 %v11147_v39, %v11033_v37  ;;  %v11310_v8 = vadd.f32 %v11149_v6, %v11040_v34  ;;  %v11323_v54 = vpop.f32.mrf.mxu1 }
 0x2fd   :  { %v8214_v36 = vpop.eup %8213  ;;  %13904 = vst [vmem:[#allocation11_spill] sm:$0xff] %v11297_v46  ;;  %8239 = vrcp.f32 %v3086_v11  ;;  %v2187_v13 = vsub.f32 0.0, %v11290_v12  ;;  %v11317_v11 = vadd.f32 %v11178_v47, %v10994_v58  ;;  %v11330_v47 = vmul.f32 %v8206_v2, %v11012_v21 }
 0x2fe   :  { %v8216_v3 = vpop.eup %8215  ;;  %8241 = vrcp.f32 %v3088_v5  ;;  %v3107_v18 = vadd.f32 1.0, %v8214_v36  ;;  %v2613_v48 = vmul.f32 1.442695, %v2185_v7  ;;  %v2186_v39 = vsub.f32 0.0, %v11302_v44 }
 0x2ff   :  { %v8218_v42 = vpop.eup %8217  ;;  %8243 = vrcp.f32 %v3105_v16  ;;  %v3106_v59 = vadd.f32 1.0, %v8216_v3  ;;  %v2617_v15 = vmul.f32 1.442695, %v2187_v13  ;;  %v2188_v25 = vsub.f32 0.0, %v11310_v8  ;;  %v11325_v16 = vpop.f32.mrf.mxu0 }
 0x300   :  { %v8220_v1 = vpop.eup %8219  ;;  %8245 = vrcp.f32 %v3107_v18  ;;  %v2615_v38 = vmul.f32 1.442695, %v2186_v39  ;;  %v11321_v5 = vadd.f32 %v11180_v35, %v10998_v20  ;;  %v3685_v13 = vmul.f32 %v8204_v50, %v11005_v41 }
 0x301   :  { %v8222_v26 = vpop.eup %8221  ;;  %8247 = vrcp.f32 %v3106_v59  ;;  %v3108_v6 = vadd.f32 1.0, %v8220_v1  ;;  %v3705_v18 = vmul.f32 %v8218_v42, %v11048_v4  ;;  %v2205_v35 = vsub.f32 0.0, %v11317_v11  ;;  %v11340_v4 = vpop.f32.mrf.mxu1 }
 0x302   :  { %v8224_v7 = vpop.eup %8223  ;;  %8249 = vpow2.f32 %v2613_v48  ;;  %v2207_v59 = vsub.f32 0.0, %v11321_v5  ;;  %v2619_v28 = vmul.f32 1.442695, %v2188_v25  ;;  %v11337_v23 = vadd.f32 %v11212_v56, %v11033_v37  ;;  %v11342_v48 = vpop.f32.mrf.mxu0 }
 0x303   :  { %v8226_v3 = vpop.eup %8225  ;;  %8251 = vrcp.f32 %v3108_v6  ;;  %v3686_v21 = vmul.f32 %v8210_v40, %v11044_v62  ;;  %v2653_v2 = vmul.f32 1.442695, %v2205_v35  ;;  %v3688_v6 = vmul.f32 %v8212_v22, %v11055_v55 }
 0x304   :  { %v8228_v39 = vpop.eup %8227  ;;  %v3125_v1 = vadd.f32 1.0, %v8226_v3  ;;  %8253 = vpow2.f32 %v2617_v15  ;;  %v2657_v15 = vmul.f32 1.442695, %v2207_v59  ;;  %v2206_v25 = vsub.f32 0.0, %v11337_v23 }
 0x305   :  { %v8230_v41 = vpop.eup %8229  ;;  %v3127_v50 = vadd.f32 1.0, %v8228_v39  ;;  %8255 = vpow2.f32 %v2615_v38  ;;  %v4101_v56 = vadd.f32 %v3705_v18, %v3685_v13  ;;  %v11348_v62 = vadd.f32 %v11214_v14, %v11040_v34  ;;  %v11361_v39 = vpop.f32.mrf.mxu1 }
 0x306   :  { %v8232_v42 = vpop.eup %8231  ;;  %8257 = vrcp.f32 %v3125_v1  ;;  %v11352_v40 = vadd.f32 %v11232_v33, %v10994_v58  ;;  %v3707_v35 = vmul.f32 %v8222_v26, %v11078_v9  ;;  %v3706_v55 = vmul.f32 %v8224_v7, %v11086_v32  ;;  %v11363_v33 = vpop.f32.mrf.mxu0 }
 0x307   :  { %v8234_v3 = vpop.eup %8233  ;;  %8259 = vrcp.f32 %v3127_v50  ;;  %13905 = vst [vmem:[#allocation12_spill] sm:$0xff] %v11348_v62  ;;  %v11358_v22 = vadd.f32 %v11234_v63, %v10998_v20  ;;  %v2655_v59 = vmul.f32 1.442695, %v2206_v25  ;;  %v2208_v14 = vsub.f32 0.0, %v11348_v62  ;;  %v13908_v63 = vld [vmem:[#allocation26_spill] sm:$0xff] }
 0x308   :  { %13906 = vst [vmem:[#allocation38_spill] sm:$0xff] %v11352_v40  ;;  %v8236_v38 = vpop.eup %8235  ;;  %8261 = vpow2.f32 %v2619_v28  ;;  %v2225_v9 = vsub.f32 0.0, %v11352_v40  ;;  %v3708_v26 = vmul.f32 %v8230_v41, %v13908_v63  ;;  %v3725_v51 = vmul.f32 %v8232_v42, %v13911_v24 }
 0x309   :  { %13907 = vst [vmem:[#allocation34_spill] sm:$0xff] %v11358_v22  ;;  %v8238_v13 = vpop.eup %8237  ;;  %v3126_v18 = vadd.f32 1.0, %v8236_v38  ;;  %8263 = vpow2.f32 %v2653_v2  ;;  %v2227_v32 = vsub.f32 0.0, %v11358_v22  ;;  %v2659_v7 = vmul.f32 1.442695, %v2208_v14  ;;  %v11384_v14 = vpop.f32.mrf.mxu0 }
 0x30a   :  { %v8240_v1 = vpop.eup %8239  ;;  %v3128_v50 = vadd.f32 1.0, %v8238_v13  ;;  %8265 = vpow2.f32 %v2657_v15  ;;  %v11370_v2 = vadd.f32 %v11251_v19, %v11033_v37  ;;  %v2693_v38 = vmul.f32 1.442695, %v2225_v9  ;;  %v11382_v19 = vpop.f32.mrf.mxu1 }
 0x30b   :  { %v8242_v28 = vpop.eup %8241  ;;  %8267 = vrcp.f32 %v3126_v18  ;;  %v2697_v36 = vmul.f32 1.442695, %v2227_v32  ;;  %v11374_v15 = vadd.f32 %v11253_v49, %v11040_v34  ;;  %v11380_v18 = vadd.f32 %v11262_v60, %v10994_v58 }
 0x30c   :  { %13909 = vst [vmem:[#allocation37_spill] sm:$0xff] %v11370_v2  ;;  %v8244_v25 = vpop.eup %8243  ;;  %8269 = vrcp.f32 %v3128_v50  ;;  %v2226_v41 = vsub.f32 0.0, %v11370_v2  ;;  %v4127_v9 = vadd.f32 %v3707_v35, %v11330_v47  ;;  %v11390_v24 = vadd.f32 %v11264_v43, %v10998_v20  ;;  %v11394_v40 = vpop.f32.mrf.mxu1 }
 0x30d   :  { %13910 = vst [vmem:[#allocation40_spill] sm:$0xff] %v11374_v15  ;;  %v8246_v13 = vpop.eup %8245  ;;  %8271 = vpow2.f32 %v2655_v59  ;;  %v2228_v49 = vsub.f32 0.0, %v11374_v15  ;;  %v13913_v59 = vld [vmem:[#allocation28_spill] sm:$0xff]  ;;  %v2245_v63 = vsub.f32 0.0, %v11380_v18  ;;  %v4114_v46 = vadd.f32 %v3706_v55, %v3686_v21  ;;  %v11396_v43 = vpop.f32.mrf.mxu0 }
 0x30e   :  { %v8248_v50 = vpop.eup %8247  ;;  %8273 = vpow2.f32 %v2659_v7  ;;  %13912 = vst [vmem:[#allocation39_spill] sm:$0xff] %v11390_v24  ;;  %v3727_v32 = vmul.f32 %v8234_v3, %v13913_v59  ;;  %v2695_v60 = vmul.f32 1.442695, %v2226_v41  ;;  %v4140_v35 = vadd.f32 %v3708_v26, %v3688_v6  ;;  %v13917_v59 = vld [vmem:[#allocation30_spill] sm:$0xff] }
 0x30f   :  { %v8250_v42 = vpop.eup %8249  ;;  %8275 = vpow2.f32 %v2693_v38  ;;  %v2699_v22 = vmul.f32 1.442695, %v2228_v49  ;;  %v4102_v7 = vadd.f32 %v4101_v56, %v3725_v51  ;;  %v2733_v15 = vmul.f32 1.442695, %v2245_v63  ;;  %v13916_v56 = vld [vmem:[#allocation29_spill] sm:$0xff] }
 0x310   :  { %v8252_v29 = vpop.eup %8251  ;;  %v3145_v2 = vadd.f32 1.0, %v8250_v42  ;;  %8277 = vpow2.f32 %v2697_v36  ;;  %v2247_v38 = vsub.f32 0.0, %v11390_v24  ;;  %v11401_v21 = vadd.f32 %v11278_v31, %v11033_v37  ;;  %v13918_v31 = vld [vmem:[#allocation9_spill] sm:$0xff] }
 0x311   :  { %v8254_v47 = vpop.eup %8253  ;;  %8279 = vpow2.f32 %v2695_v60  ;;  %v4128_v55 = vadd.f32 %v4127_v9, %v3727_v32  ;;  %v11405_v51 = vadd.f32 %v11280_v30, %v11040_v34  ;;  %v3726_v26 = vmul.f32 %v8240_v1, %v13916_v56  ;;  %v11414_v9 = vpop.f32.mrf.mxu0  ;;  %v13919_v32 = vld [vmem:[#allocation31_spill] sm:$0xff]  ;;  %v13920_v1 = vld [vmem:[#allocation32_spill] sm:$0xff] }
 0x312   :  { %v8256_v62 = vpop.eup %8255  ;;  %8281 = vrcp.f32 %v3145_v2  ;;  %v3147_v3 = vadd.f32 1.0, %v8254_v47  ;;  %13914 = vst [vmem:[#allocation35_spill] sm:$0xff] %v11401_v21  ;;  %v2737_v2 = vmul.f32 1.442695, %v2247_v38  ;;  %v2246_v49 = vsub.f32 0.0, %v11401_v21 }
 0x313   :  { %v8258_v36 = vpop.eup %8257  ;;  %v3146_v41 = vadd.f32 1.0, %v8256_v62  ;;  %8283 = vpow2.f32 %v2699_v22  ;;  %13915 = vst [vmem:[#allocation14_spill] sm:$0xff] %v11405_v51  ;;  %v3728_v60 = vmul.f32 %v8242_v28, %v13917_v59  ;;  %v3745_v63 = vmul.f32 %v8244_v25, %v13918_v31  ;;  %v11412_v22 = vpop.f32.mrf.mxu1 }
 0x314   :  { %v8260_v6 = vpop.eup %8259  ;;  %8285 = vrcp.f32 %v3147_v3  ;;  %v2248_v62 = vsub.f32 0.0, %v11405_v51  ;;  %v3747_v47 = vmul.f32 %v8246_v13, %v13919_v32  ;;  %v3746_v3 = vmul.f32 %v8248_v50, %v13920_v1 }
 0x315   :  { %v8262_v42 = vpop.eup %8261  ;;  %8287 = vrcp.f32 %v3146_v41  ;;  %v3748_v21 = vmul.f32 %v8252_v29, %v11202_v53  ;;  %v2735_v25 = vmul.f32 1.442695, %v2246_v49  ;;  %v11421_v51 = vadd.f32 %v11304_v27, %v10994_v58  ;;  %v11428_v53 = vpop.f32.mrf.mxu1 }
 0x316   :  { %v8264_v30 = vpop.eup %8263  ;;  %v3148_v38 = vadd.f32 1.0, %v8262_v42  ;;  %8289 = vpow2.f32 %v2733_v15  ;;  %v2739_v31 = vmul.f32 1.442695, %v2248_v62  ;;  %v13921_v13 = vrot.slane %v11286_v61, 4  ;;  %v11430_v29 = vpop.f32.mrf.mxu0 }
 0x317   :  { %v8266_v56 = vpop.eup %8265  ;;  %v3165_v28 = vadd.f32 1.0, %v8264_v30  ;;  %8291 = vpow2.f32 %v2737_v2  ;;  %v4115_v15 = vadd.f32 %v4114_v46, %v3726_v26  ;;  %v4141_v42 = vadd.f32 %v4140_v35, %v3728_v60 }
 0x318   :  { %v8268_v41 = vpop.eup %8267  ;;  %8293 = vrcp.f32 %v3148_v38  ;;  %v3167_v59 = vadd.f32 1.0, %v8266_v56  ;;  %v11426_v50 = vadd.f32 %v13921_v13, %v11286_v61  ;;  %v4103_v49 = vadd.f32 %v4102_v7, %v3745_v63 }
 0x319   :  { %v8270_v24 = vpop.eup %8269  ;;  %8295 = vrcp.f32 %v3165_v28  ;;  %v4129_v62 = vadd.f32 %v4128_v55, %v3747_v47  ;;  %v11434_v27 = vadd.f32 %v11306_v52, %v10998_v20  ;;  %v4116_v32 = vadd.f32 %v4115_v15, %v3746_v3  ;;  %v11443_v47 = vpop.f32.mrf.mxu1 }
 0x31a   :  { %v8272_v2 = vpop.eup %8271  ;;  %8297 = vrcp.f32 %v3167_v59  ;;  %v4142_v1 = vadd.f32 %v4141_v42, %v3748_v21  ;;  %v2265_v26 = vsub.f32 0.0, %v11421_v51  ;;  %v11439_v60 = vadd.f32 %v11323_v54, %v11033_v37  ;;  %v11445_v21 = vpop.f32.mrf.mxu0 }
 0x31b   :  { %v8274_v30 = vpop.eup %8273  ;;  %v3166_v61 = vadd.f32 1.0, %v8272_v2  ;;  %8299 = vpow2.f32 %v2735_v25  ;;  %v3765_v55 = vmul.f32 %v8258_v36, %v11243_v10  ;;  %v3767_v52 = vmul.f32 %v8260_v6, %v11247_v57  ;;  %v11466_v42 = vpop.f32.mrf.mxu1 }
 0x31c   :  { %v8276_v46 = vpop.eup %8275  ;;  %v3168_v35 = vadd.f32 1.0, %v8274_v30  ;;  %8301 = vpow2.f32 %v2739_v31  ;;  %v2267_v56 = vsub.f32 0.0, %v11434_v27  ;;  %v11450_v54 = vadd.f32 %v11325_v16, %v11040_v34  ;;  %v11468_v2 = vpop.f32.mrf.mxu0 }
 0x31d   :  { %v8278_v7 = vpop.eup %8277  ;;  %8303 = vrcp.f32 %v3166_v61  ;;  %v3185_v63 = vadd.f32 1.0, %v8276_v46  ;;  %v11454_v57 = vadd.f32 %v11340_v4, %v10994_v58  ;;  %v11458_v36 = vadd.f32 %v11342_v48, %v10998_v20 }
 0x31e   :  { %v8280_v3 = vpop.eup %8279  ;;  %8305 = vrcp.f32 %v3168_v35  ;;  %v3187_v38 = vadd.f32 1.0, %v8278_v7  ;;  %v2773_v25 = vmul.f32 1.442695, %v2265_v26  ;;  %v2266_v59 = vsub.f32 0.0, %v11439_v60 }
 0x31f   :  { %v8282_v28 = vpop.eup %8281  ;;  %8307 = vrcp.f32 %v3185_v63  ;;  %v3186_v10 = vadd.f32 1.0, %v8280_v3  ;;  %v11463_v16 = vadd.f32 %v11361_v39, %v11033_v37  ;;  %v4104_v13 = vadd.f32 %v4103_v49, %v3765_v55 }
 0x320   :  { %v8284_v6 = vpop.eup %8283  ;;  %8309 = vrcp.f32 %v3187_v38  ;;  %v3766_v15 = vmul.f32 %v8268_v41, %v11260_v17  ;;  %v3768_v30 = vmul.f32 %v8270_v24, %v11268_v45  ;;  %v3785_v61 = vmul.f32 %v8282_v28, %v11284_v0  ;;  %v11484_v28 = vpop.f32.mrf.mxu0 }
 0x321   :  { %v8286_v31 = vpop.eup %8285  ;;  %8311 = vrcp.f32 %v3186_v10  ;;  %v3188_v4 = vadd.f32 1.0, %v8284_v6  ;;  %v2777_v46 = vmul.f32 1.442695, %v2267_v56  ;;  %v2268_v35 = vsub.f32 0.0, %v11450_v54  ;;  %v11482_v56 = vpop.f32.mrf.mxu1 }
 0x322   :  { %v8288_v48 = vpop.eup %8287  ;;  %v2285_v49 = vsub.f32 0.0, %v11454_v57  ;;  %v2287_v17 = vsub.f32 0.0, %v11458_v36  ;;  %v11477_v41 = vadd.f32 %v11363_v33, %v11040_v34  ;;  %v4130_v7 = vadd.f32 %v4129_v62, %v3767_v52  ;;  %v7507_v52 = vld [vmem:[%s13563_s5 + $0x278] sm:$0xff]  }
 0x323   :  { %v8290_v39 = vpop.eup %8289  ;;  %8313 = vrcp.f32 %v3188_v4  ;;  %v2775_v55 = vmul.f32 1.442695, %v2266_v59  ;;  %v2286_v45 = vsub.f32 0.0, %v11463_v16  ;;  %v4117_v24 = vadd.f32 %v4116_v32, %v3766_v15  ;;  %7153 = vmatprep.subr.bf16.mxu1 %v7507_v52 }
 0x324   :  { %v8292_v26 = vpop.eup %8291  ;;  %8315 = vpow2.f32 %v2773_v25  ;;  %v3787_v63 = vmul.f32 %v8286_v31, %v11290_v12  ;;  %v3786_v3 = vmul.f32 %v8288_v48, %v11302_v44  ;;  %v3205_v38 = vadd.f32 1.0, %v8290_v39  ;;  %v7508_v12 = vld [vmem:[%s13563_s5 + $0x2f8] sm:$0xff]   ;;  %v11501_v39 = vpop.f32.mrf.mxu0 }
 0x325   :  { %v8294_v0 = vpop.eup %8293  ;;  %v4143_v33 = vadd.f32 %v4142_v1, %v3768_v30  ;;  %v3207_v6 = vadd.f32 1.0, %v8292_v26  ;;  %8317 = vpow2.f32 %v2777_v46  ;;  %v2779_v62 = vmul.f32 1.442695, %v2268_v35  ;;  %7175 = vmatprep.subr.bf16.mxu0 %v7508_v12  ;;  %v13924_v12 = vld [vmem:[#allocation34_spill] sm:$0xff] }
 0x326   :  { %v8296_v10 = vpop.eup %8295  ;;  %v4105_v44 = vadd.f32 %v4104_v13, %v3785_v61  ;;  %v2813_v25 = vmul.f32 1.442695, %v2285_v49  ;;  %v2817_v59 = vmul.f32 1.442695, %v2287_v17  ;;  %v2288_v31 = vsub.f32 0.0, %v11477_v41  ;;  %v11499_v61 = vpop.f32.mrf.mxu1 }
 0x327   :  { %v8298_v32 = vpop.eup %8297  ;;  %v3788_v1 = vmul.f32 %v8294_v0, %v11310_v8  ;;  %8319 = vpow2.f32 %v2775_v55  ;;  %v2815_v4 = vmul.f32 1.442695, %v2286_v45  ;;  %v11496_v48 = vadd.f32 %v11382_v19, %v10994_v58 }
 0x328   :  { %v8300_v15 = vpop.eup %8299  ;;  %v4131_v46 = vadd.f32 %v4130_v7, %v3787_v63  ;;  %v4118_v35 = vadd.f32 %v4117_v24, %v3786_v3  ;;  %v3805_v13 = vmul.f32 %v8296_v10, %v11317_v11  ;;  %8321 = vrcp.f32 %v3205_v38  ;;  %v13922_v38 = vld [vmem:[#allocation12_spill] sm:$0xff]  ;;  %v13923_v10 = vld [vmem:[#allocation38_spill] sm:$0xff] }
 0x329   :  { %v8302_v30 = vpop.eup %8301  ;;  %v3807_v8 = vmul.f32 %v8298_v32, %v11321_v5  ;;  %8323 = vrcp.f32 %v3207_v6  ;;  %v3206_v17 = vadd.f32 1.0, %v8300_v15  ;;  %v11506_v19 = vadd.f32 %v11384_v14, %v10998_v20  ;;  %v13925_v15 = vld [vmem:[#allocation37_spill] sm:$0xff] }
 0x32a   :  { %v8304_v49 = vpop.eup %8303  ;;  %8325 = vpow2.f32 %v2779_v62  ;;  %v2819_v55 = vmul.f32 1.442695, %v2288_v31  ;;  %v11511_v11 = vadd.f32 %v11394_v40, %v11033_v37  ;;  %v4144_v0 = vadd.f32 %v4143_v33, %v3788_v1  ;;  %v11518_v62 = vpop.f32.mrf.mxu0 }
 0x32b   :  { %v8306_v26 = vpop.eup %8305  ;;  %v3806_v7 = vmul.f32 %v8304_v49, %v11337_v23  ;;  %v3208_v24 = vadd.f32 1.0, %v8302_v30  ;;  %8327 = vpow2.f32 %v2813_v25  ;;  %v2305_v5 = vsub.f32 0.0, %v11496_v48  ;;  %v11516_v23 = vpop.f32.mrf.mxu1 }
 0x32c   :  { %v8308_v45 = vpop.eup %8307  ;;  %v4106_v3 = vadd.f32 %v4105_v44, %v3805_v13  ;;  %v3808_v14 = vmul.f32 %v8306_v26, %v13922_v38  ;;  %8329 = vpow2.f32 %v2817_v59  ;;  %v4132_v40 = vadd.f32 %v4131_v46, %v3807_v8 }
 0x32d   :  { %v8310_v63 = vpop.eup %8309  ;;  %v3825_v6 = vmul.f32 %v8308_v45, %v13923_v10  ;;  %8331 = vrcp.f32 %v3206_v17  ;;  %v2307_v33 = vsub.f32 0.0, %v11506_v19  ;;  %v4119_v25 = vadd.f32 %v4118_v35, %v3806_v7  ;;  %v13927_v45 = vld [vmem:[#allocation40_spill] sm:$0xff]  ;;  %v11529_v35 = vpop.f32.mrf.mxu1 }
 0x32e   :  { %v8312_v52 = vpop.eup %8311  ;;  %v3827_v32 = vmul.f32 %v8310_v63, %v13924_v12  ;;  %v2306_v1 = vsub.f32 0.0, %v11511_v11  ;;  %8333 = vrcp.f32 %v3208_v24  ;;  %v2853_v59 = vmul.f32 1.442695, %v2305_v5  ;;  %v11531_v7 = vpop.f32.mrf.mxu0 }
 0x32f   :  { %v4107_v31 = vadd.f32 %v4106_v3, %v3825_v6  ;;  %v3826_v44 = vmul.f32 %v8312_v52, %v13925_v15  ;;  %v11526_v49 = vadd.f32 %v11396_v43, %v11040_v34  ;;  %v4145_v8 = vadd.f32 %v4144_v0, %v3808_v14  ;;  %v13928_v3 = vld [vmem:[#allocation11_spill] sm:$0xff] }
 0x330   :  { %v8314_v30 = vpop.eup %8313  ;;  %v4133_v13 = vadd.f32 %v4132_v40, %v3827_v32  ;;  %v13929_v38 = vrot.slane %v13928_v3, 4  ;;  %8335 = vpow2.f32 %v2815_v4  ;;  %v2857_v5 = vmul.f32 1.442695, %v2307_v33 }
 0x331   :  { %13926 = vst [vmem:[#allocation43_spill] sm:$0xff] %v11526_v49  ;;  %v8316_v46 = vpop.eup %8315  ;;  %v4108_v26 = vrot.slane %v4107_v31, 4  ;;  %v4120_v17 = vadd.f32 %v4119_v25, %v3826_v44  ;;  %v3828_v63 = vmul.f32 %v8314_v30, %v13927_v45  ;;  %v2855_v14 = vmul.f32 1.442695, %v2306_v1  ;;  %v11539_v45 = vpop.f32.mrf.mxu1 }
 0x332   :  { %v11536_v10 = vadd.f32 %v13929_v38, %v13928_v3  ;;  %v4134_v24 = vrot.slane %v4133_v13, 4  ;;  %v8318_v43 = vpop.eup %8317  ;;  %v3225_v12 = vadd.f32 1.0, %v8316_v46  ;;  %8337 = vpow2.f32 %v2819_v55  ;;  %v11541_v3 = vpop.f32.mrf.mxu0 }
 0x333   :  { %v4109_v6 = vadd.f32 %v4108_v26, %v4107_v31  ;;  %v4121_v52 = vrot.slane %v4120_v17, 4  ;;  %v4146_v0 = vadd.f32 %v4145_v8, %v3828_v63  ;;  %v2308_v32 = vsub.f32 0.0, %v11526_v49  ;;  %13930 = vst [vmem:[#allocation13_spill] sm:$0xff] %v11541_v3 }
 0x334   :  { %v4135_v40 = vadd.f32 %v4134_v24, %v4133_v13  ;;  %v8320_v25 = vpop.eup %8319  ;;  %8339 = vpow2.f32 %v2853_v59  ;;  %v3227_v31 = vadd.f32 1.0, %v8318_v43  ;;  %v11547_v1 = vadd.f32 %v11412_v22, %v10994_v58 }
 0x335   :  { %v4110_v15 = vrot.slane %v4109_v6, 2  ;;  %v4122_v44 = vadd.f32 %v4121_v52, %v4120_v17  ;;  %v4147_v30 = vrot.slane %v4146_v0, 4  ;;  %v11543_v4 = vpop.eup %8321  ;;  %8341 = vpow2.f32 %v2857_v5  ;;  %v11561_v52 = vpop.f32.mrf.mxu0 }
 0x336   :  { %v4136_v33 = vrot.slane %v4135_v40, 2  ;;  %13931 = vst [vmem:[#allocation46_spill] sm:$0xff] %v11547_v1  ;;  %v11549_v55 = vpop.eup %8323  ;;  %8343 = vpow2.f32 %v2855_v14  ;;  %v2859_v17 = vmul.f32 1.442695, %v2308_v32  ;;  %v11553_v63 = vadd.f32 %v11414_v9, %v10998_v20  ;;  %13934 = vst [vmem:[#allocation24_spill] sm:$0xff] %v11561_v52 }
 0x337   :  { %v4111_v13 = vadd.f32 %v4110_v15, %v4109_v6  ;;  %v4123_v46 = vrot.slane %v4122_v44, 2  ;;  %v4148_v8 = vadd.f32 %v4147_v30, %v4146_v0  ;;  %v8326_v59 = vpop.eup %8325  ;;  %8345 = vrcp.f32 %v3225_v12  ;;  %v11559_v6 = vpop.f32.mrf.mxu1 }
 0x338   :  { %v4137_v26 = vadd.f32 %v4136_v33, %v4135_v40  ;;  %v8328_v38 = vpop.eup %8327  ;;  %v11557_v22 = vadd.f32 %v11428_v53, %v11033_v37  ;;  %13933 = vst [vmem:[#allocation22_spill] sm:$0xff] %v11559_v6  ;;  %8347 = vrcp.f32 %v3227_v31  ;;  %v3226_v40 = vadd.f32 1.0, %v8320_v25  ;;  %v11573_v3 = vpop.f32.mrf.mxu0 }
 0x339   :  { %v4112_v24 = vrot.slane %v4111_v13, 1  ;;  %v4124_v5 = vadd.f32 %v4123_v46, %v4122_v44  ;;  %v4149_v43 = vrot.slane %v4148_v8, 2  ;;  %v8330_v0 = vpop.eup %8329  ;;  %v2325_v12 = vsub.f32 0.0, %v11547_v1  ;;  %v11571_v1 = vpop.f32.mrf.mxu1 }
 0x33a   :  { %13932 = vst [vmem:[#allocation36_spill] sm:$0xff] %v11557_v22  ;;  %v4138_v14 = vrot.slane %v4137_v26, 1  ;;  %v11564_v9 = vpop.eup %8331  ;;  %v3228_v30 = vadd.f32 1.0, %v8326_v59  ;;  %v4331_v33 = vrot.slane %v11426_v50, 2  ;;  %v3245_v53 = vadd.f32 1.0, %v8328_v38 }
 0x33b   :  { %v4113_v32 = vadd.f32 %v4112_v24, %v4111_v13  ;;  %v4125_v15 = vrot.slane %v4124_v5, 1  ;;  %v4150_v44 = vadd.f32 %v4149_v43, %v4148_v8  ;;  %8349 = vpow2.f32 %v2859_v17  ;;  %v11568_v49 = vpop.eup %8333 }
 0x33c   :  { %v2327_v46 = vsub.f32 0.0, %v11553_v63  ;;  %v4139_v52 = vadd.f32 %v4138_v14, %v4137_v26  ;;  %v2326_v25 = vsub.f32 0.0, %v11557_v22  ;;  %v4357_v13 = vrot.slane %v11536_v10, 2  ;;  %v13937_v26 = vld [vmem:[#allocation33_spill] sm:$0xff] }
 0x33d   :  { %v4126_v6 = vadd.f32 %v4125_v15, %v4124_v5  ;;  %v4151_v31 = vrot.slane %v4150_v44, 1  ;;  %8351 = vrcp.f32 %v3226_v40  ;;  %v3247_v8 = vadd.f32 1.0, %v8330_v0  ;;  %v8336_v38 = vpop.eup %8335 }
 0x33e   :  { %v2893_v59 = vmul.f32 1.442695, %v2325_v12  ;;  %v11576_v17 = vmul.f32 0.015625, %v4113_v32  ;;  %8353 = vrcp.f32 %v3228_v30  ;;  %v13938_v5 = vpack.c.bf16 %v13937_v26, %v13937_v26  ;;  %v11596_v30 = vpop.f32.mrf.mxu0 }
 0x33f   :  { %v11578_v24 = vmul.f32 0.015625, %v4126_v6  ;;  %v4152_v43 = vadd.f32 %v4151_v31, %v4150_v44  ;;  %v11586_v15 = vadd.f32 %v4331_v33, %v11426_v50  ;;  %8355 = vrcp.f32 %v3245_v53  ;;  %v8338_v40 = vpop.eup %8337  ;;  %v11594_v44 = vpop.f32.mrf.mxu1  ;;  %13942 = vst [vmem:[#allocation9_spill] sm:$0xff] %v11596_v30 }
 0x340   :  { %13935 = vst [vmem:[#allocation26_spill] sm:$0xff] %v11576_v17  ;;  %v11583_v14 = vunpack.c.l.b16 %v13938_v5  ;;  %v2897_v22 = vmul.f32 1.442695, %v2327_v46  ;;  %v11588_v0 = vmul.f32 0.015625, %v4139_v52  ;;  %v2895_v32 = vmul.f32 1.442695, %v2326_v25 }
 0x341   :  { %13936 = vst [vmem:[#allocation27_spill] sm:$0xff] %v11578_v24  ;;  %v4632_v12 = vcombine.low %v11576_v17, %v11578_v24  ;;  %v11592_v6 = vmul.f32 0.015625, %v4152_v43  ;;  %13941 = vst [vmem:[#allocation30_spill] sm:$0xff] %v11594_v44  ;;  %v8340_v31 = vpop.eup %8339  ;;  %v13943_v5 = vld [vmem:[#allocation10_spill] sm:$0xff]  ;;  %v11604_v53 = vadd.f32 %v4357_v13, %v11536_v10  ;;  %8357 = vrcp.f32 %v3247_v8  ;;  %v13945_v24 = vld [vmem:[#allocation20_spill] sm:$0xff] }
 0x342   :  { %13939 = vst [vmem:[#allocation28_spill] sm:$0xff] %v11588_v0  ;;  %v13944_v50 = vpack.c.bf16 %v13943_v5, %v13943_v5  ;;  %v3246_v52 = vadd.f32 1.0, %v8336_v38  ;;  %v8342_v46 = vpop.eup %8341  ;;  %8359 = vpow2.f32 %v2893_v59  ;;  %v11613_v17 = vadd.f32 %v11430_v29, %v11040_v34  ;;  %v11628_v38 = vpop.f32.mrf.mxu1 }
 0x343   :  { %13940 = vst [vmem:[#allocation29_spill] sm:$0xff] %v11592_v6  ;;  %v11607_v43 = vrot.slane %v4632_v12, %v13945_v24  ;;  %v4633_v25 = vcombine.low %v11588_v0, %v11592_v6  ;;  %v8344_v30 = vpop.eup %8343  ;;  %v3248_v44 = vadd.f32 1.0, %v8338_v40  ;;  %8361 = vpow2.f32 %v2897_v22  ;;  %13948 = vst [vmem:[#allocation12_spill] sm:$0xff] %v11628_v38  ;;  %v11630_v12 = vpop.f32.mrf.mxu0 }
 0x344   :  { %v11601_v33 = vunpack.c.l.b16 %v13944_v50  ;;  %v11618_v10 = vadd.f32 %v11443_v47, %v10994_v58  ;;  %v8346_v13 = vpop.eup %8345  ;;  %8363 = vpow2.f32 %v2895_v32  ;;  %v2328_v59 = vsub.f32 0.0, %v11613_v17  ;;  %13949 = vst [vmem:[#allocation38_spill] sm:$0xff] %v11630_v12  ;;  %v13950_v12 = vld [vmem:[#allocation39_spill] sm:$0xff] }
 0x345   :  { %13946 = vst [vmem:[#allocation31_spill] sm:$0xff] %v11607_v43  ;;  %v11621_v8 = vrot.slane %v4633_v25, %v13945_v24  ;;  %v11626_v29 = vadd.f32 %v11445_v21, %v10998_v20  ;;  %8365 = vrcp.f32 %v3246_v52  ;;  %v3265_v22 = vadd.f32 1.0, %v8340_v31  ;;  %v8348_v25 = vpop.eup %8347  ;;  %v11652_v43 = vpop.f32.mrf.mxu0 }
 0x346   :  { %v2345_v47 = vsub.f32 0.0, %v11618_v10  ;;  %v11635_v40 = vadd.f32 %v11466_v42, %v11033_v37  ;;  %v2899_v50 = vmul.f32 1.442695, %v2328_v59  ;;  %v11642_v6 = vadd.f32 %v11468_v2, %v11040_v34  ;;  %13951 = vst [vmem:[#allocation34_spill] sm:$0xff] %v11652_v43  ;;  %v13952_v2 = vld [vmem:[#allocation35_spill] sm:$0xff] }
 0x347   :  { %13947 = vst [vmem:[#allocation32_spill] sm:$0xff] %v11621_v8  ;;  %v2347_v21 = vsub.f32 0.0, %v11626_v29  ;;  %v3845_v31 = vmul.f32 %v11543_v4, %v11380_v18  ;;  %8367 = vrcp.f32 %v3248_v44  ;;  %v3847_v38 = vmul.f32 %v11549_v55, %v13950_v12  ;;  %v11650_v8 = vpop.f32.mrf.mxu1 }
 0x348   :  { %v2933_v0 = vmul.f32 1.442695, %v2345_v47  ;;  %v8350_v42 = vpop.eup %8349  ;;  %v3865_v32 = vmul.f32 %v8346_v13, %v11421_v51  ;;  %v3267_v59 = vadd.f32 1.0, %v8342_v46  ;;  %8369 = vpow2.f32 %v2899_v50 }
 0x349   :  { %v11656_v52 = vmul.f32 %v11564_v9, %v13952_v2  ;;  %8371 = vrcp.f32 %v3265_v22  ;;  %v2937_v18 = vmul.f32 1.442695, %v2347_v21  ;;  %v2346_v4 = vsub.f32 0.0, %v11635_v40  ;;  %v11680_v21 = vpop.f32.mrf.mxu1 }
 0x34a   :  { %v8352_v44 = vpop.eup %8351  ;;  %v3867_v47 = vmul.f32 %v8348_v25, %v11434_v27  ;;  %v3266_v55 = vadd.f32 1.0, %v8344_v30  ;;  %v2348_v51 = vsub.f32 0.0, %v11642_v6  ;;  %v11663_v46 = vadd.f32 %v11482_v56, %v10994_v58  ;;  %v13954_v27 = vld [vmem:[#allocation14_spill] sm:$0xff]  ;;  %13955 = vst [vmem:[#allocation40_spill] sm:$0xff] %v11680_v21 }
 0x34b   :  { %v8354_v50 = vpop.eup %8353  ;;  %v3268_v13 = vadd.f32 1.0, %v8350_v42  ;;  %8373 = vpow2.f32 %v2933_v0  ;;  %v11667_v9 = vadd.f32 %v11484_v28, %v10998_v20  ;;  %v11671_v12 = vadd.f32 %v11499_v61, %v11033_v37  ;;  %v11682_v0 = vpop.f32.mrf.mxu0 }
 0x34c   :  { %v8356_v22 = vpop.eup %8355  ;;  %v11675_v30 = vmul.f32 %v11568_v49, %v13954_v27  ;;  %v11677_v25 = vadd.f32 %v3865_v32, %v3845_v31  ;;  %8375 = vrcp.f32 %v3267_v59  ;;  %v2365_v56 = vsub.f32 0.0, %v11663_v46  ;;  %13956 = vst [vmem:[#allocation11_spill] sm:$0xff] %v11682_v0 }
 0x34d   :  { %13953 = vst [vmem:[#allocation37_spill] sm:$0xff] %v11667_v9  ;;  %8377 = vpow2.f32 %v2937_v18  ;;  %v2935_v28 = vmul.f32 1.442695, %v2346_v4  ;;  %v2367_v42 = vsub.f32 0.0, %v11667_v9  ;;  %v11687_v61 = vadd.f32 %v11501_v39, %v11040_v34  ;;  %v11693_v39 = vpop.f32.mrf.mxu1 }
 0x34e   :  { %v8358_v2 = vpop.eup %8357  ;;  %8379 = vrcp.f32 %v3266_v55  ;;  %v2939_v49 = vmul.f32 1.442695, %v2348_v51  ;;  %v2973_v32 = vmul.f32 1.442695, %v2365_v56  ;;  %v2366_v31 = vsub.f32 0.0, %v11671_v12  ;;  %v11695_v55 = vpop.f32.mrf.mxu0 }
 0x34f   :  { %13957 = vst [vmem:[#allocation33_spill] sm:$0xff] %v11687_v61  ;;  %v8360_v59 = vpop.eup %8359  ;;  %v4387_v27 = vadd.f32 %v3867_v47, %v3847_v38  ;;  %v3866_v21 = vmul.f32 %v8352_v44, %v11439_v60  ;;  %8381 = vrcp.f32 %v3268_v13  ;;  %v2977_v0 = vmul.f32 1.442695, %v2367_v42  ;;  %v13961_v42 = vld [vmem:[#allocation42_spill] sm:$0xff] }
 0x350   :  { %v8362_v18 = vpop.eup %8361  ;;  %v3868_v4 = vmul.f32 %v8354_v50, %v11450_v54  ;;  %v3885_v43 = vmul.f32 %v8356_v22, %v11454_v57  ;;  %v3285_v9 = vadd.f32 1.0, %v8360_v59  ;;  %8383 = vpow2.f32 %v2973_v32  ;;  %v13958_v50 = vld [vmem:[#allocation41_spill] sm:$0xff] }
 0x351   :  { %v8364_v51 = vpop.eup %8363  ;;  %v3887_v56 = vmul.f32 %v8358_v2, %v11458_v36  ;;  %8385 = vpow2.f32 %v2935_v28  ;;  %v2975_v38 = vmul.f32 1.442695, %v2366_v31  ;;  %v2368_v60 = vsub.f32 0.0, %v11687_v61  ;;  %v11724_v31 = vpop.f32.mrf.mxu0 }
 0x352   :  { %v11699_v44 = vpop.eup %8365  ;;  %v3287_v47 = vadd.f32 1.0, %v8362_v18  ;;  %8387 = vpow2.f32 %v2939_v49  ;;  %v11703_v54 = vadd.f32 %v11516_v23, %v10994_v58  ;;  %v11707_v57 = vadd.f32 %v11518_v62, %v10998_v20  ;;  %13965 = vst [vmem:[#allocation39_spill] sm:$0xff] %v11724_v31 }
 0x353   :  { %8389 = vpow2.f32 %v2977_v0  ;;  %v13959_v36 = vrot.slane %v13958_v50, 1  ;;  %v13960_v22 = vrot.slane %v11586_v15, 1  ;;  %v13962_v2 = vrot.slane %v13961_v42, 1  ;;  %v11722_v0 = vpop.f32.mrf.mxu1 }
 0x354   :  { %v8368_v32 = vpop.eup %8367  ;;  %8391 = vrcp.f32 %v3285_v9  ;;  %v3286_v58 = vadd.f32 1.0, %v8364_v51  ;;  %v2385_v23 = vsub.f32 0.0, %v11703_v54  ;;  %v13963_v20 = vrot.slane %v11604_v53, 1  ;;  %13964 = vst [vmem:[#allocation10_spill] sm:$0xff] %v11722_v0  ;;  %v11736_v0 = vpop.f32.mrf.mxu0 }
 0x355   :  { %v4074_v13 = vadd.f32 %v13959_v36, %v13958_v50  ;;  %v4334_v28 = vadd.f32 %v13960_v22, %v11586_v15  ;;  %v4100_v49 = vadd.f32 %v13962_v2, %v13961_v42  ;;  %v8370_v59 = vpop.eup %8369  ;;  %8393 = vpow2.f32 %v2975_v38 }
 0x356   :  { %v4360_v62 = vadd.f32 %v13963_v20, %v11604_v53  ;;  %v2979_v15 = vmul.f32 1.442695, %v2368_v60  ;;  %v11726_v36 = vpop.eup %8371  ;;  %v11729_v9 = vadd.f32 %v3866_v21, %v11656_v52  ;;  %8395 = vrcp.f32 %v3287_v47  ;;  %v13966_v53 = vld [vmem:[#allocation44_spill] sm:$0xff] }
 0x357   :  { %v4523_v18 = vmul.f32 0.015625, %v4074_v13  ;;  %v4543_v50 = vmul.f32 0.015625, %v4334_v28  ;;  %v3288_v51 = vadd.f32 1.0, %v8370_v59  ;;  %v2387_v22 = vsub.f32 0.0, %v11707_v57  ;;  %v11734_v28 = vpop.f32.mrf.mxu1 }
 0x358   :  { %v3013_v42 = vmul.f32 1.442695, %v2385_v23  ;;  %v4525_v61 = vmul.f32 0.015625, %v4100_v49  ;;  %v8374_v31 = vpop.eup %8373  ;;  %8397 = vrcp.f32 %v3286_v58  ;;  %v4545_v13 = vmul.f32 0.015625, %v4360_v62 }
 0x359   :  { %v4615_v2 = vcombine.low %v13966_v53, %v4523_v18  ;;  %v4824_v20 = vpack.c.bf16 %v4523_v18, %v4523_v18  ;;  %v4700_v38 = vcombine.low %v13937_v26, %v4543_v50  ;;  %v4844_v60 = vpack.c.bf16 %v4543_v50, %v4543_v50  ;;  %v8376_v52 = vpop.eup %8375 }
 0x35a   :  { %v11739_v21 = vadd.f32 %v3868_v4, %v11675_v30  ;;  %v11742_v47 = vadd.f32 %v11677_v25, %v3885_v43  ;;  %v11744_v23 = vadd.f32 %v4387_v27, %v3887_v56  ;;  %8399 = vpow2.f32 %v2979_v15  ;;  %v8378_v49 = vpop.eup %8377  ;;  %v13968_v30 = vld [vmem:[#allocation45_spill] sm:$0xff]  ;;  %v11759_v15 = vpop.f32.mrf.mxu1 }
 0x35b   :  { %8401 = vrcp.f32 %v3288_v51  ;;  %v3017_v58 = vmul.f32 1.442695, %v2387_v22  ;;  %v5231_v26 = vunpack.c.l.b16 %v4824_v20  ;;  %v5251_v59 = vunpack.c.l.b16 %v4844_v60  ;;  %v11746_v62 = vpop.eup %8379  ;;  %v11761_v51 = vpop.f32.mrf.mxu0 }
 0x35c   :  { %v3305_v18 = vadd.f32 1.0, %v8374_v31  ;;  %8403 = vpow2.f32 %v3013_v42  ;;  %v11749_v50 = vrot.slane %v4615_v2, %v13945_v24  ;;  %v4616_v4 = vcombine.low %v13968_v30, %v4525_v61  ;;  %v11752_v53 = vpop.eup %8381 }
 0x35d   :  { %v11755_v43 = vrot.slane %v4700_v38, %v13945_v24  ;;  %v5271_v25 = vsel %vm4773_vm2, %v5251_v59, %v5231_v26  ;;  %v4701_v27 = vcombine.low %v13943_v5, %v4545_v13  ;;  %v4826_v56 = vpack.c.bf16 %v4525_v61, %v4525_v61  ;;  %v8384_v31 = vpop.eup %8383 }
 0x35e   :  { %13967 = vst [vmem:[#allocation35_spill] sm:$0xff] %v11749_v50  ;;  %v3307_v22 = vadd.f32 1.0, %v8378_v49  ;;  %v5291_v42 = vpack.c.b16 %v5271_v25, %v5271_v25  ;;  %v11764_v2 = vrot.slane %v4616_v4, %v13945_v24  ;;  %v4846_v20 = vpack.c.bf16 %v4545_v13, %v4545_v13  ;;  %v8386_v60 = vpop.eup %8385  ;;  %v13972_v4 = vld [vmem:[#allocation47_spill] sm:$0xff]  ;;  %v11784_v25 = vpop.f32.mrf.mxu1 }
 0x35f   :  { %13969 = vst [vmem:[#allocation14_spill] sm:$0xff] %v11755_v43  ;;  %v3886_v38 = vmul.f32 %v11699_v44, %v11463_v16  ;;  %v11769_v26 = vmul.f32 %v8368_v32, %v11477_v41  ;;  %8405 = vpow2.f32 %v3017_v58  ;;  %v11772_v5 = vrot.slane %v4701_v27, %v13945_v24  ;;  %v8388_v61 = vpop.eup %8387  ;;  %v7509_v16 = vld [vmem:[%s13563_s5 + $0x238] sm:$0xff]   ;;  %v11786_v27 = vpop.f32.mrf.mxu0 }
 0x360   :  { %13970 = vst [vmem:[#allocation41_spill] sm:$0xff] %v11764_v2  ;;  %6398 = vmatprep.mubr.bf16.mxu1 %v5291_v42  ;;  %v5233_v59 = vunpack.c.l.b16 %v4826_v56  ;;  %v5253_v30 = vunpack.c.l.b16 %v4846_v20  ;;  %v5270_v13 = vsel %vm4773_vm2, %v11583_v14, %v13972_v4  ;;  %v8390_v41 = vpop.eup %8389  ;;  %8407 = vrcp.f32 %v3305_v18  ;;  %v7511_v56 = vld [vmem:[%s13563_s5 + $0x270] sm:$0xff]  }
 0x361   :  { %13971 = vst [vmem:[#allocation42_spill] sm:$0xff] %v11772_v5  ;;  %v3325_v44 = vadd.f32 1.0, %v8384_v31  ;;  %v5290_v58 = vpack.c.b16 %v5270_v13, %v5270_v13  ;;  %v11791_v14 = vpop.eup %8391  ;;  %8409 = vrcp.f32 %v3307_v22  ;;  %v3306_v42 = vadd.f32 1.0, %v8386_v60  ;;  %v13973_v18 = vld [vmem:[#allocation48_spill] sm:$0xff]  ;;  %v7510_v22 = vld [vmem:[%s13563_s5 + $0x2b8] sm:$0xff]  }
 0x362   :  { %v5273_v20 = vsel %vm4773_vm2, %v5253_v30, %v5233_v59  ;;  %v5272_v31 = vsel %vm4773_vm2, %v11601_v33, %v13973_v18  ;;  %v8394_v4 = vpop.eup %8393  ;;  %v4375_v13 = vadd.f32 %v11729_v9, %v3886_v38  ;;  %v3905_v49 = vmul.f32 %v11726_v36, %v11496_v48  ;;  %v7512_v48 = vld [vmem:[%s13563_s5 + $0x2f0] sm:$0xff]  }
 0x363   :  { %v3308_v32 = vadd.f32 1.0, %v8388_v61  ;;  %v5293_v2 = vpack.c.b16 %v5273_v20, %v5273_v20  ;;  %6399 = vmatmul.mubr.bf16.vlgmr.msra.gmra.mxu1 %v5290_v58  ;;  %v11803_v60 = vpop.eup %8395  ;;  %v3907_v59 = vmul.f32 %v8376_v52, %v11506_v19  ;;  %v3327_v30 = vadd.f32 1.0, %v8390_v41  ;;  %v7513_v36 = vld [vmem:[%s13563_s5 + $0x230] sm:$0xff]   ;;  %v11827_v61 = vpop.f32.mrf.mxu1 }
 0x364   :  { %v5292_v50 = vpack.c.b16 %v5272_v31, %v5272_v31  ;;  %v11808_v33 = vadd.f32 %v11529_v35, %v11033_v37  ;;  %7154 = vmatpush3.bf16.msra.mxu1 %v7509_v16  ;;  %8411 = vrcp.f32 %v3325_v44  ;;  %v3326_v9 = vadd.f32 1.0, %v8394_v4  ;;  %v8948_v37 = vld [vmem:[%s13562_s4 + $0x8] sm:$0xff]  ;;  %v11829_v16 = vpop.f32.mrf.mxu0 }
 0x365   :  { %6438 = vmatprep.mubr.bf16.mxu0 %v5293_v2  ;;  %v11818_v19 = vadd.f32 %v11531_v7, %v11040_v34  ;;  %v13974_v35 = vld [vmem:[#allocation15_spill] sm:$0xff]  ;;  %7155 = vmatprep.subr.bf16.mxu1 %v7511_v56  ;;  %v11834_v41 = vpop.eup %8397  ;;  %8413 = vrcp.f32 %v3306_v42  ;;  %v3906_v56 = vmul.f32 %v11746_v62, %v11511_v11  ;;  %v7514_v42 = vld [vmem:[%s13563_s5 + $0x2b0] sm:$0xff]   ;;  %v13979_v11 = vld [vmem:[#allocation22_spill] sm:$0xff]  ;;  %v4363_v5 = vadd.f32 %v11742_v47, %v3905_v49 }
 0x366   :  { %v13975_v52 = vsub.s32 4, %v13974_v35  ;;  %v7515_v2 = vld [vmem:[%s13563_s5 + $0x268] sm:$0xff]   ;;  %6439 = vmatmul.mubr.bf16.vlgmr.msra.gmra.mxu0 %v5292_v50  ;;  %v2386_v34 = vsub.f32 0.0, %v11808_v33  ;;  %v13976_v7 = vsub.s32 6, %v13974_v35  ;;  %v13977_v58 = vsub.s32 5, %v13974_v35 }
 0x367   :  { %v8400_v18 = vpop.eup %8399  ;;  %8415 = vrcp.f32 %v3308_v32  ;;  %v2388_v31 = vsub.f32 0.0, %v11818_v19  ;;  %7176 = vmatpush3.bf16.msra.mxu0 %v7510_v22  ;;  %v7517_v32 = vld [vmem:[%s13563_s5 + $0x228] sm:$0xff]  }
 0x368   :  { %v11825_v38 = vrot.slane %v8948_v37, %v13975_v52  ;;  %v11839_v44 = vrot.slane %v8948_v37, %v13976_v7  ;;  %v11843_v20 = vrot.slane %v8948_v37, %v13977_v58  ;;  %v11855_v4 = vpop.eup %8401  ;;  %8417 = vrcp.f32 %v3327_v30  ;;  %v13978_v7 = vld [vmem:[#allocation13_spill] sm:$0xff]  ;;  %7177 = vmatprep.subr.bf16.mxu0 %v7512_v48  ;;  %7156 = vmatpush3.bf16.msra.mxu1 %v7513_v36  ;;  %v11878_v48 = vpop.f32.mrf.mxu0  ;;  %v7519_v36 = vld [vmem:[%s13563_s5 + $0x260] sm:$0xff]  }
 0x369   :  { %v3015_v52 = vmul.f32 1.442695, %v2386_v34  ;;  %v8404_v22 = vpop.eup %8403  ;;  %v11873_v30 = vadd.f32 %v11739_v21, %v11769_v26  ;;  %8419 = vrcp.f32 %v3326_v9  ;;  %v3019_v34 = vmul.f32 1.442695, %v2388_v31  ;;  %13981 = vst [vmem:[#allocation45_spill] sm:$0xff] %v11878_v48  ;;  %7157 = vmatprep.subr.bf16.mxu1 %v7515_v2  ;;  %v7518_v2 = vld [vmem:[%s13563_s5 + $0x2a8] sm:$0xff]  }
 0x36a   :  { %v11850_v50 = vadd.f32 %v11539_v45, %v11825_v38  ;;  %v11859_v58 = vadd.f32 %v13978_v7, %v11839_v44  ;;  %v11863_v62 = vadd.f32 %v13979_v11, %v11843_v20  ;;  %v7516_v45 = vld [vmem:[%s13563_s5 + $0x2e8] sm:$0xff]   ;;  %v11876_v11 = vpop.f32.mrf.mxu1  ;;  %v3345_v43 = vadd.f32 1.0, %v8404_v22 }
 0x36b   :  { %13980 = vst [vmem:[#allocation44_spill] sm:$0xff] %v11876_v11  ;;  %8421 = vpow2.f32 %v3015_v52  ;;  %v11886_v26 = vadd.f32 %v11744_v23, %v3907_v59  ;;  %v11888_v9 = vadd.f32 %v4375_v13, %v3906_v56  ;;  %7178 = vmatpush3.bf16.msra.mxu0 %v7514_v42  ;;  %v13982_v11 = vld [vmem:[#allocation43_spill] sm:$0xff]  ;;  %v13983_v59 = vld [vmem:[#allocation46_spill] sm:$0xff] }
 0x36c   :  { %v2089_v7 = vsub.f32 0.0, %v11850_v50  ;;  %v2091_v21 = vsub.f32 0.0, %v11859_v58  ;;  %8423 = vpow2.f32 %v3019_v34  ;;  %v8406_v48 = vpop.eup %8405  ;;  %v3908_v47 = vmul.f32 %v11752_v53, %v13982_v11  ;;  %7179 = vmatprep.subr.bf16.mxu0 %v7516_v45  ;;  %7158 = vmatpush3.bf16.msra.mxu1 %v7517_v32  ;;  %v7520_v23 = vld [vmem:[%s13563_s5 + $0x2e0] sm:$0xff]   ;;  %v11908_v22 = vpop.f32.mrf.mxu1  ;;  %v7523_v32 = vld [vmem:[%s13563_s5 + $0x258] sm:$0xff]  }
 0x36d   :  { %8425 = vrcp.f32 %v3345_v43  ;;  %v2090_v52 = vsub.f32 0.0, %v11863_v62  ;;  %v7521_v13 = vld [vmem:[%s13563_s5 + $0x220] sm:$0xff]   ;;  %v3925_v56 = vmul.f32 %v11791_v14, %v13983_v59  ;;  %v3347_v42 = vadd.f32 1.0, %v8406_v48  ;;  %13985 = vst [vmem:[#allocation47_spill] sm:$0xff] %v11908_v22  ;;  %v11910_v45 = vpop.f32.mrf.mxu0  ;;  %7159 = vmatprep.subr.bf16.mxu1 %v7519_v36  ;;  %v8408_v34 = vpop.eup %8407  ;;  %v13987_v48 = vld [vmem:[#allocation24_spill] sm:$0xff] }
 0x36e   :  { %v2421_v31 = vmul.f32 1.442695, %v2089_v7  ;;  %v2425_v49 = vmul.f32 1.442695, %v2091_v21  ;;  %v13984_v53 = vsub.s32 7, %v13974_v35  ;;  %13986 = vst [vmem:[#allocation48_spill] sm:$0xff] %v11910_v45  ;;  %v3927_v7 = vmul.f32 %v11803_v60, %v11553_v63 }
 0x36f   :  { %v2423_v14 = vmul.f32 1.442695, %v2090_v52  ;;  %v11919_v35 = vadd.f32 %v11571_v1, %v11825_v38  ;;  %v3328_v11 = vadd.f32 1.0, %v8400_v18  ;;  %v11927_v21 = vadd.f32 %v11573_v3, %v11839_v44  ;;  %7180 = vmatpush3.bf16.msra.mxu0 %v7518_v2  ;;  %v7522_v63 = vld [vmem:[%s13563_s5 + $0x2a0] sm:$0xff]   ;;  %v13989_v60 = vld [vmem:[#allocation36_spill] sm:$0xff]  ;;  %v7524_v3 = vld [vmem:[%s13563_s5 + $0x2d8] sm:$0xff]  }
 0x370   :  { %8427 = vpow2.f32 %v2421_v31  ;;  %v11906_v43 = vrot.slane %v8948_v37, %v13984_v53  ;;  %v8410_v37 = vpop.eup %8409  ;;  %v3926_v1 = vmul.f32 %v11834_v41, %v13989_v60  ;;  %v13990_v31 = vld [vmem:[#allocation30_spill] sm:$0xff]  ;;  %7181 = vmatprep.subr.bf16.mxu0 %v7520_v23  ;;  %7160 = vmatpush3.bf16.msra.mxu1 %v7521_v13  ;;  %v3928_v41 = vmul.f32 %v11855_v4, %v11613_v17  ;;  %v11953_v23 = vpop.f32.mrf.mxu1 }
 0x371   :  { %8429 = vpow2.f32 %v2425_v49  ;;  %v2109_v18 = vsub.f32 0.0, %v11919_v35  ;;  %v11937_v49 = vadd.f32 %v13990_v31, %v11843_v20  ;;  %v7525_v2 = vld [vmem:[%s13563_s5 + $0x218] sm:$0xff]   ;;  %v2111_v59 = vsub.f32 0.0, %v11927_v21  ;;  %13992 = vst [vmem:[#allocation13_spill] sm:$0xff] %v11953_v23  ;;  %v11955_v13 = vpop.f32.mrf.mxu0  ;;  %7161 = vmatprep.subr.bf16.mxu1 %v7523_v32  ;;  %v13994_v31 = vld [vmem:[#allocation12_spill] sm:$0xff] }
 0x372   :  { %8431 = vrcp.f32 %v3347_v42  ;;  %v11923_v36 = vadd.f32 %v13987_v48, %v11906_v43  ;;  %v13991_v42 = vld [vmem:[#allocation9_spill] sm:$0xff]  ;;  %13993 = vst [vmem:[#allocation22_spill] sm:$0xff] %v11955_v13  ;;  %v8412_v48 = vpop.eup %8411  ;;  %v3945_v17 = vmul.f32 %v8408_v34, %v11618_v10  ;;  %v3947_v4 = vmul.f32 %v8410_v37, %v11626_v29  ;;  %v13995_v37 = vld [vmem:[#allocation38_spill] sm:$0xff] }
 0x373   :  { %8433 = vpow2.f32 %v2423_v14  ;;  %v11951_v53 = vadd.f32 %v13991_v42, %v11906_v43  ;;  %v7527_v14 = vld [vmem:[%s13563_s5 + $0x250] sm:$0xff]   ;;  %v2461_v60 = vmul.f32 1.442695, %v2109_v18  ;;  %v8414_v42 = vpop.eup %8413  ;;  %v4402_v23 = vadd.f32 %v11873_v30, %v3908_v47  ;;  %7182 = vmatpush3.bf16.msra.mxu0 %v7522_v63  ;;  %v7526_v13 = vld [vmem:[%s13563_s5 + $0x298] sm:$0xff]   ;;  %v7531_v63 = vld [vmem:[%s13563_s5 + $0x248] sm:$0xff]  }
 0x374   :  { %13988 = vst [vmem:[#allocation15_spill] sm:$0xff] %v11923_v36  ;;  %v2092_v52 = vsub.f32 0.0, %v11923_v36  ;;  %v11964_v36 = vadd.f32 %v13994_v31, %v11825_v38  ;;  %v4364_v45 = vadd.f32 %v4363_v5, %v3925_v56  ;;  %8435 = vrcp.f32 %v3328_v11  ;;  %v8416_v22 = vpop.eup %8415  ;;  %7183 = vmatprep.subr.bf16.mxu0 %v7524_v3  ;;  %7162 = vmatpush3.bf16.msra.mxu1 %v7525_v2  ;;  %v7528_v5 = vld [vmem:[%s13563_s5 + $0x2d0] sm:$0xff]   ;;  %v11987_v11 = vpop.f32.mrf.mxu0 }
 0x375   :  { %v4390_v10 = vadd.f32 %v11886_v26, %v3927_v7  ;;  %v4377_v29 = vadd.f32 %v11888_v9, %v3926_v1  ;;  %v2110_v34 = vsub.f32 0.0, %v11937_v49  ;;  %v11975_v18 = vadd.f32 %v13995_v37, %v11839_v44  ;;  %v7529_v30 = vld [vmem:[%s13563_s5 + $0x210] sm:$0xff]   ;;  %v8418_v47 = vpop.eup %8417  ;;  %v11985_v7 = vpop.f32.mrf.mxu1  ;;  %7163 = vmatprep.subr.bf16.mxu1 %v7527_v14  ;;  %v7535_v37 = vld [vmem:[%s13563_s5 + $0x240] sm:$0xff]  }
 0x376   :  { %v2427_v32 = vmul.f32 1.442695, %v2092_v52  ;;  %v3965_v26 = vmul.f32 %v8412_v48, %v11663_v46  ;;  %8437 = vpow2.f32 %v2461_v60  ;;  %v2465_v9 = vmul.f32 1.442695, %v2111_v59  ;;  %v11992_v1 = vpop.eup %8419 }
 0x377   :  { %v2112_v56 = vsub.f32 0.0, %v11951_v53  ;;  %v11994_v3 = vadd.f32 %v4402_v23, %v3928_v41  ;;  %v4365_v2 = vadd.f32 %v4364_v45, %v3945_v17  ;;  %v4391_v52 = vadd.f32 %v4390_v10, %v3947_v4  ;;  %7184 = vmatpush3.bf16.msra.mxu0 %v7526_v13  ;;  %v7530_v41 = vld [vmem:[%s13563_s5 + $0x290] sm:$0xff]   ;;  %v12016_v10 = vpop.f32.mrf.mxu1 }
 0x378   :  { %v2129_v46 = vsub.f32 0.0, %v11964_v36  ;;  %v8422_v59 = vpop.eup %8421  ;;  %v3946_v48 = vmul.f32 %v8414_v42, %v11635_v40  ;;  %v11999_v60 = vmul.f32 %v8416_v22, %v11642_v6  ;;  %8439 = vpow2.f32 %v2427_v32  ;;  %v13996_v23 = vld [vmem:[#allocation37_spill] sm:$0xff]  ;;  %7185 = vmatprep.subr.bf16.mxu0 %v7528_v5  ;;  %7164 = vmatpush3.bf16.msra.mxu1 %v7529_v30  ;;  %v7532_v6 = vld [vmem:[%s13563_s5 + $0x2c8] sm:$0xff]  }
 0x379   :  { %v12003_v14 = vadd.f32 %v11650_v8, %v11843_v20  ;;  %v8424_v45 = vpop.eup %8423  ;;  %v3967_v17 = vmul.f32 %v8418_v47, %v13996_v23  ;;  %v3346_v4 = vadd.f32 1.0, %v8422_v59  ;;  %v2463_v31 = vmul.f32 1.442695, %v2110_v34  ;;  %v7533_v8 = vld [vmem:[%s13563_s5 + $0x208] sm:$0xff]   ;;  %v12018_v34 = vpop.f32.mrf.mxu0  ;;  %7165 = vmatprep.subr.bf16.mxu1 %v7531_v63  ;;  %v13998_v59 = vld [vmem:[#allocation34_spill] sm:$0xff] }
 0x37a   :  { %v2131_v40 = vsub.f32 0.0, %v11975_v18  ;;  %v8426_v22 = vpop.eup %8425  ;;  %v4366_v13 = vadd.f32 %v4365_v2, %v3965_v26  ;;  %v3348_v42 = vadd.f32 1.0, %v8424_v45  ;;  %8441 = vpow2.f32 %v2465_v9  ;;  %13997 = vst [vmem:[#allocation43_spill] sm:$0xff] %v12018_v34  ;;  %v13999_v63 = vld [vmem:[#allocation40_spill] sm:$0xff] }
 0x37b   :  { %v2467_v32 = vmul.f32 1.442695, %v2112_v56  ;;  %v3985_v30 = vmul.f32 %v8426_v22, %v11703_v54  ;;  %8443 = vrcp.f32 %v3346_v4  ;;  %v2501_v47 = vmul.f32 1.442695, %v2129_v46  ;;  %7186 = vmatpush3.bf16.msra.mxu0 %v7530_v41  ;;  %v7534_v54 = vld [vmem:[%s13563_s5 + $0x288] sm:$0xff]   ;;  %v7537_v41 = vld [vmem:[%s13563_s5 + $0x200] sm:$0xff]  }
 0x37c   :  { %v12026_v26 = vadd.f32 %v13998_v59, %v11906_v43  ;;  %v12028_v56 = vadd.f32 %v4377_v29, %v3946_v48  ;;  %8445 = vrcp.f32 %v3348_v42  ;;  %v2130_v2 = vsub.f32 0.0, %v12003_v14  ;;  %v14000_v22 = vld [vmem:[#allocation11_spill] sm:$0xff]  ;;  %7187 = vmatprep.subr.bf16.mxu0 %v7532_v6  ;;  %7166 = vmatpush3.bf16.msra.mxu1 %v7533_v8 }
 0x37d   :  { %v8428_v5 = vpop.eup %8427  ;;  %v12033_v45 = vadd.f32 %v13999_v63, %v11825_v38  ;;  %v4367_v23 = vadd.f32 %v4366_v13, %v3985_v30  ;;  %8447 = vpow2.f32 %v2463_v31  ;;  %v2505_v4 = vmul.f32 1.442695, %v2131_v40  ;;  %v7536_v48 = vld [vmem:[%s13563_s5 + $0x2c0] sm:$0xff]   ;;  %v12049_v40 = vpop.f32.mrf.mxu1  ;;  %7167 = vmatprep.subr.bf16.mxu1 %v7535_v37 }
 0x37e   :  { %v8430_v9 = vpop.eup %8429  ;;  %v12040_v29 = vadd.f32 %v14000_v22, %v11839_v44  ;;  %v4392_v59 = vadd.f32 %v4391_v52, %v3967_v17  ;;  %v3049_v31 = vadd.f32 1.0, %v8428_v5  ;;  %8449 = vpow2.f32 %v2467_v32  ;;  %14001 = vst [vmem:[#allocation46_spill] sm:$0xff] %v12049_v40  ;;  %v12051_v30 = vpop.f32.mrf.mxu0  ;;  %v7538_v17 = vld [vmem:[%s13563_s5 + $0x280] sm:$0xff]  }
 0x37f   :  { %v8432_v46 = vpop.eup %8431  ;;  %14002 = vst [vmem:[#allocation24_spill] sm:$0xff] %v12051_v30  ;;  %v3051_v6 = vadd.f32 1.0, %v8430_v9  ;;  %8451 = vpow2.f32 %v2501_v47  ;;  %v2132_v8 = vsub.f32 0.0, %v12026_v26  ;;  %v12056_v63 = vadd.f32 %v11693_v39, %v11843_v20  ;;  %7188 = vmatpush3.bf16.msra.mxu0 %v7534_v54 }
 0x380   :  { %v8434_v42 = vpop.eup %8433  ;;  %v3987_v13 = vmul.f32 %v8432_v46, %v11707_v57  ;;  %v4368_v22 = vrot.slane %v4367_v23, 4  ;;  %v2503_v52 = vmul.f32 1.442695, %v2130_v2  ;;  %v2149_v57 = vsub.f32 0.0, %v12033_v45  ;;  %7189 = vmatprep.subr.bf16.mxu0 %v7536_v48  ;;  %7168 = vmatpush3.bf16.msra.mxu1 %v7537_v41  ;;  %v14003_v2 = vld [vmem:[#allocation10_spill] sm:$0xff]  ;;  %v12073_v46 = vpop.f32.mrf.mxu1  ;;  %v14006_v48 = vld [vmem:[#allocation39_spill] sm:$0xff] }
 0x381   :  { %v8436_v32 = vpop.eup %8435  ;;  %v3050_v37 = vadd.f32 1.0, %v8434_v42  ;;  %8453 = vpow2.f32 %v2505_v4  ;;  %v2151_v5 = vsub.f32 0.0, %v12040_v29  ;;  %v12065_v47 = vadd.f32 %v11695_v55, %v11906_v43  ;;  %14004 = vst [vmem:[#allocation36_spill] sm:$0xff] %v12073_v46  ;;  %v12075_v4 = vpop.f32.mrf.mxu0 }
 0x382   :  { %v4393_v34 = vadd.f32 %v4392_v59, %v3987_v13  ;;  %v3966_v39 = vmul.f32 %v11992_v1, %v11671_v12  ;;  %8455 = vrcp.f32 %v3049_v31  ;;  %v12071_v54 = vadd.f32 %v14003_v2, %v11825_v38  ;;  %14005 = vst [vmem:[#allocation30_spill] sm:$0xff] %v12075_v4  ;;  %v14007_v12 = vld [vmem:[#allocation33_spill] sm:$0xff] }
 0x383   :  { %v8438_v42 = vpop.eup %8437  ;;  %8457 = vrcp.f32 %v3051_v6  ;;  %v2507_v59 = vmul.f32 1.442695, %v2132_v8  ;;  %v2150_v55 = vsub.f32 0.0, %v12056_v63  ;;  %v12080_v41 = vadd.f32 %v14006_v48, %v11839_v44  ;;  %7190 = vmatpush3.bf16.msra.mxu0 %v7538_v17 }
 0x384   :  { %v4394_v9 = vrot.slane %v4393_v34, 4  ;;  %v3968_v1 = vmul.f32 %v8436_v32, %v14007_v12  ;;  %v4369_v13 = vadd.f32 %v4368_v22, %v4367_v23  ;;  %8459 = vpow2.f32 %v2503_v52  ;;  %v12091_v23 = vpop.f32.mrf.mxu1  ;;  %v12093_v22 = vpop.f32.mrf.mxu0 }
 0x385   :  { %v2541_v31 = vmul.f32 1.442695, %v2149_v57  ;;  %v8440_v2 = vpop.eup %8439  ;;  %v4404_v46 = vadd.f32 %v11994_v3, %v11999_v60  ;;  %8461 = vrcp.f32 %v3050_v37  ;;  %v2545_v4 = vmul.f32 1.442695, %v2151_v5  ;;  %14008 = vst [vmem:[#allocation9_spill] sm:$0xff] %v12091_v23  ;;  %14009 = vst [vmem:[#allocation12_spill] sm:$0xff] %v12093_v22 }
 0x386   :  { %v2152_v6 = vsub.f32 0.0, %v12065_v47  ;;  %v4395_v8 = vadd.f32 %v4394_v9, %v4393_v34  ;;  %v3069_v30 = vadd.f32 1.0, %v8438_v42  ;;  %v2169_v40 = vsub.f32 0.0, %v12071_v54 }
 0x387   :  { %v12089_v48 = vadd.f32 %v11734_v28, %v11843_v20  ;;  %v8442_v52 = vpop.eup %8441  ;;  %v4379_v57 = vadd.f32 %v12028_v56, %v3966_v39  ;;  %8463 = vpow2.f32 %v2507_v59  ;;  %v2543_v3 = vmul.f32 1.442695, %v2150_v55  ;;  %v12100_v59 = vpop.f32.mrf.mxu1 }
 0x388   :  { %v2171_v60 = vsub.f32 0.0, %v12080_v41  ;;  %v8444_v17 = vpop.eup %8443  ;;  %v4405_v34 = vadd.f32 %v4404_v46, %v3968_v1  ;;  %v4370_v32 = vrot.slane %v4369_v13, 2  ;;  %v3052_v37 = vadd.f32 1.0, %v8440_v2  ;;  %14010 = vst [vmem:[#allocation38_spill] sm:$0xff] %v12100_v59  ;;  %v12102_v55 = vpop.f32.mrf.mxu0 }
 0x389   :  { %8465 = vpow2.f32 %v2541_v31  ;;  %v8446_v5 = vpop.eup %8445  ;;  %v3986_v28 = vmul.f32 %v8444_v17, %v11808_v33  ;;  %v2547_v9 = vmul.f32 1.442695, %v2152_v6  ;;  %v2170_v42 = vsub.f32 0.0, %v12089_v48  ;;  %14011 = vst [vmem:[#allocation37_spill] sm:$0xff] %v12102_v55 }
 0x38a   :  { %8467 = vpow2.f32 %v2545_v4  ;;  %v8448_v12 = vpop.eup %8447  ;;  %v4396_v22 = vrot.slane %v4395_v8, 2  ;;  %v3988_v56 = vmul.f32 %v8446_v5, %v11818_v19  ;;  %v2581_v39 = vmul.f32 1.442695, %v2169_v40 }
 0x38b   :  { %8469 = vrcp.f32 %v3069_v30  ;;  %v8450_v46 = vpop.eup %8449  ;;  %v4380_v1 = vadd.f32 %v4379_v57, %v3986_v28  ;;  %v2585_v31 = vmul.f32 1.442695, %v2171_v60  ;;  %v4371_v33 = vadd.f32 %v4370_v32, %v4369_v13  ;;  %v12108_v57 = vpop.f32.mrf.mxu1  ;;  %v14014_v32 = vld [vmem:[#allocation26_spill] sm:$0xff] }
 0x38c   :  { %8471 = vpow2.f32 %v2543_v3  ;;  %v8452_v2 = vpop.eup %8451  ;;  %v4406_v4 = vadd.f32 %v4405_v34, %v3988_v56  ;;  %v3071_v6 = vadd.f32 1.0, %v8442_v52  ;;  %v2583_v23 = vmul.f32 1.442695, %v2170_v42  ;;  %14012 = vst [vmem:[#allocation34_spill] sm:$0xff] %v12108_v57  ;;  %v12110_v3 = vpop.f32.mrf.mxu0  ;;  %v14015_v56 = vld [vmem:[#allocation28_spill] sm:$0xff] }
 0x38d   :  { %8473 = vrcp.f32 %v3052_v37  ;;  %v4381_v17 = vrot.slane %v4380_v1, 4  ;;  %v12106_v19 = vadd.f32 %v11736_v0, %v11906_v43  ;;  %v4397_v30 = vadd.f32 %v4396_v22, %v4395_v8  ;;  %14013 = vst [vmem:[#allocation40_spill] sm:$0xff] %v12110_v3 }
 0x38e   :  { %8475 = vpow2.f32 %v2547_v9  ;;  %v8454_v40 = vpop.eup %8453  ;;  %v4407_v5 = vrot.slane %v4406_v4, 4  ;;  %v3070_v55 = vadd.f32 1.0, %v8448_v12  ;;  %v3072_v52 = vadd.f32 1.0, %v8450_v46 }
 0x38f   :  { %8477 = vpow2.f32 %v2581_v39  ;;  %v12112_v13 = vpop.eup %8455  ;;  %v4382_v60 = vadd.f32 %v4381_v17, %v4380_v1  ;;  %v4827_v0 = vpack.c.bf16 %v14014_v32, %v14014_v32  ;;  %v3089_v8 = vadd.f32 1.0, %v8452_v2  ;;  %v12125_v17 = vpop.f32.mrf.mxu0 }
 0x390   :  { %8479 = vpow2.f32 %v2585_v31  ;;  %v12114_v34 = vpop.eup %8457  ;;  %v4408_v37 = vadd.f32 %v4407_v5, %v4406_v4  ;;  %v4372_v28 = vrot.slane %v4371_v33, 1  ;;  %v2172_v42 = vsub.f32 0.0, %v12106_v19  ;;  %v12123_v31 = vpop.f32.mrf.mxu1  ;;  %14017 = vst [vmem:[#allocation10_spill] sm:$0xff] %v12125_v17 }
 0x391   :  { %8481 = vrcp.f32 %v3071_v6  ;;  %v8460_v22 = vpop.eup %8459  ;;  %v4383_v9 = vrot.slane %v4382_v60, 2  ;;  %v4829_v39 = vpack.c.bf16 %v14015_v56, %v14015_v56  ;;  %v4398_v46 = vrot.slane %v4397_v30, 1  ;;  %14016 = vst [vmem:[#allocation11_spill] sm:$0xff] %v12123_v31 }
 0x392   :  { %8483 = vpow2.f32 %v2583_v23  ;;  %v12119_v12 = vpop.eup %8461  ;;  %v4409_v1 = vrot.slane %v4408_v37, 2  ;;  %v3091_v2 = vadd.f32 1.0, %v8454_v40  ;;  %v2587_v6 = vmul.f32 1.442695, %v2172_v42 }
 0x393   :  { %8485 = vrcp.f32 %v3070_v55  ;;  %v4384_v4 = vadd.f32 %v4383_v9, %v4382_v60  ;;  %v12127_v23 = vunpack.c.l.b16 %v4827_v0  ;;  %v12131_v3 = vadd.f32 %v11759_v15, %v11825_v38  ;;  %v12138_v0 = vpop.f32.mrf.mxu1 }
 0x394   :  { %8487 = vrcp.f32 %v3072_v52  ;;  %v8464_v5 = vpop.eup %8463  ;;  %v4410_v32 = vadd.f32 %v4409_v1, %v4408_v37  ;;  %v4373_v57 = vadd.f32 %v4372_v28, %v4371_v33  ;;  %v3090_v59 = vadd.f32 1.0, %v8460_v22  ;;  %v12140_v37 = vpop.f32.mrf.mxu0 }
 0x395   :  { %14018 = vst [vmem:[#allocation39_spill] sm:$0xff] %v12127_v23  ;;  %8489 = vrcp.f32 %v3089_v8  ;;  %v4385_v55 = vrot.slane %v4384_v4, 1  ;;  %v4399_v17 = vadd.f32 %v4398_v46, %v4397_v30  ;;  %v2189_v40 = vsub.f32 0.0, %v12131_v3 }
 0x396   :  { %v8466_v56 = vpop.eup %8465  ;;  %8491 = vpow2.f32 %v2587_v6  ;;  %v4411_v60 = vrot.slane %v4410_v32, 1  ;;  %v12136_v52 = vadd.f32 %v11761_v51, %v11839_v44  ;;  %v12142_v8 = vunpack.c.l.b16 %v4829_v39 }
 0x397   :  { %v8468_v31 = vpop.eup %8467  ;;  %v4386_v33 = vadd.f32 %v4385_v55, %v4384_v4  ;;  %8493 = vrcp.f32 %v3091_v2  ;;  %v3092_v22 = vadd.f32 1.0, %v8464_v5  ;;  %v3109_v30 = vadd.f32 1.0, %v8466_v56  ;;  %v12159_v56 = vpop.f32.mrf.mxu1 }
 0x398   :  { %v8470_v15 = vpop.eup %8469  ;;  %14019 = vst [vmem:[#allocation33_spill] sm:$0xff] %v12142_v8  ;;  %v4412_v9 = vadd.f32 %v4411_v60, %v4410_v32  ;;  %v2621_v42 = vmul.f32 1.442695, %v2189_v40  ;;  %v12146_v46 = vadd.f32 %v11784_v25, %v11843_v20  ;;  %v12150_v1 = vmul.f32 0.015625, %v4373_v57  ;;  %14024 = vst [vmem:[#allocation51_spill] sm:$0xff] %v12159_v56  ;;  %v12161_v25 = vpop.f32.mrf.mxu0 }
 0x399   :  { %v8472_v28 = vpop.eup %8471  ;;  %v12152_v6 = vmul.f32 0.015625, %v4386_v33  ;;  %8495 = vrcp.f32 %v3090_v59  ;;  %v2191_v39 = vsub.f32 0.0, %v12136_v52  ;;  %v12155_v2 = vmul.f32 0.015625, %v4399_v17  ;;  %14025 = vst [vmem:[#allocation52_spill] sm:$0xff] %v12161_v25 }
 0x39a   :  { %v12148_v51 = vpop.eup %8473  ;;  %14020 = vst [vmem:[#allocation26_spill] sm:$0xff] %v12150_v1  ;;  %v12157_v5 = vmul.f32 0.015625, %v4412_v9  ;;  %v3111_v32 = vadd.f32 1.0, %v8468_v31  ;;  %8497 = vpow2.f32 %v2621_v42  ;;  %v3110_v60 = vadd.f32 1.0, %v8472_v28 }
 0x39b   :  { %14021 = vst [vmem:[#allocation28_spill] sm:$0xff] %v12152_v6  ;;  %v8476_v4 = vpop.eup %8475  ;;  %14022 = vst [vmem:[#allocation49_spill] sm:$0xff] %v12155_v2  ;;  %v4717_v57 = vcombine.low %v12150_v1, %v12152_v6  ;;  %8499 = vrcp.f32 %v3092_v22  ;;  %v2625_v59 = vmul.f32 1.442695, %v2191_v39  ;;  %v12169_v33 = vmul.f32 %v12112_v13, %v11850_v50  ;;  %v12180_v13 = vpop.f32.mrf.mxu1 }
 0x39c   :  { %14023 = vst [vmem:[#allocation50_spill] sm:$0xff] %v12157_v5  ;;  %v8478_v55 = vpop.eup %8477  ;;  %v4718_v17 = vcombine.low %v12155_v2, %v12157_v5  ;;  %8501 = vrcp.f32 %v3109_v30  ;;  %v2190_v31 = vsub.f32 0.0, %v12146_v46  ;;  %v3112_v22 = vadd.f32 1.0, %v8476_v4  ;;  %14028 = vst [vmem:[#allocation55_spill] sm:$0xff] %v12180_v13  ;;  %v12182_v30 = vpop.f32.mrf.mxu0 }
 0x39d   :  { %v8480_v40 = vpop.eup %8479  ;;  %v12175_v8 = vrot.slane %v4717_v57, %v13945_v24  ;;  %8503 = vpow2.f32 %v2625_v59  ;;  %v3129_v23 = vadd.f32 1.0, %v8478_v55  ;;  %14029 = vst [vmem:[#allocation56_spill] sm:$0xff] %v12182_v30  ;;  %v12186_v57 = vadd.f32 %v11786_v27, %v11906_v43 }
 0x39e   :  { %v8482_v9 = vpop.eup %8481  ;;  %v12178_v39 = vrot.slane %v4718_v17, %v13945_v24  ;;  %8505 = vrcp.f32 %v3111_v32  ;;  %v2623_v50 = vmul.f32 1.442695, %v2190_v31  ;;  %v3131_v6 = vadd.f32 1.0, %v8480_v40 }
 0x39f   :  { %14026 = vst [vmem:[#allocation53_spill] sm:$0xff] %v12175_v8  ;;  %v8484_v28 = vpop.eup %8483  ;;  %8507 = vrcp.f32 %v3110_v60  ;;  %v12190_v4 = vadd.f32 %v11827_v61, %v11825_v38  ;;  %v3691_v55 = vmul.f32 %v12114_v34, %v11859_v58  ;;  %v12198_v60 = vmul.f32 %v12119_v12, %v11863_v62  ;;  %v12208_v34 = vpop.f32.mrf.mxu1 }
 0x3a0   :  { %14027 = vst [vmem:[#allocation54_spill] sm:$0xff] %v12178_v39  ;;  %v8486_v5 = vpop.eup %8485  ;;  %v3130_v17 = vadd.f32 1.0, %v8484_v28  ;;  %8509 = vpow2.f32 %v2623_v50  ;;  %v2192_v27 = vsub.f32 0.0, %v12186_v57  ;;  %v3709_v42 = vmul.f32 %v8470_v15, %v11919_v35  ;;  %14030 = vst [vmem:[#allocation57_spill] sm:$0xff] %v12208_v34  ;;  %v12210_v28 = vpop.f32.mrf.mxu0  ;;  %v14032_v35 = vld [vmem:[#allocation44_spill] sm:$0xff]  ;;  %v14034_v15 = vld [vmem:[#allocation47_spill] sm:$0xff] }
 0x3a1   :  { %v8488_v59 = vpop.eup %8487  ;;  %8511 = vrcp.f32 %v3112_v22  ;;  %v2209_v61 = vsub.f32 0.0, %v12190_v4  ;;  %v3711_v32 = vmul.f32 %v8482_v9, %v11927_v21  ;;  %v12206_v58 = vadd.f32 %v11829_v16, %v11839_v44  ;;  %14031 = vst [vmem:[#allocation58_spill] sm:$0xff] %v12210_v28  ;;  %v14040_v34 = vld [vmem:[#allocation15_spill] sm:$0xff] }
 0x3a2   :  { %v8490_v31 = vpop.eup %8489  ;;  %8513 = vrcp.f32 %v3129_v23  ;;  %v2627_v12 = vmul.f32 1.442695, %v2192_v27  ;;  %v12215_v21 = vadd.f32 %v14032_v35, %v11843_v20  ;;  %v14033_v23 = vld [vmem:[#allocation45_spill] sm:$0xff]  ;;  %v12223_v9 = vadd.f32 %v14034_v15, %v11825_v38  ;;  %v12237_v28 = vpop.f32.mrf.mxu0 }
 0x3a3   :  { %v8492_v40 = vpop.eup %8491  ;;  %8515 = vrcp.f32 %v3131_v6  ;;  %v2661_v22 = vmul.f32 1.442695, %v2209_v61  ;;  %v2211_v39 = vsub.f32 0.0, %v12206_v58  ;;  %v12219_v16 = vadd.f32 %v14033_v23, %v11906_v43  ;;  %v14035_v6 = vld [vmem:[#allocation48_spill] sm:$0xff]  ;;  %14039 = vst [vmem:[#allocation47_spill] sm:$0xff] %v12237_v28 }
 0x3a4   :  { %v3132_v62 = vadd.f32 1.0, %v8492_v40  ;;  %v8494_v50 = vpop.eup %8493  ;;  %8517 = vrcp.f32 %v3130_v17  ;;  %v12227_v27 = vadd.f32 %v14035_v6, %v11839_v44  ;;  %v14037_v17 = vld [vmem:[#allocation13_spill] sm:$0xff]  ;;  %v2210_v8 = vsub.f32 0.0, %v12215_v21 }
 0x3a5   :  { %v12231_v61 = vadd.f32 %v14037_v17, %v11843_v20  ;;  %v2665_v35 = vmul.f32 1.442695, %v2211_v39  ;;  %v2212_v23 = vsub.f32 0.0, %v12219_v16  ;;  %v3692_v6 = vmul.f32 %v12148_v51, %v14040_v34 }
 0x3a6   :  { %8519 = vrcp.f32 %v3132_v62  ;;  %14036 = vst [vmem:[#allocation44_spill] sm:$0xff] %v12227_v27  ;;  %v8496_v40 = vpop.eup %8495  ;;  %v12235_v62 = vpop.f32.mrf.mxu1  ;;  %v2229_v24 = vsub.f32 0.0, %v12223_v9  ;;  %v2231_v17 = vsub.f32 0.0, %v12227_v27  ;;  %v4153_v39 = vadd.f32 %v3709_v42, %v12169_v33 }
 0x3a7   :  { %8521 = vpow2.f32 %v2627_v12  ;;  %14038 = vst [vmem:[#allocation45_spill] sm:$0xff] %v12235_v62  ;;  %v8498_v15 = vpop.eup %8497  ;;  %v2663_v12 = vmul.f32 1.442695, %v2210_v8  ;;  %v2667_v30 = vmul.f32 1.442695, %v2212_v23  ;;  %v4179_v13 = vadd.f32 %v3711_v32, %v3691_v55  ;;  %v12257_v42 = vpop.f32.mrf.mxu0 }
 0x3a8   :  { %8523 = vpow2.f32 %v2661_v22  ;;  %v8500_v1 = vpop.eup %8499  ;;  %v3710_v62 = vmul.f32 %v8486_v5, %v11937_v49  ;;  %v3149_v28 = vadd.f32 1.0, %v8498_v15  ;;  %v2230_v25 = vsub.f32 0.0, %v12231_v61  ;;  %v14041_v22 = vld [vmem:[#allocation22_spill] sm:$0xff]  ;;  %v12255_v8 = vpop.f32.mrf.mxu1 }
 0x3a9   :  { %8525 = vpow2.f32 %v2665_v35  ;;  %v8502_v2 = vpop.eup %8501  ;;  %v3712_v51 = vmul.f32 %v8488_v59, %v11951_v53  ;;  %v2701_v34 = vmul.f32 1.442695, %v2229_v24  ;;  %v12249_v27 = vadd.f32 %v14041_v22, %v11906_v43 }
 0x3aa   :  { %v8504_v56 = vpop.eup %8503  ;;  %v12253_v33 = vadd.f32 %v11985_v7, %v11825_v38  ;;  %v3729_v5 = vmul.f32 %v8490_v31, %v11964_v36  ;;  %8527 = vpow2.f32 %v2663_v12  ;;  %v2705_v32 = vmul.f32 1.442695, %v2231_v17  ;;  %v12270_v22 = vpop.f32.mrf.mxu1 }
 0x3ab   :  { %v8506_v49 = vpop.eup %8505  ;;  %v12262_v24 = vadd.f32 %v11987_v11, %v11839_v44  ;;  %v3731_v59 = vmul.f32 %v8494_v50, %v11975_v18  ;;  %v3151_v55 = vadd.f32 1.0, %v8504_v56  ;;  %8529 = vpow2.f32 %v2667_v30  ;;  %14042 = vst [vmem:[#allocation48_spill] sm:$0xff] %v12270_v22  ;;  %v12272_v18 = vpop.f32.mrf.mxu0 }
 0x3ac   :  { %v8508_v53 = vpop.eup %8507  ;;  %v2232_v7 = vsub.f32 0.0, %v12249_v27  ;;  %v3730_v23 = vmul.f32 %v8496_v40, %v12003_v14  ;;  %8531 = vrcp.f32 %v3149_v28  ;;  %v2703_v15 = vmul.f32 1.442695, %v2230_v25  ;;  %14043 = vst [vmem:[#allocation13_spill] sm:$0xff] %v12272_v18 }
 0x3ad   :  { %v8510_v35 = vpop.eup %8509  ;;  %v2249_v36 = vsub.f32 0.0, %v12253_v33  ;;  %v3732_v17 = vmul.f32 %v8500_v1, %v12026_v26  ;;  %8533 = vpow2.f32 %v2701_v34  ;;  %v2251_v12 = vsub.f32 0.0, %v12262_v24 }
 0x3ae   :  { %v8512_v31 = vpop.eup %8511  ;;  %v2707_v11 = vmul.f32 1.442695, %v2232_v7  ;;  %v4166_v30 = vadd.f32 %v3710_v62, %v12198_v60  ;;  %v3749_v14 = vmul.f32 %v8502_v2, %v12033_v45  ;;  %v3150_v28 = vadd.f32 1.0, %v8510_v35  ;;  %v12281_v2 = vpop.f32.mrf.mxu1 }
 0x3af   :  { %v8514_v56 = vpop.eup %8513  ;;  %8535 = vpow2.f32 %v2705_v32  ;;  %v4192_v50 = vadd.f32 %v3712_v51, %v3692_v6  ;;  %v4154_v40 = vadd.f32 %v4153_v39, %v3729_v5  ;;  %v2741_v26 = vmul.f32 1.442695, %v2249_v36  ;;  %v12283_v6 = vpop.f32.mrf.mxu0  ;;  %v14044_v32 = vld [vmem:[#allocation43_spill] sm:$0xff]  ;;  %v14045_v36 = vld [vmem:[#allocation46_spill] sm:$0xff] }
 0x3b0   :  { %v8516_v25 = vpop.eup %8515  ;;  %8537 = vrcp.f32 %v3151_v55  ;;  %v4180_v34 = vadd.f32 %v4179_v13, %v3731_v59  ;;  %v3751_v7 = vmul.f32 %v8506_v49, %v12040_v29  ;;  %v12279_v18 = vadd.f32 %v12016_v10, %v11843_v20 }
 0x3b1   :  { %v8518_v1 = vpop.eup %8517  ;;  %8539 = vpow2.f32 %v2703_v15  ;;  %v4167_v60 = vadd.f32 %v4166_v30, %v3730_v23  ;;  %v4193_v62 = vadd.f32 %v4192_v50, %v3732_v17  ;;  %v2745_v45 = vmul.f32 1.442695, %v2251_v12  ;;  %v12301_v17 = vpop.f32.mrf.mxu0 }
 0x3b2   :  { %8541 = vpow2.f32 %v2707_v11  ;;  %v4155_v51 = vadd.f32 %v4154_v40, %v3749_v14  ;;  %v3750_v13 = vmul.f32 %v8508_v53, %v12056_v63  ;;  %v3752_v29 = vmul.f32 %v8512_v31, %v12065_v47  ;;  %v12299_v31 = vpop.f32.mrf.mxu1  ;;  %14047 = vst [vmem:[#allocation22_spill] sm:$0xff] %v12301_v17 }
 0x3b3   :  { %v8520_v22 = vpop.eup %8519  ;;  %8543 = vrcp.f32 %v3150_v28  ;;  %v3769_v10 = vmul.f32 %v8514_v56, %v12071_v54  ;;  %v12290_v59 = vadd.f32 %v14044_v32, %v11906_v43  ;;  %v4181_v35 = vadd.f32 %v4180_v34, %v3751_v7  ;;  %14046 = vst [vmem:[#allocation15_spill] sm:$0xff] %v12299_v31  ;;  %v14048_v56 = vld [vmem:[#allocation24_spill] sm:$0xff] }
 0x3b4   :  { %v8522_v39 = vpop.eup %8521  ;;  %8545 = vpow2.f32 %v2741_v26  ;;  %v2250_v15 = vsub.f32 0.0, %v12279_v18  ;;  %v12295_v63 = vadd.f32 %v14045_v36, %v11825_v38  ;;  %v3771_v47 = vmul.f32 %v8516_v25, %v12080_v41  ;;  %v7540_v36 = vld [vmem:[%s13563_s5 + $0x3f8] sm:$0xff]  }
 0x3b5   :  { %v8524_v49 = vpop.eup %8523  ;;  %v3152_v5 = vadd.f32 1.0, %v8522_v39  ;;  %v3770_v53 = vmul.f32 %v8518_v1, %v12089_v48  ;;  %8547 = vpow2.f32 %v2745_v45  ;;  %v4168_v11 = vadd.f32 %v4167_v60, %v3750_v13  ;;  %v14052_v13 = vld [vmem:[#allocation30_spill] sm:$0xff]  ;;  %7219 = vmatprep.subr.bf16.mxu0 %v7540_v36  ;;  %v14060_v36 = vld [vmem:[#allocation40_spill] sm:$0xff] }
 0x3b6   :  { %v8526_v55 = vpop.eup %8525  ;;  %v3169_v23 = vadd.f32 1.0, %v8524_v49  ;;  %v4194_v12 = vadd.f32 %v4193_v62, %v3752_v29  ;;  %v12305_v30 = vadd.f32 %v14048_v56, %v11839_v44  ;;  %v4156_v28 = vadd.f32 %v4155_v51, %v3769_v10  ;;  %v14049_v62 = vld [vmem:[#allocation36_spill] sm:$0xff]  ;;  %v14053_v49 = vld [vmem:[#allocation9_spill] sm:$0xff] }
 0x3b7   :  { %v3171_v54 = vadd.f32 1.0, %v8526_v55  ;;  %8549 = vrcp.f32 %v3152_v5  ;;  %v8528_v14 = vpop.eup %8527  ;;  %v3772_v50 = vmul.f32 %v8520_v22, %v12106_v19  ;;  %v2252_v41 = vsub.f32 0.0, %v12290_v59  ;;  %v12318_v19 = vpop.f32.mrf.mxu1 }
 0x3b8   :  { %8551 = vrcp.f32 %v3169_v23  ;;  %v8530_v48 = vpop.eup %8529  ;;  %v3170_v25 = vadd.f32 1.0, %v8528_v14  ;;  %v2743_v40 = vmul.f32 1.442695, %v2250_v15  ;;  %v2269_v26 = vsub.f32 0.0, %v12295_v63  ;;  %14050 = vst [vmem:[#allocation43_spill] sm:$0xff] %v12318_v19  ;;  %v12320_v22 = vpop.f32.mrf.mxu0  ;;  %v7539_v15 = vld [vmem:[%s13563_s5 + $0x378] sm:$0xff]  }
 0x3b9   :  { %8553 = vrcp.f32 %v3171_v54  ;;  %v8532_v1 = vpop.eup %8531  ;;  %v12310_v34 = vadd.f32 %v4181_v35, %v3771_v47  ;;  %v12312_v7 = vadd.f32 %v4168_v11, %v3770_v53  ;;  %v3172_v60 = vadd.f32 1.0, %v8530_v48  ;;  %14051 = vst [vmem:[#allocation46_spill] sm:$0xff] %v12320_v22  ;;  %v14054_v35 = vld [vmem:[#allocation12_spill] sm:$0xff]  ;;  %v14055_v48 = vld [vmem:[#allocation38_spill] sm:$0xff]  ;;  %7197 = vmatprep.subr.bf16.mxu1 %v7539_v15 }
 0x3ba   :  { %v12316_v45 = vadd.f32 %v14049_v62, %v11843_v20  ;;  %v8534_v39 = vpop.eup %8533  ;;  %8555 = vrcp.f32 %v3170_v25  ;;  %v2271_v51 = vsub.f32 0.0, %v12305_v30  ;;  %v12325_v29 = vadd.f32 %v14052_v13, %v11906_v43  ;;  %v12351_v62 = vpop.f32.mrf.mxu0  ;;  %v14058_v13 = vld [vmem:[#allocation37_spill] sm:$0xff] }
 0x3bb   :  { %v12329_v10 = vadd.f32 %v14053_v49, %v11825_v38  ;;  %8557 = vrcp.f32 %v3172_v60  ;;  %v3189_v32 = vadd.f32 1.0, %v8534_v39  ;;  %v2747_v55 = vmul.f32 1.442695, %v2252_v41  ;;  %v12349_v60 = vpop.f32.mrf.mxu1  ;;  %14057 = vst [vmem:[#allocation36_spill] sm:$0xff] %v12351_v62 }
 0x3bc   :  { %v8536_v5 = vpop.eup %8535  ;;  %v12333_v23 = vadd.f32 %v14054_v35, %v11839_v44  ;;  %v12341_v53 = vadd.f32 %v4194_v12, %v3772_v50  ;;  %8559 = vpow2.f32 %v2743_v40  ;;  %v2781_v11 = vmul.f32 1.442695, %v2269_v26  ;;  %14056 = vst [vmem:[#allocation24_spill] sm:$0xff] %v12349_v60  ;;  %v14059_v35 = vld [vmem:[#allocation34_spill] sm:$0xff] }
 0x3bd   :  { %v8538_v47 = vpop.eup %8537  ;;  %v3191_v54 = vadd.f32 1.0, %v8536_v5  ;;  %v3789_v14 = vmul.f32 %v8532_v1, %v12131_v3  ;;  %8561 = vrcp.f32 %v3189_v32  ;;  %v2270_v41 = vsub.f32 0.0, %v12316_v45 }
 0x3be   :  { %v8540_v56 = vpop.eup %8539  ;;  %v12347_v25 = vadd.f32 %v14055_v48, %v11843_v20  ;;  %v2272_v40 = vsub.f32 0.0, %v12325_v29  ;;  %v2289_v3 = vsub.f32 0.0, %v12329_v10  ;;  %v2291_v39 = vsub.f32 0.0, %v12333_v23 }
 0x3bf   :  { %v8542_v12 = vpop.eup %8541  ;;  %8563 = vrcp.f32 %v3191_v54  ;;  %v3190_v50 = vadd.f32 1.0, %v8540_v56  ;;  %v12358_v49 = vadd.f32 %v14058_v13, %v11906_v43  ;;  %v3791_v32 = vmul.f32 %v8538_v47, %v12136_v52  ;;  %v12371_v13 = vpop.f32.mrf.mxu0 }
 0x3c0   :  { %v8544_v26 = vpop.eup %8543  ;;  %v3192_v1 = vadd.f32 1.0, %v8542_v12  ;;  %8565 = vpow2.f32 %v2747_v55  ;;  %v12363_v15 = vadd.f32 %v14059_v35, %v11825_v38  ;;  %v12367_v54 = vadd.f32 %v14060_v36, %v11839_v44  ;;  %v12369_v12 = vpop.f32.mrf.mxu1  ;;  %14063 = vst [vmem:[#allocation12_spill] sm:$0xff] %v12371_v13 }
 0x3c1   :  { %v8546_v5 = vpop.eup %8545  ;;  %8567 = vrcp.f32 %v3190_v50  ;;  %v4157_v56 = vadd.f32 %v4156_v28, %v3789_v14  ;;  %v2785_v55 = vmul.f32 1.442695, %v2271_v51  ;;  %v2783_v48 = vmul.f32 1.442695, %v2270_v41  ;;  %14062 = vst [vmem:[#allocation9_spill] sm:$0xff] %v12369_v12  ;;  %v14064_v50 = vld [vmem:[#allocation11_spill] sm:$0xff] }
 0x3c2   :  { %14061 = vst [vmem:[#allocation30_spill] sm:$0xff] %v12367_v54  ;;  %8569 = vrcp.f32 %v3192_v1  ;;  %v8548_v62 = vpop.eup %8547  ;;  %v2787_v60 = vmul.f32 1.442695, %v2272_v40  ;;  %v2821_v52 = vmul.f32 1.442695, %v2289_v3  ;;  %v2290_v47 = vsub.f32 0.0, %v12347_v25 }
 0x3c3   :  { %v12376_v35 = vadd.f32 %v14064_v50, %v11843_v20  ;;  %v3790_v36 = vmul.f32 %v8544_v26, %v12146_v46  ;;  %v3209_v28 = vadd.f32 1.0, %v8546_v5  ;;  %v2825_v14 = vmul.f32 1.442695, %v2291_v39  ;;  %v14065_v50 = vld [vmem:[#allocation10_spill] sm:$0xff] }
 0x3c4   :  { %v8550_v22 = vpop.eup %8549  ;;  %v2292_v51 = vsub.f32 0.0, %v12358_v49  ;;  %v4183_v1 = vadd.f32 %v12310_v34, %v3791_v32  ;;  %8571 = vpow2.f32 %v2781_v11  ;;  %v2309_v40 = vsub.f32 0.0, %v12363_v15  ;;  %v12395_v34 = vpop.f32.mrf.mxu1 }
 0x3c5   :  { %v8552_v41 = vpop.eup %8551  ;;  %v2311_v3 = vsub.f32 0.0, %v12367_v54  ;;  %v3211_v12 = vadd.f32 1.0, %v8548_v62  ;;  %v12385_v19 = vadd.f32 %v14065_v50, %v11906_v43  ;;  %v12389_v46 = vadd.f32 %v12138_v0, %v11825_v38  ;;  %14068 = vst [vmem:[#allocation34_spill] sm:$0xff] %v12395_v34  ;;  %v12397_v11 = vpop.f32.mrf.mxu0 }
 0x3c6   :  { %v8554_v13 = vpop.eup %8553  ;;  %v12393_v26 = vadd.f32 %v12140_v37, %v11839_v44  ;;  %14069 = vst [vmem:[#allocation40_spill] sm:$0xff] %v12397_v11  ;;  %v3792_v39 = vmul.f32 %v8550_v22, %v12186_v57  ;;  %8573 = vpow2.f32 %v2785_v55  ;;  %v2823_v62 = vmul.f32 1.442695, %v2290_v47  ;;  %v12407_v47 = vpop.f32.mrf.mxu1 }
 0x3c7   :  { %14066 = vst [vmem:[#allocation38_spill] sm:$0xff] %v12389_v46  ;;  %v2310_v5 = vsub.f32 0.0, %v12376_v35  ;;  %v8556_v32 = vpop.eup %8555  ;;  %v4170_v50 = vadd.f32 %v12312_v7, %v3790_v36  ;;  %v3809_v0 = vmul.f32 %v8552_v41, %v12190_v4  ;;  %8575 = vrcp.f32 %v3209_v28  ;;  %14070 = vst [vmem:[#allocation11_spill] sm:$0xff] %v12407_v47  ;;  %v12409_v7 = vpop.f32.mrf.mxu0 }
 0x3c8   :  { %14067 = vst [vmem:[#allocation37_spill] sm:$0xff] %v12393_v26  ;;  %v2827_v17 = vmul.f32 1.442695, %v2292_v51  ;;  %v8558_v31 = vpop.eup %8557  ;;  %v3811_v37 = vmul.f32 %v8554_v13, %v12206_v58  ;;  %8577 = vpow2.f32 %v2783_v48  ;;  %v2861_v34 = vmul.f32 1.442695, %v2309_v40  ;;  %14071 = vst [vmem:[#allocation10_spill] sm:$0xff] %v12409_v7 }
 0x3c9   :  { %v2865_v54 = vmul.f32 1.442695, %v2311_v3  ;;  %v8560_v11 = vpop.eup %8559  ;;  %8579 = vrcp.f32 %v3211_v12  ;;  %v2312_v57 = vsub.f32 0.0, %v12385_v19  ;;  %v2329_v22 = vsub.f32 0.0, %v12389_v46  ;;  %v14072_v3 = vld [vmem:[#allocation44_spill] sm:$0xff] }
 0x3ca   :  { %v2331_v55 = vsub.f32 0.0, %v12393_v26  ;;  %v8562_v4 = vpop.eup %8561  ;;  %v4196_v36 = vadd.f32 %v12341_v53, %v3792_v39  ;;  %v3810_v58 = vmul.f32 %v8556_v32, %v12215_v21  ;;  %8581 = vpow2.f32 %v2787_v60  ;;  %v14073_v21 = vld [vmem:[#allocation51_spill] sm:$0xff] }
 0x3cb   :  { %v2863_v48 = vmul.f32 1.442695, %v2310_v5  ;;  %v4158_v28 = vadd.f32 %v4157_v56, %v3809_v0  ;;  %v3812_v12 = vmul.f32 %v8558_v31, %v12219_v16  ;;  %v3829_v51 = vmul.f32 %v8562_v4, %v12223_v9  ;;  %v12420_v56 = vpop.f32.mrf.mxu1  ;;  %v12422_v16 = vpop.f32.mrf.mxu0 }
 0x3cc   :  { %v8564_v13 = vpop.eup %8563  ;;  %8583 = vpow2.f32 %v2821_v52  ;;  %v4184_v40 = vadd.f32 %v4183_v1, %v3811_v37  ;;  %v3210_v26 = vadd.f32 1.0, %v8560_v11  ;;  %v2867_v53 = vmul.f32 1.442695, %v2312_v57 }
 0x3cd   :  { %v8566_v41 = vpop.eup %8565  ;;  %v3831_v47 = vmul.f32 %v8564_v13, %v14072_v3  ;;  %8585 = vpow2.f32 %v2825_v14  ;;  %v4159_v46 = vadd.f32 %v4158_v28, %v3829_v51  ;;  %v12418_v60 = vadd.f32 %v14073_v21, %v11843_v20  ;;  %v14074_v13 = vld [vmem:[#allocation52_spill] sm:$0xff] }
 0x3ce   :  { %v8568_v7 = vpop.eup %8567  ;;  %8587 = vpow2.f32 %v2823_v62  ;;  %v4171_v31 = vadd.f32 %v4170_v50, %v3810_v58  ;;  %v4197_v11 = vadd.f32 %v4196_v36, %v3812_v12  ;;  %v3212_v32 = vadd.f32 1.0, %v8566_v41 }
 0x3cf   :  { %v8570_v9 = vpop.eup %8569  ;;  %v4185_v52 = vadd.f32 %v4184_v40, %v3831_v47  ;;  %v3830_v1 = vmul.f32 %v8568_v7, %v12231_v61  ;;  %8589 = vpow2.f32 %v2827_v17  ;;  %v4160_v14 = vrot.slane %v4159_v46, 4  ;;  %v12430_v47 = vpop.f32.mrf.mxu1 }
 0x3d0   :  { %v3832_v39 = vmul.f32 %v8570_v9, %v12249_v27  ;;  %8591 = vpow2.f32 %v2861_v34  ;;  %v2901_v0 = vmul.f32 1.442695, %v2329_v22  ;;  %v12428_v50 = vadd.f32 %v14074_v13, %v11906_v43  ;;  %v12432_v61 = vpop.f32.mrf.mxu0 }
 0x3d1   :  { %v4186_v62 = vrot.slane %v4185_v52, 4  ;;  %v4172_v5 = vadd.f32 %v4171_v31, %v3830_v1  ;;  %v8572_v37 = vpop.eup %8571  ;;  %v4161_v57 = vadd.f32 %v4160_v14, %v4159_v46  ;;  %8593 = vrcp.f32 %v3210_v26 }
 0x3d2   :  { %v4198_v4 = vadd.f32 %v4197_v11, %v3832_v39  ;;  %8595 = vpow2.f32 %v2865_v54  ;;  %v2905_v27 = vmul.f32 1.442695, %v2331_v55  ;;  %v2330_v46 = vsub.f32 0.0, %v12418_v60  ;;  %v12438_v54 = vpop.f32.mrf.mxu1  ;;  %v12440_v55 = vpop.f32.mrf.mxu0 }
 0x3d3   :  { %v4187_v17 = vadd.f32 %v4186_v62, %v4185_v52  ;;  %v4173_v7 = vrot.slane %v4172_v5, 4  ;;  %v8574_v34 = vpop.eup %8573  ;;  %v4162_v36 = vrot.slane %v4161_v57, 2  ;;  %8597 = vpow2.f32 %v2863_v48  ;;  %14075 = vst [vmem:[#allocation44_spill] sm:$0xff] %v12440_v55 }
 0x3d4   :  { %v4199_v58 = vrot.slane %v4198_v4, 4  ;;  %v12435_v22 = vpop.eup %8575  ;;  %v3229_v12 = vadd.f32 1.0, %v8572_v37  ;;  %8599 = vpow2.f32 %v2867_v53  ;;  %v2332_v3 = vsub.f32 0.0, %v12428_v50 }
 0x3d5   :  { %v4188_v26 = vrot.slane %v4187_v17, 2  ;;  %v4174_v28 = vadd.f32 %v4173_v7, %v4172_v5  ;;  %v8578_v51 = vpop.eup %8577  ;;  %v4163_v41 = vadd.f32 %v4162_v36, %v4161_v57  ;;  %8601 = vpow2.f32 %v2901_v0  ;;  %v14076_v0 = vld [vmem:[#allocation55_spill] sm:$0xff]  ;;  %v12450_v7 = vpop.f32.mrf.mxu1 }
 0x3d6   :  { %v4200_v40 = vadd.f32 %v4199_v58, %v4198_v4  ;;  %v12442_v21 = vpop.eup %8579  ;;  %8603 = vrcp.f32 %v3212_v32  ;;  %v3231_v31 = vadd.f32 1.0, %v8574_v34  ;;  %v2903_v53 = vmul.f32 1.442695, %v2330_v46  ;;  %v14077_v4 = vld [vmem:[#allocation49_spill] sm:$0xff]  ;;  %v12452_v34 = vpop.f32.mrf.mxu0 }
 0x3d7   :  { %v4189_v48 = vadd.f32 %v4188_v26, %v4187_v17  ;;  %v4175_v9 = vrot.slane %v4174_v28, 2  ;;  %v8582_v52 = vpop.eup %8581  ;;  %v4164_v1 = vrot.slane %v4163_v41, 1  ;;  %8605 = vpow2.f32 %v2905_v27 }
 0x3d8   :  { %v4201_v11 = vrot.slane %v4200_v40, 2  ;;  %v3230_v5 = vadd.f32 1.0, %v8578_v51  ;;  %v12446_v37 = vadd.f32 %v14076_v0, %v11825_v38  ;;  %v4849_v13 = vpack.c.bf16 %v14077_v4, %v14077_v4  ;;  %v14078_v4 = vld [vmem:[#allocation56_spill] sm:$0xff] }
 0x3d9   :  { %v8584_v14 = vpop.eup %8583  ;;  %v4190_v39 = vrot.slane %v4189_v48, 1  ;;  %v4176_v62 = vadd.f32 %v4175_v9, %v4174_v28  ;;  %8607 = vrcp.f32 %v3229_v12  ;;  %v2907_v32 = vmul.f32 1.442695, %v2332_v3 }
 0x3da   :  { %v8586_v57 = vpop.eup %8585  ;;  %v4202_v17 = vadd.f32 %v4201_v11, %v4200_v40  ;;  %v4165_v36 = vadd.f32 %v4164_v1, %v4163_v41  ;;  %8609 = vrcp.f32 %v3231_v31  ;;  %v3232_v46 = vadd.f32 1.0, %v8582_v52  ;;  %v12459_v31 = vpop.f32.mrf.mxu1 }
 0x3db   :  { %v8588_v27 = vpop.eup %8587  ;;  %v4177_v58 = vrot.slane %v4176_v62, 1  ;;  %v4191_v28 = vadd.f32 %v4190_v39, %v4189_v48  ;;  %v3249_v9 = vadd.f32 1.0, %v8584_v14  ;;  %8611 = vpow2.f32 %v2903_v53  ;;  %v12461_v52 = vpop.f32.mrf.mxu0 }
 0x3dc   :  { %v8590_v26 = vpop.eup %8589  ;;  %v4203_v51 = vrot.slane %v4202_v17, 1  ;;  %8613 = vrcp.f32 %v3230_v5  ;;  %v3251_v40 = vadd.f32 1.0, %v8586_v57  ;;  %v2349_v12 = vsub.f32 0.0, %v12446_v37 }
 0x3dd   :  { %v8592_v0 = vpop.eup %8591  ;;  %v4178_v55 = vadd.f32 %v4177_v58, %v4176_v62  ;;  %v3250_v11 = vadd.f32 1.0, %v8588_v27  ;;  %8615 = vpow2.f32 %v2907_v32  ;;  %v12457_v41 = vadd.f32 %v14078_v4, %v11839_v44  ;;  %v14083_v32 = vld [vmem:[#allocation26_spill] sm:$0xff]  ;;  %v14087_v4 = vld [vmem:[#allocation20_spill] sm:$0xff] }
 0x3de   :  { %v4204_v3 = vadd.f32 %v4203_v51, %v4202_v17  ;;  %v8594_v48 = vpop.eup %8593  ;;  %v12463_v1 = vmul.f32 0.015625, %v4165_v36  ;;  %8617 = vrcp.f32 %v3232_v46  ;;  %v3252_v14 = vadd.f32 1.0, %v8590_v26 }
 0x3df   :  { %v12465_v53 = vmul.f32 0.015625, %v4178_v55  ;;  %v8596_v39 = vpop.eup %8595  ;;  %v12467_v62 = vmul.f32 0.015625, %v4191_v28  ;;  %8619 = vrcp.f32 %v3249_v9  ;;  %v3269_v57 = vadd.f32 1.0, %v8592_v0  ;;  %v12483_v9 = vpop.f32.mrf.mxu1 }
 0x3e0   :  { %14079 = vst [vmem:[#allocation51_spill] sm:$0xff] %v12463_v1  ;;  %v12469_v5 = vmul.f32 0.015625, %v4204_v3  ;;  %v8598_v17 = vpop.eup %8597  ;;  %v14084_v27 = vpack.c.bf16 %v14083_v32, %v14083_v32  ;;  %8621 = vrcp.f32 %v3251_v40  ;;  %v2941_v55 = vmul.f32 1.442695, %v2349_v12  ;;  %14085 = vst [vmem:[#allocation56_spill] sm:$0xff] %v12483_v9  ;;  %v12485_v0 = vpop.f32.mrf.mxu0  ;;  %v14089_v12 = vld [vmem:[#allocation57_spill] sm:$0xff] }
 0x3e1   :  { %14080 = vst [vmem:[#allocation52_spill] sm:$0xff] %v12465_v53  ;;  %14081 = vst [vmem:[#allocation55_spill] sm:$0xff] %v12467_v62  ;;  %v4649_v36 = vcombine.low %v12463_v1, %v12465_v53  ;;  %v8600_v46 = vpop.eup %8599  ;;  %v12478_v26 = vunpack.c.l.b16 %v4849_v13  ;;  %8623 = vrcp.f32 %v3250_v11  ;;  %v2351_v51 = vsub.f32 0.0, %v12457_v41 }
 0x3e2   :  { %14082 = vst [vmem:[#allocation49_spill] sm:$0xff] %v12469_v5  ;;  %v12474_v58 = vunpack.c.l.b16 %v14084_v27  ;;  %v4650_v28 = vcombine.low %v12467_v62, %v12469_v5  ;;  %14086 = vst [vmem:[#allocation26_spill] sm:$0xff] %v12485_v0  ;;  %v8602_v3 = vpop.eup %8601  ;;  %8625 = vrcp.f32 %v3252_v14  ;;  %v3271_v40 = vadd.f32 1.0, %v8596_v39 }
 0x3e3   :  { %v12488_v32 = vrot.slane %v4649_v36, %v14087_v4  ;;  %v12492_v13 = vadd.f32 %v14089_v12, %v11843_v20  ;;  %v8604_v27 = vpop.eup %8603  ;;  %8627 = vrcp.f32 %v3269_v57  ;;  %v3270_v11 = vadd.f32 1.0, %v8598_v17  ;;  %v12506_v57 = vpop.f32.mrf.mxu0 }
 0x3e4   :  { %v12495_v5 = vrot.slane %v4650_v28, %v14087_v4  ;;  %v2945_v53 = vmul.f32 1.442695, %v2351_v51  ;;  %v8606_v62 = vpop.eup %8605  ;;  %v3849_v1 = vmul.f32 %v12435_v22, %v12253_v33  ;;  %v3272_v0 = vadd.f32 1.0, %v8600_v46  ;;  %v12504_v28 = vpop.f32.mrf.mxu1  ;;  %14092 = vst [vmem:[#allocation61_spill] sm:$0xff] %v12506_v57  ;;  %v14093_v22 = vld [vmem:[#allocation58_spill] sm:$0xff] }
 0x3e5   :  { %14088 = vst [vmem:[#allocation59_spill] sm:$0xff] %v12488_v32  ;;  %8629 = vpow2.f32 %v2941_v55  ;;  %v2350_v14 = vsub.f32 0.0, %v12492_v13  ;;  %v3851_v36 = vmul.f32 %v12442_v21, %v12262_v24  ;;  %v3289_v12 = vadd.f32 1.0, %v8602_v3  ;;  %14091 = vst [vmem:[#allocation60_spill] sm:$0xff] %v12504_v28  ;;  %v14094_v24 = vld [vmem:[#allocation45_spill] sm:$0xff] }
 0x3e6   :  { %14090 = vst [vmem:[#allocation57_spill] sm:$0xff] %v12495_v5  ;;  %8631 = vpow2.f32 %v2945_v53  ;;  %v8608_v17 = vpop.eup %8607  ;;  %v3850_v51 = vmul.f32 %v8594_v48, %v12279_v18  ;;  %v12511_v55 = vadd.f32 %v14093_v22, %v11906_v43  ;;  %v3291_v39 = vadd.f32 1.0, %v8606_v62  ;;  %v14095_v53 = vld [vmem:[#allocation47_spill] sm:$0xff] }
 0x3e7   :  { %8633 = vrcp.f32 %v3271_v40  ;;  %v2943_v33 = vmul.f32 1.442695, %v2350_v14  ;;  %v8610_v46 = vpop.eup %8609  ;;  %v12515_v21 = vadd.f32 %v14094_v24, %v11825_v38  ;;  %v12519_v3 = vadd.f32 %v14095_v53, %v11839_v44  ;;  %v12530_v24 = vpop.f32.mrf.mxu1 }
 0x3e8   :  { %8635 = vrcp.f32 %v3270_v11  ;;  %v8612_v5 = vpop.eup %8611  ;;  %v3852_v18 = vmul.f32 %v8604_v27, %v12290_v59  ;;  %v2352_v48 = vsub.f32 0.0, %v12511_v55  ;;  %v12525_v40 = vadd.f32 %v12255_v8, %v11843_v20  ;;  %14096 = vst [vmem:[#allocation58_spill] sm:$0xff] %v12530_v24  ;;  %v12532_v53 = vpop.f32.mrf.mxu0 }
 0x3e9   :  { %8637 = vrcp.f32 %v3272_v0  ;;  %v8614_v11 = vpop.eup %8613  ;;  %v3869_v62 = vmul.f32 %v8608_v17, %v12295_v63  ;;  %v2369_v14 = vsub.f32 0.0, %v12515_v21  ;;  %v2371_v22 = vsub.f32 0.0, %v12519_v3  ;;  %14097 = vst [vmem:[#allocation45_spill] sm:$0xff] %v12532_v53 }
 0x3ea   :  { %8639 = vrcp.f32 %v3289_v12  ;;  %v8616_v59 = vpop.eup %8615  ;;  %v3871_v0 = vmul.f32 %v8610_v46, %v12305_v30  ;;  %v2947_v27 = vmul.f32 1.442695, %v2352_v48  ;;  %v2370_v8 = vsub.f32 0.0, %v12525_v40  ;;  %v12549_v48 = vpop.f32.mrf.mxu1 }
 0x3eb   :  { %8641 = vpow2.f32 %v2943_v33  ;;  %v8618_v32 = vpop.eup %8617  ;;  %v3290_v57 = vadd.f32 1.0, %v8612_v5  ;;  %v2981_v63 = vmul.f32 1.442695, %v2369_v14  ;;  %v2985_v12 = vmul.f32 1.442695, %v2371_v22  ;;  %v14098_v33 = vld [vmem:[#allocation48_spill] sm:$0xff] }
 0x3ec   :  { %8643 = vrcp.f32 %v3291_v39  ;;  %v8620_v17 = vpop.eup %8619  ;;  %v3870_v28 = vmul.f32 %v8614_v11, %v12316_v45  ;;  %v2983_v4 = vmul.f32 1.442695, %v2370_v8  ;;  %v12539_v53 = vadd.f32 %v12257_v42, %v11906_v43  ;;  %v14099_v5 = vld [vmem:[#allocation13_spill] sm:$0xff]  ;;  %14100 = vst [vmem:[#allocation47_spill] sm:$0xff] %v12549_v48  ;;  %v12551_v45 = vpop.f32.mrf.mxu0  ;;  %v14122_v48 = vld [vmem:[#allocation22_spill] sm:$0xff] }
 0x3ed   :  { %8645 = vpow2.f32 %v2947_v27  ;;  %v8622_v24 = vpop.eup %8621  ;;  %v3292_v30 = vadd.f32 1.0, %v8616_v59  ;;  %v12543_v46 = vadd.f32 %v14098_v33, %v11825_v38  ;;  %v12547_v39 = vadd.f32 %v14099_v5, %v11839_v44  ;;  %14101 = vst [vmem:[#allocation48_spill] sm:$0xff] %v12551_v45  ;;  %v14102_v5 = vld [vmem:[#allocation27_spill] sm:$0xff] }
 0x3ee   :  { %8647 = vpow2.f32 %v2981_v63  ;;  %v8624_v11 = vpop.eup %8623  ;;  %v4413_v14 = vadd.f32 %v3869_v62, %v3849_v1  ;;  %v3872_v42 = vmul.f32 %v8618_v32, %v12325_v29  ;;  %v2372_v22 = vsub.f32 0.0, %v12539_v53 }
 0x3ef   :  { %8649 = vpow2.f32 %v2985_v12  ;;  %v8626_v59 = vpop.eup %8625  ;;  %v3889_v27 = vmul.f32 %v8620_v17, %v12329_v10  ;;  %v2389_v38 = vsub.f32 0.0, %v12543_v46  ;;  %v2391_v44 = vsub.f32 0.0, %v12547_v39  ;;  %v12563_v10 = vpop.f32.mrf.mxu1 }
 0x3f0   :  { %8651 = vrcp.f32 %v3290_v57  ;;  %v8628_v8 = vpop.eup %8627  ;;  %v4439_v63 = vadd.f32 %v3871_v0, %v3851_v36  ;;  %v2987_v33 = vmul.f32 1.442695, %v2372_v22  ;;  %v4828_v1 = vpack.c.bf16 %v14102_v5, %v14102_v5  ;;  %14103 = vst [vmem:[#allocation13_spill] sm:$0xff] %v12563_v10  ;;  %v12565_v57 = vpop.f32.mrf.mxu0 }
 0x3f1   :  { %8653 = vpow2.f32 %v2983_v4  ;;  %v12560_v29 = vadd.f32 %v3870_v28, %v3850_v51  ;;  %v3891_v32 = vmul.f32 %v8622_v24, %v12333_v23  ;;  %v3021_v12 = vmul.f32 1.442695, %v2389_v38  ;;  %14104 = vst [vmem:[#allocation27_spill] sm:$0xff] %v12565_v57  ;;  %v14105_v4 = vld [vmem:[#allocation28_spill] sm:$0xff]  ;;  %v14106_v38 = vld [vmem:[#allocation29_spill] sm:$0xff] }
 0x3f2   :  { %v8630_v62 = vpop.eup %8629  ;;  %8655 = vrcp.f32 %v3292_v30  ;;  %v3025_v36 = vmul.f32 1.442695, %v2391_v44  ;;  %v4848_v0 = vpack.c.bf16 %v14105_v4, %v14105_v4  ;;  %v12569_v5 = vadd.f32 %v3872_v42, %v3852_v18  ;;  %v14108_v18 = vld [vmem:[#allocation39_spill] sm:$0xff] }
 0x3f3   :  { %v8632_v17 = vpop.eup %8631  ;;  %v3309_v45 = vadd.f32 1.0, %v8630_v62  ;;  %8657 = vpow2.f32 %v2987_v33  ;;  %v12571_v28 = vadd.f32 %v4413_v14, %v3889_v27  ;;  %v5235_v24 = vunpack.c.l.b16 %v4828_v1  ;;  %v14107_v62 = vld [vmem:[#allocation50_spill] sm:$0xff]  ;;  %v12590_v27 = vpop.f32.mrf.mxu1 }
 0x3f4   :  { %v8634_v22 = vpop.eup %8633  ;;  %v3311_v51 = vadd.f32 1.0, %v8632_v17  ;;  %8659 = vpow2.f32 %v3021_v12  ;;  %v5255_v30 = vunpack.c.l.b16 %v4848_v0  ;;  %v4830_v57 = vpack.c.bf16 %v14106_v38, %v14106_v38  ;;  %14109 = vst [vmem:[#allocation28_spill] sm:$0xff] %v12590_v27  ;;  %v12592_v1 = vpop.f32.mrf.mxu0  ;;  %v14111_v38 = vld [vmem:[#allocation33_spill] sm:$0xff] }
 0x3f5   :  { %v12573_v23 = vpop.eup %8635  ;;  %v4850_v44 = vpack.c.bf16 %v14107_v62, %v14107_v62  ;;  %v12581_v4 = vadd.f32 %v4439_v63, %v3891_v32  ;;  %8661 = vrcp.f32 %v3309_v45  ;;  %v5274_v14 = vsel %vm4773_vm2, %v12474_v58, %v14108_v18  ;;  %14110 = vst [vmem:[#allocation29_spill] sm:$0xff] %v12592_v1  ;;  %v418_v58 = vld [vmem:[%s13562_s4 + $0x10] sm:$0xf] }
 0x3f6   :  { %v12579_v33 = vpop.eup %8637  ;;  %v12588_v42 = vadd.f32 %v12281_v2, %v11843_v20  ;;  %v3890_v17 = vmul.f32 %v8624_v11, %v12347_v25  ;;  %v3892_v63 = vmul.f32 %v8626_v59, %v12358_v49  ;;  %8663 = vpow2.f32 %v3025_v36  ;;  %v7541_v25 = vld [vmem:[%s13563_s5 + $0x338] sm:$0xff]   ;;  %v14112_v18 = vld [vmem:[#allocation16_spill] sm:$0xff] }
 0x3f7   :  { %v12594_v12 = vpop.eup %8639  ;;  %v5275_v45 = vsel %vm4773_vm2, %v5255_v30, %v5235_v24  ;;  %v5237_v2 = vunpack.c.l.b16 %v4830_v57  ;;  %v5257_v0 = vunpack.c.l.b16 %v4850_v44  ;;  %v5276_v62 = vsel %vm4773_vm2, %v12478_v26, %v14111_v38  ;;  %v7543_v57 = vld [vmem:[%s13563_s5 + $0x370] sm:$0xff]   ;;  %v14115_v38 = vld [vmem:[#allocation30_spill] sm:$0xff] }
 0x3f8   :  { %v8642_v32 = vpop.eup %8641  ;;  %v5295_v20 = vpack.c.b16 %v5275_v45, %v5275_v45  ;;  %8665 = vrcp.f32 %v3311_v51  ;;  %v5294_v59 = vpack.c.b16 %v5274_v14, %v5274_v14  ;;  %v2390_v36 = vsub.f32 0.0, %v12588_v42  ;;  %v12623_v14 = vpop.f32.mrf.mxu1 }
 0x3f9   :  { %v12608_v49 = vpop.eup %8643  ;;  %v3310_v11 = vadd.f32 1.0, %v8642_v32  ;;  %v3909_v30 = vmul.f32 %v8628_v8, %v12363_v15  ;;  %v5277_v26 = vsel %vm4773_vm2, %v5257_v0, %v5237_v2  ;;  %v12618_v44 = vadd.f32 %v12283_v6, %v11906_v43  ;;  %14113 = vst [vmem:[#allocation50_spill] sm:$0xff] %v12623_v14  ;;  %v12625_v45 = vpop.f32.mrf.mxu0  ;;  %v7542_v8 = vld [vmem:[%s13563_s5 + $0x3b8] sm:$0xff]   ;;  %v14116_v2 = vld [vmem:[#allocation15_spill] sm:$0xff] }
 0x3fa   :  { %v8646_v24 = vpop.eup %8645  ;;  %6478 = vmatprep.mubr.bf16.mxu1 %v5295_v20  ;;  %v12621_v51 = vrot.slane %v418_v58, %v14112_v18  ;;  %14114 = vst [vmem:[#allocation39_spill] sm:$0xff] %v12625_v45  ;;  %v3911_v1 = vmul.f32 %v8634_v22, %v14115_v38  ;;  %v5297_v27 = vpack.c.b16 %v5277_v26, %v5277_v26  ;;  %v14117_v18 = vld [vmem:[#allocation17_spill] sm:$0xff]  ;;  %v3023_v26 = vmul.f32 1.442695, %v2390_v36  ;;  %v12660_v36 = vpop.f32.mrf.mxu1 }
 0x3fb   :  { %v8648_v32 = vpop.eup %8647  ;;  %8667 = vrcp.f32 %v3310_v11  ;;  %6479 = vmatmul.mubr.bf16.vlgmr.msra.gmra.mxu1 %v5294_v59  ;;  %v5296_v15 = vpack.c.b16 %v5276_v62, %v5276_v62  ;;  %v2392_v20 = vsub.f32 0.0, %v12618_v44  ;;  %v12637_v45 = vrot.slane %v418_v58, %v14117_v18  ;;  %v7544_v22 = vld [vmem:[%s13563_s5 + $0x3f0] sm:$0xff]   ;;  %14120 = vst [vmem:[#allocation33_spill] sm:$0xff] %v12660_v36  ;;  %v14131_v36 = vld [vmem:[#allocation38_spill] sm:$0xff] }
 0x3fc   :  { %v8650_v43 = vpop.eup %8649  ;;  %v3329_v6 = vadd.f32 1.0, %v8648_v32  ;;  %v12634_v0 = vadd.f32 %v14116_v2, %v12621_v51  ;;  %7198 = vmatpush3.bf16.msra.mxu1 %v7541_v25  ;;  %v7545_v62 = vld [vmem:[%s13563_s5 + $0x330] sm:$0xff]   ;;  %6518 = vmatprep.mubr.bf16.mxu0 %v5297_v27  ;;  %v14118_v32 = vld [vmem:[#allocation18_spill] sm:$0xff]  ;;  %v14119_v2 = vld [vmem:[#allocation19_spill] sm:$0xff]  ;;  %v12657_v10 = vadd.f32 %v12560_v29, %v3890_v17 }
 0x3fd   :  { %v12645_v11 = vpop.eup %8651  ;;  %v3331_v59 = vadd.f32 1.0, %v8650_v43  ;;  %v12648_v38 = vrot.slane %v418_v58, %v14118_v32  ;;  %v12651_v18 = vrot.slane %v418_v58, %v14119_v2  ;;  %7199 = vmatprep.subr.bf16.mxu1 %v7543_v57  ;;  %v7547_v25 = vld [vmem:[%s13563_s5 + $0x368] sm:$0xff]   ;;  %6519 = vmatmul.mubr.bf16.vlgmr.msra.gmra.mxu0 %v5296_v15  ;;  %v3027_v43 = vmul.f32 1.442695, %v2392_v20  ;;  %v12662_v32 = vpop.f32.mrf.mxu0  ;;  %v7546_v15 = vld [vmem:[%s13563_s5 + $0x3b0] sm:$0xff]  }
 0x3fe   :  { %v8654_v14 = vpop.eup %8653  ;;  %8669 = vrcp.f32 %v3329_v6  ;;  %v2093_v27 = vsub.f32 0.0, %v12634_v0  ;;  %14121 = vst [vmem:[#allocation16_spill] sm:$0xff] %v12662_v32  ;;  %v12667_v57 = vadd.f32 %v12569_v5, %v3892_v63  ;;  %v3312_v2 = vadd.f32 1.0, %v8646_v24  ;;  %v14123_v29 = vld [vmem:[#allocation43_spill] sm:$0xff]  ;;  %7220 = vmatpush3.bf16.msra.mxu0 %v7542_v8  ;;  %v12705_v32 = vpop.f32.mrf.mxu1 }
 0x3ff   :  { %v12664_v58 = vpop.eup %8655  ;;  %v12671_v9 = vadd.f32 %v14122_v48, %v12637_v45  ;;  %v12675_v17 = vadd.f32 %v14123_v29, %v12648_v38  ;;  %v12681_v20 = vadd.f32 %v12571_v28, %v3909_v30  ;;  %v12684_v5 = vadd.f32 %v12581_v4, %v3911_v1  ;;  %v14125_v48 = vld [vmem:[#allocation46_spill] sm:$0xff]  ;;  %7221 = vmatprep.subr.bf16.mxu0 %v7544_v22  ;;  %v7548_v24 = vld [vmem:[%s13563_s5 + $0x3e8] sm:$0xff]  }
 0x400   :  { %v8658_v6 = vpop.eup %8657  ;;  %8671 = vrcp.f32 %v3331_v59  ;;  %v12688_v63 = vadd.f32 %v14125_v48, %v12651_v18  ;;  %7200 = vmatpush3.bf16.msra.mxu1 %v7545_v62  ;;  %v7549_v8 = vld [vmem:[%s13563_s5 + $0x328] sm:$0xff]   ;;  %v3330_v30 = vadd.f32 1.0, %v8654_v14  ;;  %v2429_v4 = vmul.f32 1.442695, %v2093_v27  ;;  %v7551_v22 = vld [vmem:[%s13563_s5 + $0x360] sm:$0xff]   ;;  %14128 = vst [vmem:[#allocation17_spill] sm:$0xff] %v12705_v32  ;;  %v12707_v14 = vpop.f32.mrf.mxu0 }
 0x401   :  { %14124 = vst [vmem:[#allocation30_spill] sm:$0xff] %v12675_v17  ;;  %v8660_v28 = vpop.eup %8659  ;;  %8673 = vpow2.f32 %v3023_v26  ;;  %v2095_v1 = vsub.f32 0.0, %v12671_v9  ;;  %7201 = vmatprep.subr.bf16.mxu1 %v7547_v25  ;;  %v2094_v59 = vsub.f32 0.0, %v12675_v17  ;;  %v14127_v29 = vld [vmem:[#allocation24_spill] sm:$0xff]  ;;  %14129 = vst [vmem:[#allocation18_spill] sm:$0xff] %v12707_v14  ;;  %v3910_v25 = vmul.f32 %v12573_v23, %v12376_v35  ;;  %v7553_v23 = vld [vmem:[%s13563_s5 + $0x320] sm:$0xff]  }
 0x402   :  { %14126 = vst [vmem:[#allocation15_spill] sm:$0xff] %v12688_v63  ;;  %v3349_v62 = vadd.f32 1.0, %v8660_v28  ;;  %8675 = vpow2.f32 %v3027_v43  ;;  %v12703_v48 = vadd.f32 %v14127_v29, %v12621_v51  ;;  %v8662_v26 = vpop.eup %8661  ;;  %v3912_v27 = vmul.f32 %v12579_v33, %v12385_v19  ;;  %v14130_v43 = vld [vmem:[#allocation36_spill] sm:$0xff]  ;;  %7222 = vmatpush3.bf16.msra.mxu0 %v7546_v15  ;;  %v7552_v19 = vld [vmem:[%s13563_s5 + $0x3e0] sm:$0xff]   ;;  %v14132_v33 = vld [vmem:[#allocation37_spill] sm:$0xff] }
 0x403   :  { %8677 = vrcp.f32 %v3312_v2  ;;  %v12715_v28 = vadd.f32 %v14130_v43, %v12637_v45  ;;  %v7550_v29 = vld [vmem:[%s13563_s5 + $0x3a8] sm:$0xff]   ;;  %v8664_v32 = vpop.eup %8663  ;;  %v3929_v14 = vmul.f32 %v12594_v12, %v14131_v36  ;;  %v2433_v17 = vmul.f32 1.442695, %v2095_v1  ;;  %7223 = vmatprep.subr.bf16.mxu0 %v7548_v24  ;;  %v7555_v36 = vld [vmem:[%s13563_s5 + $0x358] sm:$0xff]  }
 0x404   :  { %8679 = vrcp.f32 %v3349_v62  ;;  %v2096_v35 = vsub.f32 0.0, %v12688_v63  ;;  %7202 = vmatpush3.bf16.msra.mxu1 %v7549_v8  ;;  %v3931_v2 = vmul.f32 %v12608_v49, %v14132_v33  ;;  %v3332_v15 = vadd.f32 1.0, %v8658_v6  ;;  %v14133_v62 = vld [vmem:[#allocation9_spill] sm:$0xff]  ;;  %v12739_v63 = vpop.f32.mrf.mxu1  ;;  %v12741_v49 = vpop.f32.mrf.mxu0 }
 0x405   :  { %8681 = vrcp.f32 %v3330_v30  ;;  %v3351_v12 = vadd.f32 1.0, %v8664_v32  ;;  %7203 = vmatprep.subr.bf16.mxu1 %v7551_v22  ;;  %v8666_v24 = vpop.eup %8665  ;;  %v2431_v8 = vmul.f32 1.442695, %v2094_v59  ;;  %v2113_v1 = vsub.f32 0.0, %v12703_v48  ;;  %14134 = vst [vmem:[#allocation19_spill] sm:$0xff] %v12741_v49  ;;  %v14135_v30 = vld [vmem:[#allocation12_spill] sm:$0xff] }
 0x406   :  { %8683 = vpow2.f32 %v2429_v4  ;;  %v12737_v43 = vadd.f32 %v14133_v62, %v12648_v38  ;;  %v12744_v32 = vadd.f32 %v12657_v10, %v3910_v25  ;;  %v2115_v6 = vsub.f32 0.0, %v12715_v28  ;;  %7224 = vmatpush3.bf16.msra.mxu0 %v7550_v29  ;;  %v7554_v22 = vld [vmem:[%s13563_s5 + $0x3a0] sm:$0xff]   ;;  %v7556_v25 = vld [vmem:[%s13563_s5 + $0x3d8] sm:$0xff]   ;;  %v12775_v49 = vpop.f32.mrf.mxu1 }
 0x407   :  { %8685 = vrcp.f32 %v3351_v12  ;;  %v12749_v4 = vadd.f32 %v14135_v30, %v12651_v18  ;;  %v12755_v33 = vadd.f32 %v12667_v57, %v3912_v27  ;;  %v2435_v62 = vmul.f32 1.442695, %v2096_v35  ;;  %7225 = vmatprep.subr.bf16.mxu0 %v7552_v19  ;;  %v7557_v29 = vld [vmem:[%s13563_s5 + $0x318] sm:$0xff]   ;;  %v7559_v27 = vld [vmem:[%s13563_s5 + $0x350] sm:$0xff]  }
 0x408   :  { %v8668_v59 = vpop.eup %8667  ;;  %8687 = vpow2.f32 %v2433_v17  ;;  %v2114_v10 = vsub.f32 0.0, %v12737_v43  ;;  %7204 = vmatpush3.bf16.msra.mxu1 %v7553_v23  ;;  %v3949_v12 = vmul.f32 %v8662_v26, %v12446_v37  ;;  %v3951_v30 = vmul.f32 %v8666_v24, %v12457_v41  ;;  %v14136_v57 = vld [vmem:[#allocation34_spill] sm:$0xff]  ;;  %v12777_v37 = vpop.f32.mrf.mxu0  ;;  %v14137_v24 = vld [vmem:[#allocation40_spill] sm:$0xff] }
 0x409   :  { %8689 = vrcp.f32 %v3332_v15  ;;  %v12768_v17 = vadd.f32 %v14136_v57, %v12621_v51  ;;  %7205 = vmatprep.subr.bf16.mxu1 %v7555_v36  ;;  %v4416_v35 = vadd.f32 %v12681_v20, %v3929_v14  ;;  %v4442_v19 = vadd.f32 %v12684_v5, %v3931_v2  ;;  %v7558_v20 = vld [vmem:[%s13563_s5 + $0x398] sm:$0xff]   ;;  %v14138_v2 = vld [vmem:[#allocation11_spill] sm:$0xff] }
 0x40a   :  { %8691 = vpow2.f32 %v2431_v8  ;;  %v2469_v23 = vmul.f32 1.442695, %v2113_v1  ;;  %v3930_v26 = vmul.f32 %v12645_v11, %v12418_v60  ;;  %v2473_v15 = vmul.f32 1.442695, %v2115_v6  ;;  %7226 = vmatpush3.bf16.msra.mxu0 %v7554_v22  ;;  %v7560_v11 = vld [vmem:[%s13563_s5 + $0x3d0] sm:$0xff]  }
 0x40b   :  { %v8670_v41 = vpop.eup %8669  ;;  %v2116_v36 = vsub.f32 0.0, %v12749_v4  ;;  %v12784_v57 = vadd.f32 %v14137_v24, %v12637_v45  ;;  %v3932_v5 = vmul.f32 %v12664_v58, %v12428_v50  ;;  %8693 = vpow2.f32 %v2435_v62  ;;  %7227 = vmatprep.subr.bf16.mxu0 %v7556_v25  ;;  %v7561_v8 = vld [vmem:[%s13563_s5 + $0x310] sm:$0xff]   ;;  %v14139_v58 = vld [vmem:[#allocation10_spill] sm:$0xff] }
 0x40c   :  { %v2471_v14 = vmul.f32 1.442695, %v2114_v10  ;;  %v12793_v60 = vadd.f32 %v14138_v2, %v12648_v38  ;;  %7206 = vmatpush3.bf16.msra.mxu1 %v7557_v29  ;;  %v4417_v6 = vadd.f32 %v4416_v35, %v3949_v12  ;;  %v4443_v22 = vadd.f32 %v4442_v19, %v3951_v30  ;;  %v7563_v10 = vld [vmem:[%s13563_s5 + $0x348] sm:$0xff]   ;;  %v12815_v30 = vpop.f32.mrf.mxu1  ;;  %v12817_v35 = vpop.f32.mrf.mxu0 }
 0x40d   :  { %v8672_v1 = vpop.eup %8671  ;;  %v2133_v50 = vsub.f32 0.0, %v12768_v17  ;;  %v12804_v62 = vadd.f32 %v14139_v58, %v12651_v18  ;;  %7207 = vmatprep.subr.bf16.mxu1 %v7559_v27  ;;  %v3950_v29 = vmul.f32 %v8668_v59, %v12492_v13  ;;  %v3969_v24 = vmul.f32 %v8670_v41, %v12515_v21  ;;  %14140 = vst [vmem:[#allocation22_spill] sm:$0xff] %v12815_v30  ;;  %v7562_v13 = vld [vmem:[%s13563_s5 + $0x390] sm:$0xff]   ;;  %v7564_v41 = vld [vmem:[%s13563_s5 + $0x3c8] sm:$0xff]  }
 0x40e   :  { %v8674_v25 = vpop.eup %8673  ;;  %8695 = vpow2.f32 %v2469_v23  ;;  %v12813_v12 = vadd.f32 %v12420_v56, %v12621_v51  ;;  %14141 = vst [vmem:[#allocation43_spill] sm:$0xff] %v12817_v35  ;;  %v2475_v2 = vmul.f32 1.442695, %v2116_v36  ;;  %v2135_v58 = vsub.f32 0.0, %v12784_v57  ;;  %7228 = vmatpush3.bf16.msra.mxu0 %v7558_v20 }
 0x40f   :  { %v8676_v19 = vpop.eup %8675  ;;  %v3350_v27 = vadd.f32 1.0, %v8674_v25  ;;  %8697 = vpow2.f32 %v2473_v15  ;;  %v3971_v59 = vmul.f32 %v8672_v1, %v12519_v3  ;;  %v2134_v23 = vsub.f32 0.0, %v12793_v60  ;;  %7229 = vmatprep.subr.bf16.mxu0 %v7560_v11  ;;  %v7565_v15 = vld [vmem:[%s13563_s5 + $0x308] sm:$0xff]  }
 0x410   :  { %v8678_v21 = vpop.eup %8677  ;;  %v3352_v56 = vadd.f32 1.0, %v8676_v19  ;;  %8699 = vpow2.f32 %v2471_v14  ;;  %7208 = vmatpush3.bf16.msra.mxu1 %v7561_v8  ;;  %v2509_v20 = vmul.f32 1.442695, %v2133_v50  ;;  %v2136_v25 = vsub.f32 0.0, %v12804_v62  ;;  %v7567_v14 = vld [vmem:[%s13563_s5 + $0x340] sm:$0xff]   ;;  %v12843_v50 = vpop.f32.mrf.mxu0 }
 0x411   :  { %v8680_v36 = vpop.eup %8679  ;;  %8701 = vrcp.f32 %v3350_v27  ;;  %v12834_v3 = vadd.f32 %v12422_v16, %v12637_v45  ;;  %7209 = vmatprep.subr.bf16.mxu1 %v7563_v10  ;;  %v4418_v8 = vadd.f32 %v4417_v6, %v3969_v24  ;;  %v2153_v19 = vsub.f32 0.0, %v12813_v12  ;;  %v12841_v27 = vpop.f32.mrf.mxu1  ;;  %14143 = vst [vmem:[#allocation24_spill] sm:$0xff] %v12843_v50  ;;  %v7566_v6 = vld [vmem:[%s13563_s5 + $0x388] sm:$0xff]   ;;  %v7568_v50 = vld [vmem:[%s13563_s5 + $0x3c0] sm:$0xff]  }
 0x412   :  { %v8682_v11 = vpop.eup %8681  ;;  %v3989_v1 = vmul.f32 %v8680_v36, %v12543_v46  ;;  %8703 = vrcp.f32 %v3352_v56  ;;  %14142 = vst [vmem:[#allocation46_spill] sm:$0xff] %v12841_v27  ;;  %v4429_v16 = vadd.f32 %v12744_v32, %v3930_v26  ;;  %v4455_v10 = vadd.f32 %v12755_v33, %v3932_v5  ;;  %7230 = vmatpush3.bf16.msra.mxu0 %v7562_v13  ;;  %v7569_v32 = vld [vmem:[%s13563_s5 + $0x300] sm:$0xff]  }
 0x413   :  { %v8684_v35 = vpop.eup %8683  ;;  %v2513_v30 = vmul.f32 1.442695, %v2135_v58  ;;  %v4444_v46 = vadd.f32 %v4443_v22, %v3971_v59  ;;  %8705 = vpow2.f32 %v2475_v2  ;;  %v2511_v36 = vmul.f32 1.442695, %v2134_v23  ;;  %7231 = vmatprep.subr.bf16.mxu0 %v7564_v41  ;;  %v12866_v41 = vpop.f32.mrf.mxu1 }
 0x414   :  { %v8686_v24 = vpop.eup %8685  ;;  %v4419_v56 = vadd.f32 %v4418_v8, %v3989_v1  ;;  %7210 = vmatpush3.bf16.msra.mxu1 %v7565_v15  ;;  %v2515_v5 = vmul.f32 1.442695, %v2136_v25  ;;  %v2155_v58 = vsub.f32 0.0, %v12834_v3  ;;  %v12860_v22 = vadd.f32 %v12430_v47, %v12648_v38  ;;  %14144 = vst [vmem:[#allocation36_spill] sm:$0xff] %v12866_v41  ;;  %v12868_v15 = vpop.f32.mrf.mxu0  ;;  %v7570_v47 = vld [vmem:[%s13563_s5 + $0x380] sm:$0xff]  }
 0x415   :  { %v8688_v33 = vpop.eup %8687  ;;  %v3991_v26 = vmul.f32 %v8686_v24, %v12547_v39  ;;  %7211 = vmatprep.subr.bf16.mxu1 %v7567_v14  ;;  %v4430_v13 = vadd.f32 %v4429_v16, %v3950_v29  ;;  %8707 = vpow2.f32 %v2509_v20  ;;  %v2549_v59 = vmul.f32 1.442695, %v2153_v19  ;;  %14145 = vst [vmem:[#allocation38_spill] sm:$0xff] %v12868_v15 }
 0x416   :  { %v8690_v2 = vpop.eup %8689  ;;  %v12864_v23 = vadd.f32 %v12432_v61, %v12651_v18  ;;  %v4420_v25 = vrot.slane %v4419_v56, 4  ;;  %v3053_v1 = vadd.f32 1.0, %v8684_v35  ;;  %8709 = vpow2.f32 %v2513_v30  ;;  %7232 = vmatpush3.bf16.msra.mxu0 %v7566_v6 }
 0x417   :  { %v8692_v39 = vpop.eup %8691  ;;  %v4445_v8 = vadd.f32 %v4444_v46, %v3991_v26  ;;  %v3952_v29 = vmul.f32 %v8678_v21, %v12511_v55  ;;  %v3970_v20 = vmul.f32 %v8682_v11, %v12525_v40  ;;  %v3055_v61 = vadd.f32 1.0, %v8688_v33  ;;  %7233 = vmatprep.subr.bf16.mxu0 %v7568_v50  ;;  %v12878_v46 = vpop.f32.mrf.mxu1  ;;  %v14148_v33 = vld [vmem:[#allocation44_spill] sm:$0xff] }
 0x418   :  { %8711 = vpow2.f32 %v2511_v36  ;;  %7212 = vmatpush3.bf16.msra.mxu1 %v7569_v32  ;;  %v8694_v14 = vpop.eup %8693  ;;  %v2553_v16 = vmul.f32 1.442695, %v2155_v58  ;;  %v2154_v35 = vsub.f32 0.0, %v12860_v22  ;;  %v3972_v30 = vmul.f32 %v8690_v2, %v12539_v53  ;;  %14146 = vst [vmem:[#allocation37_spill] sm:$0xff] %v12878_v46  ;;  %v12880_v55 = vpop.f32.mrf.mxu0 }
 0x419   :  { %v4446_v19 = vrot.slane %v4445_v8, 4  ;;  %8713 = vpow2.f32 %v2515_v5  ;;  %v3054_v6 = vadd.f32 1.0, %v8692_v39  ;;  %v2156_v24 = vsub.f32 0.0, %v12864_v23  ;;  %14147 = vst [vmem:[#allocation9_spill] sm:$0xff] %v12880_v55 }
 0x41a   :  { %8715 = vpow2.f32 %v2549_v59  ;;  %v4421_v21 = vadd.f32 %v4420_v25, %v4419_v56  ;;  %v12884_v50 = vadd.f32 %v12438_v54, %v12621_v51  ;;  %7234 = vmatpush3.bf16.msra.mxu0 %v7570_v47  ;;  %v4456_v32 = vadd.f32 %v4455_v10, %v3952_v29  ;;  %v12890_v54 = vpop.f32.mrf.mxu1 }
 0x41b   :  { %v8696_v40 = vpop.eup %8695  ;;  %v4447_v11 = vadd.f32 %v4446_v19, %v4445_v8  ;;  %8717 = vrcp.f32 %v3053_v1  ;;  %v3056_v53 = vadd.f32 1.0, %v8694_v14  ;;  %v12888_v26 = vadd.f32 %v14148_v33, %v12637_v45  ;;  %14149 = vst [vmem:[#allocation12_spill] sm:$0xff] %v12890_v54  ;;  %v12892_v8 = vpop.f32.mrf.mxu0 }
 0x41c   :  { %v8698_v36 = vpop.eup %8697  ;;  %8719 = vrcp.f32 %v3055_v61  ;;  %v4431_v58 = vadd.f32 %v4430_v13, %v3970_v20  ;;  %v2551_v2 = vmul.f32 1.442695, %v2154_v35  ;;  %v4457_v59 = vadd.f32 %v4456_v32, %v3972_v30  ;;  %14150 = vst [vmem:[#allocation34_spill] sm:$0xff] %v12892_v8 }
 0x41d   :  { %v8700_v5 = vpop.eup %8699  ;;  %8721 = vpow2.f32 %v2553_v16  ;;  %v3073_v39 = vadd.f32 1.0, %v8696_v40  ;;  %v2555_v25 = vmul.f32 1.442695, %v2156_v24  ;;  %v4422_v1 = vrot.slane %v4421_v21, 2  ;;  %v12902_v24 = vpop.f32.mrf.mxu1 }
 0x41e   :  { %v8702_v56 = vpop.eup %8701  ;;  %8723 = vrcp.f32 %v3054_v6  ;;  %v4448_v47 = vrot.slane %v4447_v11, 2  ;;  %v2173_v61 = vsub.f32 0.0, %v12884_v50  ;;  %v2175_v20 = vsub.f32 0.0, %v12888_v26  ;;  %14151 = vst [vmem:[#allocation40_spill] sm:$0xff] %v12902_v24 }
 0x41f   :  { %v8704_v10 = vpop.eup %8703  ;;  %v3990_v29 = vmul.f32 %v8702_v56, %v12588_v42  ;;  %8725 = vrcp.f32 %v3056_v53  ;;  %v12900_v14 = vadd.f32 %v12450_v7, %v12648_v38  ;;  %v3075_v35 = vadd.f32 1.0, %v8698_v36  ;;  %v12904_v42 = vpop.f32.mrf.mxu0 }
 0x420   :  { %v3992_v13 = vmul.f32 %v8704_v10, %v12618_v44  ;;  %v8706_v19 = vpop.eup %8705  ;;  %8727 = vpow2.f32 %v2551_v2  ;;  %v3074_v6 = vadd.f32 1.0, %v8700_v5  ;;  %14152 = vst [vmem:[#allocation11_spill] sm:$0xff] %v12904_v42  ;;  %v4423_v44 = vadd.f32 %v4422_v1, %v4421_v21 }
 0x421   :  { %v4432_v16 = vadd.f32 %v4431_v58, %v3990_v29  ;;  %8729 = vpow2.f32 %v2555_v25  ;;  %v4449_v32 = vadd.f32 %v4448_v47, %v4447_v11  ;;  %v2589_v33 = vmul.f32 1.442695, %v2173_v61  ;;  %v12907_v29 = vpop.f32.mrf.mxu1 }
 0x422   :  { %v4458_v30 = vadd.f32 %v4457_v59, %v3992_v13  ;;  %v8708_v40 = vpop.eup %8707  ;;  %8731 = vrcp.f32 %v3073_v39  ;;  %v2593_v7 = vmul.f32 1.442695, %v2175_v20  ;;  %v2174_v58 = vsub.f32 0.0, %v12900_v14  ;;  %14153 = vst [vmem:[#allocation10_spill] sm:$0xff] %v12907_v29  ;;  %v12909_v13 = vpop.f32.mrf.mxu0 }
 0x423   :  { %v4433_v53 = vrot.slane %v4432_v16, 4  ;;  %v8710_v56 = vpop.eup %8709  ;;  %8733 = vrcp.f32 %v3075_v35  ;;  %v3076_v5 = vadd.f32 1.0, %v8706_v19  ;;  %14154 = vst [vmem:[#allocation44_spill] sm:$0xff] %v12909_v13  ;;  %v4424_v11 = vrot.slane %v4423_v44, 1  ;;  %v12923_v42 = vpop.f32.mrf.mxu1 }
 0x424   :  { %v4459_v10 = vrot.slane %v4458_v30, 4  ;;  %8735 = vrcp.f32 %v3074_v6  ;;  %v4450_v1 = vrot.slane %v4449_v32, 1  ;;  %v2591_v20 = vmul.f32 1.442695, %v2174_v58  ;;  %14155 = vst [vmem:[#allocation62_spill] sm:$0xff] %v12923_v42 }
 0x425   :  { %v8712_v36 = vpop.eup %8711  ;;  %v4434_v2 = vadd.f32 %v4433_v53, %v4432_v16  ;;  %8737 = vpow2.f32 %v2589_v33  ;;  %v12915_v19 = vadd.f32 %v12452_v34, %v12651_v18  ;;  %v12921_v6 = vadd.f32 %v12459_v31, %v12621_v51  ;;  %v12933_v42 = vpop.f32.mrf.mxu1 }
 0x426   :  { %v8714_v59 = vpop.eup %8713  ;;  %v4460_v25 = vadd.f32 %v4459_v10, %v4458_v30  ;;  %8739 = vpow2.f32 %v2593_v7  ;;  %v3093_v30 = vadd.f32 1.0, %v8708_v40  ;;  %v3095_v10 = vadd.f32 1.0, %v8710_v56  ;;  %v12925_v7 = vpop.f32.mrf.mxu0  ;;  %14157 = vst [vmem:[#allocation64_spill] sm:$0xff] %v12933_v42 }
 0x427   :  { %v8716_v21 = vpop.eup %8715  ;;  %v4435_v47 = vrot.slane %v4434_v2, 2  ;;  %8741 = vrcp.f32 %v3076_v5  ;;  %14156 = vst [vmem:[#allocation63_spill] sm:$0xff] %v12925_v7  ;;  %v4425_v34 = vadd.f32 %v4424_v11, %v4423_v44  ;;  %v3094_v29 = vadd.f32 1.0, %v8712_v36 }
 0x428   :  { %v12911_v39 = vpop.eup %8717  ;;  %v4461_v61 = vrot.slane %v4460_v25, 2  ;;  %8743 = vpow2.f32 %v2591_v20  ;;  %v4451_v40 = vadd.f32 %v4450_v1, %v4449_v32  ;;  %v2193_v31 = vsub.f32 0.0, %v12921_v6  ;;  %v12935_v44 = vpop.f32.mrf.mxu0 }
 0x429   :  { %v12917_v16 = vpop.eup %8719  ;;  %v4436_v35 = vadd.f32 %v4435_v47, %v4434_v2  ;;  %v2176_v2 = vsub.f32 0.0, %v12915_v19  ;;  %v3096_v47 = vadd.f32 1.0, %v8714_v59  ;;  %8745 = vrcp.f32 %v3093_v30  ;;  %14158 = vst [vmem:[#allocation65_spill] sm:$0xff] %v12935_v44 }
 0x42a   :  { %v8722_v53 = vpop.eup %8721  ;;  %v4462_v33 = vadd.f32 %v4461_v61, %v4460_v25  ;;  %v3113_v25 = vadd.f32 1.0, %v8716_v21  ;;  %8747 = vrcp.f32 %v3095_v10  ;;  %v12937_v11 = vmul.f32 0.015625, %v4425_v34 }
 0x42b   :  { %v12927_v58 = vpop.eup %8723  ;;  %v4437_v13 = vrot.slane %v4436_v35, 1  ;;  %v3115_v7 = vadd.f32 1.0, %v8722_v53  ;;  %8749 = vrcp.f32 %v3094_v29  ;;  %v2595_v59 = vmul.f32 1.442695, %v2176_v2  ;;  %v14163_v2 = vld [vmem:[#allocation56_spill] sm:$0xff] }
 0x42c   :  { %v4463_v5 = vrot.slane %v4462_v33, 1  ;;  %v12931_v24 = vpop.eup %8725  ;;  %14159 = vst [vmem:[#allocation66_spill] sm:$0xff] %v12937_v11  ;;  %v12941_v1 = vmul.f32 0.015625, %v4451_v40  ;;  %8751 = vrcp.f32 %v3096_v47  ;;  %v2629_v21 = vmul.f32 1.442695, %v2193_v31  ;;  %v12963_v47 = vpop.f32.mrf.mxu0 }
 0x42d   :  { %v4438_v56 = vadd.f32 %v4437_v13, %v4436_v35  ;;  %v8728_v61 = vpop.eup %8727  ;;  %8753 = vrcp.f32 %v3113_v25  ;;  %v12959_v40 = vadd.f32 %v14163_v2, %v12648_v38  ;;  %14165 = vst [vmem:[#allocation70_spill] sm:$0xff] %v12963_v47 }
 0x42e   :  { %v4464_v20 = vadd.f32 %v4463_v5, %v4462_v33  ;;  %v8730_v36 = vpop.eup %8729  ;;  %14161 = vst [vmem:[#allocation68_spill] sm:$0xff] %v12941_v1  ;;  %v3114_v53 = vadd.f32 1.0, %v8728_v61  ;;  %v12951_v33 = vadd.f32 %v12461_v52, %v12637_v45  ;;  %8755 = vrcp.f32 %v3115_v7  ;;  %v12961_v5 = vpop.f32.mrf.mxu1 }
 0x42f   :  { %v12939_v32 = vmul.f32 0.015625, %v4438_v56  ;;  %v12945_v35 = vpop.eup %8731  ;;  %v3116_v34 = vadd.f32 1.0, %v8730_v36  ;;  %14164 = vst [vmem:[#allocation56_spill] sm:$0xff] %v12961_v5  ;;  %v14166_v56 = vld [vmem:[#allocation20_spill] sm:$0xff]  ;;  %8757 = vpow2.f32 %v2595_v59  ;;  %v12977_v2 = vpop.f32.mrf.mxu0 }
 0x430   :  { %v12943_v13 = vmul.f32 0.015625, %v4464_v20  ;;  %v12953_v10 = vpop.eup %8733  ;;  %v2195_v25 = vsub.f32 0.0, %v12951_v33  ;;  %8759 = vpow2.f32 %v2629_v21  ;;  %v2194_v20 = vsub.f32 0.0, %v12959_v40  ;;  %v12975_v36 = vpop.f32.mrf.mxu1  ;;  %14170 = vst [vmem:[#allocation74_spill] sm:$0xff] %v12977_v2 }
 0x431   :  { %14160 = vst [vmem:[#allocation67_spill] sm:$0xff] %v12939_v32  ;;  %v4734_v30 = vcombine.low %v12937_v11, %v12939_v32  ;;  %v12965_v31 = vpop.eup %8735  ;;  %14169 = vst [vmem:[#allocation73_spill] sm:$0xff] %v12975_v36  ;;  %8761 = vrcp.f32 %v3114_v53  ;;  %v14172_v32 = vld [vmem:[#allocation60_spill] sm:$0xff]  ;;  %v12993_v2 = vpop.f32.mrf.mxu0 }
 0x432   :  { %14162 = vst [vmem:[#allocation69_spill] sm:$0xff] %v12943_v13  ;;  %v4735_v29 = vcombine.low %v12941_v1, %v12943_v13  ;;  %v8738_v61 = vpop.eup %8737  ;;  %v2633_v5 = vmul.f32 1.442695, %v2195_v25  ;;  %8763 = vrcp.f32 %v3116_v34  ;;  %v2631_v21 = vmul.f32 1.442695, %v2194_v20  ;;  %v12991_v36 = vpop.f32.mrf.mxu1  ;;  %14174 = vst [vmem:[#allocation60_spill] sm:$0xff] %v12993_v2 }
 0x433   :  { %v12968_v52 = vrot.slane %v4734_v30, %v14166_v56  ;;  %v8740_v47 = vpop.eup %8739  ;;  %v14171_v30 = vld [vmem:[#allocation26_spill] sm:$0xff]  ;;  %v12989_v44 = vadd.f32 %v14172_v32, %v12621_v51  ;;  %v3133_v1 = vadd.f32 1.0, %v8738_v61  ;;  %v7106_v32 = vpop.f32.mrf.mxu0 }
 0x434   :  { %v12972_v7 = vrot.slane %v4735_v29, %v14166_v56  ;;  %v12981_v13 = vadd.f32 %v14171_v30, %v12651_v18  ;;  %v12983_v59 = vpop.eup %8741  ;;  %14173 = vst [vmem:[#allocation26_spill] sm:$0xff] %v12991_v36  ;;  %8765 = vpow2.f32 %v2633_v5  ;;  %v14175_v30 = vld [vmem:[#allocation61_spill] sm:$0xff]  ;;  %v3135_v29 = vadd.f32 1.0, %v8740_v47  ;;  %v7084_v20 = vpop.f32.mrf.mxu1  ;;  %v14176_v2 = vld [vmem:[#allocation58_spill] sm:$0xff]  ;;  %v14180_v47 = vld [vmem:[#allocation47_spill] sm:$0xff] }
 0x435   :  { %14167 = vst [vmem:[#allocation71_spill] sm:$0xff] %v12968_v52  ;;  %v8744_v53 = vpop.eup %8743  ;;  %v12998_v42 = vadd.f32 %v14175_v30, %v12637_v45  ;;  %8767 = vpow2.f32 %v2631_v21  ;;  %v2213_v34 = vsub.f32 0.0, %v12989_v44  ;;  %v13004_v36 = vadd.f32 %v14176_v2, %v12648_v38  ;;  %v14178_v5 = vld [vmem:[#allocation45_spill] sm:$0xff]  ;;  %v14182_v20 = vld [vmem:[#allocation48_spill] sm:$0xff]  ;;  %v7107_v54 = vpop.f32.mrf.mxu0 }
 0x436   :  { %14168 = vst [vmem:[#allocation72_spill] sm:$0xff] %v12972_v7  ;;  %v2196_v25 = vsub.f32 0.0, %v12981_v13  ;;  %v13008_v11 = vadd.f32 %v14178_v5, %v12651_v18  ;;  %v8746_v30 = vpop.eup %8745  ;;  %v3134_v8 = vadd.f32 1.0, %v8744_v53  ;;  %v13012_v21 = vadd.f32 %v14180_v47, %v12621_v51  ;;  %v7085_v32 = vpop.f32.mrf.mxu1  ;;  %v14184_v47 = vld [vmem:[#allocation13_spill] sm:$0xff] }
 0x437   :  { %v2215_v52 = vsub.f32 0.0, %v12998_v42  ;;  %14177 = vst [vmem:[#allocation61_spill] sm:$0xff] %v13004_v36  ;;  %v2669_v61 = vmul.f32 1.442695, %v2213_v34  ;;  %v8748_v56 = vpop.eup %8747  ;;  %v2214_v55 = vsub.f32 0.0, %v13004_v36  ;;  %v13024_v15 = vadd.f32 %v14184_v47, %v12648_v38 }
 0x438   :  { %v2635_v7 = vmul.f32 1.442695, %v2196_v25  ;;  %14179 = vst [vmem:[#allocation58_spill] sm:$0xff] %v13008_v11  ;;  %14181 = vst [vmem:[#allocation45_spill] sm:$0xff] %v13012_v21  ;;  %v13016_v25 = vadd.f32 %v14182_v20, %v12637_v45  ;;  %v2216_v5 = vsub.f32 0.0, %v13008_v11  ;;  %v8750_v46 = vpop.eup %8749  ;;  %v2233_v53 = vsub.f32 0.0, %v13012_v21 }
 0x439   :  { %v2673_v2 = vmul.f32 1.442695, %v2215_v52  ;;  %v8752_v20 = vpop.eup %8751  ;;  %v2671_v54 = vmul.f32 1.442695, %v2214_v55 }
 0x43a   :  { %14183 = vst [vmem:[#allocation47_spill] sm:$0xff] %v13016_v25  ;;  %8769 = vpow2.f32 %v2635_v7  ;;  %v2235_v34 = vsub.f32 0.0, %v13016_v25  ;;  %v8754_v32 = vpop.eup %8753  ;;  %v2675_v52 = vmul.f32 1.442695, %v2216_v5  ;;  %v2234_v7 = vsub.f32 0.0, %v13024_v15 }
 0x43b   :  { %8771 = vpow2.f32 %v2669_v61  ;;  %v8756_v41 = vpop.eup %8755  ;;  %v2709_v27 = vmul.f32 1.442695, %v2233_v53  ;;  %v14185_v61 = vld [vmem:[#allocation27_spill] sm:$0xff]  ;;  %v3714_v53 = vmul.f32 %v12965_v31, %v12737_v43 }
 0x43c   :  { %8773 = vpow2.f32 %v2673_v2  ;;  %v13029_v21 = vadd.f32 %v14185_v61, %v12651_v18  ;;  %v8758_v25 = vpop.eup %8757  ;;  %v2713_v11 = vmul.f32 1.442695, %v2235_v34  ;;  %v2711_v36 = vmul.f32 1.442695, %v2234_v7  ;;  %v14187_v61 = vld [vmem:[#allocation28_spill] sm:$0xff] }
 0x43d   :  { %8775 = vrcp.f32 %v3133_v1  ;;  %v8760_v47 = vpop.eup %8759  ;;  %v3713_v1 = vmul.f32 %v12945_v35, %v12703_v48  ;;  %v3136_v7 = vadd.f32 1.0, %v8758_v25  ;;  %v13044_v48 = vadd.f32 %v14187_v61, %v12621_v51 }
 0x43e   :  { %8777 = vrcp.f32 %v3135_v29  ;;  %14186 = vst [vmem:[#allocation48_spill] sm:$0xff] %v13029_v21  ;;  %v2236_v55 = vsub.f32 0.0, %v13029_v21  ;;  %v8762_v2 = vpop.eup %8761  ;;  %v3715_v29 = vmul.f32 %v12953_v10, %v12715_v28  ;;  %v14188_v28 = vld [vmem:[#allocation30_spill] sm:$0xff]  ;;  %v3153_v43 = vadd.f32 1.0, %v8760_v47 }
 0x43f   :  { %8779 = vrcp.f32 %v3134_v8  ;;  %v13034_v5 = vpop.eup %8763  ;;  %v3694_v10 = vmul.f32 %v12927_v58, %v14188_v28  ;;  %v3716_v25 = vmul.f32 %v12983_v59, %v12749_v4  ;;  %v2253_v58 = vsub.f32 0.0, %v13044_v48  ;;  %v14191_v28 = vld [vmem:[#allocation50_spill] sm:$0xff] }
 0x440   :  { %8781 = vpow2.f32 %v2671_v54  ;;  %v2715_v8 = vmul.f32 1.442695, %v2236_v55  ;;  %v3693_v54 = vmul.f32 %v12911_v39, %v12634_v0  ;;  %v3736_v47 = vmul.f32 %v8752_v20, %v12804_v62 }
 0x441   :  { %8783 = vpow2.f32 %v2675_v52  ;;  %v8766_v34 = vpop.eup %8765  ;;  %v3695_v52 = vmul.f32 %v12917_v16, %v12671_v9  ;;  %v3733_v9 = vmul.f32 %v8746_v30, %v12768_v17  ;;  %v3735_v16 = vmul.f32 %v8748_v56, %v12784_v57  ;;  %v14190_v56 = vld [vmem:[#allocation29_spill] sm:$0xff] }
 0x442   :  { %8785 = vpow2.f32 %v2709_v27  ;;  %v8768_v35 = vpop.eup %8767  ;;  %v14189_v27 = vld [vmem:[#allocation15_spill] sm:$0xff]  ;;  %v4205_v55 = vadd.f32 %v3713_v1, %v3693_v54  ;;  %v3155_v0 = vadd.f32 1.0, %v8766_v34  ;;  %v3755_v4 = vmul.f32 %v8756_v41, %v12834_v3 }
 0x443   :  { %8787 = vpow2.f32 %v2713_v11  ;;  %v3696_v31 = vmul.f32 %v12931_v24, %v14189_v27  ;;  %v4231_v39 = vadd.f32 %v3715_v29, %v3695_v52  ;;  %v4218_v11 = vadd.f32 %v3714_v53, %v3694_v10  ;;  %v7572_v27 = vld [vmem:[%s13563_s5 + $0x4f8] sm:$0xff]  }
 0x444   :  { %8789 = vpow2.f32 %v2711_v36  ;;  %v3154_v61 = vadd.f32 1.0, %v8768_v35  ;;  %v3734_v24 = vmul.f32 %v8750_v46, %v12793_v60  ;;  %v3753_v53 = vmul.f32 %v8754_v32, %v12813_v12  ;;  %7263 = vmatprep.subr.bf16.mxu0 %v7572_v27 }
 0x445   :  { %8791 = vpow2.f32 %v2715_v8  ;;  %v4244_v30 = vadd.f32 %v3716_v25, %v3696_v31  ;;  %v13063_v8 = vadd.f32 %v14190_v56, %v12637_v45  ;;  %v4206_v46 = vadd.f32 %v4205_v55, %v3733_v9  ;;  %v14200_v56 = vld [vmem:[#allocation18_spill] sm:$0xff] }
 0x446   :  { %8793 = vrcp.f32 %v3136_v7  ;;  %v4232_v62 = vadd.f32 %v4231_v39, %v3735_v16  ;;  %v4219_v34 = vadd.f32 %v4218_v11, %v3734_v24  ;;  %v3754_v7 = vmul.f32 %v8762_v2, %v12860_v22  ;;  %v14192_v2 = vld [vmem:[#allocation39_spill] sm:$0xff]  ;;  %v13087_v39 = vpop.f32.mrf.mxu1  ;;  %v13089_v11 = vpop.f32.mrf.mxu0  ;;  %v14195_v16 = vld [vmem:[#allocation33_spill] sm:$0xff] }
 0x447   :  { %v8770_v21 = vpop.eup %8769  ;;  %8795 = vrcp.f32 %v3153_v43  ;;  %v4245_v3 = vadd.f32 %v4244_v30, %v3736_v47  ;;  %v13065_v41 = vadd.f32 %v4206_v46, %v3753_v53  ;;  %v2255_v52 = vsub.f32 0.0, %v13063_v8  ;;  %v7571_v43 = vld [vmem:[%s13563_s5 + $0x478] sm:$0xff]   ;;  %14193 = vst [vmem:[#allocation13_spill] sm:$0xff] %v13087_v39  ;;  %14194 = vst [vmem:[#allocation27_spill] sm:$0xff] %v13089_v11 }
 0x448   :  { %v8772_v36 = vpop.eup %8771  ;;  %v3156_v1 = vadd.f32 1.0, %v8770_v21  ;;  %8797 = vrcp.f32 %v3155_v0  ;;  %v2749_v21 = vmul.f32 1.442695, %v2253_v58  ;;  %v13067_v32 = vadd.f32 %v4232_v62, %v3755_v4  ;;  %7241 = vmatprep.subr.bf16.mxu1 %v7571_v43  ;;  %v14197_v47 = vld [vmem:[#allocation17_spill] sm:$0xff] }
 0x449   :  { %v8774_v29 = vpop.eup %8773  ;;  %v3173_v59 = vadd.f32 1.0, %v8772_v36  ;;  %8799 = vrcp.f32 %v3154_v61  ;;  %v13073_v10 = vadd.f32 %v14191_v28, %v12648_v38  ;;  %v3756_v55 = vmul.f32 %v13034_v5, %v12864_v23  ;;  %v14196_v36 = vld [vmem:[#allocation16_spill] sm:$0xff]  ;;  %v14243_v11 = vld [vmem:[#allocation65_spill] sm:$0xff] }
 0x44a   :  { %v8776_v17 = vpop.eup %8775  ;;  %v3175_v57 = vadd.f32 1.0, %v8774_v29  ;;  %8801 = vrcp.f32 %v3156_v1  ;;  %v13085_v0 = vadd.f32 %v14192_v2, %v12651_v18  ;;  %v13094_v58 = vadd.f32 %v14195_v16, %v12621_v51  ;;  %v13106_v29 = vpop.f32.mrf.mxu0 }
 0x44b   :  { %v8778_v60 = vpop.eup %8777  ;;  %8803 = vrcp.f32 %v3173_v59  ;;  %v3773_v61 = vmul.f32 %v8776_v17, %v12884_v50  ;;  %v13098_v24 = vadd.f32 %v14196_v36, %v12637_v45  ;;  %v13102_v1 = vadd.f32 %v14197_v47, %v12648_v38  ;;  %v13104_v50 = vpop.f32.mrf.mxu1  ;;  %14199 = vst [vmem:[#allocation30_spill] sm:$0xff] %v13106_v29 }
 0x44c   :  { %v8780_v20 = vpop.eup %8779  ;;  %8805 = vrcp.f32 %v3175_v57  ;;  %14198 = vst [vmem:[#allocation28_spill] sm:$0xff] %v13104_v50  ;;  %v2753_v59 = vmul.f32 1.442695, %v2255_v52  ;;  %v2254_v17 = vsub.f32 0.0, %v13073_v10  ;;  %v2256_v57 = vsub.f32 0.0, %v13085_v0 }
 0x44d   :  { %v8782_v12 = vpop.eup %8781  ;;  %8807 = vpow2.f32 %v2749_v21  ;;  %v13112_v46 = vadd.f32 %v14200_v56, %v12651_v18  ;;  %v7128_v62 = vpop.f32.mrf.mxu1  ;;  %v2273_v52 = vsub.f32 0.0, %v13094_v58  ;;  %v4220_v43 = vadd.f32 %v4219_v34, %v3754_v7 }
 0x44e   :  { %v8784_v54 = vpop.eup %8783  ;;  %v3174_v35 = vadd.f32 1.0, %v8782_v12  ;;  %v7150_v21 = vpop.f32.mrf.mxu0  ;;  %v2275_v27 = vsub.f32 0.0, %v13098_v24  ;;  %v4246_v34 = vadd.f32 %v4245_v3, %v3756_v55  ;;  %v2755_v7 = vmul.f32 1.442695, %v2256_v57 }
 0x44f   :  { %v8786_v31 = vpop.eup %8785  ;;  %v3176_v22 = vadd.f32 1.0, %v8784_v54  ;;  %v3775_v54 = vmul.f32 %v8778_v60, %v12888_v26  ;;  %v13121_v26 = vadd.f32 %v12739_v63, %v12621_v51  ;;  %v2276_v16 = vsub.f32 0.0, %v13112_v46 }
 0x450   :  { %v8788_v25 = vpop.eup %8787  ;;  %8809 = vrcp.f32 %v3174_v35  ;;  %v3193_v9 = vadd.f32 1.0, %v8786_v31  ;;  %v3774_v35 = vmul.f32 %v8780_v20, %v12900_v14  ;;  %v2274_v31 = vsub.f32 0.0, %v13102_v1  ;;  %v7151_v2 = vpop.f32.mrf.mxu0  ;;  %v14201_v14 = vld [vmem:[#allocation19_spill] sm:$0xff] }
 0x451   :  { %v8790_v23 = vpop.eup %8789  ;;  %8811 = vrcp.f32 %v3176_v22  ;;  %v3195_v5 = vadd.f32 1.0, %v8788_v25  ;;  %v7129_v22 = vpop.f32.mrf.mxu1  ;;  %v13125_v60 = vadd.f32 %v14201_v14, %v12637_v45  ;;  %v4234_v36 = vadd.f32 %v13067_v32, %v3775_v54  ;;  %v14205_v2 = vld [vmem:[#allocation58_spill] sm:$0xff]  ;;  %v14206_v14 = vld [vmem:[#allocation43_spill] sm:$0xff] }
 0x452   :  { %v8792_v53 = vpop.eup %8791  ;;  %8813 = vrcp.f32 %v3193_v9  ;;  %v3194_v4 = vadd.f32 1.0, %v8790_v23  ;;  %v2751_v9 = vmul.f32 1.442695, %v2254_v17  ;;  %v4221_v47 = vadd.f32 %v4220_v43, %v3774_v35  ;;  %v14204_v43 = vld [vmem:[#allocation61_spill] sm:$0xff] }
 0x453   :  { %8815 = vrcp.f32 %v3195_v5  ;;  %v3196_v30 = vadd.f32 1.0, %v8792_v53  ;;  %v8794_v12 = vpop.eup %8793  ;;  %v4208_v5 = vadd.f32 %v13065_v41, %v3773_v61  ;;  %v2789_v53 = vmul.f32 1.442695, %v2273_v52 }
 0x454   :  { %8817 = vrcp.f32 %v3194_v4  ;;  %v8796_v28 = vpop.eup %8795  ;;  %v3776_v63 = vmul.f32 %v8794_v12, %v12915_v19  ;;  %v2791_v17 = vmul.f32 1.442695, %v2274_v31  ;;  %v2293_v57 = vsub.f32 0.0, %v13121_v26 }
 0x455   :  { %8819 = vrcp.f32 %v3196_v30  ;;  %v8798_v25 = vpop.eup %8797  ;;  %v13133_v30 = vadd.f32 %v12775_v49, %v12648_v38  ;;  %v3793_v55 = vmul.f32 %v8796_v28, %v12921_v6  ;;  %v2295_v41 = vsub.f32 0.0, %v13125_v60  ;;  %v14203_v6 = vld [vmem:[#allocation22_spill] sm:$0xff] }
 0x456   :  { %8821 = vpow2.f32 %v2753_v59  ;;  %v8800_v20 = vpop.eup %8799  ;;  %v2793_v59 = vmul.f32 1.442695, %v2275_v27  ;;  %v3795_v32 = vmul.f32 %v8798_v25, %v12951_v33  ;;  %v2795_v61 = vmul.f32 1.442695, %v2276_v16 }
 0x457   :  { %v8802_v23 = vpop.eup %8801  ;;  %8823 = vpow2.f32 %v2751_v9  ;;  %v13141_v19 = vadd.f32 %v12777_v37, %v12651_v18  ;;  %v3794_v49 = vmul.f32 %v8800_v20, %v12959_v40  ;;  %v13147_v21 = vadd.f32 %v14203_v6, %v12621_v51 }
 0x458   :  { %v8804_v4 = vpop.eup %8803  ;;  %8825 = vpow2.f32 %v2755_v7  ;;  %v4247_v54 = vadd.f32 %v4246_v34, %v3776_v63  ;;  %v3796_v33 = vmul.f32 %v8802_v23, %v12981_v13  ;;  %v2294_v52 = vsub.f32 0.0, %v13133_v30  ;;  %v14207_v7 = vld [vmem:[#allocation45_spill] sm:$0xff]  ;;  %v14208_v63 = vld [vmem:[#allocation47_spill] sm:$0xff] }
 0x459   :  { %v8806_v3 = vpop.eup %8805  ;;  %14202 = vst [vmem:[#allocation15_spill] sm:$0xff] %v13141_v19  ;;  %v3813_v62 = vmul.f32 %v8804_v4, %v12989_v44  ;;  %8827 = vpow2.f32 %v2789_v53  ;;  %v4209_v28 = vadd.f32 %v4208_v5, %v3793_v55  ;;  %v2829_v40 = vmul.f32 1.442695, %v2293_v57 }
 0x45a   :  { %v8808_v56 = vpop.eup %8807  ;;  %v3815_v35 = vmul.f32 %v8806_v3, %v12998_v42  ;;  %v2833_v31 = vmul.f32 1.442695, %v2295_v41  ;;  %v4235_v22 = vadd.f32 %v4234_v36, %v3795_v32  ;;  %v2296_v9 = vsub.f32 0.0, %v13141_v19 }
 0x45b   :  { %v13157_v20 = vadd.f32 %v14206_v14, %v12637_v45  ;;  %v4222_v42 = vadd.f32 %v4221_v47, %v3794_v49  ;;  %v4210_v34 = vadd.f32 %v4209_v28, %v3813_v62  ;;  %v2313_v23 = vsub.f32 0.0, %v13147_v21  ;;  %v14209_v49 = vld [vmem:[#allocation48_spill] sm:$0xff]  ;;  %v14210_v14 = vld [vmem:[#allocation46_spill] sm:$0xff] }
 0x45c   :  { %v4248_v53 = vadd.f32 %v4247_v54, %v3796_v33  ;;  %v4236_v4 = vadd.f32 %v4235_v22, %v3815_v35  ;;  %v2831_v3 = vmul.f32 1.442695, %v2294_v52  ;;  %8829 = vpow2.f32 %v2793_v59 }
 0x45d   :  { %v8810_v12 = vpop.eup %8809  ;;  %8831 = vpow2.f32 %v2791_v17  ;;  %v2315_v54 = vsub.f32 0.0, %v13157_v20  ;;  %v3213_v52 = vadd.f32 1.0, %v8808_v56  ;;  %v13167_v17 = vadd.f32 %v14210_v14, %v12648_v38 }
 0x45e   :  { %v8812_v37 = vpop.eup %8811  ;;  %v3814_v27 = vmul.f32 %v8810_v12, %v14204_v43  ;;  %v2835_v43 = vmul.f32 1.442695, %v2296_v9  ;;  %8833 = vpow2.f32 %v2795_v61  ;;  %v14213_v61 = vld [vmem:[#allocation36_spill] sm:$0xff]  ;;  %v13286_v50 = vadd.f32 %v14243_v11, %v12637_v45 }
 0x45f   :  { %v8814_v44 = vpop.eup %8813  ;;  %v3816_v25 = vmul.f32 %v8812_v37, %v14205_v2  ;;  %8835 = vpow2.f32 %v2829_v40 }
 0x460   :  { %v8816_v13 = vpop.eup %8815  ;;  %v3833_v16 = vmul.f32 %v8814_v44, %v14207_v7  ;;  %v4223_v57 = vadd.f32 %v4222_v42, %v3814_v27  ;;  %v2869_v44 = vmul.f32 1.442695, %v2313_v23  ;;  %8837 = vpow2.f32 %v2833_v31 }
 0x461   :  { %v8818_v5 = vpop.eup %8817  ;;  %v3835_v36 = vmul.f32 %v8816_v13, %v14208_v63  ;;  %v4249_v12 = vadd.f32 %v4248_v53, %v3816_v25  ;;  %8839 = vrcp.f32 %v3213_v52  ;;  %v2314_v31 = vsub.f32 0.0, %v13167_v17 }
 0x462   :  { %v8820_v55 = vpop.eup %8819  ;;  %v4211_v41 = vadd.f32 %v4210_v34, %v3833_v16  ;;  %v3834_v32 = vmul.f32 %v8818_v5, %v13024_v15  ;;  %v14211_v34 = vld [vmem:[#allocation24_spill] sm:$0xff]  ;;  %v13175_v5 = vadd.f32 %v14213_v61, %v12621_v51 }
 0x463   :  { %v8822_v6 = vpop.eup %8821  ;;  %v4237_v47 = vadd.f32 %v4236_v4, %v3835_v36  ;;  %v3836_v62 = vmul.f32 %v8820_v55, %v14209_v49  ;;  %v13171_v56 = vadd.f32 %v14211_v34, %v12651_v18  ;;  %v14214_v49 = vld [vmem:[#allocation38_spill] sm:$0xff] }
 0x464   :  { %v4212_v37 = vrot.slane %v4211_v41, 4  ;;  %v4224_v28 = vadd.f32 %v4223_v57, %v3834_v32  ;;  %v3215_v2 = vadd.f32 1.0, %v8822_v6  ;;  %v8824_v15 = vpop.eup %8823 }
 0x465   :  { %v4238_v33 = vrot.slane %v4237_v47, 4  ;;  %v4250_v35 = vadd.f32 %v4249_v12, %v3836_v62  ;;  %v8826_v13 = vpop.eup %8825  ;;  %14212 = vst [vmem:[#allocation29_spill] sm:$0xff] %v13171_v56  ;;  %v3214_v4 = vadd.f32 1.0, %v8824_v15  ;;  %v2316_v6 = vsub.f32 0.0, %v13171_v56 }
 0x466   :  { %v4213_v27 = vadd.f32 %v4212_v37, %v4211_v41  ;;  %v4225_v22 = vrot.slane %v4224_v28, 4  ;;  %v8828_v7 = vpop.eup %8827  ;;  %8841 = vrcp.f32 %v3215_v2  ;;  %v3216_v55 = vadd.f32 1.0, %v8826_v13  ;;  %v14215_v13 = vld [vmem:[#allocation37_spill] sm:$0xff] }
 0x467   :  { %v4239_v59 = vadd.f32 %v4238_v33, %v4237_v47  ;;  %v4251_v25 = vrot.slane %v4250_v35, 4  ;;  %v3233_v32 = vadd.f32 1.0, %v8828_v7  ;;  %8843 = vpow2.f32 %v2831_v3 }
 0x468   :  { %v4214_v9 = vrot.slane %v4213_v27, 2  ;;  %v4226_v42 = vadd.f32 %v4225_v22, %v4224_v28  ;;  %v13181_v62 = vadd.f32 %v14214_v49, %v12637_v45  ;;  %8845 = vrcp.f32 %v3214_v4  ;;  %v14221_v4 = vld [vmem:[#allocation9_spill] sm:$0xff] }
 0x469   :  { %v4240_v16 = vrot.slane %v4239_v59, 2  ;;  %v4252_v23 = vadd.f32 %v4251_v25, %v4250_v35  ;;  %v2873_v33 = vmul.f32 1.442695, %v2315_v54  ;;  %v8830_v35 = vpop.eup %8829  ;;  %8847 = vrcp.f32 %v3216_v55 }
 0x46a   :  { %v4215_v40 = vadd.f32 %v4214_v9, %v4213_v27  ;;  %v4227_v53 = vrot.slane %v4226_v42, 2  ;;  %v2871_v22 = vmul.f32 1.442695, %v2314_v31  ;;  %v8832_v2 = vpop.eup %8831  ;;  %8849 = vrcp.f32 %v3233_v32 }
 0x46b   :  { %v4241_v63 = vadd.f32 %v4240_v16, %v4239_v59  ;;  %v4253_v36 = vrot.slane %v4252_v23, 2  ;;  %v2875_v59 = vmul.f32 1.442695, %v2316_v6  ;;  %v2333_v25 = vsub.f32 0.0, %v13175_v5  ;;  %v8834_v7 = vpop.eup %8833 }
 0x46c   :  { %v4216_v57 = vrot.slane %v4215_v40, 1  ;;  %v4228_v41 = vadd.f32 %v4227_v53, %v4226_v42  ;;  %8851 = vpow2.f32 %v2835_v43  ;;  %v2335_v14 = vsub.f32 0.0, %v13181_v62  ;;  %v8836_v43 = vpop.eup %8835 }
 0x46d   :  { %v4242_v12 = vrot.slane %v4241_v63, 1  ;;  %v4254_v47 = vadd.f32 %v4253_v36, %v4252_v23  ;;  %v13187_v9 = vadd.f32 %v14215_v13, %v12648_v38  ;;  %v3235_v34 = vadd.f32 1.0, %v8830_v35  ;;  %v8838_v36 = vpop.eup %8837 }
 0x46e   :  { %v4217_v37 = vadd.f32 %v4216_v57, %v4215_v40  ;;  %v4229_v28 = vrot.slane %v4228_v41, 1  ;;  %8853 = vpow2.f32 %v2869_v44  ;;  %v3234_v61 = vadd.f32 1.0, %v8832_v2  ;;  %v13206_v57 = vpop.eup %8839 }
 0x46f   :  { %v4243_v52 = vadd.f32 %v4242_v12, %v4241_v63  ;;  %v4255_v27 = vrot.slane %v4254_v47, 1  ;;  %14216 = vst [vmem:[#allocation50_spill] sm:$0xff] %v13187_v9  ;;  %8855 = vpow2.f32 %v2873_v33  ;;  %v2909_v53 = vmul.f32 1.442695, %v2333_v25  ;;  %v14225_v12 = vld [vmem:[#allocation12_spill] sm:$0xff]  ;;  %v14227_v33 = vld [vmem:[#allocation34_spill] sm:$0xff] }
 0x470   :  { %v4230_v15 = vadd.f32 %v4229_v28, %v4228_v41  ;;  %v13189_v54 = vmul.f32 0.015625, %v4217_v37  ;;  %8857 = vpow2.f32 %v2871_v22  ;;  %v13201_v63 = vadd.f32 %v14221_v4, %v12651_v18  ;;  %v14223_v41 = vld [vmem:[#allocation20_spill] sm:$0xff] }
 0x471   :  { %v4256_v3 = vadd.f32 %v4255_v27, %v4254_v47  ;;  %v13193_v16 = vmul.f32 0.015625, %v4243_v52  ;;  %8859 = vpow2.f32 %v2875_v59  ;;  %v2913_v55 = vmul.f32 1.442695, %v2335_v14 }
 0x472   :  { %14217 = vst [vmem:[#allocation39_spill] sm:$0xff] %v13189_v54  ;;  %v13191_v42 = vmul.f32 0.015625, %v4230_v15  ;;  %14222 = vst [vmem:[#allocation18_spill] sm:$0xff] %v13201_v63  ;;  %v2334_v31 = vsub.f32 0.0, %v13187_v9  ;;  %8861 = vrcp.f32 %v3235_v34  ;;  %v3236_v6 = vadd.f32 1.0, %v8834_v7  ;;  %v14228_v34 = vld [vmem:[#allocation40_spill] sm:$0xff] }
 0x473   :  { %14219 = vst [vmem:[#allocation16_spill] sm:$0xff] %v13193_v16  ;;  %v13195_v23 = vmul.f32 0.015625, %v4256_v3  ;;  %v13213_v47 = vadd.f32 %v14225_v12, %v12621_v51  ;;  %v13215_v49 = vpop.eup %8841  ;;  %8863 = vrcp.f32 %v3234_v61  ;;  %v3253_v28 = vadd.f32 1.0, %v8836_v43  ;;  %v14230_v43 = vld [vmem:[#allocation51_spill] sm:$0xff] }
 0x474   :  { %14218 = vst [vmem:[#allocation33_spill] sm:$0xff] %v13191_v42  ;;  %v4666_v40 = vcombine.low %v13189_v54, %v13191_v42  ;;  %v13222_v35 = vadd.f32 %v14227_v33, %v12637_v45  ;;  %v3255_v52 = vadd.f32 1.0, %v8838_v36  ;;  %8865 = vpow2.f32 %v2909_v53  ;;  %v8844_v59 = vpop.eup %8843 }
 0x475   :  { %14220 = vst [vmem:[#allocation17_spill] sm:$0xff] %v13195_v23  ;;  %v4667_v44 = vcombine.low %v13193_v16, %v13195_v23  ;;  %v2336_v27 = vsub.f32 0.0, %v13201_v63  ;;  %v2353_v22 = vsub.f32 0.0, %v13213_v47  ;;  %8867 = vpow2.f32 %v2913_v55  ;;  %v13229_v14 = vpop.eup %8845 }
 0x476   :  { %v13209_v32 = vrot.slane %v4666_v40, %v14223_v41  ;;  %v2355_v15 = vsub.f32 0.0, %v13222_v35  ;;  %8869 = vrcp.f32 %v3236_v6  ;;  %v2911_v25 = vmul.f32 1.442695, %v2334_v31  ;;  %v13235_v61 = vpop.eup %8847  ;;  %v14232_v31 = vld [vmem:[#allocation44_spill] sm:$0xff] }
 0x477   :  { %v13218_v37 = vrot.slane %v4667_v44, %v14223_v41  ;;  %v2949_v3 = vmul.f32 1.442695, %v2353_v22  ;;  %8871 = vrcp.f32 %v3253_v28  ;;  %v13233_v7 = vadd.f32 %v14228_v34, %v12648_v38  ;;  %v13239_v4 = vpop.eup %8849  ;;  %v14231_v44 = vld [vmem:[#allocation10_spill] sm:$0xff]  ;;  %v14233_v28 = vld [vmem:[#allocation55_spill] sm:$0xff] }
 0x478   :  { %14224 = vst [vmem:[#allocation19_spill] sm:$0xff] %v13209_v32  ;;  %v2953_v13 = vmul.f32 1.442695, %v2355_v15  ;;  %v4831_v40 = vpack.c.bf16 %v14230_v43, %v14230_v43  ;;  %8873 = vrcp.f32 %v3255_v52  ;;  %v2915_v53 = vmul.f32 1.442695, %v2336_v27  ;;  %v14234_v52 = vld [vmem:[#allocation62_spill] sm:$0xff] }
 0x479   :  { %14226 = vst [vmem:[#allocation22_spill] sm:$0xff] %v13218_v37  ;;  %14229 = vst [vmem:[#allocation61_spill] sm:$0xff] %v13233_v7  ;;  %v3254_v36 = vadd.f32 1.0, %v8844_v59  ;;  %8875 = vpow2.f32 %v2949_v3  ;;  %v13243_v55 = vadd.f32 %v14231_v44, %v12621_v51  ;;  %v13247_v6 = vadd.f32 %v14232_v31, %v12637_v45  ;;  %v8852_v12 = vpop.eup %8851  ;;  %v14236_v59 = vld [vmem:[#allocation11_spill] sm:$0xff]  ;;  %v14238_v44 = vld [vmem:[#allocation66_spill] sm:$0xff] }
 0x47a   :  { %v4833_v33 = vpack.c.bf16 %v14233_v28, %v14233_v28  ;;  %8877 = vpow2.f32 %v2911_v25  ;;  %v13253_v27 = vadd.f32 %v14234_v52, %v12648_v38  ;;  %v2354_v15 = vsub.f32 0.0, %v13233_v7  ;;  %v14239_v28 = vld [vmem:[#allocation68_spill] sm:$0xff] }
 0x47b   :  { %v8854_v22 = vpop.eup %8853  ;;  %8879 = vpow2.f32 %v2953_v13  ;;  %v13258_v3 = vadd.f32 %v14236_v59, %v12651_v18  ;;  %v2373_v34 = vsub.f32 0.0, %v13243_v55  ;;  %v4851_v31 = vpack.c.bf16 %v14238_v44, %v14238_v44  ;;  %v14240_v44 = vld [vmem:[#allocation63_spill] sm:$0xff] }
 0x47c   :  { %14235 = vst [vmem:[#allocation58_spill] sm:$0xff] %v13253_v27  ;;  %v8856_v43 = vpop.eup %8855  ;;  %v4853_v25 = vpack.c.bf16 %v14239_v28, %v14239_v28  ;;  %8881 = vpow2.f32 %v2915_v53  ;;  %v2375_v52 = vsub.f32 0.0, %v13247_v6  ;;  %v5238_v13 = vunpack.c.l.b16 %v4831_v40 }
 0x47d   :  { %14237 = vst [vmem:[#allocation43_spill] sm:$0xff] %v13258_v3  ;;  %v13266_v2 = vpop.eup %8857  ;;  %8883 = vrcp.f32 %v3254_v36  ;;  %v3256_v37 = vadd.f32 1.0, %v8852_v12  ;;  %v2989_v32 = vmul.f32 1.442695, %v2373_v34  ;;  %v3273_v41 = vadd.f32 1.0, %v8854_v22  ;;  %v14242_v22 = vld [vmem:[#allocation64_spill] sm:$0xff] }
 0x47e   :  { %v13268_v59 = vpop.eup %8859  ;;  %v2993_v23 = vmul.f32 1.442695, %v2375_v52  ;;  %v2374_v16 = vsub.f32 0.0, %v13253_v27  ;;  %v13273_v42 = vadd.f32 %v14240_v44, %v12651_v18  ;;  %v5240_v53 = vunpack.c.l.b16 %v4833_v33  ;;  %v14244_v33 = vld [vmem:[#allocation52_spill] sm:$0xff] }
 0x47f   :  { %v13275_v28 = vpop.eup %8861  ;;  %v2951_v54 = vmul.f32 1.442695, %v2354_v15  ;;  %v2356_v29 = vsub.f32 0.0, %v13258_v3  ;;  %8885 = vpow2.f32 %v2989_v32  ;;  %v5258_v36 = vunpack.c.l.b16 %v4851_v31 }
 0x480   :  { %14241 = vst [vmem:[#allocation45_spill] sm:$0xff] %v13273_v42  ;;  %v13278_v40 = vpop.eup %8863  ;;  %v5260_v12 = vunpack.c.l.b16 %v4853_v25  ;;  %8887 = vpow2.f32 %v2993_v23  ;;  %v13282_v34 = vadd.f32 %v14242_v22, %v12621_v51  ;;  %v2991_v44 = vmul.f32 1.442695, %v2374_v16  ;;  %v14245_v25 = vld [vmem:[#allocation67_spill] sm:$0xff] }
 0x481   :  { %v8866_v52 = vpop.eup %8865  ;;  %8889 = vrcp.f32 %v3256_v37  ;;  %v4832_v15 = vpack.c.bf16 %v14244_v33, %v14244_v33  ;;  %v2376_v31 = vsub.f32 0.0, %v13273_v42  ;;  %v4852_v51 = vpack.c.bf16 %v14245_v25, %v14245_v25  ;;  %v14247_v25 = vld [vmem:[#allocation69_spill] sm:$0xff] }
 0x482   :  { %v8868_v32 = vpop.eup %8867  ;;  %8891 = vrcp.f32 %v3273_v41  ;;  %v2393_v23 = vsub.f32 0.0, %v13282_v34  ;;  %v3275_v37 = vadd.f32 1.0, %v8856_v43  ;;  %v2955_v16 = vmul.f32 1.442695, %v2356_v29  ;;  %v14246_v41 = vld [vmem:[#allocation49_spill] sm:$0xff] }
 0x483   :  { %v13294_v22 = vpop.eup %8869  ;;  %8893 = vpow2.f32 %v2951_v54  ;;  %v2395_v45 = vsub.f32 0.0, %v13286_v50  ;;  %v5239_v33 = vunpack.c.l.b16 %v4832_v15  ;;  %v5259_v3 = vunpack.c.l.b16 %v4852_v51 }
 0x484   :  { %v13297_v11 = vpop.eup %8871  ;;  %v3029_v39 = vmul.f32 1.442695, %v2393_v23  ;;  %v4834_v42 = vpack.c.bf16 %v14246_v41, %v14246_v41  ;;  %8895 = vpow2.f32 %v2991_v44  ;;  %v4854_v7 = vpack.c.bf16 %v14247_v25, %v14247_v25  ;;  %v7573_v44 = vld [vmem:[%s13563_s5 + $0x438] sm:$0xff]  }
 0x485   :  { %v13301_v27 = vpop.eup %8873  ;;  %v3033_v63 = vmul.f32 1.442695, %v2395_v45  ;;  %v5278_v54 = vsel %vm4773_vm2, %v5258_v36, %v5238_v13  ;;  %v3293_v43 = vadd.f32 1.0, %v8866_v52  ;;  %v2995_v56 = vmul.f32 1.442695, %v2376_v31 }
 0x486   :  { %v8876_v29 = vpop.eup %8875  ;;  %8897 = vpow2.f32 %v3029_v39  ;;  %v5279_v23 = vsel %vm4773_vm2, %v5259_v3, %v5239_v33  ;;  %v5241_v9 = vunpack.c.l.b16 %v4834_v42  ;;  %v5261_v41 = vunpack.c.l.b16 %v4854_v7  ;;  %v7575_v39 = vld [vmem:[%s13563_s5 + $0x470] sm:$0xff]  }
 0x487   :  { %v8878_v15 = vpop.eup %8877  ;;  %8899 = vpow2.f32 %v3033_v63  ;;  %v5299_v51 = vpack.c.b16 %v5279_v23, %v5279_v23  ;;  %v3295_v19 = vadd.f32 1.0, %v8868_v32  ;;  %v5298_v25 = vpack.c.b16 %v5278_v54, %v5278_v54  ;;  %v14248_v32 = vld [vmem:[#allocation56_spill] sm:$0xff] }
 0x488   :  { %v8880_v45 = vpop.eup %8879  ;;  %8901 = vpow2.f32 %v2955_v16  ;;  %v5280_v13 = vsel %vm4773_vm2, %v5260_v12, %v5240_v53  ;;  %v3313_v63 = vadd.f32 1.0, %v8876_v29  ;;  %v5281_v42 = vsel %vm4773_vm2, %v5261_v41, %v5241_v9  ;;  %v7574_v12 = vld [vmem:[%s13563_s5 + $0x4b8] sm:$0xff]   ;;  %v14250_v29 = vld [vmem:[#allocation23_spill] sm:$0xff] }
 0x489   :  { %v13314_v3 = vpop.eup %8881  ;;  %8903 = vrcp.f32 %v3275_v37  ;;  %6558 = vmatprep.mubr.bf16.mxu1 %v5299_v51  ;;  %v3315_v36 = vadd.f32 1.0, %v8880_v45  ;;  %v5301_v52 = vpack.c.b16 %v5281_v42, %v5281_v42  ;;  %v13321_v53 = vadd.f32 %v14248_v32, %v12648_v38  ;;  %v14249_v37 = vld [vmem:[#allocation70_spill] sm:$0xff]  ;;  %v7577_v38 = vld [vmem:[%s13563_s5 + $0x430] sm:$0xff]  }
 0x48a   :  { %v13317_v7 = vpop.eup %8883  ;;  %8905 = vpow2.f32 %v2995_v56  ;;  %6559 = vmatmul.mubr.bf16.vlgmr.msra.gmra.mxu1 %v5298_v25  ;;  %v5300_v31 = vpack.c.b16 %v5280_v13, %v5280_v13  ;;  %v13328_v16 = vadd.f32 %v14249_v37, %v12651_v18  ;;  %v7576_v56 = vld [vmem:[%s13563_s5 + $0x4f0] sm:$0xff]   ;;  %v7579_v18 = vld [vmem:[%s13563_s5 + $0x468] sm:$0xff]   ;;  %v3294_v37 = vadd.f32 1.0, %v8878_v15 }
 0x48b   :  { %8907 = vrcp.f32 %v3293_v43  ;;  %7242 = vmatpush3.bf16.msra.mxu1 %v7573_v44  ;;  %6598 = vmatprep.mubr.bf16.mxu0 %v5301_v52  ;;  %v2394_v33 = vsub.f32 0.0, %v13321_v53  ;;  %v14251_v43 = vld [vmem:[#allocation25_spill] sm:$0xff]  ;;  %v14253_v52 = vld [vmem:[#allocation14_spill] sm:$0xff]  ;;  %v13368_v15 = vmul.f32 %v13206_v57, %v13044_v48 }
 0x48c   :  { %v8886_v9 = vpop.eup %8885  ;;  %8909 = vrcp.f32 %v3295_v19  ;;  %7243 = vmatprep.subr.bf16.mxu1 %v7575_v39  ;;  %v14252_v23 = vcombine.low %v14250_v29, %v14251_v43  ;;  %6599 = vmatmul.mubr.bf16.vlgmr.msra.gmra.mxu0 %v5300_v31  ;;  %v2396_v44 = vsub.f32 0.0, %v13328_v16  ;;  %v3274_v19 = vadd.f32 1.0, %v13266_v2  ;;  %v7578_v39 = vld [vmem:[%s13563_s5 + $0x4b0] sm:$0xff]   ;;  %v7580_v2 = vld [vmem:[%s13563_s5 + $0x4e8] sm:$0xff]  }
 0x48d   :  { %v8888_v54 = vpop.eup %8887  ;;  %8911 = vrcp.f32 %v3313_v63  ;;  %v3333_v41 = vadd.f32 1.0, %v8886_v9  ;;  %v3031_v13 = vmul.f32 1.442695, %v2394_v33  ;;  %7264 = vmatpush3.bf16.msra.mxu0 %v7574_v12  ;;  %v14254_v63 = vld [vmem:[#allocation42_spill] sm:$0xff]  ;;  %v14256_v9 = vld [vmem:[#allocation53_spill] sm:$0xff]  ;;  %v13375_v43 = vmul.f32 %v13239_v4, %v13094_v58 }
 0x48e   :  { %v4772_v51 = vrot.slane %v14252_v23, 7  ;;  %v13344_v45 = vpop.eup %8889  ;;  %8913 = vrcp.f32 %v3315_v36  ;;  %v3335_v25 = vadd.f32 1.0, %v8888_v54  ;;  %v14255_v32 = vcombine.low %v14253_v52, %v14254_v63  ;;  %7265 = vmatprep.subr.bf16.mxu0 %v7576_v56  ;;  %v7581_v36 = vld [vmem:[%s13563_s5 + $0x428] sm:$0xff]   ;;  %v14257_v33 = vld [vmem:[#allocation54_spill] sm:$0xff] }
 0x48f   :  { %v13350_v42 = vpop.eup %8891  ;;  %8915 = vrcp.f32 %v3333_v41  ;;  %7244 = vmatpush3.bf16.msra.mxu1 %v7577_v38  ;;  %v14258_v54 = vcombine.low %v14256_v9, %v14257_v33  ;;  %v3035_v56 = vmul.f32 1.442695, %v2396_v44  ;;  %v7583_v38 = vld [vmem:[%s13563_s5 + $0x460] sm:$0xff]   ;;  %v3276_v23 = vadd.f32 1.0, %v13268_v59  ;;  %v14259_v41 = vld [vmem:[#allocation21_spill] sm:$0xff]  ;;  %v14260_v52 = vld [vmem:[#allocation8_spill] sm:$0xff] }
 0x490   :  { %v4783_v31 = vrot.slane %v14255_v32, 7  ;;  %v8894_v12 = vpop.eup %8893  ;;  %8917 = vrcp.f32 %v3335_v25  ;;  %7245 = vmatprep.subr.bf16.mxu1 %v7579_v18  ;;  %v14261_v63 = vcombine.low %v14259_v41, %v14260_v52  ;;  %v7582_v18 = vld [vmem:[%s13563_s5 + $0x4a8] sm:$0xff]   ;;  %v7584_v59 = vld [vmem:[%s13563_s5 + $0x4e0] sm:$0xff]  }
 0x491   :  { %v13364_v29 = vrot.slane %v14258_v54, 7  ;;  %8919 = vpow2.f32 %v3031_v13  ;;  %v8896_v57 = vpop.eup %8895  ;;  %7266 = vmatpush3.bf16.msra.mxu0 %v7578_v39  ;;  %v3314_v4 = vadd.f32 1.0, %v8894_v12  ;;  %v7585_v44 = vld [vmem:[%s13563_s5 + $0x420] sm:$0xff]   ;;  %v14263_v13 = vld [vmem:[#allocation41_spill] sm:$0xff] }
 0x492   :  { %v4774_v48 = vsel %vm4773_vm2, %v4772_v51, %v14261_v63  ;;  %8921 = vrcp.f32 %v3274_v19  ;;  %7267 = vmatprep.subr.bf16.mxu0 %v7580_v2  ;;  %v14262_v25 = vld [vmem:[#allocation35_spill] sm:$0xff]  ;;  %v7587_v2 = vld [vmem:[%s13563_s5 + $0x458] sm:$0xff]  }
 0x493   :  { %v8898_v58 = vpop.eup %8897  ;;  %8923 = vrcp.f32 %v3294_v37  ;;  %7246 = vmatpush3.bf16.msra.mxu1 %v7581_v36  ;;  %v4776_v19 = vsel %vm4775_vm3, %v4772_v51, %v4774_v48  ;;  %v14264_v39 = vcombine.low %v14262_v25, %v14263_v13  ;;  %v14265_v63 = vld [vmem:[#allocation31_spill] sm:$0xff]  ;;  %v14266_v48 = vld [vmem:[#allocation32_spill] sm:$0xff] }
 0x494   :  { %v8900_v9 = vpop.eup %8899  ;;  %v3353_v37 = vadd.f32 1.0, %v8898_v58  ;;  %8925 = vpow2.f32 %v3035_v56  ;;  %7247 = vmatprep.subr.bf16.mxu1 %v7583_v38  ;;  %v4778_v36 = vsel %vm4777_vm4, %v4772_v51, %v4776_v19  ;;  %v14267_v25 = vcombine.low %v14265_v63, %v14266_v48  ;;  %v7586_v19 = vld [vmem:[%s13563_s5 + $0x4a0] sm:$0xff]  }
 0x495   :  { %v4784_v32 = vsel %vm4773_vm2, %v4783_v31, %v14264_v39  ;;  %v8902_v33 = vpop.eup %8901  ;;  %v3355_v54 = vadd.f32 1.0, %v8900_v9  ;;  %v4780_v41 = vsel %vm4779_vm5, %v4772_v51, %v4778_v36  ;;  %v3296_v58 = vadd.f32 1.0, %v13314_v3  ;;  %7268 = vmatpush3.bf16.msra.mxu0 %v7582_v18  ;;  %v7588_v3 = vld [vmem:[%s13563_s5 + $0x4d8] sm:$0xff]  }
 0x496   :  { %v4785_v12 = vsel %vm4775_vm3, %v4783_v31, %v4784_v32  ;;  %v4791_v56 = vsel %vm4773_vm2, %v13364_v29, %v14267_v25  ;;  %v8904_v38 = vpop.eup %8903  ;;  %8927 = vrcp.f32 %v3353_v37  ;;  %4814 = vst [vmem:[#allocation4] sm:$0xff] %v4780_v41  ;;  %v3875_v32 = vmul.f32 %v13275_v28, %v13098_v24  ;;  %7269 = vmatprep.subr.bf16.mxu0 %v7584_v59 }
 0x497   :  { %v4786_v52 = vsel %vm4777_vm4, %v4783_v31, %v4785_v12  ;;  %v4792_v51 = vsel %vm4775_vm3, %v13364_v29, %v4791_v56  ;;  %v8906_v39 = vpop.eup %8905  ;;  %v3334_v9 = vadd.f32 1.0, %v8896_v57  ;;  %8929 = vrcp.f32 %v3355_v54  ;;  %7248 = vmatpush3.bf16.msra.mxu1 %v7585_v44  ;;  %v7591_v57 = vld [vmem:[%s13563_s5 + $0x450] sm:$0xff]  }
 0x498   :  { %v4787_v13 = vsel %vm4779_vm5, %v4783_v31, %v4786_v52  ;;  %v7589_v31 = vld [vmem:[%s13563_s5 + $0x418] sm:$0xff]   ;;  %v4793_v18 = vsel %vm4777_vm4, %v13364_v29, %v4792_v51  ;;  %v8908_v37 = vpop.eup %8907  ;;  %v3893_v24 = vmul.f32 %v13297_v11, %v13121_v26  ;;  %8931 = vrcp.f32 %v3276_v23  ;;  %7249 = vmatprep.subr.bf16.mxu1 %v7587_v2 }
 0x499   :  { %4815 = vst [vmem:[#allocation4 + $0x8] sm:$0xff] %v4787_v13  ;;  %v3316_v28 = vadd.f32 1.0, %v8902_v33  ;;  %v4794_v59 = vsel %vm4779_vm5, %v13364_v29, %v4793_v18  ;;  %v8910_v44 = vpop.eup %8909  ;;  %v3855_v36 = vmul.f32 %v13215_v49, %v13063_v8  ;;  %v3895_v12 = vmul.f32 %v13301_v27, %v13125_v60  ;;  %7270 = vmatpush3.bf16.msra.mxu0 %v7586_v19  ;;  %v7590_v29 = vld [vmem:[%s13563_s5 + $0x498] sm:$0xff]   ;;  %v7592_v27 = vld [vmem:[%s13563_s5 + $0x4d0] sm:$0xff]  }
 0x49a   :  { %8933 = vrcp.f32 %v3314_v4  ;;  %4816 = vst [vmem:[#allocation4 + $0x10] sm:$0xff] %v4794_v59  ;;  %v8912_v26 = vpop.eup %8911  ;;  %v4465_v11 = vadd.f32 %v13375_v43, %v13368_v15  ;;  %v3913_v23 = vmul.f32 %v13350_v42, %v13147_v21  ;;  %v3336_v2 = vadd.f32 1.0, %v8906_v39  ;;  %7271 = vmatprep.subr.bf16.mxu0 %v7588_v3  ;;  %v7593_v21 = vld [vmem:[%s13563_s5 + $0x410] sm:$0xff]  }
 0x49b   :  { %8935 = vrcp.f32 %v3296_v58  ;;  %v8914_v8 = vpop.eup %8913  ;;  %v4491_v49 = vadd.f32 %v3875_v32, %v3855_v36  ;;  %v3915_v60 = vmul.f32 %v8904_v38, %v13157_v20  ;;  %7250 = vmatpush3.bf16.msra.mxu1 %v7589_v31  ;;  %v3933_v43 = vmul.f32 %v8908_v37, %v13175_v5  ;;  %v7595_v20 = vld [vmem:[%s13563_s5 + $0x448] sm:$0xff]   ;;  %v7594_v5 = vld [vmem:[%s13563_s5 + $0x490] sm:$0xff]  }
 0x49c   :  { %8937 = vrcp.f32 %v3334_v9  ;;  %v8916_v42 = vpop.eup %8915  ;;  %v4466_v15 = vadd.f32 %v4465_v11, %v3893_v24  ;;  %7251 = vmatprep.subr.bf16.mxu1 %v7591_v57  ;;  %v3935_v54 = vmul.f32 %v8910_v44, %v13181_v62  ;;  %v3953_v63 = vmul.f32 %v8912_v26, %v13213_v47  ;;  %v7596_v62 = vld [vmem:[%s13563_s5 + $0x4c8] sm:$0xff]  }
 0x49d   :  { %8939 = vrcp.f32 %v3316_v28  ;;  %v8918_v4 = vpop.eup %8917  ;;  %v4492_v33 = vadd.f32 %v4491_v49, %v3895_v12  ;;  %7272 = vmatpush3.bf16.msra.mxu0 %v7590_v29  ;;  %v3955_v56 = vmul.f32 %v8914_v8, %v13222_v35  ;;  %v7597_v47 = vld [vmem:[%s13563_s5 + $0x408] sm:$0xff]   ;;  %v3973_v13 = vmul.f32 %v8916_v42, %v13243_v55  ;;  %v7599_v35 = vld [vmem:[%s13563_s5 + $0x440] sm:$0xff]  }
 0x49e   :  { %v8920_v41 = vpop.eup %8919  ;;  %v4467_v52 = vadd.f32 %v4466_v15, %v3913_v23  ;;  %8941 = vrcp.f32 %v3336_v2  ;;  %7273 = vmatprep.subr.bf16.mxu0 %v7592_v27  ;;  %v3874_v39 = vmul.f32 %v13278_v40, %v13102_v1  ;;  %v3975_v9 = vmul.f32 %v8918_v4, %v13247_v6  ;;  %v7598_v55 = vld [vmem:[%s13563_s5 + $0x488] sm:$0xff]   ;;  %v7600_v1 = vld [vmem:[%s13563_s5 + $0x4c0] sm:$0xff]  }
 0x49f   :  { %v8922_v48 = vpop.eup %8921  ;;  %v4493_v25 = vadd.f32 %v4492_v33, %v3915_v60  ;;  %v3354_v38 = vadd.f32 1.0, %v8920_v41  ;;  %7252 = vmatpush3.bf16.msra.mxu1 %v7593_v21  ;;  %v3854_v37 = vmul.f32 %v13229_v14, %v13073_v10  ;;  %v3894_v24 = vmul.f32 %v13317_v7, %v13133_v30  ;;  %v7601_v6 = vld [vmem:[%s13563_s5 + $0x400] sm:$0xff]   ;;  %v14270_v60 = vld [vmem:[#allocation29_spill] sm:$0xff] }
 0x4a0   :  { %v8924_v58 = vpop.eup %8923  ;;  %v4468_v19 = vadd.f32 %v4467_v52, %v3933_v43  ;;  %7253 = vmatprep.subr.bf16.mxu1 %v7595_v20  ;;  %v3876_v57 = vmul.f32 %v13294_v22, %v13112_v46  ;;  %v3914_v7 = vmul.f32 %v8922_v48, %v13167_v17  ;;  %v3856_v26 = vmul.f32 %v13235_v61, %v13085_v0  ;;  %v14268_v11 = vld [vmem:[#allocation15_spill] sm:$0xff]  ;;  %v14269_v29 = vld [vmem:[#allocation50_spill] sm:$0xff]  ;;  %v14271_v21 = vld [vmem:[#allocation61_spill] sm:$0xff] }
 0x4a1   :  { %v8926_v51 = vpop.eup %8925  ;;  %v4494_v32 = vadd.f32 %v4493_v25, %v3935_v54  ;;  %8943 = vrcp.f32 %v3354_v38  ;;  %7274 = vmatpush3.bf16.msra.mxu0 %v7594_v5  ;;  %v4478_v14 = vadd.f32 %v3874_v39, %v3854_v37  ;;  %v3896_v23 = vmul.f32 %v13344_v45, %v14268_v11  ;;  %v14272_v20 = vld [vmem:[#allocation18_spill] sm:$0xff]  ;;  %v14274_v48 = vld [vmem:[#allocation73_spill] sm:$0xff] }
 0x4a2   :  { %v4469_v3 = vadd.f32 %v4468_v19, %v3953_v63  ;;  %v3356_v31 = vadd.f32 1.0, %v8926_v51  ;;  %7275 = vmatprep.subr.bf16.mxu0 %v7596_v62  ;;  %v3934_v17 = vmul.f32 %v8924_v58, %v14269_v29  ;;  %v4504_v49 = vadd.f32 %v3876_v57, %v3856_v26  ;;  %v14273_v52 = vld [vmem:[#allocation58_spill] sm:$0xff]  ;;  %v14276_v62 = vld [vmem:[#allocation43_spill] sm:$0xff]  ;;  %v14279_v57 = vld [vmem:[#allocation60_spill] sm:$0xff] }
 0x4a3   :  { %v8928_v18 = vpop.eup %8927  ;;  %v4495_v28 = vadd.f32 %v4494_v32, %v3955_v56  ;;  %7254 = vmatpush3.bf16.msra.mxu1 %v7597_v47  ;;  %v4479_v2 = vadd.f32 %v4478_v14, %v3894_v24  ;;  %v14275_v25 = vld [vmem:[#allocation26_spill] sm:$0xff]  ;;  %v14277_v32 = vld [vmem:[#allocation45_spill] sm:$0xff] }
 0x4a4   :  { %v8930_v40 = vpop.eup %8929  ;;  %v4470_v59 = vadd.f32 %v4469_v3, %v3973_v13  ;;  %v3993_v10 = vmul.f32 %v8928_v18, %v13282_v34  ;;  %8945 = vrcp.f32 %v3356_v31  ;;  %7255 = vmatprep.subr.bf16.mxu1 %v7599_v35  ;;  %v7602_v34 = vld [vmem:[%s13563_s5 + $0x480] sm:$0xff]   ;;  %v4505_v43 = vadd.f32 %v4504_v49, %v3896_v23 }
 0x4a5   :  { %v8932_v30 = vpop.eup %8931  ;;  %v4496_v44 = vadd.f32 %v4495_v28, %v3975_v9  ;;  %v3995_v36 = vmul.f32 %v8930_v40, %v13286_v50  ;;  %7276 = vmatpush3.bf16.msra.mxu0 %v7598_v55  ;;  %v4480_v45 = vadd.f32 %v4479_v2, %v3914_v7  ;;  %v7083_v56 = vadd.f32 %v14275_v25, %v14274_v48  ;;  %v6894_v19 = vld [vmem:[%s13564_s6] ss:$0 sm:$0xff]  ;;  %v14284_v48 = vld [vmem:[#allocation39_spill] sm:$0xff]  ;;  %s8995_s6 = smov [#allocation4]  }
 0x4a6   :  { %v4471_v46 = vadd.f32 %v4470_v59, %v3993_v10  ;;  %7277 = vmatprep.subr.bf16.mxu0 %v7600_v1  ;;  %v3916_v0 = vmul.f32 %v8932_v30, %v14270_v60  ;;  %v14278_v40 = vld [vmem:[#allocation74_spill] sm:$0xff]  ;;  %v14280_v10 = vld [vmem:[#allocation13_spill] sm:$0xff]  ;;  %v14281_v30 = vld [vmem:[#allocation28_spill] sm:$0xff]  ;;  %v4835_v25 = vpack.c.bf16 %v14284_v48, %v14284_v48  ;;  %s6703_s25 = sshll.u32 %s8995_s6, 4  ;;  %s6704_s25 = int_to_ptr.vmem [resolvable:$true] %s6703_s25 }
 0x4a7   :  { %v8934_v12 = vpop.eup %8933  ;;  %v4497_v8 = vadd.f32 %v4496_v44, %v3995_v36  ;;  %7256 = vmatpush3.bf16.msra.mxu1 %v7601_v6  ;;  %v4481_v41 = vadd.f32 %v4480_v45, %v3934_v17  ;;  %v6321_v37 = vadd.f32 %v7083_v56, %v6894_v19  ;;  %v7105_v59 = vadd.f32 %v14279_v57, %v14278_v40  ;;  %v14282_v17 = vld [vmem:[#allocation27_spill] sm:$0xff]  ;;  %s8949_s26 = scalar_lea.vmem %s6704_s25, 640  ;;  %p8954_p1 = scmp.lt.s32.totalorder %s6704_s25, %s6704_s25 }
 0x4a8   :  { %v8936_v22 = vpop.eup %8935  ;;  %v4472_v61 = vrot.slane %v4471_v46, 4  ;;  %v3954_v42 = vmul.f32 %v8934_v12, %v14271_v21  ;;  %v4506_v38 = vadd.f32 %v4505_v43, %v3916_v0  ;;  %v7127_v14 = vadd.f32 %v14281_v30, %v14280_v10  ;;  %p8950_p0 = scmp.ne.s32.totalorder %s6704_s25, %s8949_s26  ;;  %p8955_p2 = scmp.lt.s32.totalorder %s8949_s26, %s8949_s26 }
 0x4a9   :  { %v8938_v50 = vpop.eup %8937  ;;  %v4498_v15 = vrot.slane %v4497_v8, 4  ;;  %v3936_v4 = vmul.f32 %v8936_v22, %v14272_v20  ;;  %7278 = vmatpush3.bf16.msra.mxu0 %v7602_v34  ;;  %v6361_v26 = vadd.f32 %v7105_v59, %v6321_v37 }
 0x4aa   :  { %v8940_v27 = vpop.eup %8939  ;;  %v4473_v33 = vadd.f32 %v4472_v61, %v4471_v46  ;;  %v3974_v63 = vmul.f32 %v8938_v50, %v14273_v52  ;;  %v4482_v13 = vadd.f32 %v4481_v41, %v3954_v42  ;;  %p8956_p3 = por %p8955_p2, %p8954_p1 }
 0x4ab   :  { %v8942_v54 = vpop.eup %8941  ;;  %v4499_v5 = vadd.f32 %v4498_v15, %v4497_v8  ;;  %v3956_v47 = vmul.f32 %v8940_v27, %v14276_v62  ;;  %v4507_v39 = vadd.f32 %v4506_v38, %v3936_v4  ;;  %v6401_v46 = vadd.f32 %v7127_v14, %v6361_v26  ;;  %v14283_v8 = vld [vmem:[#allocation30_spill] sm:$0xff] }
 0x4ac   :  { %v4474_v58 = vrot.slane %v4473_v33, 2  ;;  %v3976_v9 = vmul.f32 %v8942_v54, %v14277_v32  ;;  %v4483_v31 = vadd.f32 %v4482_v13, %v3974_v63  ;;  %v7149_v50 = vadd.f32 %v14283_v8, %v14282_v17  ;;  %v14292_v8 = vld [vmem:[#allocation59_spill] sm:$0xff]  ;;  %p8957_p4 = pnand %p8956_p3, %p8950_p0 }
 0x4ad   :  { %v4500_v35 = vrot.slane %v4499_v5, 2  ;;  %v4508_v24 = vadd.f32 %v4507_v39, %v3956_v47  ;;  %v14286_v39 = vld [vmem:[#allocation16_spill] sm:$0xff] }
 0x4ae   :  { %v8944_v51 = vpop.eup %8943  ;;  %v4475_v3 = vadd.f32 %v4474_v58, %v4473_v33  ;;  %v6441_v27 = vadd.f32 %v7149_v50, %v6401_v46  ;;  %v14285_v58 = vld [vmem:[#allocation33_spill] sm:$0xff]  ;;  %v4837_v32 = vpack.c.bf16 %v14286_v39, %v14286_v39 }
 0x4af   :  { %v4501_v55 = vadd.f32 %v4500_v35, %v4499_v5  ;;  %v3994_v18 = vmul.f32 %v8944_v51, %v13321_v53  ;;  %v4509_v7 = vadd.f32 %v4508_v24, %v3976_v9  ;;  %v4836_v19 = vpack.c.bf16 %v14285_v58, %v14285_v58  ;;  %v14293_v50 = vld [vmem:[#allocation57_spill] sm:$0xff] }
 0x4b0   :  { %v4476_v28 = vrot.slane %v4475_v3, 1  ;;  %v5244_v30 = vunpack.c.l.b16 %v4837_v32 }
 0x4b1   :  { %v8946_v1 = vpop.eup %8945  ;;  %v4484_v6 = vadd.f32 %v4483_v31, %v3994_v18  ;;  %v4502_v36 = vrot.slane %v4501_v55, 1  ;;  %v5242_v31 = vunpack.c.l.b16 %v4835_v25  ;;  %v14287_v18 = vld [vmem:[#allocation17_spill] sm:$0xff] }
 0x4b2   :  { %v3996_v44 = vmul.f32 %v8946_v1, %v13328_v16  ;;  %v4477_v11 = vadd.f32 %v4476_v28, %v4475_v3  ;;  %v4838_v37 = vpack.c.bf16 %v14287_v18, %v14287_v18  ;;  %v5243_v28 = vunpack.c.l.b16 %v4836_v19 }
 0x4b3   :  { %v4485_v12 = vrot.slane %v4484_v6, 4  ;;  %v4503_v2 = vadd.f32 %v4502_v36, %v4501_v55 }
 0x4b4   :  { %v4510_v23 = vadd.f32 %v4509_v7, %v3996_v44  ;;  %v4554_v49 = vmul.f32 0.015625, %v4477_v11  ;;  %v5245_v36 = vunpack.c.l.b16 %v4838_v37 }
 0x4b5   :  { %v4486_v53 = vadd.f32 %v4485_v12, %v4484_v6  ;;  %v4556_v15 = vmul.f32 0.015625, %v4503_v2  ;;  %v14288_v6 = vld [vmem:[#allocation20_spill] sm:$0xff] }
 0x4b6   :  { %v4511_v34 = vrot.slane %v4510_v23, 4  ;;  %v4855_v33 = vpack.c.bf16 %v4554_v49, %v4554_v49  ;;  %v14290_v2 = vld [vmem:[#allocation72_spill] sm:$0xff] }
 0x4b7   :  { %v4487_v29 = vrot.slane %v4486_v53, 2  ;;  %v4857_v62 = vpack.c.bf16 %v4556_v15, %v4556_v15 }
 0x4b8   :  { %v4512_v60 = vadd.f32 %v4511_v34, %v4510_v23  ;;  %v5262_v35 = vunpack.c.l.b16 %v4855_v33 }
 0x4b9   :  { %v4488_v61 = vadd.f32 %v4487_v29, %v4486_v53  ;;  %v5264_v24 = vunpack.c.l.b16 %v4857_v62 }
 0x4ba   :  { %v4513_v21 = vrot.slane %v4512_v60, 2  ;;  %v5282_v10 = vsel %vm4773_vm2, %v5262_v35, %v5242_v31 }
 0x4bb   :  { %v7169_v22 = vpop.f32.mrf.mxu1  ;;  %v4489_v43 = vrot.slane %v4488_v61, 1  ;;  %v5302_v26 = vpack.c.b16 %v5282_v10, %v5282_v10  ;;  %v5284_v11 = vsel %vm4773_vm2, %v5264_v24, %v5244_v30 }
 0x4bc   :  { %v4514_v54 = vadd.f32 %v4513_v21, %v4512_v60  ;;  %v5304_v34 = vpack.c.b16 %v5284_v11, %v5284_v11  ;;  %v14296_v21 = vld [vmem:[#allocation22_spill] sm:$0xff] }
 0x4bd   :  { %v7170_v0 = vpop.f32.mrf.mxu1  ;;  %v7191_v16 = vpop.f32.mrf.mxu0  ;;  %v4490_v63 = vadd.f32 %v4489_v43, %v4488_v61 }
 0x4be   :  { %v7171_v45 = vadd.f32 %v7170_v0, %v7169_v22  ;;  %v4515_v56 = vrot.slane %v4514_v54, 1  ;;  %v14289_v22 = vld [vmem:[#allocation71_spill] sm:$0xff] }
 0x4bf   :  { %v7172_v42 = vpop.f32.mrf.mxu1  ;;  %v7192_v4 = vpop.f32.mrf.mxu0  ;;  %v4555_v47 = vmul.f32 0.015625, %v4490_v63  ;;  %v14291_v29 = vcombine.low %v14289_v22, %v14290_v2 }
 0x4c0   :  { %v6481_v20 = vadd.f32 %v7171_v45, %v6441_v27  ;;  %v7193_v41 = vadd.f32 %v7192_v4, %v7191_v16  ;;  %v4516_v51 = vadd.f32 %v4515_v56, %v4514_v54  ;;  %v14295_v45 = vld [vmem:[#allocation19_spill] sm:$0xff] }
 0x4c1   :  { %v7173_v52 = vpop.f32.mrf.mxu1  ;;  %v7194_v5 = vpop.f32.mrf.mxu0  ;;  %v4751_v9 = vcombine.low %v4554_v49, %v4555_v47  ;;  %v4856_v3 = vpack.c.bf16 %v4555_v47, %v4555_v47  ;;  %v4797_v17 = vrot.slane %v14291_v29, 7  ;;  %v14294_v49 = vcombine.low %v14292_v8, %v14293_v50 }
 0x4c2   :  { %v13520_v38 = vadd.f32 %v7193_v41, %v6481_v20  ;;  %v4557_v55 = vmul.f32 0.015625, %v4516_v51  ;;  %v14297_v42 = vcombine.low %v14295_v45, %v14296_v21 }
 0x4c3   :  { %v7195_v13 = vpop.f32.mrf.mxu0  ;;  %v5263_v1 = vunpack.c.l.b16 %v4856_v3  ;;  %v4759_v40 = vrot.slane %v4751_v9, %v14288_v6  ;;  %v4798_v60 = vsel %vm4773_vm2, %v4797_v17, %v14294_v49 }
 0x4c4   :  { %v4752_v57 = vcombine.low %v4556_v15, %v4557_v55  ;;  %v4858_v59 = vpack.c.bf16 %v4557_v55, %v4557_v55  ;;  %v4799_v0 = vsel %vm4775_vm3, %v4797_v17, %v4798_v60 }
 0x4c5   :  { %v5283_v14 = vsel %vm4773_vm2, %v5263_v1, %v5243_v28  ;;  %v4800_v61 = vsel %vm4777_vm4, %v4797_v17, %v4799_v0 }
 0x4c6   :  { %v4766_v7 = vrot.slane %v4752_v57, %v14288_v6  ;;  %v5303_v44 = vpack.c.b16 %v5283_v14, %v5283_v14  ;;  %v5265_v12 = vunpack.c.l.b16 %v4858_v59  ;;  %v4801_v27 = vsel %vm4779_vm5, %v4797_v17, %v4800_v61 }
 0x4c7   :  { %4817 = vst [vmem:[#allocation4 + $0x18] sm:$0xff] %v4801_v27 }
 0x4c8   :  { %v4767_v23 = vcombine.low %v4759_v40, %v4766_v7  ;;  %6638 = vmatprep.mubr.bf16.mxu1 %v5303_v44  ;;  %v5285_v53 = vsel %vm4773_vm2, %v5265_v12, %v5245_v36 }
 0x4c9   :  { %v5305_v46 = vpack.c.b16 %v5285_v53, %v5285_v53  ;;  %6639 = vmatmul.mubr.bf16.vlgmr.msra.gmra.mxu1 %v5302_v26 }
 0x4ca   :  { %v4804_v16 = vrot.slane %v4767_v23, 7 }
 0x4cb   :  { %6678 = vmatprep.mubr.bf16.mxu0 %v5305_v46 }
 0x4cc   :  { %6679 = vmatmul.mubr.bf16.vlgmr.msra.gmra.mxu0 %v5304_v34  ;;  %v4805_v15 = vsel %vm4773_vm2, %v4804_v16, %v14297_v42 }
 0x4cd   :  { %v4806_v43 = vsel %vm4775_vm3, %v4804_v16, %v4805_v15 }
 0x4ce   :  { %v4807_v20 = vsel %vm4777_vm4, %v4804_v16, %v4806_v43 }
 0x4cf   :  { %v4808_v4 = vsel %vm4779_vm5, %v4804_v16, %v4807_v20 }
 0x4d0   :  { %4818 = vst [vmem:[#allocation4 + $0x20] sm:$0xff] %v4808_v4 }
 0x4d1   :  { %8960 = shalt.err (!%p8957_p4)
}
 0x4d2   :  { %6706 = dma.vmem_to_hbm [thread:$0]  %s6704_s25, 640, %s13566_s8, [#allocation5]  }
 0x4d3   :  { %s8996_s8 = smov [#allocation2]  }
 0x4d4   :  { %s6693_s29 = sshll.u32 %s8996_s8, 4  ;;  %s6694_s29 = int_to_ptr.vmem [resolvable:$true] %s6693_s29 }
 0x4d5   :  { %s8969_s30 = scalar_lea.vmem %s6694_s29, 32  ;;  %p8974_p6 = scmp.lt.s32.totalorder %s6694_s29, %s6694_s29 }
 0x4d6   :  { %p8970_p5 = scmp.ne.s32.totalorder %s6694_s29, %s8969_s30  ;;  %p8975_p7 = scmp.lt.s32.totalorder %s8969_s30, %s8969_s30 }
 0x4d8   :  { %p8976_p8 = por %p8975_p7, %p8974_p6 }
 0x4da   :  { %p8977_p9 = pnand %p8976_p8, %p8970_p5 }
 0x54a   :  { %v7213_v33 = vpop.f32.mrf.mxu1 }
 0x54c   :  { %v7214_v54 = vpop.f32.mrf.mxu1  ;;  %v7235_v41 = vpop.f32.mrf.mxu0 }
 0x54d   :  { %v7215_v56 = vadd.f32 %v7214_v54, %v7213_v33 }
 0x54e   :  { %v7216_v52 = vpop.f32.mrf.mxu1  ;;  %v7236_v63 = vpop.f32.mrf.mxu0 }
 0x54f   :  { %v6561_v62 = vadd.f32 %v7215_v56, %v13520_v38  ;;  %v7237_v58 = vadd.f32 %v7236_v63, %v7235_v41 }
 0x550   :  { %v7217_v5 = vpop.f32.mrf.mxu1  ;;  %v7238_v48 = vpop.f32.mrf.mxu0 }
 0x551   :  { %v6601_v13 = vadd.f32 %v7237_v58, %v6561_v62 }
 0x552   :  { %v7239_v25 = vpop.f32.mrf.mxu0 }
 0x589   :  { %v7257_v47 = vpop.f32.mrf.mxu1 }
 0x58b   :  { %v7258_v19 = vpop.f32.mrf.mxu1 }
 0x58c   :  { %v7279_v35 = vpop.f32.mrf.mxu0  ;;  %v7259_v51 = vadd.f32 %v7258_v19, %v7257_v47 }
 0x58d   :  { %v7260_v39 = vpop.f32.mrf.mxu1 }
 0x58e   :  { %v6641_v32 = vadd.f32 %v7259_v51, %v6601_v13  ;;  %v7280_v9 = vpop.f32.mrf.mxu0 }
 0x58f   :  { %v7281_v3 = vadd.f32 %v7280_v9, %v7279_v35  ;;  %v7261_v31 = vpop.f32.mrf.mxu1 }
 0x590   :  { %v7282_v55 = vpop.f32.mrf.mxu0 }
 0x591   :  { %v6681_v18 = vadd.f32 %v7281_v3, %v6641_v32 }
 0x592   :  { %v7283_v37 = vpop.f32.mrf.mxu0 }
 0x593   :  { %6686 = vst [vmem:[#allocation2] sm:$0x3] %v6681_v18 }
 0x594   :  { %8980 = shalt.err (!%p8977_p9)
}
 0x595   :  { %6696 = dma.vmem_to_hbm [thread:$0]  %s6694_s29, 32, %s13565_s7, [#allocation3]  }
 0x596   :  { %8989 = dma.done.wait [#allocation3], 32  }
 0x597   :  { %8990 = vsyncadd [#allocation3], 4294967264 }
 0x598   :  { %8991 = dma.done.wait [#allocation5], 640  }
 0x599   :  { %8992 = vsyncadd [#allocation5], 4294966656 }
 0x59a   :  { %6713 = vsyncpa [#allocation3], 1 }
 0x59b   :  { %6714 = vsyncpa [#allocation5], 1 }

</bundles_post_ra>
